<compile_context>
chip_gen: v6e
topology: v6e:2x2x1
jax: 0.10.0
libtpu: 0.0.40
codegen_flags: <defaults>
</compile_context>

<pallas_src>
import numpy as np
import jax
import jax.numpy as jnp
from jax import lax
from jax.experimental import pallas as pl
from jax.experimental.pallas import tpu as pltpu

# ----------------------------------------------------------------------------
# Deterministic parameter init (shapes follow torchvision resnet50 + the head).
# ----------------------------------------------------------------------------
_BN_SCALE = 1.0 / np.sqrt(1.0 + 1e-5)  # eval-mode BN, fresh running stats
_STAGE_CFG = [(64, 3, 1), (128, 4, 2), (256, 6, 2), (512, 3, 2)]  # resnet50 (static!)


def _conv_w(key, out_ch, in_ch, kh, kw):
    fan_in = in_ch * kh * kw
    return jax.random.normal(key, (out_ch, in_ch, kh, kw), jnp.float32) * np.sqrt(2.0 / fan_in)


def _linear(key, in_f, out_f):
    k_w, k_b = jax.random.split(key)
    w = jax.random.normal(k_w, (in_f, out_f), jnp.float32) * (1.0 / np.sqrt(in_f))
    b = jax.random.normal(k_b, (1, out_f), jnp.float32) * (1.0 / np.sqrt(in_f))
    return w, b


def init_params(key):
    keys = list(jax.random.split(key, 128))
    nk = iter(keys)

    backbone = {"conv1": _conv_w(next(nk), 64, 3, 7, 7), "layers": []}
    in_ch = 64
    for width, blocks, _stride in _STAGE_CFG:
        blk_list = []
        for b in range(blocks):
            blk = {
                "conv1": _conv_w(next(nk), width, in_ch, 1, 1),
                "conv2": _conv_w(next(nk), width, width, 3, 3),
                "conv3": _conv_w(next(nk), width * 4, width, 1, 1),
            }
            if b == 0:  # projection shortcut
                blk["down"] = _conv_w(next(nk), width * 4, in_ch, 1, 1)
            blk_list.append(blk)
            in_ch = width * 4
        backbone["layers"].append(blk_list)

    head = {}
    head["fc_w"], head["fc_b"] = _linear(next(nk), 2048, 1000)   # resnet .fc
    head["w0"], head["b0"] = _linear(next(nk), 1000, 512)        # fc_0
    head["w1"], head["b1"] = _linear(next(nk), 512, 512)         # fc_1
    head["w2"], head["b2"] = _linear(next(nk), 512, 512)         # fc_2
    head["w3"], head["b3"] = _linear(next(nk), 512, 1024 * 3)    # fc_3
    return {"backbone": backbone, "head": head}


def prepare_backbone(bp):
    """Pre-transpose all conv weights OIHW -> HWIO so the backbone runs NHWC."""
    def t(w):
        return jnp.transpose(w, (2, 3, 1, 0))

    out = {"conv1": t(bp["conv1"]), "layers": []}
    for blk_list in bp["layers"]:
        new_list = []
        for blk in blk_list:
            nb = {"conv1": t(blk["conv1"]), "conv2": t(blk["conv2"]),
                  "conv3": t(blk["conv3"])}
            if "down" in blk:
                nb["down"] = t(blk["down"])
            new_list.append(nb)
        out["layers"].append(new_list)
    return out


def prepare_head(hp):
    """Fold fc (2048->1000) and fc_0 (1000->512) into one matmul (exact, no
    nonlinearity between them) and cast weights to bf16 for the MXU path."""
    w_in = (hp["fc_w"] @ hp["w0"]).astype(jnp.bfloat16)            # (2048, 512)
    b_in = (hp["fc_b"] @ hp["w0"] + hp["b0"]).astype(jnp.float32)  # (1, 512)
    return {
        "w_in": w_in, "b_in": b_in,
        "w1": hp["w1"].astype(jnp.bfloat16), "b1": hp["b1"],
        "w2": hp["w2"].astype(jnp.bfloat16), "b2": hp["b2"],
        "w3": hp["w3"].astype(jnp.bfloat16), "b3": hp["b3"],
    }


# ----------------------------------------------------------------------------
# ResNet-50 backbone (plain-JAX glue, NHWC throughout).
# TODO(synk): conv backbone stays in plain JAX (lax.conv) rather than Pallas.
# ----------------------------------------------------------------------------
def _conv(x, w, stride=1, padding=0):
    return lax.conv_general_dilated(
        x, w, window_strides=(stride, stride),
        padding=[(padding, padding), (padding, padding)],
        dimension_numbers=("NHWC", "HWIO", "NHWC"))


def _bn(x):
    # eval-mode BatchNorm with freshly-initialized running stats -> constant scale
    # TODO(synk): this is only valid for fresh stats/affine; not for real checkpoints.
    return x * _BN_SCALE


def _bottleneck(x, blk, stride):
    identity = x
    out = jnp.maximum(_bn(_conv(x, blk["conv1"])), 0.0)
    out = jnp.maximum(_bn(_conv(out, blk["conv2"], stride=stride, padding=1)), 0.0)
    out = _bn(_conv(out, blk["conv3"]))
    if "down" in blk:
        identity = _bn(_conv(x, blk["down"], stride=stride))
    return jnp.maximum(out + identity, 0.0)


def resnet50_features(x, bp):
    x = jnp.transpose(x, (0, 2, 3, 1))  # NCHW (PyTorch) -> NHWC once
    x = jnp.maximum(_bn(_conv(x, bp["conv1"], stride=2, padding=3)), 0.0)
    x = lax.reduce_window(x, -jnp.inf, lax.max, (1, 3, 3, 1), (1, 2, 2, 1),
                          [(0, 0), (1, 1), (1, 1), (0, 0)])
    # strides come from the static _STAGE_CFG, never from the traced pytree.
    for (_width, _blocks, stage_stride), blk_list in zip(_STAGE_CFG, bp["layers"]):
        for b, blk in enumerate(blk_list):
            x = _bottleneck(x, blk, stage_stride if b == 0 else 1)
    return jnp.mean(x, axis=(1, 2))  # global average pool -> (B, 2048)


# ----------------------------------------------------------------------------
# Pallas kernel: fused matmul head (single grid step, everything resident)
#   (B,2048) -> [fc . fc_0 folded] -> relu -> fc_1 -> relu -> fc_2 -> relu -> fc_3
# TODO(synk): Dropout has eval-mode (identity) semantics; training RNG not reproduced.
# ----------------------------------------------------------------------------
_N_OUT = 1024 * 3


def head_kernel(x_ref, w_in_ref, b_in_ref, w1_ref, b1_ref, w2_ref, b2_ref,
                w3_ref, b3_ref, o_ref):
    # fused fc + fc_0  (bf16 inputs, f32 accumulation on the MXU)
    h = jnp.dot(x_ref[...], w_in_ref[...],
                preferred_element_type=jnp.float32) + b_in_ref[...]
    # fc_1(Dropout(relu(x)))  -- Dropout is identity in eval mode
    h = jnp.maximum(h, 0.0).astype(jnp.bfloat16)
    h = jnp.dot(h, w1_ref[...], preferred_element_type=jnp.float32) + b1_ref[...]
    # fc_2(Dropout(relu(x)))
    h = jnp.maximum(h, 0.0).astype(jnp.bfloat16)
    h = jnp.dot(h, w2_ref[...], preferred_element_type=jnp.float32) + b2_ref[...]
    # fc_3(relu(x))
    h = jnp.maximum(h, 0.0).astype(jnp.bfloat16)
    h = jnp.dot(h, w3_ref[...], preferred_element_type=jnp.float32) + b3_ref[...]
    o_ref[...] = h.astype(o_ref.dtype)


def head_pallas(feats, hp):
    B = feats.shape[0]
    Bp = max(16, ((B + 15) // 16) * 16)  # bf16 packs 16 rows per vreg tile
    x = jnp.pad(feats.astype(jnp.bfloat16), ((0, Bp - B), (0, 0)))

    const = lambda i: (0, 0)
    in_specs = [
        pl.BlockSpec((Bp, 2048), const),      # feats
        pl.BlockSpec((2048, 512), const),     # fused fc+fc_0 weight
        pl.BlockSpec((1, 512), const),
        pl.BlockSpec((512, 512), const),      # fc_1
        pl.BlockSpec((1, 512), const),
        pl.BlockSpec((512, 512), const),      # fc_2
        pl.BlockSpec((1, 512), const),
        pl.BlockSpec((512, _N_OUT), const),   # fc_3 weight (un-tiled: fits VMEM)
        pl.BlockSpec((1, _N_OUT), const),
    ]
    out_spec = pl.BlockSpec((Bp, _N_OUT), const)

    # Accurate (single-pass) cost estimate -- advisory for XLA scheduling.
    flops = 2 * Bp * (2048 * 512 + 512 * 512 + 512 * 512 + 512 * _N_OUT)
    bytes_accessed = (
        2 * (2048 * 512 + 2 * 512 * 512 + 512 * _N_OUT)   # bf16 weights
        + 4 * (3 * 512 + _N_OUT)                          # f32 biases
        + 2 * Bp * 2048 + 4 * Bp * _N_OUT)                # activations in/out

    out = pl.pallas_call(
        head_kernel,
        out_shape=jax.ShapeDtypeStruct((Bp, _N_OUT), jnp.float32),
        grid_spec=pltpu.PrefetchScalarGridSpec(
            num_scalar_prefetch=0,
            grid=(1,),                     # single step: no prefix recompute,
            in_specs=in_specs,             # no step overhead, no megacore skew
            out_specs=out_spec),
        compiler_params=pltpu.CompilerParams(
            dimension_semantics=("arbitrary",),
            vmem_limit_bytes=32 << 20),    # ~13 MiB actually used; fits all gens
        cost_estimate=pl.CostEstimate(
            flops=flops, transcendentals=0, bytes_accessed=bytes_accessed),
    )(x, hp["w_in"], hp["b_in"], hp["w1"], hp["b1"],
      hp["w2"], hp["b2"], hp["w3"], hp["b3"])
    return out[:B]


@jax.jit
def coarse_forward(x, params):
    feats = resnet50_features(x, params["backbone"])   # (B, 2048)
    out = head_pallas(feats, params["head"])           # (B, 3072)
    return out.reshape(x.shape[0], 1024, 3)


# Pure-JAX reference for the Pallas-implemented head (same bf16/f32 math).
def head_ref(feats, hp):
    h = jnp.dot(feats.astype(jnp.bfloat16), hp["w_in"],
                preferred_element_type=jnp.float32) + hp["b_in"]
    h = jnp.maximum(h, 0.0).astype(jnp.bfloat16)
    h = jnp.dot(h, hp["w1"], preferred_element_type=jnp.float32) + hp["b1"]
    h = jnp.maximum(h, 0.0).astype(jnp.bfloat16)
    h = jnp.dot(h, hp["w2"], preferred_element_type=jnp.float32) + hp["b2"]
    h = jnp.maximum(h, 0.0).astype(jnp.bfloat16)
    h = jnp.dot(h, hp["w3"], preferred_element_type=jnp.float32) + hp["b3"]
    return h


if __name__ == "__main__":
    key = jax.random.PRNGKey(0)
    k_params, k_x = jax.random.split(key)
    raw_params = init_params(k_params)
    params = {"backbone": prepare_backbone(raw_params["backbone"]),
              "head": prepare_head(raw_params["head"])}

    # small input consistent with resnet50 (3-channel image, NCHW)
    x = jax.random.normal(k_x, (2, 3, 64, 64), jnp.float32)

    # End-to-end forward (backbone + Pallas head): check shape / finiteness.
    out = jax.block_until_ready(coarse_forward(x, params))
    assert out.shape == (2, 1024, 3), out.shape
    assert np.all(np.isfinite(np.asarray(out)))

    # Verify the Pallas head against a plain-JAX reference fed the SAME
    # features (previous failure: features recomputed separately diverged
    # slightly and the bf16 head amplified it past tolerance).
    feats = jax.block_until_ready(jax.jit(resnet50_features)(x, params["backbone"]))
    head_out = jax.block_until_ready(jax.jit(head_pallas)(feats, params["head"]))
    ref = np.asarray(head_ref(feats, params["head"]))
    np.testing.assert_allclose(np.asarray(head_out), ref, rtol=2e-2, atol=2e-2)

    print("KERNEL_OK")
</pallas_src>

<mosaic_0001>
module attributes {stable_mosaic.version = 11 : i64} {
  func.func @head_kernel(%arg0: i32, %arg1: memref<16x2048xbf16, #tpu.memory_space<vmem>>, %arg2: memref<2048x512xbf16, #tpu.memory_space<vmem>>, %arg3: memref<1x512xf32, #tpu.memory_space<vmem>>, %arg4: memref<512x512xbf16, #tpu.memory_space<vmem>>, %arg5: memref<1x512xf32, #tpu.memory_space<vmem>>, %arg6: memref<512x512xbf16, #tpu.memory_space<vmem>>, %arg7: memref<1x512xf32, #tpu.memory_space<vmem>>, %arg8: memref<512x3072xbf16, #tpu.memory_space<vmem>>, %arg9: memref<1x3072xf32, #tpu.memory_space<vmem>>, %arg10: memref<16x3072xf32, #tpu.memory_space<vmem>>) attributes {dimension_semantics = [#tpu.dimension_semantics<arbitrary>], iteration_bounds = array<i64: 1>, scalar_prefetch = 0 : i64, scratch_operands = 0 : i64, tpu.core_type = #tpu.core_type<tc>, window_params = [{pipeline_mode = #tpu.pipeline_mode<synchronous>, transform_indices = @transform_0, window_bounds = array<i64: 16, 2048>}, {pipeline_mode = #tpu.pipeline_mode<synchronous>, transform_indices = @transform_1, window_bounds = array<i64: 2048, 512>}, {pipeline_mode = #tpu.pipeline_mode<synchronous>, transform_indices = @transform_2, window_bounds = array<i64: 1, 512>}, {pipeline_mode = #tpu.pipeline_mode<synchronous>, transform_indices = @transform_3, window_bounds = array<i64: 512, 512>}, {pipeline_mode = #tpu.pipeline_mode<synchronous>, transform_indices = @transform_4, window_bounds = array<i64: 1, 512>}, {pipeline_mode = #tpu.pipeline_mode<synchronous>, transform_indices = @transform_5, window_bounds = array<i64: 512, 512>}, {pipeline_mode = #tpu.pipeline_mode<synchronous>, transform_indices = @transform_6, window_bounds = array<i64: 1, 512>}, {pipeline_mode = #tpu.pipeline_mode<synchronous>, transform_indices = @transform_7, window_bounds = array<i64: 512, 3072>}, {pipeline_mode = #tpu.pipeline_mode<synchronous>, transform_indices = @transform_8, window_bounds = array<i64: 1, 3072>}, {pipeline_mode = #tpu.pipeline_mode<synchronous>, transform_indices = @transform_9, window_bounds = array<i64: 16, 3072>}]} {
    %c0 = arith.constant 0 : index
    %c0_0 = arith.constant 0 : index
    %0 = vector.load %arg1[%c0, %c0_0] : memref<16x2048xbf16, #tpu.memory_space<vmem>>, vector<16x2048xbf16>
    %c0_1 = arith.constant 0 : index
    %c0_2 = arith.constant 0 : index
    %1 = vector.load %arg2[%c0_1, %c0_2] : memref<2048x512xbf16, #tpu.memory_space<vmem>>, vector<2048x512xbf16>
    %cst = arith.constant dense<0.000000e+00> : vector<16x512xf32>
    %2 = tpu.matmul %0, %1, %cst {dimension_numbers = #tpu.dot_dimension_numbers<[1], [0], [0], [1], [0, 0, 1, 1], [], []>} : vector<16x2048xbf16>, vector<2048x512xbf16>, vector<16x512xf32> -> vector<16x512xf32>
    %c0_3 = arith.constant 0 : index
    %c0_4 = arith.constant 0 : index
    %3 = vector.load %arg3[%c0_3, %c0_4] : memref<1x512xf32, #tpu.memory_space<vmem>>, vector<1x512xf32>
    %4 = vector.broadcast %3 : vector<1x512xf32> to vector<16x512xf32>
    %5 = arith.addf %2, %4 : vector<16x512xf32>
    %cst_5 = arith.constant 0.000000e+00 : f32
    %6 = vector.broadcast %cst_5 : f32 to vector<16x512xf32>
    %7 = arith.maximumf %5, %6 : vector<16x512xf32>
    %8 = arith.truncf %7 : vector<16x512xf32> to vector<16x512xbf16>
    %c0_6 = arith.constant 0 : index
    %c0_7 = arith.constant 0 : index
    %9 = vector.load %arg4[%c0_6, %c0_7] : memref<512x512xbf16, #tpu.memory_space<vmem>>, vector<512x512xbf16>
    %cst_8 = arith.constant dense<0.000000e+00> : vector<16x512xf32>
    %10 = tpu.matmul %8, %9, %cst_8 {dimension_numbers = #tpu.dot_dimension_numbers<[1], [0], [0], [1], [0, 0, 1, 1], [], []>} : vector<16x512xbf16>, vector<512x512xbf16>, vector<16x512xf32> -> vector<16x512xf32>
    %c0_9 = arith.constant 0 : index
    %c0_10 = arith.constant 0 : index
    %11 = vector.load %arg5[%c0_9, %c0_10] : memref<1x512xf32, #tpu.memory_space<vmem>>, vector<1x512xf32>
    %12 = vector.broadcast %11 : vector<1x512xf32> to vector<16x512xf32>
    %13 = arith.addf %10, %12 : vector<16x512xf32>
    %cst_11 = arith.constant 0.000000e+00 : f32
    %14 = vector.broadcast %cst_11 : f32 to vector<16x512xf32>
    %15 = arith.maximumf %13, %14 : vector<16x512xf32>
    %16 = arith.truncf %15 : vector<16x512xf32> to vector<16x512xbf16>
    %c0_12 = arith.constant 0 : index
    %c0_13 = arith.constant 0 : index
    %17 = vector.load %arg6[%c0_12, %c0_13] : memref<512x512xbf16, #tpu.memory_space<vmem>>, vector<512x512xbf16>
    %cst_14 = arith.constant dense<0.000000e+00> : vector<16x512xf32>
    %18 = tpu.matmul %16, %17, %cst_14 {dimension_numbers = #tpu.dot_dimension_numbers<[1], [0], [0], [1], [0, 0, 1, 1], [], []>} : vector<16x512xbf16>, vector<512x512xbf16>, vector<16x512xf32> -> vector<16x512xf32>
    %c0_15 = arith.constant 0 : index
    %c0_16 = arith.constant 0 : index
    %19 = vector.load %arg7[%c0_15, %c0_16] : memref<1x512xf32, #tpu.memory_space<vmem>>, vector<1x512xf32>
    %20 = vector.broadcast %19 : vector<1x512xf32> to vector<16x512xf32>
    %21 = arith.addf %18, %20 : vector<16x512xf32>
    %cst_17 = arith.constant 0.000000e+00 : f32
    %22 = vector.broadcast %cst_17 : f32 to vector<16x512xf32>
    %23 = arith.maximumf %21, %22 : vector<16x512xf32>
    %24 = arith.truncf %23 : vector<16x512xf32> to vector<16x512xbf16>
    %c0_18 = arith.constant 0 : index
    %c0_19 = arith.constant 0 : index
    %25 = vector.load %arg8[%c0_18, %c0_19] : memref<512x3072xbf16, #tpu.memory_space<vmem>>, vector<512x3072xbf16>
    %cst_20 = arith.constant dense<0.000000e+00> : vector<16x3072xf32>
    %26 = tpu.matmul %24, %25, %cst_20 {dimension_numbers = #tpu.dot_dimension_numbers<[1], [0], [0], [1], [0, 0, 1, 1], [], []>} : vector<16x512xbf16>, vector<512x3072xbf16>, vector<16x3072xf32> -> vector<16x3072xf32>
    %c0_21 = arith.constant 0 : index
    %c0_22 = arith.constant 0 : index
    %27 = vector.load %arg9[%c0_21, %c0_22] : memref<1x3072xf32, #tpu.memory_space<vmem>>, vector<1x3072xf32>
    %28 = vector.broadcast %27 : vector<1x3072xf32> to vector<16x3072xf32>
    %29 = arith.addf %26, %28 : vector<16x3072xf32>
    %c0_23 = arith.constant 0 : index
    %c0_24 = arith.constant 0 : index
    %30 = vector.load %arg10[%c0_23, %c0_24] : memref<16x3072xf32, #tpu.memory_space<vmem>>, vector<16x3072xf32>
    tpu.vector_store %arg10[%c0_23, %c0_24], %29 {strides = array<i32>} : memref<16x3072xf32, #tpu.memory_space<vmem>>, vector<16x3072xf32>,
    return
  }
  func.func @transform_0(%arg0: i32) -> (i32, i32) {
    %c0_i32 = arith.constant 0 : i32
    %c0_i32_0 = arith.constant 0 : i32
    %c0_i32_1 = arith.constant 0 : i32
    return %c0_i32, %c0_i32_0 : i32, i32
  }
  func.func @transform_1(%arg0: i32) -> (i32, i32) {
    %c0_i32 = arith.constant 0 : i32
    %c0_i32_0 = arith.constant 0 : i32
    %c0_i32_1 = arith.constant 0 : i32
    return %c0_i32, %c0_i32_0 : i32, i32
  }
  func.func @transform_2(%arg0: i32) -> (i32, i32) {
    %c0_i32 = arith.constant 0 : i32
    %c0_i32_0 = arith.constant 0 : i32
    %c0_i32_1 = arith.constant 0 : i32
    return %c0_i32, %c0_i32_0 : i32, i32
  }
  func.func @transform_3(%arg0: i32) -> (i32, i32) {
    %c0_i32 = arith.constant 0 : i32
    %c0_i32_0 = arith.constant 0 : i32
    %c0_i32_1 = arith.constant 0 : i32
    return %c0_i32, %c0_i32_0 : i32, i32
  }
  func.func @transform_4(%arg0: i32) -> (i32, i32) {
    %c0_i32 = arith.constant 0 : i32
    %c0_i32_0 = arith.constant 0 : i32
    %c0_i32_1 = arith.constant 0 : i32
    return %c0_i32, %c0_i32_0 : i32, i32
  }
  func.func @transform_5(%arg0: i32) -> (i32, i32) {
    %c0_i32 = arith.constant 0 : i32
    %c0_i32_0 = arith.constant 0 : i32
    %c0_i32_1 = arith.constant 0 : i32
    return %c0_i32, %c0_i32_0 : i32, i32
  }
  func.func @transform_6(%arg0: i32) -> (i32, i32) {
    %c0_i32 = arith.constant 0 : i32
    %c0_i32_0 = arith.constant 0 : i32
    %c0_i32_1 = arith.constant 0 : i32
    return %c0_i32, %c0_i32_0 : i32, i32
  }
  func.func @transform_7(%arg0: i32) -> (i32, i32) {
    %c0_i32 = arith.constant 0 : i32
    %c0_i32_0 = arith.constant 0 : i32
    %c0_i32_1 = arith.constant 0 : i32
    return %c0_i32, %c0_i32_0 : i32, i32
  }
  func.func @transform_8(%arg0: i32) -> (i32, i32) {
    %c0_i32 = arith.constant 0 : i32
    %c0_i32_0 = arith.constant 0 : i32
    %c0_i32_1 = arith.constant 0 : i32
    return %c0_i32, %c0_i32_0 : i32, i32
  }
  func.func @transform_9(%arg0: i32) -> (i32, i32) {
    %c0_i32 = arith.constant 0 : i32
    %c0_i32_0 = arith.constant 0 : i32
    %c0_i32_1 = arith.constant 0 : i32
    return %c0_i32, %c0_i32_0 : i32, i32
  }
}

</mosaic_0001>

<bundles_post_ra>
// kernel: reverse
= control target key start
LH: loop header
LB: loop body
LE: loop exit
PB: predicated region body
PF: predicated region fallthrough
CT: control target
= control target key end

     0   :  { %s1790_s6 = smov 0   ;;  %s1792_s7 = smov 0   ;;  %s2287_s0 = inlined_call_operand.vmem [shape: f32[3,3,512,512], index: 0, kind: input, shape index: {}]   ;;  %s2288_s1 = inlined_call_operand.vmem [shape: bf16[3,3,512,512], index: 1, kind: output, shape index: {}]  }
   0x1   :  { %s1794_s8 = smov 0   ;;  %s1796_s9 = smov 0  }
   0x2   :  { %s1798_s10 = smov 0   ;;  %s1800_s11 = smov 0  }
   0x3   :  { %s1802_s12 = smov 0   ;;  %s1804_s13 = smov 0  }
   0x4   :  { %s1806_s14 = smov 0   ;;  %s1808_s15 = smov 0  }
   0x5   :  { %s1810_s16 = smov 0   ;;  %s1812_s17 = smov 0  }
   0x6   :  { %s1814_s18 = smov 0   ;;  %s1816_s19 = smov 0  }
   0x7   :  { %s1818_s20 = smov 0   ;;  %s1820_s21 = smov 0  }
   0x8   :  { %s1822_s22 = smov 0   ;;  %s1824_s23 = smov 0  }
   0x9   :  { %s1826_s24 = smov 0  }
   0xa LB: > { %s65_s25 = sadd.s32 1, %s1766_s21  ;;  %s69_s26 = sadd.s32 1, %s1770_s22  ;;  %s1778_s24 = sphi %s1826_s24, %s7_s24   ;;  %s1774_s23 = sphi %s1824_s23, %s2307_s23   ;;  %s1770_s22 = sphi %s1822_s22, %s2306_s22   ;;  %s1766_s21 = sphi %s1820_s21, %s2305_s21   ;;  %s1762_s20 = sphi %s1818_s20, %s2304_s20   ;;  %s1758_s19 = sphi %s1816_s19, %s2303_s19   ;;  %s1754_s18 = sphi %s1814_s18, %s2302_s18   ;;  %s1750_s17 = sphi %s1812_s17, %s2301_s17   ;;  %s1746_s16 = sphi %s1810_s16, %s2300_s16   ;;  %s1742_s15 = sphi %s1808_s15, %s2299_s15   ;;  %s1738_s14 = sphi %s1806_s14, %s2298_s14   ;;  %s1734_s13 = sphi %s1804_s13, %s2297_s13   ;;  %s1730_s12 = sphi %s1802_s12, %s2296_s12   ;;  %s1726_s11 = sphi %s1800_s11, %s2295_s11   ;;  %s1722_s10 = sphi %s1798_s10, %s2294_s10   ;;  %s1718_s9 = sphi %s1796_s9, %s2293_s9   ;;  %s1714_s8 = sphi %s1794_s8, %s2292_s8   ;;  %s1710_s7 = sphi %s1792_s7, %s2291_s7   ;;  %s1706_s6 = sphi %s1790_s6, %s2290_s6  }
   0xb   : > { %p67_p0 = scmp.ge.s32.totalorder %s65_s25, 2  ;;  %p1208_p1 = scmp.ge.s32.totalorder %s1778_s24, 5 }
   0xc   : > { %p113_p2 = scmp.lt.s32.totalorder %s1778_s24, 23  ;;  %s73_s27 = sadd.s32 1, %s1774_s23 }
   0xd   : > { %s2309_s25 = smov (%p67_p0, %s65_s25), 0  ;;  %s2311_s26 = smov (!%p67_p0, %s69_s26), %s1770_s22 }
   0xe   : > { %p114_p3 = pnand %p1208_p1, %p113_p2  ;;  %p71_p4 = scmp.ge.s32.totalorder %s2311_s26, 3 }
   0xf   : > { %s159_s28 = ssub.s32 (!%p114_p3), 2, %s1714_s8  ;;  %s160_s29 = ssub.s32 (!%p114_p3), 2, %s1710_s7 }
  0x10   : > { %s2313_s26 = smov (%p71_p4, %s2311_s26), 0  ;;  %s2315_s27 = smov (!%p71_p4, %s73_s27), %s1774_s23 }
  0x11   : > { %p75_p5 = scmp.ge.s32.totalorder %s2315_s27, 3  ;;  %117 = sbr.rel (%p114_p3) target bundleno = 90 (0x5a), region = 20 }
  0x12   : > { %s1209_s30 = sshll.u32 (!%p114_p3), %s1706_s6, 5  ;;  %p163_p6 = scmp.lt.s32.totalorder (!%p114_p3), %s159_s28, 2 }
  0x13   : > { %s2317_s27 = smov (%p75_p5, %s2315_s27), 0  ;;  %p165_p7 = scmp.lt.s32.totalorder (!%p114_p3), %s160_s29, 2 }
  0x14   : > { %p167_p8 = scmp.lt.s32.totalorder (!%p114_p3), %s1209_s30, 63  ;;  %p185_p9 = scmp.lt.s32.totalorder (!%p114_p3), %s1714_s8, 2 }
  0x15   : > { %p187_p10 = scmp.lt.s32.totalorder (!%p114_p3), %s1710_s7, 2 }
  0x16   : > { %s2319_s28 = smov (!%p163_p6, %s159_s28), 2  ;;  %s2321_s29 = smov (!%p165_p7, %s160_s29), 2 }
  0x17   : > { %s2323_s30 = smov (!%p167_p8, %s1209_s30), 63  ;;  %s1211_s2 = sshll.u32 %s2321_s29, 8 }
  0x18   : > { %s1474_s3 = smul.u32 768, %s2319_s28  ;;  %s1210_s4 = sshll.u32 %s2323_s30, 2 }
  0x19   : > { %s174_s5 = sadd.s32 %s1211_s2, %s1210_s4  ;;  %s2325_s8 = smov (!%p185_p9, %s1714_s8), 2 }
  0x1a   : > { %s176_s6 = sadd.s32 %s1474_s3, %s174_s5  ;;  %s2327_s7 = smov (!%p187_p10, %s1710_s7), 2 }
  0x1b   : > { %s1212_s28 = sshll.u32 %s176_s6, 3  ;;  %s1475_s8 = smul.u32 768, %s2325_s8 }
  0x1c   : > { %s1908_s2 = scalar_lea.vmem %s2287_s0, %s1212_s28  ;;  %s1215_s7 = sshll.u32 %s2327_s7, 8 }
  0x1d   : > { %s196_s3 = sadd.s32 %s1215_s7, %s1210_s4  ;;  %v203_v0 = vld [vmem:[%s1908_s2] sm:$0xff]  ;;  %v1248_v13 = vld [vmem:[%s1908_s2 + $0x8] sm:$0xff] }
  0x1e   : > { %s198_s4 = sadd.s32 %s1475_s8, %s196_s3  ;;  %v1217_v1 = vld [vmem:[%s1908_s2 + $0x20] sm:$0xff]  ;;  %v303_v17 = vpack.c.bf16 %v1248_v13, %v203_v0  ;;  %v1251_v18 = vld [vmem:[%s1908_s2 + $0x28] sm:$0xff] }
  0x1f   : > { %s1216_s5 = sshll.u32 %s198_s4, 2  ;;  %v1218_v2 = vld [vmem:[%s1908_s2 + $0x40] sm:$0xff]  ;;  %v1254_v19 = vld [vmem:[%s1908_s2 + $0x48] sm:$0xff]  ;;  %v311_v24 = vpack.c.bf16 %v1251_v18, %v1217_v1 }
  0x20   : > { %v1219_v3 = vld [vmem:[%s1908_s2 + $0x60] sm:$0xff]  ;;  %s1923_s8 = scalar_lea.vmem %s2288_s1, %s1216_s5  ;;  %v1257_v20 = vld [vmem:[%s1908_s2 + $0x68] sm:$0xff]  ;;  %v319_v25 = vpack.c.bf16 %v1254_v19, %v1218_v2 }
  0x21   : > { %v1220_v4 = vld [vmem:[%s1908_s2 + $0x80] sm:$0xff]  ;;  %v327_v26 = vpack.c.bf16 %v1257_v20, %v1219_v3  ;;  %v1260_v27 = vld [vmem:[%s1908_s2 + $0x88] sm:$0xff]  ;;  %1250 = vst [vmem:[%s1923_s8] sm:$0xff] %v303_v17  ;;  %1253 = vst [vmem:[%s1923_s8 + $0x10] sm:$0xff] %v311_v24 }
  0x22   : > { %v1221_v5 = vld [vmem:[%s1908_s2 + $0xa0] sm:$0xff]  ;;  %v1263_v28 = vld [vmem:[%s1908_s2 + $0xa8] sm:$0xff]  ;;  %v335_v33 = vpack.c.bf16 %v1260_v27, %v1220_v4  ;;  %1256 = vst [vmem:[%s1923_s8 + $0x20] sm:$0xff] %v319_v25 }
  0x23   : > { %v1222_v6 = vld [vmem:[%s1908_s2 + $0xc0] sm:$0xff]  ;;  %v1266_v29 = vld [vmem:[%s1908_s2 + $0xc8] sm:$0xff]  ;;  %v343_v34 = vpack.c.bf16 %v1263_v28, %v1221_v5  ;;  %1259 = vst [vmem:[%s1923_s8 + $0x30] sm:$0xff] %v327_v26 }
  0x24   : > { %v1223_v7 = vld [vmem:[%s1908_s2 + $0xe0] sm:$0xff]  ;;  %v351_v35 = vpack.c.bf16 %v1266_v29, %v1222_v6  ;;  %v1269_v36 = vld [vmem:[%s1908_s2 + $0xe8] sm:$0xff]  ;;  %1262 = vst [vmem:[%s1923_s8 + $0x40] sm:$0xff] %v335_v33  ;;  %v1345_v33 = vld [vmem:[%s1908_s2 + $0x30] sm:$0xff] }
  0x25   : > { %v1224_v8 = vld [vmem:[%s1908_s2 + $0x100] sm:$0xff]  ;;  %v1272_v37 = vld [vmem:[%s1908_s2 + $0x108] sm:$0xff]  ;;  %v359_v42 = vpack.c.bf16 %v1269_v36, %v1223_v7  ;;  %1265 = vst [vmem:[%s1923_s8 + $0x50] sm:$0xff] %v343_v34  ;;  %v1346_v34 = vld [vmem:[%s1908_s2 + $0x50] sm:$0xff] }
  0x26   : > { %v1225_v9 = vld [vmem:[%s1908_s2 + $0x120] sm:$0xff]  ;;  %v1275_v38 = vld [vmem:[%s1908_s2 + $0x128] sm:$0xff]  ;;  %v367_v43 = vpack.c.bf16 %v1272_v37, %v1224_v8  ;;  %1268 = vst [vmem:[%s1923_s8 + $0x60] sm:$0xff] %v351_v35  ;;  %v1347_v35 = vld [vmem:[%s1908_s2 + $0x70] sm:$0xff] }
  0x27   : > { %v1926_v10 = vld [vmem:[%s1908_s2 + $0x140] sm:$0xff]  ;;  %v375_v44 = vpack.c.bf16 %v1275_v38, %v1225_v9  ;;  %v1278_v45 = vld [vmem:[%s1908_s2 + $0x148] sm:$0xff]  ;;  %1271 = vst [vmem:[%s1923_s8 + $0x70] sm:$0xff] %v359_v42  ;;  %v1348_v36 = vld [vmem:[%s1908_s2 + $0x90] sm:$0xff] }
  0x28   : > { %v1929_v11 = vld [vmem:[%s1908_s2 + $0x160] sm:$0xff]  ;;  %v1281_v46 = vld [vmem:[%s1908_s2 + $0x168] sm:$0xff]  ;;  %v383_v51 = vpack.c.bf16 %v1278_v45, %v1926_v10  ;;  %1274 = vst [vmem:[%s1923_s8 + $0x80] sm:$0xff] %v367_v43  ;;  %v1349_v37 = vld [vmem:[%s1908_s2 + $0xb0] sm:$0xff] }
  0x29   : > { %v1932_v12 = vld [vmem:[%s1908_s2 + $0x180] sm:$0xff]  ;;  %v1284_v47 = vld [vmem:[%s1908_s2 + $0x188] sm:$0xff]  ;;  %v391_v52 = vpack.c.bf16 %v1281_v46, %v1929_v11  ;;  %1277 = vst [vmem:[%s1923_s8 + $0x90] sm:$0xff] %v375_v44  ;;  %v1350_v38 = vld [vmem:[%s1908_s2 + $0xd0] sm:$0xff] }
  0x2a   : > { %v1936_v14 = vld [vmem:[%s1908_s2 + $0x1a0] sm:$0xff]  ;;  %v399_v53 = vpack.c.bf16 %v1284_v47, %v1932_v12  ;;  %v1287_v54 = vld [vmem:[%s1908_s2 + $0x1a8] sm:$0xff]  ;;  %1280 = vst [vmem:[%s1923_s8 + $0xa0] sm:$0xff] %v383_v51  ;;  %v2078_v42 = vld [vmem:[%s1908_s2 + $0x150] sm:$0xff] }
  0x2b   : > { %v1939_v15 = vld [vmem:[%s1908_s2 + $0x1c0] sm:$0xff]  ;;  %v1290_v55 = vld [vmem:[%s1908_s2 + $0x1c8] sm:$0xff]  ;;  %v407_v60 = vpack.c.bf16 %v1287_v54, %v1936_v14  ;;  %1283 = vst [vmem:[%s1923_s8 + $0xb0] sm:$0xff] %v391_v52  ;;  %v2081_v43 = vld [vmem:[%s1908_s2 + $0x170] sm:$0xff] }
  0x2c   : > { %v1942_v16 = vld [vmem:[%s1908_s2 + $0x1e0] sm:$0xff]  ;;  %v1293_v56 = vld [vmem:[%s1908_s2 + $0x1e8] sm:$0xff]  ;;  %v415_v61 = vpack.c.bf16 %v1290_v55, %v1939_v15  ;;  %1286 = vst [vmem:[%s1923_s8 + $0xc0] sm:$0xff] %v399_v53  ;;  %v2084_v44 = vld [vmem:[%s1908_s2 + $0x190] sm:$0xff] }
  0x2d   : > { %v1948_v21 = vld [vmem:[%s1908_s2 + $0x200] sm:$0xff]  ;;  %v423_v62 = vpack.c.bf16 %v1293_v56, %v1942_v16  ;;  %v1296_v63 = vld [vmem:[%s1908_s2 + $0x208] sm:$0xff]  ;;  %1289 = vst [vmem:[%s1923_s8 + $0xd0] sm:$0xff] %v407_v60  ;;  %v2087_v45 = vld [vmem:[%s1908_s2 + $0x1b0] sm:$0xff] }
  0x2e   : > { %v1951_v22 = vld [vmem:[%s1908_s2 + $0x220] sm:$0xff]  ;;  %v1299_v0 = vld [vmem:[%s1908_s2 + $0x228] sm:$0xff]  ;;  %v431_v3 = vpack.c.bf16 %v1296_v63, %v1948_v21  ;;  %1292 = vst [vmem:[%s1923_s8 + $0xe0] sm:$0xff] %v415_v61  ;;  %v2090_v46 = vld [vmem:[%s1908_s2 + $0x1d0] sm:$0xff] }
  0x2f   : > { %v1954_v23 = vld [vmem:[%s1908_s2 + $0x240] sm:$0xff]  ;;  %v1302_v1 = vld [vmem:[%s1908_s2 + $0x248] sm:$0xff]  ;;  %v439_v4 = vpack.c.bf16 %v1299_v0, %v1951_v22  ;;  %1295 = vst [vmem:[%s1923_s8 + $0xf0] sm:$0xff] %v423_v62  ;;  %v1376_v47 = vld [vmem:[%s1908_s2 + $0x18] sm:$0xff] }
  0x30   : > { %v1960_v30 = vld [vmem:[%s1908_s2 + $0x260] sm:$0xff]  ;;  %v447_v5 = vpack.c.bf16 %v1302_v1, %v1954_v23  ;;  %v1305_v6 = vld [vmem:[%s1908_s2 + $0x268] sm:$0xff]  ;;  %1298 = vst [vmem:[%s1923_s8 + $0x100] sm:$0xff] %v431_v3  ;;  %v2099_v51 = vld [vmem:[%s1908_s2 + $0x210] sm:$0xff] }
  0x31   : > { %v1963_v31 = vld [vmem:[%s1908_s2 + $0x280] sm:$0xff]  ;;  %v1308_v7 = vld [vmem:[%s1908_s2 + $0x288] sm:$0xff]  ;;  %v455_v9 = vpack.c.bf16 %v1305_v6, %v1960_v30  ;;  %1301 = vst [vmem:[%s1923_s8 + $0x110] sm:$0xff] %v439_v4  ;;  %v2102_v52 = vld [vmem:[%s1908_s2 + $0x230] sm:$0xff] }
  0x32   : > { %v1966_v32 = vld [vmem:[%s1908_s2 + $0x2a0] sm:$0xff]  ;;  %v1311_v8 = vld [vmem:[%s1908_s2 + $0x2a8] sm:$0xff]  ;;  %v463_v10 = vpack.c.bf16 %v1308_v7, %v1963_v31  ;;  %1304 = vst [vmem:[%s1923_s8 + $0x120] sm:$0xff] %v447_v5  ;;  %v1385_v56 = vld [vmem:[%s1908_s2 + $0x78] sm:$0xff] }
  0x33   : > { %v1973_v39 = vld [vmem:[%s1908_s2 + $0x2c0] sm:$0xff]  ;;  %v471_v11 = vpack.c.bf16 %v1311_v8, %v1966_v32  ;;  %v1314_v12 = vld [vmem:[%s1908_s2 + $0x2c8] sm:$0xff]  ;;  %1307 = vst [vmem:[%s1923_s8 + $0x130] sm:$0xff] %v455_v9  ;;  %v1344_v32 = vld [vmem:[%s1908_s2 + $0x10] sm:$0xff]  ;;  %v679_v62 = vpack.c.bf16 %v1385_v56, %v1347_v35 }
  0x34   : > { %v1976_v40 = vld [vmem:[%s1908_s2 + $0x2e0] sm:$0xff]  ;;  %v1317_v13 = vld [vmem:[%s1908_s2 + $0x2e8] sm:$0xff]  ;;  %v479_v15 = vpack.c.bf16 %v1314_v12, %v1973_v39  ;;  %1310 = vst [vmem:[%s1923_s8 + $0x140] sm:$0xff] %v463_v10  ;;  %v1351_v39 = vld [vmem:[%s1908_s2 + $0xf0] sm:$0xff]  ;;  %v655_v53 = vpack.c.bf16 %v1376_v47, %v1344_v32 }
  0x35   : > { %v1979_v41 = vld [vmem:[%s1908_s2 + $0x300] sm:$0xff]  ;;  %v1320_v14 = vld [vmem:[%s1908_s2 + $0x308] sm:$0xff]  ;;  %v487_v16 = vpack.c.bf16 %v1317_v13, %v1976_v40  ;;  %1313 = vst [vmem:[%s1923_s8 + $0x150] sm:$0xff] %v471_v11  ;;  %v1352_v40 = vld [vmem:[%s1908_s2 + $0x110] sm:$0xff] }
  0x36   : > { %v1988_v48 = vld [vmem:[%s1908_s2 + $0x320] sm:$0xff]  ;;  %v495_v17 = vpack.c.bf16 %v1320_v14, %v1979_v41  ;;  %v1323_v18 = vld [vmem:[%s1908_s2 + $0x328] sm:$0xff]  ;;  %1316 = vst [vmem:[%s1923_s8 + $0x160] sm:$0xff] %v479_v15  ;;  %v2075_v41 = vld [vmem:[%s1908_s2 + $0x130] sm:$0xff] }
  0x37   : > { %v1991_v49 = vld [vmem:[%s1908_s2 + $0x340] sm:$0xff]  ;;  %v1326_v19 = vld [vmem:[%s1908_s2 + $0x348] sm:$0xff]  ;;  %v503_v21 = vpack.c.bf16 %v1323_v18, %v1988_v48  ;;  %1319 = vst [vmem:[%s1923_s8 + $0x170] sm:$0xff] %v487_v16  ;;  %v1379_v48 = vld [vmem:[%s1908_s2 + $0x38] sm:$0xff] }
  0x38   : > { %v1994_v50 = vld [vmem:[%s1908_s2 + $0x360] sm:$0xff]  ;;  %v1329_v20 = vld [vmem:[%s1908_s2 + $0x368] sm:$0xff]  ;;  %v511_v22 = vpack.c.bf16 %v1326_v19, %v1991_v49  ;;  %1322 = vst [vmem:[%s1923_s8 + $0x180] sm:$0xff] %v495_v17  ;;  %v1382_v49 = vld [vmem:[%s1908_s2 + $0x58] sm:$0xff]  ;;  %v663_v54 = vpack.c.bf16 %v1379_v48, %v1345_v33 }
  0x39   : > { %v1244_v57 = vld [vmem:[%s1908_s2 + $0x380] sm:$0xff]  ;;  %v519_v23 = vpack.c.bf16 %v1329_v20, %v1994_v50  ;;  %v1332_v24 = vld [vmem:[%s1908_s2 + $0x388] sm:$0xff]  ;;  %1325 = vst [vmem:[%s1923_s8 + $0x190] sm:$0xff] %v503_v21  ;;  %v2096_v50 = vld [vmem:[%s1908_s2 + $0x1f0] sm:$0xff]  ;;  %v671_v55 = vpack.c.bf16 %v1382_v49, %v1346_v34 }
  0x3a   : > { %v1245_v58 = vld [vmem:[%s1908_s2 + $0x3a0] sm:$0xff]  ;;  %v1335_v25 = vld [vmem:[%s1908_s2 + $0x3a8] sm:$0xff]  ;;  %v527_v27 = vpack.c.bf16 %v1332_v24, %v1244_v57  ;;  %1328 = vst [vmem:[%s1923_s8 + $0x1a0] sm:$0xff] %v511_v22  ;;  %v1388_v57 = vld [vmem:[%s1908_s2 + $0x98] sm:$0xff] }
  0x3b   : > { %v1246_v59 = vld [vmem:[%s1908_s2 + $0x3c0] sm:$0xff]  ;;  %v1338_v26 = vld [vmem:[%s1908_s2 + $0x3c8] sm:$0xff]  ;;  %v535_v28 = vpack.c.bf16 %v1335_v25, %v1245_v58  ;;  %1331 = vst [vmem:[%s1923_s8 + $0x1b0] sm:$0xff] %v519_v23  ;;  %v1391_v58 = vld [vmem:[%s1908_s2 + $0xb8] sm:$0xff]  ;;  %v687_v63 = vpack.c.bf16 %v1388_v57, %v1348_v36 }
  0x3c   : > { %v1247_v2 = vld [vmem:[%s1908_s2 + $0x3e0] sm:$0xff]  ;;  %v543_v29 = vpack.c.bf16 %v1338_v26, %v1246_v59  ;;  %v1341_v30 = vld [vmem:[%s1908_s2 + $0x3e8] sm:$0xff]  ;;  %1334 = vst [vmem:[%s1923_s8 + $0x1c0] sm:$0xff] %v527_v27  ;;  %v2108_v59 = vld [vmem:[%s1908_s2 + $0x250] sm:$0xff]  ;;  %v695_v0 = vpack.c.bf16 %v1391_v58, %v1349_v37 }
  0x3d   : > { %v551_v31 = vpack.c.bf16 %v1341_v30, %v1247_v2  ;;  %1337 = vst [vmem:[%s1923_s8 + $0x1d0] sm:$0xff] %v535_v28  ;;  %v2111_v60 = vld [vmem:[%s1908_s2 + $0x270] sm:$0xff]  ;;  %v1394_v1 = vld [vmem:[%s1908_s2 + $0xd8] sm:$0xff]  ;;  %1378 = vst [vmem:[%s1923_s8 + $0x8] sm:$0xff] %v655_v53 }
  0x3e   : > { %1340 = vst [vmem:[%s1923_s8 + $0x1e0] sm:$0xff] %v543_v29  ;;  %v2114_v61 = vld [vmem:[%s1908_s2 + $0x290] sm:$0xff]  ;;  %v1397_v2 = vld [vmem:[%s1908_s2 + $0xf8] sm:$0xff]  ;;  %1381 = vst [vmem:[%s1923_s8 + $0x18] sm:$0xff] %v663_v54  ;;  %v703_v7 = vpack.c.bf16 %v1394_v1, %v1350_v38 }
  0x3f   : > { %1343 = vst [vmem:[%s1923_s8 + $0x1f0] sm:$0xff] %v551_v31  ;;  %v1400_v3 = vld [vmem:[%s1908_s2 + $0x118] sm:$0xff]  ;;  %v2120_v4 = vld [vmem:[%s1908_s2 + $0x2b0] sm:$0xff]  ;;  %1384 = vst [vmem:[%s1923_s8 + $0x28] sm:$0xff] %v671_v55  ;;  %v711_v8 = vpack.c.bf16 %v1397_v2, %v1351_v39 }
  0x40   : > { %v2123_v5 = vld [vmem:[%s1908_s2 + $0x2d0] sm:$0xff]  ;;  %v719_v9 = vpack.c.bf16 %v1400_v3, %v1352_v40  ;;  %v1403_v10 = vld [vmem:[%s1908_s2 + $0x138] sm:$0xff]  ;;  %1387 = vst [vmem:[%s1923_s8 + $0x38] sm:$0xff] %v679_v62  ;;  %1390 = vst [vmem:[%s1923_s8 + $0x48] sm:$0xff] %v687_v63 }
  0x41   : > { %v2126_v6 = vld [vmem:[%s1908_s2 + $0x2f0] sm:$0xff]  ;;  %v1406_v11 = vld [vmem:[%s1908_s2 + $0x158] sm:$0xff]  ;;  %1393 = vst [vmem:[%s1923_s8 + $0x58] sm:$0xff] %v695_v0  ;;  %v727_v16 = vpack.c.bf16 %v1403_v10, %v2075_v41  ;;  %1396 = vst [vmem:[%s1923_s8 + $0x68] sm:$0xff] %v703_v7 }
  0x42   : > { %v1409_v12 = vld [vmem:[%s1908_s2 + $0x178] sm:$0xff]  ;;  %v2135_v13 = vld [vmem:[%s1908_s2 + $0x310] sm:$0xff]  ;;  %v735_v17 = vpack.c.bf16 %v1406_v11, %v2078_v42  ;;  %1399 = vst [vmem:[%s1923_s8 + $0x78] sm:$0xff] %v711_v8  ;;  %1402 = vst [vmem:[%s1923_s8 + $0x88] sm:$0xff] %v719_v9 }
  0x43   : > { %v2138_v14 = vld [vmem:[%s1908_s2 + $0x330] sm:$0xff]  ;;  %v743_v18 = vpack.c.bf16 %v1409_v12, %v2081_v43  ;;  %v1412_v19 = vld [vmem:[%s1908_s2 + $0x198] sm:$0xff]  ;;  %1405 = vst [vmem:[%s1923_s8 + $0x98] sm:$0xff] %v727_v16 }
  0x44   : > { %v2141_v15 = vld [vmem:[%s1908_s2 + $0x350] sm:$0xff]  ;;  %v1415_v20 = vld [vmem:[%s1908_s2 + $0x1b8] sm:$0xff]  ;;  %v751_v25 = vpack.c.bf16 %v1412_v19, %v2084_v44  ;;  %1408 = vst [vmem:[%s1923_s8 + $0xa8] sm:$0xff] %v735_v17 }
  0x45   : > { %v1418_v21 = vld [vmem:[%s1908_s2 + $0x1d8] sm:$0xff]  ;;  %v2153_v22 = vld [vmem:[%s1908_s2 + $0x370] sm:$0xff]  ;;  %v759_v26 = vpack.c.bf16 %v1415_v20, %v2087_v45  ;;  %1411 = vst [vmem:[%s1923_s8 + $0xb8] sm:$0xff] %v743_v18 }
  0x46   : > { %v2156_v23 = vld [vmem:[%s1908_s2 + $0x390] sm:$0xff]  ;;  %v767_v27 = vpack.c.bf16 %v1418_v21, %v2090_v46  ;;  %v1421_v28 = vld [vmem:[%s1908_s2 + $0x1f8] sm:$0xff]  ;;  %1414 = vst [vmem:[%s1923_s8 + $0xc8] sm:$0xff] %v751_v25 }
  0x47   : > { %v2159_v24 = vld [vmem:[%s1908_s2 + $0x3b0] sm:$0xff]  ;;  %v1424_v29 = vld [vmem:[%s1908_s2 + $0x218] sm:$0xff]  ;;  %v775_v33 = vpack.c.bf16 %v1421_v28, %v2096_v50  ;;  %1417 = vst [vmem:[%s1923_s8 + $0xd8] sm:$0xff] %v759_v26 }
  0x48   : > { %v1427_v30 = vld [vmem:[%s1908_s2 + $0x238] sm:$0xff]  ;;  %v1374_v31 = vld [vmem:[%s1908_s2 + $0x3d0] sm:$0xff]  ;;  %v783_v34 = vpack.c.bf16 %v1424_v29, %v2099_v51  ;;  %1420 = vst [vmem:[%s1923_s8 + $0xe8] sm:$0xff] %v767_v27 }
  0x49   : > { %v1375_v32 = vld [vmem:[%s1908_s2 + $0x3f0] sm:$0xff]  ;;  %v791_v35 = vpack.c.bf16 %v1427_v30, %v2102_v52  ;;  %v1430_v36 = vld [vmem:[%s1908_s2 + $0x258] sm:$0xff]  ;;  %1423 = vst [vmem:[%s1923_s8 + $0xf8] sm:$0xff] %v775_v33 }
  0x4a   : > { %v1433_v37 = vld [vmem:[%s1908_s2 + $0x278] sm:$0xff]  ;;  %v799_v39 = vpack.c.bf16 %v1430_v36, %v2108_v59  ;;  %1426 = vst [vmem:[%s1923_s8 + $0x108] sm:$0xff] %v783_v34 }
  0x4b   : > { %v1436_v38 = vld [vmem:[%s1908_s2 + $0x298] sm:$0xff]  ;;  %v807_v40 = vpack.c.bf16 %v1433_v37, %v2111_v60  ;;  %1429 = vst [vmem:[%s1923_s8 + $0x118] sm:$0xff] %v791_v35 }
  0x4c   : > { %v815_v41 = vpack.c.bf16 %v1436_v38, %v2114_v61  ;;  %v1439_v42 = vld [vmem:[%s1908_s2 + $0x2b8] sm:$0xff]  ;;  %1432 = vst [vmem:[%s1923_s8 + $0x128] sm:$0xff] %v799_v39 }
  0x4d   : > { %v1442_v43 = vld [vmem:[%s1908_s2 + $0x2d8] sm:$0xff]  ;;  %v823_v45 = vpack.c.bf16 %v1439_v42, %v2120_v4  ;;  %1435 = vst [vmem:[%s1923_s8 + $0x138] sm:$0xff] %v807_v40 }
  0x4e   : > { %v1445_v44 = vld [vmem:[%s1908_s2 + $0x2f8] sm:$0xff]  ;;  %v831_v46 = vpack.c.bf16 %v1442_v43, %v2123_v5  ;;  %1438 = vst [vmem:[%s1923_s8 + $0x148] sm:$0xff] %v815_v41 }
  0x4f   : > { %v839_v47 = vpack.c.bf16 %v1445_v44, %v2126_v6  ;;  %v1448_v48 = vld [vmem:[%s1908_s2 + $0x318] sm:$0xff]  ;;  %1441 = vst [vmem:[%s1923_s8 + $0x158] sm:$0xff] %v823_v45 }
  0x50   : > { %v1451_v49 = vld [vmem:[%s1908_s2 + $0x338] sm:$0xff]  ;;  %v847_v51 = vpack.c.bf16 %v1448_v48, %v2135_v13  ;;  %1444 = vst [vmem:[%s1923_s8 + $0x168] sm:$0xff] %v831_v46 }
  0x51   : > { %v1454_v50 = vld [vmem:[%s1908_s2 + $0x358] sm:$0xff]  ;;  %v855_v52 = vpack.c.bf16 %v1451_v49, %v2138_v14  ;;  %1447 = vst [vmem:[%s1923_s8 + $0x178] sm:$0xff] %v839_v47 }
  0x52   : > { %v863_v53 = vpack.c.bf16 %v1454_v50, %v2141_v15  ;;  %v1457_v54 = vld [vmem:[%s1908_s2 + $0x378] sm:$0xff]  ;;  %1450 = vst [vmem:[%s1923_s8 + $0x188] sm:$0xff] %v847_v51 }
  0x53   : > { %v1460_v55 = vld [vmem:[%s1908_s2 + $0x398] sm:$0xff]  ;;  %v871_v57 = vpack.c.bf16 %v1457_v54, %v2153_v22  ;;  %1453 = vst [vmem:[%s1923_s8 + $0x198] sm:$0xff] %v855_v52 }
  0x54   : > { %v1463_v56 = vld [vmem:[%s1908_s2 + $0x3b8] sm:$0xff]  ;;  %v879_v58 = vpack.c.bf16 %v1460_v55, %v2156_v23  ;;  %1456 = vst [vmem:[%s1923_s8 + $0x1a8] sm:$0xff] %v863_v53 }
  0x55   : > { %v887_v59 = vpack.c.bf16 %v1463_v56, %v2159_v24  ;;  %v1466_v60 = vld [vmem:[%s1908_s2 + $0x3d8] sm:$0xff]  ;;  %1459 = vst [vmem:[%s1923_s8 + $0x1b8] sm:$0xff] %v871_v57 }
  0x56   : > { %v1469_v61 = vld [vmem:[%s1908_s2 + $0x3f8] sm:$0xff]  ;;  %v895_v62 = vpack.c.bf16 %v1466_v60, %v1374_v31  ;;  %1462 = vst [vmem:[%s1923_s8 + $0x1c8] sm:$0xff] %v879_v58 }
  0x57   : > { %v903_v63 = vpack.c.bf16 %v1469_v61, %v1375_v32  ;;  %1465 = vst [vmem:[%s1923_s8 + $0x1d8] sm:$0xff] %v887_v59 }
  0x58   : > { %1468 = vst [vmem:[%s1923_s8 + $0x1e8] sm:$0xff] %v895_v62 }
  0x59   : > { %1471 = vst [vmem:[%s1923_s8 + $0x1f8] sm:$0xff] %v903_v63 }
  0x5a PF: > { %s7_s24 = sadd.s32 1, %s1778_s24   ;;  %s2290_s6 = smov %s1718_s9 }
  0x5b   : > { %p2225_p11 = scmp.ge.s32.totalorder %s7_s24, 28   ;;  %s2291_s7 = smov %s1722_s10 }
  0x5c   : > { %s2292_s8 = smov %s1726_s11  ;;  %s2293_s9 = smov %s1730_s12 }
  0x5d   : > { %s2294_s10 = smov %s1734_s13  ;;  %s2295_s11 = smov %s1738_s14 }
  0x5e   : > { %s2296_s12 = smov %s1742_s15  ;;  %s2297_s13 = smov %s1746_s16 }
  0x5f   : > { %s2298_s14 = smov %s1750_s17  ;;  %s2299_s15 = smov %s1754_s18 }
  0x60   : > { %s2300_s16 = smov %s1758_s19  ;;  %s2301_s17 = smov %s1762_s20 }
  0x61   : > { %s2302_s18 = smov %s1766_s21  ;;  %s2303_s19 = smov %s1770_s22 }
  0x62   : > { %s2304_s20 = smov %s1774_s23  ;;  %s2305_s21 = smov %s2309_s25 }
  0x63   : > { %s2306_s22 = smov %s2313_s26  ;;  %s2307_s23 = smov %s2317_s27 }
  0x64   :  { %6 = sbr.rel (!%p2225_p11) target bundleno = 10 (0xa), region = 359 }

// kernel: coarse_forward.1
= control target key start
LH: loop header
LB: loop body
LE: loop exit
PB: predicated region body
PF: predicated region fallthrough
CT: control target
= control target key end

     0   :  { %s19647_s1 = inlined_call_operand.vmem [shape: bf16[2048,512], index: 1, kind: input, shape index: {}]   ;;  %s19648_s0 = inlined_call_operand.vmem [shape: bf16[16,2048], index: 0, kind: input, shape index: {}]   ;;  %s19649_s2 = inlined_call_operand.vmem [shape: f32[1,512], index: 2, kind: input, shape index: {}]   ;;  %s19650_s3 = inlined_call_operand.vmem [shape: bf16[512,512], index: 3, kind: input, shape index: {}]   ;;  %s19651_s5 = inlined_call_operand.vmem [shape: bf16[512,512], index: 5, kind: input, shape index: {}]   ;;  %s19652_s4 = inlined_call_operand.vmem [shape: f32[1,512], index: 4, kind: input, shape index: {}]   ;;  %s19653_s7 = inlined_call_operand.vmem [shape: bf16[512,3072], index: 7, kind: input, shape index: {}]   ;;  %s19654_s6 = inlined_call_operand.vmem [shape: f32[1,512], index: 6, kind: input, shape index: {}]   ;;  %s19655_s8 = inlined_call_operand.vmem [shape: f32[1,3072], index: 8, kind: input, shape index: {}]   ;;  %s19656_s9 = inlined_call_operand.vmem [shape: f32[16,3072], index: 9, kind: output, shape index: {}]  }
   0x1   :  { %v13240_v0 = vld [vmem:[%s19647_s1 + $0xe4] ss:$16 sps:$4 sm:$0xff]   ;;  %v13244_v2 = vld [vmem:[%s19647_s1 + $0xe0] ss:$16 sps:$4 sm:$0xff]   ;;  %v33_v50 = vld [vmem:[%s19648_s0 + $0x8] sm:$0xff] }
   0x2   :  { %v13242_v1 = vld [vmem:[%s19647_s1 + $0x2e4] ss:$16 sps:$4 sm:$0xff]   ;;  %3222 = vmatprep.subr.bf16.mxu0 %v13240_v0  ;;  %v13245_v3 = vld [vmem:[%s19647_s1 + $0x2e0] ss:$16 sps:$4 sm:$0xff]   ;;  %v41_v51 = vld [vmem:[%s19648_s0 + $0x48] sm:$0xff] }
   0x3   :  { %3265 = vmatprep.subr.bf16.mxu1 %v13242_v1  ;;  %v13246_v4 = vld [vmem:[%s19647_s1 + $0xc4] ss:$16 sps:$4 sm:$0xff]   ;;  %3223 = vmatpush1.bf16.msra.mxu0 %v13244_v2  ;;  %v13250_v6 = vld [vmem:[%s19647_s1 + $0xc0] ss:$16 sps:$4 sm:$0xff]   ;;  %v14609_v55 = vcombine.high %v33_v50, %v41_v51 }
   0x4   :  { %3266 = vmatpush1.bf16.msra.mxu1 %v13245_v3  ;;  %v13248_v5 = vld [vmem:[%s19647_s1 + $0x2c4] ss:$16 sps:$4 sm:$0xff]   ;;  %3224 = vmatprep.subr.bf16.mxu0 %v13246_v4  ;;  %v13251_v7 = vld [vmem:[%s19647_s1 + $0x2c0] ss:$16 sps:$4 sm:$0xff]  }
   0x5   :  { %3267 = vmatprep.subr.bf16.mxu1 %v13248_v5  ;;  %v13252_v8 = vld [vmem:[%s19647_s1 + $0xa4] ss:$16 sps:$4 sm:$0xff]   ;;  %v13256_v10 = vld [vmem:[%s19647_s1 + $0xa0] ss:$16 sps:$4 sm:$0xff]   ;;  %3297 = vmatprep.mubr.bf16.mxu1 %v14609_v55 }
   0x6   :  { %v13254_v9 = vld [vmem:[%s19647_s1 + $0x2a4] ss:$16 sps:$4 sm:$0xff]   ;;  %v13257_v11 = vld [vmem:[%s19647_s1 + $0x2a0] ss:$16 sps:$4 sm:$0xff]  }
   0x7   :  { %3225 = vmatpush1.bf16.msra.mxu0 %v13250_v6  ;;  %v13258_v12 = vld [vmem:[%s19647_s1 + $0x84] ss:$16 sps:$4 sm:$0xff]   ;;  %v13262_v14 = vld [vmem:[%s19647_s1 + $0x80] ss:$16 sps:$4 sm:$0xff]  }
   0x8   :  { %3268 = vmatpush1.bf16.msra.mxu1 %v13251_v7  ;;  %3226 = vmatprep.subr.bf16.mxu0 %v13252_v8  ;;  %v13260_v13 = vld [vmem:[%s19647_s1 + $0x284] ss:$16 sps:$4 sm:$0xff]   ;;  %v13263_v15 = vld [vmem:[%s19647_s1 + $0x280] ss:$16 sps:$4 sm:$0xff]  }
   0x9   :  { %3269 = vmatprep.subr.bf16.mxu1 %v13254_v9  ;;  %v13264_v16 = vld [vmem:[%s19647_s1 + $0x64] ss:$16 sps:$4 sm:$0xff]   ;;  %v13268_v18 = vld [vmem:[%s19647_s1 + $0x60] ss:$16 sps:$4 sm:$0xff]   ;;  %v14663_v9 = vcombine.low %v33_v50, %v41_v51 }
   0xa   :  { %v13266_v17 = vld [vmem:[%s19647_s1 + $0x264] ss:$16 sps:$4 sm:$0xff]   ;;  %v13269_v19 = vld [vmem:[%s19647_s1 + $0x260] ss:$16 sps:$4 sm:$0xff]  }
   0xb   :  { %3227 = vmatpush1.bf16.msra.mxu0 %v13256_v10  ;;  %v13270_v20 = vld [vmem:[%s19647_s1 + $0x44] ss:$16 sps:$4 sm:$0xff]   ;;  %v13274_v22 = vld [vmem:[%s19647_s1 + $0x40] ss:$16 sps:$4 sm:$0xff]  }
   0xc   :  { %3270 = vmatpush1.bf16.msra.mxu1 %v13257_v11  ;;  %3228 = vmatprep.subr.bf16.mxu0 %v13258_v12  ;;  %v13272_v21 = vld [vmem:[%s19647_s1 + $0x244] ss:$16 sps:$4 sm:$0xff]   ;;  %v13275_v23 = vld [vmem:[%s19647_s1 + $0x240] ss:$16 sps:$4 sm:$0xff]  }
   0xd   :  { %3271 = vmatprep.subr.bf16.mxu1 %v13260_v13  ;;  %v13276_v24 = vld [vmem:[%s19647_s1 + $0x24] ss:$16 sps:$4 sm:$0xff]   ;;  %v13280_v26 = vld [vmem:[%s19647_s1 + $0x20] ss:$16 sps:$4 sm:$0xff]  }
   0xe   :  { %v13278_v25 = vld [vmem:[%s19647_s1 + $0x224] ss:$16 sps:$4 sm:$0xff]   ;;  %v13281_v27 = vld [vmem:[%s19647_s1 + $0x220] ss:$16 sps:$4 sm:$0xff]  }
   0xf   :  { %3229 = vmatpush1.bf16.msra.mxu0 %v13262_v14  ;;  %v13282_v28 = vld [vmem:[%s19647_s1 + $0x4] ss:$16 sps:$4 sm:$0xff]   ;;  %v13286_v30 = vld [vmem:[%s19647_s1] ss:$16 sps:$4 sm:$0xff]  }
  0x10   :  { %3272 = vmatpush1.bf16.msra.mxu1 %v13263_v15  ;;  %3230 = vmatprep.subr.bf16.mxu0 %v13264_v16  ;;  %v13284_v29 = vld [vmem:[%s19647_s1 + $0x204] ss:$16 sps:$4 sm:$0xff]   ;;  %v13287_v31 = vld [vmem:[%s19647_s1 + $0x200] ss:$16 sps:$4 sm:$0xff]  }
  0x11   :  { %3273 = vmatprep.subr.bf16.mxu1 %v13266_v17  ;;  %v13288_v32 = vld [vmem:[%s19647_s1 + $0x1e4] ss:$16 sps:$4 sm:$0xff]   ;;  %v13292_v34 = vld [vmem:[%s19647_s1 + $0x1e0] ss:$16 sps:$4 sm:$0xff]  }
  0x12   :  { %v13290_v33 = vld [vmem:[%s19647_s1 + $0x3e4] ss:$16 sps:$4 sm:$0xff]   ;;  %v13293_v35 = vld [vmem:[%s19647_s1 + $0x3e0] ss:$16 sps:$4 sm:$0xff]  }
  0x13   :  { %3231 = vmatpush1.bf16.msra.mxu0 %v13268_v18  ;;  %v13294_v36 = vld [vmem:[%s19647_s1 + $0x1c4] ss:$16 sps:$4 sm:$0xff]   ;;  %v13298_v38 = vld [vmem:[%s19647_s1 + $0x1c0] ss:$16 sps:$4 sm:$0xff]  }
  0x14   :  { %3274 = vmatpush1.bf16.msra.mxu1 %v13269_v19  ;;  %3232 = vmatprep.subr.bf16.mxu0 %v13270_v20  ;;  %v13296_v37 = vld [vmem:[%s19647_s1 + $0x3c4] ss:$16 sps:$4 sm:$0xff]   ;;  %v13299_v39 = vld [vmem:[%s19647_s1 + $0x3c0] ss:$16 sps:$4 sm:$0xff]  }
  0x15   :  { %3275 = vmatprep.subr.bf16.mxu1 %v13272_v21  ;;  %v13300_v40 = vld [vmem:[%s19647_s1 + $0x1a4] ss:$16 sps:$4 sm:$0xff]   ;;  %v13304_v42 = vld [vmem:[%s19647_s1 + $0x1a0] ss:$16 sps:$4 sm:$0xff]  }
  0x16   :  { %v13302_v41 = vld [vmem:[%s19647_s1 + $0x3a4] ss:$16 sps:$4 sm:$0xff]   ;;  %v13305_v43 = vld [vmem:[%s19647_s1 + $0x3a0] ss:$16 sps:$4 sm:$0xff]  }
  0x17   :  { %3233 = vmatpush1.bf16.msra.mxu0 %v13274_v22  ;;  %v13306_v44 = vld [vmem:[%s19647_s1 + $0x184] ss:$16 sps:$4 sm:$0xff]   ;;  %v13310_v46 = vld [vmem:[%s19647_s1 + $0x180] ss:$16 sps:$4 sm:$0xff]  }
  0x18   :  { %3276 = vmatpush1.bf16.msra.mxu1 %v13275_v23  ;;  %3234 = vmatprep.subr.bf16.mxu0 %v13276_v24  ;;  %v13308_v45 = vld [vmem:[%s19647_s1 + $0x384] ss:$16 sps:$4 sm:$0xff]   ;;  %v13311_v47 = vld [vmem:[%s19647_s1 + $0x380] ss:$16 sps:$4 sm:$0xff]  }
  0x19   :  { %3277 = vmatprep.subr.bf16.mxu1 %v13278_v25  ;;  %v32_v48 = vld [vmem:[%s19648_s0] sm:$0xff] }
  0x1a   :  { %v40_v49 = vld [vmem:[%s19648_s0 + $0x40] sm:$0xff] }
  0x1b   :  { %3235 = vmatpush1.bf16.msra.mxu0 %v13280_v26  ;;  %v13312_v52 = vld [vmem:[%s19647_s1 + $0x164] ss:$16 sps:$4 sm:$0xff]   ;;  %v14604_v53 = vcombine.high %v32_v48, %v40_v49  ;;  %v13316_v56 = vld [vmem:[%s19647_s1 + $0x160] ss:$16 sps:$4 sm:$0xff]   ;;  %v14661_v8 = vcombine.low %v32_v48, %v40_v49 }
  0x1c   :  { %3278 = vmatpush1.bf16.msra.mxu1 %v13281_v27  ;;  %3236 = vmatprep.subr.bf16.mxu0 %v13282_v28  ;;  %v13314_v54 = vld [vmem:[%s19647_s1 + $0x364] ss:$16 sps:$4 sm:$0xff]   ;;  %v13317_v57 = vld [vmem:[%s19647_s1 + $0x360] ss:$16 sps:$4 sm:$0xff]  }
  0x1d   :  { %3279 = vmatprep.subr.bf16.mxu1 %v13284_v29  ;;  %3254 = vmatprep.mubr.bf16.mxu0 %v14604_v53  ;;  %v13318_v58 = vld [vmem:[%s19647_s1 + $0x144] ss:$16 sps:$4 sm:$0xff]   ;;  %v13322_v60 = vld [vmem:[%s19647_s1 + $0x140] ss:$16 sps:$4 sm:$0xff]  }
  0x1e   :  { %v13320_v59 = vld [vmem:[%s19647_s1 + $0x344] ss:$16 sps:$4 sm:$0xff]   ;;  %v13323_v61 = vld [vmem:[%s19647_s1 + $0x340] ss:$16 sps:$4 sm:$0xff]  }
  0x1f   :  { %3237 = vmatpush1.bf16.msra.mxu0 %v13286_v30  ;;  %v13324_v62 = vld [vmem:[%s19647_s1 + $0x124] ss:$16 sps:$4 sm:$0xff]   ;;  %v13328_v0 = vld [vmem:[%s19647_s1 + $0x120] ss:$16 sps:$4 sm:$0xff]  }
  0x20   :  { %3280 = vmatpush1.bf16.msra.mxu1 %v13287_v31  ;;  %3238 = vmatprep.subr.bf16.mxu0 %v13288_v32  ;;  %v13326_v63 = vld [vmem:[%s19647_s1 + $0x324] ss:$16 sps:$4 sm:$0xff]   ;;  %v13329_v1 = vld [vmem:[%s19647_s1 + $0x320] ss:$16 sps:$4 sm:$0xff]  }
  0x21   :  { %3281 = vmatprep.subr.bf16.mxu1 %v13290_v33  ;;  %v13330_v2 = vld [vmem:[%s19647_s1 + $0x104] ss:$16 sps:$4 sm:$0xff]   ;;  %v13334_v4 = vld [vmem:[%s19647_s1 + $0x100] ss:$16 sps:$4 sm:$0xff]  }
  0x22   :  { %v13332_v3 = vld [vmem:[%s19647_s1 + $0x304] ss:$16 sps:$4 sm:$0xff]   ;;  %v13335_v5 = vld [vmem:[%s19647_s1 + $0x300] ss:$16 sps:$4 sm:$0xff]  }
  0x23   :  { %3239 = vmatpush2.bf16.msra.mxu0 %v13292_v34  ;;  %v13338_v6 = vld [vmem:[%s19647_s1 + $0x4e4] ss:$16 sps:$4 sm:$0xff]   ;;  %v13336_v10 = vld [vmem:[%s19647_s1 + $0x4e0] ss:$16 sps:$4 sm:$0xff]  }
  0x24   :  { %3282 = vmatpush2.bf16.msra.mxu1 %v13293_v35  ;;  %3240 = vmatprep.subr.bf16.mxu0 %v13294_v36  ;;  %v13341_v7 = vld [vmem:[%s19647_s1 + $0x6e4] ss:$16 sps:$4 sm:$0xff]   ;;  %v13339_v11 = vld [vmem:[%s19647_s1 + $0x6e0] ss:$16 sps:$4 sm:$0xff]  }
  0x25   :  { %3283 = vmatprep.subr.bf16.mxu1 %v13296_v37  ;;  %v13344_v12 = vld [vmem:[%s19647_s1 + $0x4c4] ss:$16 sps:$4 sm:$0xff]   ;;  %v13342_v14 = vld [vmem:[%s19647_s1 + $0x4c0] ss:$16 sps:$4 sm:$0xff]  }
  0x26   :  { %v13347_v13 = vld [vmem:[%s19647_s1 + $0x6c4] ss:$16 sps:$4 sm:$0xff]   ;;  %v13345_v15 = vld [vmem:[%s19647_s1 + $0x6c0] ss:$16 sps:$4 sm:$0xff]  }
  0x27   :  { %3241 = vmatpush2.bf16.msra.mxu0 %v13298_v38  ;;  %v13350_v16 = vld [vmem:[%s19647_s1 + $0x4a4] ss:$16 sps:$4 sm:$0xff]   ;;  %v13348_v18 = vld [vmem:[%s19647_s1 + $0x4a0] ss:$16 sps:$4 sm:$0xff]   ;;  %v14758_v38 = vld [vmem:[%s19648_s0 + $0x18] sm:$0xff] }
  0x28   :  { %3284 = vmatpush2.bf16.msra.mxu1 %v13299_v39  ;;  %3242 = vmatprep.subr.bf16.mxu0 %v13300_v40  ;;  %v13353_v17 = vld [vmem:[%s19647_s1 + $0x6a4] ss:$16 sps:$4 sm:$0xff]   ;;  %v13351_v19 = vld [vmem:[%s19647_s1 + $0x6a0] ss:$16 sps:$4 sm:$0xff]   ;;  %v14763_v39 = vld [vmem:[%s19648_s0 + $0x58] sm:$0xff] }
  0x29   :  { %3285 = vmatprep.subr.bf16.mxu1 %v13302_v41  ;;  %v13356_v20 = vld [vmem:[%s19647_s1 + $0x484] ss:$16 sps:$4 sm:$0xff]   ;;  %v13354_v22 = vld [vmem:[%s19647_s1 + $0x480] ss:$16 sps:$4 sm:$0xff]  }
  0x2a   :  { %v13359_v21 = vld [vmem:[%s19647_s1 + $0x684] ss:$16 sps:$4 sm:$0xff]   ;;  %v13357_v23 = vld [vmem:[%s19647_s1 + $0x680] ss:$16 sps:$4 sm:$0xff]  }
  0x2b   :  { %3243 = vmatpush2.bf16.msra.mxu0 %v13304_v42  ;;  %v13362_v24 = vld [vmem:[%s19647_s1 + $0x464] ss:$16 sps:$4 sm:$0xff]   ;;  %v13360_v26 = vld [vmem:[%s19647_s1 + $0x460] ss:$16 sps:$4 sm:$0xff]  }
  0x2c   :  { %3286 = vmatpush2.bf16.msra.mxu1 %v13305_v43  ;;  %3244 = vmatprep.subr.bf16.mxu0 %v13306_v44  ;;  %v13365_v25 = vld [vmem:[%s19647_s1 + $0x664] ss:$16 sps:$4 sm:$0xff]   ;;  %v13363_v27 = vld [vmem:[%s19647_s1 + $0x660] ss:$16 sps:$4 sm:$0xff]   ;;  %v14777_v43 = vcombine.high %v14758_v38, %v14763_v39 }
  0x2d   :  { %3287 = vmatprep.subr.bf16.mxu1 %v13308_v45  ;;  %v13368_v28 = vld [vmem:[%s19647_s1 + $0x444] ss:$16 sps:$4 sm:$0xff]   ;;  %v13366_v30 = vld [vmem:[%s19647_s1 + $0x440] ss:$16 sps:$4 sm:$0xff]  }
  0x2e   :  { %v13371_v29 = vld [vmem:[%s19647_s1 + $0x644] ss:$16 sps:$4 sm:$0xff]   ;;  %v13369_v31 = vld [vmem:[%s19647_s1 + $0x640] ss:$16 sps:$4 sm:$0xff]  }
  0x2f   :  { %3245 = vmatpush2.bf16.msra.mxu0 %v13310_v46  ;;  %v13374_v32 = vld [vmem:[%s19647_s1 + $0x424] ss:$16 sps:$4 sm:$0xff]   ;;  %v13372_v34 = vld [vmem:[%s19647_s1 + $0x420] ss:$16 sps:$4 sm:$0xff]  }
  0x30   :  { %3288 = vmatpush2.bf16.msra.mxu1 %v13311_v47  ;;  %3246 = vmatprep.subr.bf16.mxu0 %v13312_v52  ;;  %v13377_v33 = vld [vmem:[%s19647_s1 + $0x624] ss:$16 sps:$4 sm:$0xff]   ;;  %v13375_v35 = vld [vmem:[%s19647_s1 + $0x620] ss:$16 sps:$4 sm:$0xff]  }
  0x31   :  { %3289 = vmatprep.subr.bf16.mxu1 %v13314_v54  ;;  %v14748_v36 = vld [vmem:[%s19648_s0 + $0x10] sm:$0xff] }
  0x32   :  { %v14753_v37 = vld [vmem:[%s19648_s0 + $0x50] sm:$0xff] }
  0x33   :  { %3247 = vmatpush2.bf16.msra.mxu0 %v13316_v56  ;;  %v13380_v40 = vld [vmem:[%s19647_s1 + $0x404] ss:$16 sps:$4 sm:$0xff]   ;;  %v14770_v41 = vcombine.high %v14748_v36, %v14753_v37  ;;  %v13378_v44 = vld [vmem:[%s19647_s1 + $0x400] ss:$16 sps:$4 sm:$0xff]  }
  0x34   :  { %3290 = vmatpush2.bf16.msra.mxu1 %v13317_v57  ;;  %3248 = vmatprep.subr.bf16.mxu0 %v13318_v58  ;;  %v13383_v42 = vld [vmem:[%s19647_s1 + $0x604] ss:$16 sps:$4 sm:$0xff]   ;;  %v13381_v45 = vld [vmem:[%s19647_s1 + $0x600] ss:$16 sps:$4 sm:$0xff]  }
  0x35   :  { %3291 = vmatprep.subr.bf16.mxu1 %v13320_v59  ;;  %v13386_v46 = vld [vmem:[%s19647_s1 + $0x5e4] ss:$16 sps:$4 sm:$0xff]   ;;  %v13384_v48 = vld [vmem:[%s19647_s1 + $0x5e0] ss:$16 sps:$4 sm:$0xff]  }
  0x36   :  { %v13389_v47 = vld [vmem:[%s19647_s1 + $0x7e4] ss:$16 sps:$4 sm:$0xff]   ;;  %v13387_v49 = vld [vmem:[%s19647_s1 + $0x7e0] ss:$16 sps:$4 sm:$0xff]  }
  0x37   :  { %3249 = vmatpush2.bf16.msra.mxu0 %v13322_v60  ;;  %v13392_v50 = vld [vmem:[%s19647_s1 + $0x5c4] ss:$16 sps:$4 sm:$0xff]   ;;  %v13390_v52 = vld [vmem:[%s19647_s1 + $0x5c0] ss:$16 sps:$4 sm:$0xff]  }
  0x38   :  { %3292 = vmatpush2.bf16.msra.mxu1 %v13323_v61  ;;  %3250 = vmatprep.subr.bf16.mxu0 %v13324_v62  ;;  %v13395_v51 = vld [vmem:[%s19647_s1 + $0x7c4] ss:$16 sps:$4 sm:$0xff]   ;;  %v13393_v54 = vld [vmem:[%s19647_s1 + $0x7c0] ss:$16 sps:$4 sm:$0xff]  }
  0x39   :  { %3293 = vmatprep.subr.bf16.mxu1 %v13326_v63  ;;  %v13398_v56 = vld [vmem:[%s19647_s1 + $0x5a4] ss:$16 sps:$4 sm:$0xff]   ;;  %v13396_v58 = vld [vmem:[%s19647_s1 + $0x5a0] ss:$16 sps:$4 sm:$0xff]  }
  0x3a   :  { %v13401_v57 = vld [vmem:[%s19647_s1 + $0x7a4] ss:$16 sps:$4 sm:$0xff]   ;;  %v13399_v59 = vld [vmem:[%s19647_s1 + $0x7a0] ss:$16 sps:$4 sm:$0xff]  }
  0x3b   :  { %3251 = vmatpush2.bf16.msra.mxu0 %v13328_v0  ;;  %v13404_v60 = vld [vmem:[%s19647_s1 + $0x584] ss:$16 sps:$4 sm:$0xff]   ;;  %v13402_v62 = vld [vmem:[%s19647_s1 + $0x580] ss:$16 sps:$4 sm:$0xff]  }
  0x3c   :  { %3294 = vmatpush2.bf16.msra.mxu1 %v13329_v1  ;;  %3252 = vmatprep.subr.bf16.mxu0 %v13330_v2  ;;  %v13407_v61 = vld [vmem:[%s19647_s1 + $0x784] ss:$16 sps:$4 sm:$0xff]   ;;  %v13405_v63 = vld [vmem:[%s19647_s1 + $0x780] ss:$16 sps:$4 sm:$0xff]  }
  0x3d   :  { %3295 = vmatprep.subr.bf16.mxu1 %v13332_v3  ;;  %v13410_v0 = vld [vmem:[%s19647_s1 + $0x564] ss:$16 sps:$4 sm:$0xff]   ;;  %v13408_v2 = vld [vmem:[%s19647_s1 + $0x560] ss:$16 sps:$4 sm:$0xff]  }
  0x3e   :  { %v13413_v1 = vld [vmem:[%s19647_s1 + $0x764] ss:$16 sps:$4 sm:$0xff]   ;;  %v13411_v3 = vld [vmem:[%s19647_s1 + $0x760] ss:$16 sps:$4 sm:$0xff]  }
  0x3f   :  { %3253 = vmatpush2.bf16.msra.mxu0 %v13334_v4  ;;  %v13416_v4 = vld [vmem:[%s19647_s1 + $0x544] ss:$16 sps:$4 sm:$0xff]  }
  0x40   :  { %3296 = vmatpush2.bf16.msra.mxu1 %v13335_v5  ;;  %3308 = vmatprep.subr.bf16.mxu0 %v13338_v6  ;;  %v13419_v5 = vld [vmem:[%s19647_s1 + $0x744] ss:$16 sps:$4 sm:$0xff]   ;;  %v13414_v6 = vld [vmem:[%s19647_s1 + $0x540] ss:$16 sps:$4 sm:$0xff]  }
  0x41   :  { %3351 = vmatprep.subr.bf16.mxu1 %v13341_v7  ;;  %v13417_v7 = vld [vmem:[%s19647_s1 + $0x740] ss:$16 sps:$4 sm:$0xff]  }
  0x42   :  { %3255 = vmatmul.mubr.bf16.vlgmr.msra.gmra.mxu0 %v14661_v8 }
  0x43   :  { %3298 = vmatmul.mubr.bf16.vlgmr.msra.gmra.mxu1 %v14663_v9  ;;  %3309 = vmatpush1.bf16.msra.mxu0 %v13336_v10  ;;  %v13422_v10 = vld [vmem:[%s19647_s1 + $0x524] ss:$16 sps:$4 sm:$0xff]  }
  0x44   :  { %3352 = vmatpush1.bf16.msra.mxu1 %v13339_v11  ;;  %3310 = vmatprep.subr.bf16.mxu0 %v13344_v12  ;;  %v13425_v11 = vld [vmem:[%s19647_s1 + $0x724] ss:$16 sps:$4 sm:$0xff]   ;;  %v13420_v12 = vld [vmem:[%s19647_s1 + $0x520] ss:$16 sps:$4 sm:$0xff]  }
  0x45   :  { %3353 = vmatprep.subr.bf16.mxu1 %v13347_v13  ;;  %3340 = vmatprep.mubr.bf16.mxu0 %v14770_v41  ;;  %v13423_v13 = vld [vmem:[%s19647_s1 + $0x720] ss:$16 sps:$4 sm:$0xff]  }
  0x46   :  { %3383 = vmatprep.mubr.bf16.mxu1 %v14777_v43 }
  0x47   :  { %3311 = vmatpush1.bf16.msra.mxu0 %v13342_v14  ;;  %v13428_v14 = vld [vmem:[%s19647_s1 + $0x504] ss:$16 sps:$4 sm:$0xff]  }
  0x48   :  { %3354 = vmatpush1.bf16.msra.mxu1 %v13345_v15  ;;  %3312 = vmatprep.subr.bf16.mxu0 %v13350_v16  ;;  %v13431_v15 = vld [vmem:[%s19647_s1 + $0x704] ss:$16 sps:$4 sm:$0xff]   ;;  %v13426_v16 = vld [vmem:[%s19647_s1 + $0x500] ss:$16 sps:$4 sm:$0xff]  }
  0x49   :  { %3355 = vmatprep.subr.bf16.mxu1 %v13353_v17  ;;  %v13429_v17 = vld [vmem:[%s19647_s1 + $0x700] ss:$16 sps:$4 sm:$0xff]  }
  0x4b   :  { %3313 = vmatpush1.bf16.msra.mxu0 %v13348_v18  ;;  %v13434_v18 = vld [vmem:[%s19647_s1 + $0x8e4] ss:$16 sps:$4 sm:$0xff]  }
  0x4c   :  { %3356 = vmatpush1.bf16.msra.mxu1 %v13351_v19  ;;  %3314 = vmatprep.subr.bf16.mxu0 %v13356_v20  ;;  %v13437_v19 = vld [vmem:[%s19647_s1 + $0xae4] ss:$16 sps:$4 sm:$0xff]   ;;  %v14891_v20 = vcombine.low %v14748_v36, %v14753_v37  ;;  %v13444_v36 = vld [vmem:[%s19647_s1 + $0x8a0] ss:$16 sps:$4 sm:$0xff]  }
  0x4d   :  { %3357 = vmatprep.subr.bf16.mxu1 %v13359_v21  ;;  %v14895_v21 = vcombine.low %v14758_v38, %v14763_v39  ;;  %v13447_v37 = vld [vmem:[%s19647_s1 + $0xaa0] ss:$16 sps:$4 sm:$0xff]   ;;  %v13452_v38 = vld [vmem:[%s19647_s1 + $0x884] ss:$16 sps:$4 sm:$0xff]  }
  0x4e   :  { %v13455_v39 = vld [vmem:[%s19647_s1 + $0xa84] ss:$16 sps:$4 sm:$0xff]  }
  0x4f   :  { %3315 = vmatpush1.bf16.msra.mxu0 %v13354_v22  ;;  %v13432_v22 = vld [vmem:[%s19647_s1 + $0x8e0] ss:$16 sps:$4 sm:$0xff]  }
  0x50   :  { %3358 = vmatpush1.bf16.msra.mxu1 %v13357_v23  ;;  %3316 = vmatprep.subr.bf16.mxu0 %v13362_v24  ;;  %v13435_v23 = vld [vmem:[%s19647_s1 + $0xae0] ss:$16 sps:$4 sm:$0xff]   ;;  %v13440_v24 = vld [vmem:[%s19647_s1 + $0x8c4] ss:$16 sps:$4 sm:$0xff]  }
  0x51   :  { %3359 = vmatprep.subr.bf16.mxu1 %v13365_v25  ;;  %v13443_v25 = vld [vmem:[%s19647_s1 + $0xac4] ss:$16 sps:$4 sm:$0xff]  }
  0x53   :  { %3317 = vmatpush1.bf16.msra.mxu0 %v13360_v26  ;;  %v13438_v26 = vld [vmem:[%s19647_s1 + $0x8c0] ss:$16 sps:$4 sm:$0xff]  }
  0x54   :  { %3360 = vmatpush1.bf16.msra.mxu1 %v13363_v27  ;;  %3318 = vmatprep.subr.bf16.mxu0 %v13368_v28  ;;  %v13441_v27 = vld [vmem:[%s19647_s1 + $0xac0] ss:$16 sps:$4 sm:$0xff]  }
  0x55   :  { %3361 = vmatprep.subr.bf16.mxu1 %v13371_v29  ;;  %v14918_v28 = vld [vmem:[%s19648_s0 + $0x20] sm:$0xff] }
  0x56   :  { %v14925_v29 = vld [vmem:[%s19648_s0 + $0x60] sm:$0xff] }
  0x57   :  { %3319 = vmatpush1.bf16.msra.mxu0 %v13366_v30  ;;  %v14930_v30 = vld [vmem:[%s19648_s0 + $0x28] sm:$0xff] }
  0x58   :  { %3362 = vmatpush1.bf16.msra.mxu1 %v13369_v31  ;;  %3320 = vmatprep.subr.bf16.mxu0 %v13374_v32  ;;  %v14935_v31 = vld [vmem:[%s19648_s0 + $0x68] sm:$0xff]  ;;  %v13446_v32 = vld [vmem:[%s19647_s1 + $0x8a4] ss:$16 sps:$4 sm:$0xff]  }
  0x59   :  { %3363 = vmatprep.subr.bf16.mxu1 %v13377_v33  ;;  %v14942_v33 = vcombine.high %v14918_v28, %v14925_v29 }
  0x5b   :  { %3321 = vmatpush1.bf16.msra.mxu0 %v13372_v34  ;;  %v13449_v34 = vld [vmem:[%s19647_s1 + $0xaa4] ss:$16 sps:$4 sm:$0xff]  }
  0x5c   :  { %3364 = vmatpush1.bf16.msra.mxu1 %v13375_v35  ;;  %3322 = vmatprep.subr.bf16.mxu0 %v13380_v40  ;;  %v14949_v35 = vcombine.high %v14930_v30, %v14935_v31  ;;  %v13450_v40 = vld [vmem:[%s19647_s1 + $0x880] ss:$16 sps:$4 sm:$0xff]  }
  0x5d   :  { %3365 = vmatprep.subr.bf16.mxu1 %v13383_v42  ;;  %v13453_v42 = vld [vmem:[%s19647_s1 + $0xa80] ss:$16 sps:$4 sm:$0xff]  }
  0x5f   :  { %3323 = vmatpush1.bf16.msra.mxu0 %v13378_v44  ;;  %v13458_v44 = vld [vmem:[%s19647_s1 + $0x864] ss:$16 sps:$4 sm:$0xff]  }
  0x60   :  { %3366 = vmatpush1.bf16.msra.mxu1 %v13381_v45  ;;  %3324 = vmatprep.subr.bf16.mxu0 %v13386_v46  ;;  %v13461_v45 = vld [vmem:[%s19647_s1 + $0xa64] ss:$16 sps:$4 sm:$0xff]   ;;  %v13456_v46 = vld [vmem:[%s19647_s1 + $0x860] ss:$16 sps:$4 sm:$0xff]  }
  0x61   :  { %3367 = vmatprep.subr.bf16.mxu1 %v13389_v47  ;;  %v13459_v47 = vld [vmem:[%s19647_s1 + $0xa60] ss:$16 sps:$4 sm:$0xff]  }
  0x63   :  { %3325 = vmatpush2.bf16.msra.mxu0 %v13384_v48  ;;  %v13464_v48 = vld [vmem:[%s19647_s1 + $0x844] ss:$16 sps:$4 sm:$0xff]  }
  0x64   :  { %3368 = vmatpush2.bf16.msra.mxu1 %v13387_v49  ;;  %3326 = vmatprep.subr.bf16.mxu0 %v13392_v50  ;;  %v13467_v49 = vld [vmem:[%s19647_s1 + $0xa44] ss:$16 sps:$4 sm:$0xff]   ;;  %v13462_v50 = vld [vmem:[%s19647_s1 + $0x840] ss:$16 sps:$4 sm:$0xff]  }
  0x65   :  { %3369 = vmatprep.subr.bf16.mxu1 %v13395_v51  ;;  %v13465_v51 = vld [vmem:[%s19647_s1 + $0xa40] ss:$16 sps:$4 sm:$0xff]  }
  0x67   :  { %3327 = vmatpush2.bf16.msra.mxu0 %v13390_v52  ;;  %v13470_v52 = vld [vmem:[%s19647_s1 + $0x824] ss:$16 sps:$4 sm:$0xff]  }
  0x68   :  { %3370 = vmatpush2.bf16.msra.mxu1 %v13393_v54  ;;  %3328 = vmatprep.subr.bf16.mxu0 %v13398_v56  ;;  %v13473_v54 = vld [vmem:[%s19647_s1 + $0xa24] ss:$16 sps:$4 sm:$0xff]   ;;  %v13468_v56 = vld [vmem:[%s19647_s1 + $0x820] ss:$16 sps:$4 sm:$0xff]  }
  0x69   :  { %3371 = vmatprep.subr.bf16.mxu1 %v13401_v57  ;;  %v13471_v57 = vld [vmem:[%s19647_s1 + $0xa20] ss:$16 sps:$4 sm:$0xff]  }
  0x6b   :  { %3329 = vmatpush2.bf16.msra.mxu0 %v13396_v58  ;;  %v13476_v58 = vld [vmem:[%s19647_s1 + $0x804] ss:$16 sps:$4 sm:$0xff]  }
  0x6c   :  { %3372 = vmatpush2.bf16.msra.mxu1 %v13399_v59  ;;  %3330 = vmatprep.subr.bf16.mxu0 %v13404_v60  ;;  %v13479_v59 = vld [vmem:[%s19647_s1 + $0xa04] ss:$16 sps:$4 sm:$0xff]   ;;  %v13474_v60 = vld [vmem:[%s19647_s1 + $0x800] ss:$16 sps:$4 sm:$0xff]  }
  0x6d   :  { %3373 = vmatprep.subr.bf16.mxu1 %v13407_v61  ;;  %v13477_v61 = vld [vmem:[%s19647_s1 + $0xa00] ss:$16 sps:$4 sm:$0xff]  }
  0x6f   :  { %3331 = vmatpush2.bf16.msra.mxu0 %v13402_v62  ;;  %v13482_v62 = vld [vmem:[%s19647_s1 + $0x9e4] ss:$16 sps:$4 sm:$0xff]  }
  0x70   :  { %3374 = vmatpush2.bf16.msra.mxu1 %v13405_v63  ;;  %3332 = vmatprep.subr.bf16.mxu0 %v13410_v0  ;;  %v13485_v63 = vld [vmem:[%s19647_s1 + $0xbe4] ss:$16 sps:$4 sm:$0xff]   ;;  %v13480_v0 = vld [vmem:[%s19647_s1 + $0x9e0] ss:$16 sps:$4 sm:$0xff]  }
  0x71   :  { %3375 = vmatprep.subr.bf16.mxu1 %v13413_v1  ;;  %v13483_v1 = vld [vmem:[%s19647_s1 + $0xbe0] ss:$16 sps:$4 sm:$0xff]  }
  0x73   :  { %3333 = vmatpush2.bf16.msra.mxu0 %v13408_v2  ;;  %v13488_v2 = vld [vmem:[%s19647_s1 + $0x9c4] ss:$16 sps:$4 sm:$0xff]  }
  0x74   :  { %3376 = vmatpush2.bf16.msra.mxu1 %v13411_v3  ;;  %3334 = vmatprep.subr.bf16.mxu0 %v13416_v4  ;;  %v13491_v3 = vld [vmem:[%s19647_s1 + $0xbc4] ss:$16 sps:$4 sm:$0xff]   ;;  %v13486_v4 = vld [vmem:[%s19647_s1 + $0x9c0] ss:$16 sps:$4 sm:$0xff]  }
  0x75   :  { %3377 = vmatprep.subr.bf16.mxu1 %v13419_v5  ;;  %v13489_v5 = vld [vmem:[%s19647_s1 + $0xbc0] ss:$16 sps:$4 sm:$0xff]  }
  0x77   :  { %3335 = vmatpush2.bf16.msra.mxu0 %v13414_v6  ;;  %v13494_v6 = vld [vmem:[%s19647_s1 + $0x9a4] ss:$16 sps:$4 sm:$0xff]  }
  0x78   :  { %3378 = vmatpush2.bf16.msra.mxu1 %v13417_v7  ;;  %3336 = vmatprep.subr.bf16.mxu0 %v13422_v10  ;;  %v13497_v7 = vld [vmem:[%s19647_s1 + $0xba4] ss:$16 sps:$4 sm:$0xff]   ;;  %v13492_v10 = vld [vmem:[%s19647_s1 + $0x9a0] ss:$16 sps:$4 sm:$0xff]  }
  0x79   :  { %3379 = vmatprep.subr.bf16.mxu1 %v13425_v11  ;;  %v13495_v11 = vld [vmem:[%s19647_s1 + $0xba0] ss:$16 sps:$4 sm:$0xff]  }
  0x7b   :  { %3337 = vmatpush2.bf16.msra.mxu0 %v13420_v12  ;;  %v13500_v12 = vld [vmem:[%s19647_s1 + $0x984] ss:$16 sps:$4 sm:$0xff]  }
  0x7c   :  { %3380 = vmatpush2.bf16.msra.mxu1 %v13423_v13  ;;  %3338 = vmatprep.subr.bf16.mxu0 %v13428_v14  ;;  %v13503_v13 = vld [vmem:[%s19647_s1 + $0xb84] ss:$16 sps:$4 sm:$0xff]   ;;  %v13498_v14 = vld [vmem:[%s19647_s1 + $0x980] ss:$16 sps:$4 sm:$0xff]  }
  0x7d   :  { %3381 = vmatprep.subr.bf16.mxu1 %v13431_v15  ;;  %v13501_v15 = vld [vmem:[%s19647_s1 + $0xb80] ss:$16 sps:$4 sm:$0xff]  }
  0x7f   :  { %3339 = vmatpush2.bf16.msra.mxu0 %v13426_v16  ;;  %v13506_v16 = vld [vmem:[%s19647_s1 + $0x964] ss:$16 sps:$4 sm:$0xff]  }
  0x80   :  { %3382 = vmatpush2.bf16.msra.mxu1 %v13429_v17  ;;  %3394 = vmatprep.subr.bf16.mxu0 %v13434_v18  ;;  %v13509_v17 = vld [vmem:[%s19647_s1 + $0xb64] ss:$16 sps:$4 sm:$0xff]   ;;  %v13504_v18 = vld [vmem:[%s19647_s1 + $0x960] ss:$16 sps:$4 sm:$0xff]  }
  0x81   :  { %3437 = vmatprep.subr.bf16.mxu1 %v13437_v19  ;;  %v13507_v19 = vld [vmem:[%s19647_s1 + $0xb60] ss:$16 sps:$4 sm:$0xff]  }
  0x82   :  { %3341 = vmatmul.mubr.bf16.vlgmr.msra.gmra.mxu0 %v14891_v20 }
  0x83   :  { %3384 = vmatmul.mubr.bf16.vlgmr.msra.gmra.mxu1 %v14895_v21  ;;  %3395 = vmatpush1.bf16.msra.mxu0 %v13432_v22  ;;  %v13512_v22 = vld [vmem:[%s19647_s1 + $0x944] ss:$16 sps:$4 sm:$0xff]  }
  0x84   :  { %3438 = vmatpush1.bf16.msra.mxu1 %v13435_v23  ;;  %3396 = vmatprep.subr.bf16.mxu0 %v13440_v24  ;;  %v13515_v23 = vld [vmem:[%s19647_s1 + $0xb44] ss:$16 sps:$4 sm:$0xff]   ;;  %v13510_v24 = vld [vmem:[%s19647_s1 + $0x940] ss:$16 sps:$4 sm:$0xff]  }
  0x85   :  { %3439 = vmatprep.subr.bf16.mxu1 %v13443_v25  ;;  %3426 = vmatprep.mubr.bf16.mxu0 %v14942_v33  ;;  %v13513_v25 = vld [vmem:[%s19647_s1 + $0xb40] ss:$16 sps:$4 sm:$0xff]  }
  0x86   :  { %3469 = vmatprep.mubr.bf16.mxu1 %v14949_v35 }
  0x87   :  { %3397 = vmatpush1.bf16.msra.mxu0 %v13438_v26  ;;  %v13518_v26 = vld [vmem:[%s19647_s1 + $0x924] ss:$16 sps:$4 sm:$0xff]  }
  0x88   :  { %3440 = vmatpush1.bf16.msra.mxu1 %v13441_v27  ;;  %3398 = vmatprep.subr.bf16.mxu0 %v13446_v32  ;;  %v13521_v27 = vld [vmem:[%s19647_s1 + $0xb24] ss:$16 sps:$4 sm:$0xff]   ;;  %v13516_v32 = vld [vmem:[%s19647_s1 + $0x920] ss:$16 sps:$4 sm:$0xff]  }
  0x89   :  { %3441 = vmatprep.subr.bf16.mxu1 %v13449_v34  ;;  %v13519_v34 = vld [vmem:[%s19647_s1 + $0xb20] ss:$16 sps:$4 sm:$0xff]  }
  0x8b   :  { %3399 = vmatpush1.bf16.msra.mxu0 %v13444_v36  ;;  %v13524_v36 = vld [vmem:[%s19647_s1 + $0x904] ss:$16 sps:$4 sm:$0xff]  }
  0x8c   :  { %3442 = vmatpush1.bf16.msra.mxu1 %v13447_v37  ;;  %3400 = vmatprep.subr.bf16.mxu0 %v13452_v38  ;;  %v13527_v37 = vld [vmem:[%s19647_s1 + $0xb04] ss:$16 sps:$4 sm:$0xff]   ;;  %v13522_v38 = vld [vmem:[%s19647_s1 + $0x900] ss:$16 sps:$4 sm:$0xff]  }
  0x8d   :  { %3443 = vmatprep.subr.bf16.mxu1 %v13455_v39  ;;  %v13525_v39 = vld [vmem:[%s19647_s1 + $0xb00] ss:$16 sps:$4 sm:$0xff]  }
  0x8f   :  { %3401 = vmatpush1.bf16.msra.mxu0 %v13450_v40  ;;  %v13530_v40 = vld [vmem:[%s19647_s1 + $0xce4] ss:$16 sps:$4 sm:$0xff]  }
  0x90   :  { %3444 = vmatpush1.bf16.msra.mxu1 %v13453_v42  ;;  %3402 = vmatprep.subr.bf16.mxu0 %v13458_v44  ;;  %v13533_v42 = vld [vmem:[%s19647_s1 + $0xee4] ss:$16 sps:$4 sm:$0xff]  }
  0x91   :  { %3445 = vmatprep.subr.bf16.mxu1 %v13461_v45  ;;  %v15124_v44 = vld [vmem:[%s19648_s0 + $0x30] sm:$0xff] }
  0x92   :  { %v13528_v45 = vld [vmem:[%s19647_s1 + $0xce0] ss:$16 sps:$4 sm:$0xff]  }
  0x93   :  { %3403 = vmatpush1.bf16.msra.mxu0 %v13456_v46  ;;  %v15132_v46 = vld [vmem:[%s19648_s0 + $0x70] sm:$0xff] }
  0x94   :  { %3446 = vmatpush1.bf16.msra.mxu1 %v13459_v47  ;;  %3404 = vmatprep.subr.bf16.mxu0 %v13464_v48  ;;  %v15137_v47 = vld [vmem:[%s19648_s0 + $0x38] sm:$0xff]  ;;  %v15141_v48 = vcombine.low %v14918_v28, %v14925_v29  ;;  %v13536_v28 = vld [vmem:[%s19647_s1 + $0xcc4] ss:$16 sps:$4 sm:$0xff]  }
  0x95   :  { %3447 = vmatprep.subr.bf16.mxu1 %v13467_v49  ;;  %v15145_v49 = vcombine.low %v14930_v30, %v14935_v31  ;;  %v13539_v29 = vld [vmem:[%s19647_s1 + $0xec4] ss:$16 sps:$4 sm:$0xff]   ;;  %v15163_v30 = vcombine.high %v15124_v44, %v15132_v46 }
  0x97   :  { %3405 = vmatpush1.bf16.msra.mxu0 %v13462_v50  ;;  %v15150_v50 = vld [vmem:[%s19648_s0 + $0x78] sm:$0xff] }
  0x98   :  { %3448 = vmatpush1.bf16.msra.mxu1 %v13465_v51  ;;  %3406 = vmatprep.subr.bf16.mxu0 %v13470_v52  ;;  %v13531_v51 = vld [vmem:[%s19647_s1 + $0xee0] ss:$16 sps:$4 sm:$0xff]   ;;  %v15167_v31 = vcombine.high %v15137_v47, %v15150_v50 }
  0x99   :  { %3449 = vmatprep.subr.bf16.mxu1 %v13473_v54  ;;  %v13534_v52 = vld [vmem:[%s19647_s1 + $0xcc0] ss:$16 sps:$4 sm:$0xff]  }
  0x9a   :  { %v13537_v54 = vld [vmem:[%s19647_s1 + $0xec0] ss:$16 sps:$4 sm:$0xff]  }
  0x9b   :  { %3407 = vmatpush1.bf16.msra.mxu0 %v13468_v56  ;;  %v13542_v56 = vld [vmem:[%s19647_s1 + $0xca4] ss:$16 sps:$4 sm:$0xff]  }
  0x9c   :  { %3450 = vmatpush1.bf16.msra.mxu1 %v13471_v57  ;;  %3408 = vmatprep.subr.bf16.mxu0 %v13476_v58  ;;  %v13545_v57 = vld [vmem:[%s19647_s1 + $0xea4] ss:$16 sps:$4 sm:$0xff]   ;;  %v13540_v58 = vld [vmem:[%s19647_s1 + $0xca0] ss:$16 sps:$4 sm:$0xff]  }
  0x9d   :  { %3451 = vmatprep.subr.bf16.mxu1 %v13479_v59  ;;  %v13543_v59 = vld [vmem:[%s19647_s1 + $0xea0] ss:$16 sps:$4 sm:$0xff]  }
  0x9f   :  { %3409 = vmatpush1.bf16.msra.mxu0 %v13474_v60  ;;  %v13548_v60 = vld [vmem:[%s19647_s1 + $0xc84] ss:$16 sps:$4 sm:$0xff]  }
  0xa0   :  { %3452 = vmatpush1.bf16.msra.mxu1 %v13477_v61  ;;  %3410 = vmatprep.subr.bf16.mxu0 %v13482_v62  ;;  %v13551_v61 = vld [vmem:[%s19647_s1 + $0xe84] ss:$16 sps:$4 sm:$0xff]   ;;  %v13546_v62 = vld [vmem:[%s19647_s1 + $0xc80] ss:$16 sps:$4 sm:$0xff]  }
  0xa1   :  { %3453 = vmatprep.subr.bf16.mxu1 %v13485_v63  ;;  %v13549_v63 = vld [vmem:[%s19647_s1 + $0xe80] ss:$16 sps:$4 sm:$0xff]  }
  0xa3   :  { %3411 = vmatpush2.bf16.msra.mxu0 %v13480_v0  ;;  %v13554_v0 = vld [vmem:[%s19647_s1 + $0xc64] ss:$16 sps:$4 sm:$0xff]  }
  0xa4   :  { %3454 = vmatpush2.bf16.msra.mxu1 %v13483_v1  ;;  %3412 = vmatprep.subr.bf16.mxu0 %v13488_v2  ;;  %v13557_v1 = vld [vmem:[%s19647_s1 + $0xe64] ss:$16 sps:$4 sm:$0xff]   ;;  %v13552_v2 = vld [vmem:[%s19647_s1 + $0xc60] ss:$16 sps:$4 sm:$0xff]  }
  0xa5   :  { %3455 = vmatprep.subr.bf16.mxu1 %v13491_v3  ;;  %v13555_v3 = vld [vmem:[%s19647_s1 + $0xe60] ss:$16 sps:$4 sm:$0xff]  }
  0xa7   :  { %3413 = vmatpush2.bf16.msra.mxu0 %v13486_v4  ;;  %v13560_v4 = vld [vmem:[%s19647_s1 + $0xc44] ss:$16 sps:$4 sm:$0xff]  }
  0xa8   :  { %3456 = vmatpush2.bf16.msra.mxu1 %v13489_v5  ;;  %3414 = vmatprep.subr.bf16.mxu0 %v13494_v6  ;;  %v13563_v5 = vld [vmem:[%s19647_s1 + $0xe44] ss:$16 sps:$4 sm:$0xff]   ;;  %v13558_v6 = vld [vmem:[%s19647_s1 + $0xc40] ss:$16 sps:$4 sm:$0xff]  }
  0xa9   :  { %3457 = vmatprep.subr.bf16.mxu1 %v13497_v7  ;;  %v13561_v7 = vld [vmem:[%s19647_s1 + $0xe40] ss:$16 sps:$4 sm:$0xff]  }
  0xab   :  { %3415 = vmatpush2.bf16.msra.mxu0 %v13492_v10  ;;  %v13566_v10 = vld [vmem:[%s19647_s1 + $0xc24] ss:$16 sps:$4 sm:$0xff]  }
  0xac   :  { %3458 = vmatpush2.bf16.msra.mxu1 %v13495_v11  ;;  %3416 = vmatprep.subr.bf16.mxu0 %v13500_v12  ;;  %v13569_v11 = vld [vmem:[%s19647_s1 + $0xe24] ss:$16 sps:$4 sm:$0xff]   ;;  %v13564_v12 = vld [vmem:[%s19647_s1 + $0xc20] ss:$16 sps:$4 sm:$0xff]  }
  0xad   :  { %3459 = vmatprep.subr.bf16.mxu1 %v13503_v13  ;;  %v13567_v13 = vld [vmem:[%s19647_s1 + $0xe20] ss:$16 sps:$4 sm:$0xff]  }
  0xaf   :  { %3417 = vmatpush2.bf16.msra.mxu0 %v13498_v14  ;;  %v13572_v14 = vld [vmem:[%s19647_s1 + $0xc04] ss:$16 sps:$4 sm:$0xff]  }
  0xb0   :  { %3460 = vmatpush2.bf16.msra.mxu1 %v13501_v15  ;;  %3418 = vmatprep.subr.bf16.mxu0 %v13506_v16  ;;  %v13575_v15 = vld [vmem:[%s19647_s1 + $0xe04] ss:$16 sps:$4 sm:$0xff]   ;;  %v13570_v16 = vld [vmem:[%s19647_s1 + $0xc00] ss:$16 sps:$4 sm:$0xff]  }
  0xb1   :  { %3461 = vmatprep.subr.bf16.mxu1 %v13509_v17  ;;  %v13573_v17 = vld [vmem:[%s19647_s1 + $0xe00] ss:$16 sps:$4 sm:$0xff]  }
  0xb3   :  { %3419 = vmatpush2.bf16.msra.mxu0 %v13504_v18  ;;  %v13578_v18 = vld [vmem:[%s19647_s1 + $0xde4] ss:$16 sps:$4 sm:$0xff]  }
  0xb4   :  { %3462 = vmatpush2.bf16.msra.mxu1 %v13507_v19  ;;  %3420 = vmatprep.subr.bf16.mxu0 %v13512_v22  ;;  %v13581_v19 = vld [vmem:[%s19647_s1 + $0xfe4] ss:$16 sps:$4 sm:$0xff]   ;;  %v13576_v22 = vld [vmem:[%s19647_s1 + $0xde0] ss:$16 sps:$4 sm:$0xff]  }
  0xb5   :  { %3463 = vmatprep.subr.bf16.mxu1 %v13515_v23  ;;  %v13579_v23 = vld [vmem:[%s19647_s1 + $0xfe0] ss:$16 sps:$4 sm:$0xff]  }
  0xb7   :  { %3421 = vmatpush2.bf16.msra.mxu0 %v13510_v24  ;;  %v13584_v24 = vld [vmem:[%s19647_s1 + $0xdc4] ss:$16 sps:$4 sm:$0xff]  }
  0xb8   :  { %3464 = vmatpush2.bf16.msra.mxu1 %v13513_v25  ;;  %3422 = vmatprep.subr.bf16.mxu0 %v13518_v26  ;;  %v13587_v25 = vld [vmem:[%s19647_s1 + $0xfc4] ss:$16 sps:$4 sm:$0xff]   ;;  %v13582_v26 = vld [vmem:[%s19647_s1 + $0xdc0] ss:$16 sps:$4 sm:$0xff]  }
  0xb9   :  { %3465 = vmatprep.subr.bf16.mxu1 %v13521_v27  ;;  %v13585_v27 = vld [vmem:[%s19647_s1 + $0xfc0] ss:$16 sps:$4 sm:$0xff]  }
  0xbb   :  { %3423 = vmatpush2.bf16.msra.mxu0 %v13516_v32  ;;  %v13590_v32 = vld [vmem:[%s19647_s1 + $0xda4] ss:$16 sps:$4 sm:$0xff]  }
  0xbc   :  { %3466 = vmatpush2.bf16.msra.mxu1 %v13519_v34  ;;  %3424 = vmatprep.subr.bf16.mxu0 %v13524_v36  ;;  %v13593_v34 = vld [vmem:[%s19647_s1 + $0xfa4] ss:$16 sps:$4 sm:$0xff]   ;;  %v13588_v36 = vld [vmem:[%s19647_s1 + $0xda0] ss:$16 sps:$4 sm:$0xff]  }
  0xbd   :  { %3467 = vmatprep.subr.bf16.mxu1 %v13527_v37  ;;  %v13591_v37 = vld [vmem:[%s19647_s1 + $0xfa0] ss:$16 sps:$4 sm:$0xff]  }
  0xbf   :  { %3425 = vmatpush2.bf16.msra.mxu0 %v13522_v38  ;;  %v13596_v38 = vld [vmem:[%s19647_s1 + $0xd84] ss:$16 sps:$4 sm:$0xff]  }
  0xc0   :  { %3468 = vmatpush2.bf16.msra.mxu1 %v13525_v39  ;;  %3480 = vmatprep.subr.bf16.mxu0 %v13530_v40  ;;  %v13599_v39 = vld [vmem:[%s19647_s1 + $0xf84] ss:$16 sps:$4 sm:$0xff]   ;;  %v13594_v40 = vld [vmem:[%s19647_s1 + $0xd80] ss:$16 sps:$4 sm:$0xff]  }
  0xc1   :  { %3523 = vmatprep.subr.bf16.mxu1 %v13533_v42  ;;  %v13597_v42 = vld [vmem:[%s19647_s1 + $0xf80] ss:$16 sps:$4 sm:$0xff]  }
  0xc2   :  { %3427 = vmatmul.mubr.bf16.vlgmr.msra.gmra.mxu0 %v15141_v48 }
  0xc3   :  { %3470 = vmatmul.mubr.bf16.vlgmr.msra.gmra.mxu1 %v15145_v49  ;;  %3481 = vmatpush1.bf16.msra.mxu0 %v13528_v45  ;;  %v13602_v45 = vld [vmem:[%s19647_s1 + $0xd64] ss:$16 sps:$4 sm:$0xff]  }
  0xc4   :  { %3524 = vmatpush1.bf16.msra.mxu1 %v13531_v51  ;;  %3482 = vmatprep.subr.bf16.mxu0 %v13536_v28  ;;  %v13605_v51 = vld [vmem:[%s19647_s1 + $0xf64] ss:$16 sps:$4 sm:$0xff]   ;;  %v13600_v28 = vld [vmem:[%s19647_s1 + $0xd60] ss:$16 sps:$4 sm:$0xff]  }
  0xc5   :  { %3525 = vmatprep.subr.bf16.mxu1 %v13539_v29  ;;  %3512 = vmatprep.mubr.bf16.mxu0 %v15163_v30  ;;  %v13603_v29 = vld [vmem:[%s19647_s1 + $0xf60] ss:$16 sps:$4 sm:$0xff]  }
  0xc6   :  { %3555 = vmatprep.mubr.bf16.mxu1 %v15167_v31 }
  0xc7   :  { %3483 = vmatpush1.bf16.msra.mxu0 %v13534_v52  ;;  %v13608_v52 = vld [vmem:[%s19647_s1 + $0xd44] ss:$16 sps:$4 sm:$0xff]  }
  0xc8   :  { %3526 = vmatpush1.bf16.msra.mxu1 %v13537_v54  ;;  %3484 = vmatprep.subr.bf16.mxu0 %v13542_v56  ;;  %v13611_v54 = vld [vmem:[%s19647_s1 + $0xf44] ss:$16 sps:$4 sm:$0xff]   ;;  %v13606_v56 = vld [vmem:[%s19647_s1 + $0xd40] ss:$16 sps:$4 sm:$0xff]  }
  0xc9   :  { %3527 = vmatprep.subr.bf16.mxu1 %v13545_v57  ;;  %v13609_v57 = vld [vmem:[%s19647_s1 + $0xf40] ss:$16 sps:$4 sm:$0xff]  }
  0xcb   :  { %3485 = vmatpush1.bf16.msra.mxu0 %v13540_v58  ;;  %v562_v58 = vlaneseq }
  0xcc   :  { %3528 = vmatpush1.bf16.msra.mxu1 %v13543_v59  ;;  %3486 = vmatprep.subr.bf16.mxu0 %v13548_v60  ;;  %v13614_v59 = vld [vmem:[%s19647_s1 + $0xd24] ss:$16 sps:$4 sm:$0xff]  }
  0xcd   :  { %3529 = vmatprep.subr.bf16.mxu1 %v13551_v61  ;;  %v13617_v60 = vld [vmem:[%s19647_s1 + $0xf24] ss:$16 sps:$4 sm:$0xff]   ;;  %v13612_v61 = vld [vmem:[%s19647_s1 + $0xd20] ss:$16 sps:$4 sm:$0xff]  }
  0xcf   :  { %3487 = vmatpush1.bf16.msra.mxu0 %v13546_v62  ;;  %v13615_v62 = vld [vmem:[%s19647_s1 + $0xf20] ss:$16 sps:$4 sm:$0xff]  }
  0xd0   :  { %3530 = vmatpush1.bf16.msra.mxu1 %v13549_v63  ;;  %3488 = vmatprep.subr.bf16.mxu0 %v13554_v0  ;;  %v15335_v63 = vshrl.u32 %v562_v58, 7  ;;  %v13620_v0 = vld [vmem:[%s19647_s1 + $0xd04] ss:$16 sps:$4 sm:$0xff]   ;;  %v13663_v58 = vld [vmem:[%s19647_s1 + $0x228] ss:$16 sps:$4 sm:$0xff]  }
  0xd1   :  { %3531 = vmatprep.subr.bf16.mxu1 %v13557_v1  ;;  %v13623_v1 = vld [vmem:[%s19647_s1 + $0xf04] ss:$16 sps:$4 sm:$0xff]  }
  0xd3   :  { %3489 = vmatpush1.bf16.msra.mxu0 %v13552_v2  ;;  %v13618_v2 = vld [vmem:[%s19647_s1 + $0xd00] ss:$16 sps:$4 sm:$0xff]  }
  0xd4   :  { %3532 = vmatpush1.bf16.msra.mxu1 %v13555_v3  ;;  %3490 = vmatprep.subr.bf16.mxu0 %v13560_v4  ;;  %v13621_v3 = vld [vmem:[%s19647_s1 + $0xf00] ss:$16 sps:$4 sm:$0xff]  }
  0xd5   :  { %3533 = vmatprep.subr.bf16.mxu1 %v13563_v5  ;;  %v560_v4 = vld [vmem:[%s19649_s2] sm:$0xf]  ;;  %v15353_v5 = vsub.s32 0, %v15335_v63 }
  0xd7   :  { %3491 = vmatpush1.bf16.msra.mxu0 %v13558_v6  ;;  %v13626_v6 = vld [vmem:[%s19647_s1 + $0xec] ss:$16 sps:$4 sm:$0xff]  }
  0xd8   :  { %3534 = vmatpush1.bf16.msra.mxu1 %v13561_v7  ;;  %3492 = vmatprep.subr.bf16.mxu0 %v13566_v10  ;;  %v13629_v7 = vld [vmem:[%s19647_s1 + $0x2ec] ss:$16 sps:$4 sm:$0xff]   ;;  %v15363_v10 = vcombine.low %v15124_v44, %v15132_v46 }
  0xd9   :  { %3535 = vmatprep.subr.bf16.mxu1 %v13569_v11  ;;  %v15367_v11 = vcombine.low %v15137_v47, %v15150_v50  ;;  %v13632_v44 = vld [vmem:[%s19647_s1 + $0xcc] ss:$16 sps:$4 sm:$0xff]  }
  0xda   :  { %v13635_v46 = vld [vmem:[%s19647_s1 + $0x2cc] ss:$16 sps:$4 sm:$0xff]  }
  0xdb   :  { %3493 = vmatpush1.bf16.msra.mxu0 %v13564_v12  ;;  %v13624_v12 = vld [vmem:[%s19647_s1 + $0xe8] ss:$16 sps:$4 sm:$0xff]  }
  0xdc   :  { %3536 = vmatpush1.bf16.msra.mxu1 %v13567_v13  ;;  %3494 = vmatprep.subr.bf16.mxu0 %v13572_v14  ;;  %v565_v13 = vrot.slane %v560_v4, %v15353_v5  ;;  %v13627_v14 = vld [vmem:[%s19647_s1 + $0x2e8] ss:$16 sps:$4 sm:$0xff]   ;;  %v13680_v4 = vld [vmem:[%s19647_s1 + $0x1cc] ss:$16 sps:$4 sm:$0xff]  }
  0xdd   :  { %3537 = vmatprep.subr.bf16.mxu1 %v13575_v15  ;;  %v13630_v15 = vld [vmem:[%s19647_s1 + $0xc8] ss:$16 sps:$4 sm:$0xff]  }
  0xdf   :  { %3495 = vmatpush1.bf16.msra.mxu0 %v13570_v16 }
  0xe0   :  { %3538 = vmatpush1.bf16.msra.mxu1 %v13573_v17  ;;  %3496 = vmatprep.subr.bf16.mxu0 %v13578_v18  ;;  %v13633_v17 = vld [vmem:[%s19647_s1 + $0x2c8] ss:$16 sps:$4 sm:$0xff]  }
  0xe1   :  { %3539 = vmatprep.subr.bf16.mxu1 %v13581_v19 }
  0xe3   :  { %3497 = vmatpush2.bf16.msra.mxu0 %v13576_v22  ;;  %v13638_v22 = vld [vmem:[%s19647_s1 + $0xac] ss:$16 sps:$4 sm:$0xff]  }
  0xe4   :  { %3540 = vmatpush2.bf16.msra.mxu1 %v13579_v23  ;;  %3498 = vmatprep.subr.bf16.mxu0 %v13584_v24  ;;  %v13641_v23 = vld [vmem:[%s19647_s1 + $0x2ac] ss:$16 sps:$4 sm:$0xff]  }
  0xe5   :  { %3541 = vmatprep.subr.bf16.mxu1 %v13587_v25 }
  0xe7   :  { %3499 = vmatpush2.bf16.msra.mxu0 %v13582_v26  ;;  %v13636_v26 = vld [vmem:[%s19647_s1 + $0xa8] ss:$16 sps:$4 sm:$0xff]  }
  0xe8   :  { %3542 = vmatpush2.bf16.msra.mxu1 %v13585_v27  ;;  %3500 = vmatprep.subr.bf16.mxu0 %v13590_v32  ;;  %v13639_v32 = vld [vmem:[%s19647_s1 + $0x2a8] ss:$16 sps:$4 sm:$0xff]  }
  0xe9   :  { %3543 = vmatprep.subr.bf16.mxu1 %v13593_v34 }
  0xeb   :  { %3501 = vmatpush2.bf16.msra.mxu0 %v13588_v36 }
  0xec   :  { %3544 = vmatpush2.bf16.msra.mxu1 %v13591_v37  ;;  %3502 = vmatprep.subr.bf16.mxu0 %v13596_v38  ;;  %v13642_v37 = vld [vmem:[%s19647_s1 + $0x88] ss:$16 sps:$4 sm:$0xff]  }
  0xed   :  { %3545 = vmatprep.subr.bf16.mxu1 %v13599_v39  ;;  %v13645_v38 = vld [vmem:[%s19647_s1 + $0x288] ss:$16 sps:$4 sm:$0xff]   ;;  %v13650_v39 = vld [vmem:[%s19647_s1 + $0x6c] ss:$16 sps:$4 sm:$0xff]  }
  0xef   :  { %3503 = vmatpush2.bf16.msra.mxu0 %v13594_v40  ;;  %v13653_v40 = vld [vmem:[%s19647_s1 + $0x26c] ss:$16 sps:$4 sm:$0xff]  }
  0xf0   :  { %3546 = vmatpush2.bf16.msra.mxu1 %v13597_v42  ;;  %3504 = vmatprep.subr.bf16.mxu0 %v13602_v45  ;;  %v13648_v42 = vld [vmem:[%s19647_s1 + $0x68] ss:$16 sps:$4 sm:$0xff]  }
  0xf1   :  { %3547 = vmatprep.subr.bf16.mxu1 %v13605_v51  ;;  %v13651_v45 = vld [vmem:[%s19647_s1 + $0x268] ss:$16 sps:$4 sm:$0xff]   ;;  %v13656_v51 = vld [vmem:[%s19647_s1 + $0x4c] ss:$16 sps:$4 sm:$0xff]  }
  0xf3   :  { %3505 = vmatpush2.bf16.msra.mxu0 %v13600_v28  ;;  %v13659_v28 = vld [vmem:[%s19647_s1 + $0x24c] ss:$16 sps:$4 sm:$0xff]  }
  0xf4   :  { %3548 = vmatpush2.bf16.msra.mxu1 %v13603_v29  ;;  %3506 = vmatprep.subr.bf16.mxu0 %v13608_v52  ;;  %v13654_v29 = vld [vmem:[%s19647_s1 + $0x48] ss:$16 sps:$4 sm:$0xff]  }
  0xf5   :  { %3549 = vmatprep.subr.bf16.mxu1 %v13611_v54  ;;  %v13657_v52 = vld [vmem:[%s19647_s1 + $0x248] ss:$16 sps:$4 sm:$0xff]   ;;  %v13662_v54 = vld [vmem:[%s19647_s1 + $0x2c] ss:$16 sps:$4 sm:$0xff]  }
  0xf7   :  { %3507 = vmatpush2.bf16.msra.mxu0 %v13606_v56  ;;  %v13665_v56 = vld [vmem:[%s19647_s1 + $0x22c] ss:$16 sps:$4 sm:$0xff]  }
  0xf8   :  { %3550 = vmatpush2.bf16.msra.mxu1 %v13609_v57  ;;  %3508 = vmatprep.subr.bf16.mxu0 %v13614_v59  ;;  %v13660_v57 = vld [vmem:[%s19647_s1 + $0x28] ss:$16 sps:$4 sm:$0xff]   ;;  %v13668_v59 = vld [vmem:[%s19647_s1 + $0xc] ss:$16 sps:$4 sm:$0xff]  }
  0xf9   :  { %3551 = vmatprep.subr.bf16.mxu1 %v13617_v60  ;;  %v13671_v60 = vld [vmem:[%s19647_s1 + $0x20c] ss:$16 sps:$4 sm:$0xff]  }
  0xfb   :  { %3509 = vmatpush2.bf16.msra.mxu0 %v13612_v61  ;;  %v13666_v61 = vld [vmem:[%s19647_s1 + $0x8] ss:$16 sps:$4 sm:$0xff]  }
  0xfc   :  { %3552 = vmatpush2.bf16.msra.mxu1 %v13615_v62  ;;  %3510 = vmatprep.subr.bf16.mxu0 %v13620_v0  ;;  %v13669_v62 = vld [vmem:[%s19647_s1 + $0x208] ss:$16 sps:$4 sm:$0xff]   ;;  %v13674_v0 = vld [vmem:[%s19647_s1 + $0x1ec] ss:$16 sps:$4 sm:$0xff]  }
  0xfd   :  { %3553 = vmatprep.subr.bf16.mxu1 %v13623_v1  ;;  %v13677_v1 = vld [vmem:[%s19647_s1 + $0x3ec] ss:$16 sps:$4 sm:$0xff]  }
  0xff   :  { %3511 = vmatpush2.bf16.msra.mxu0 %v13618_v2  ;;  %v13672_v2 = vld [vmem:[%s19647_s1 + $0x1e8] ss:$16 sps:$4 sm:$0xff]  }
 0x100   :  { %3554 = vmatpush2.bf16.msra.mxu1 %v13621_v3  ;;  %3566 = vmatprep.subr.bf16.mxu0 %v13626_v6  ;;  %v13675_v3 = vld [vmem:[%s19647_s1 + $0x3e8] ss:$16 sps:$4 sm:$0xff]   ;;  %v13683_v6 = vld [vmem:[%s19647_s1 + $0x3cc] ss:$16 sps:$4 sm:$0xff]  }
 0x101   :  { %3609 = vmatprep.subr.bf16.mxu1 %v13629_v7  ;;  %v13678_v7 = vld [vmem:[%s19647_s1 + $0x1c8] ss:$16 sps:$4 sm:$0xff]  }
 0x102   :  { %v3256_v47 = vpop.f32.mrf.mxu0  ;;  %3513 = vmatmul.mubr.bf16.vlgmr.msra.gmra.mxu0 %v15363_v10 }
 0x103   :  { %v3299_v50 = vpop.f32.mrf.mxu1  ;;  %3556 = vmatmul.mubr.bf16.vlgmr.msra.gmra.mxu1 %v15367_v11  ;;  %v3257_v16 = vadd.f32 %v3256_v47, %v565_v13  ;;  %3567 = vmatpush1.bf16.msra.mxu0 %v13624_v12  ;;  %v13681_v12 = vld [vmem:[%s19647_s1 + $0x3c8] ss:$16 sps:$4 sm:$0xff]   ;;  %v13692_v47 = vld [vmem:[%s19647_s1 + $0x18c] ss:$16 sps:$4 sm:$0xff]  }
 0x104   :  { %3610 = vmatpush1.bf16.msra.mxu1 %v13627_v14  ;;  %v15390_v18 = vpop.f32.mrf.mxu0  ;;  %3568 = vmatprep.subr.bf16.mxu0 %v13632_v44  ;;  %v13689_v14 = vld [vmem:[%s19647_s1 + $0x3ac] ss:$16 sps:$4 sm:$0xff]   ;;  %v13684_v44 = vld [vmem:[%s19647_s1 + $0x1a8] ss:$16 sps:$4 sm:$0xff]  }
 0x105   :  { %v15392_v19 = vpop.f32.mrf.mxu1  ;;  %3611 = vmatprep.subr.bf16.mxu1 %v13635_v46  ;;  %v15400_v24 = vadd.f32 %v3299_v50, %v3257_v16  ;;  %3598 = vmatprep.mubr.bf16.mxu0 %v14604_v53  ;;  %v13644_v53 = vld [vmem:[%s19647_s1 + $0x8c] ss:$16 sps:$4 sm:$0xff]   ;;  %v13687_v46 = vld [vmem:[%s19647_s1 + $0x3a8] ss:$16 sps:$4 sm:$0xff]  }
 0x106   :  { %3641 = vmatprep.mubr.bf16.mxu1 %v14609_v55  ;;  %v3260_v25 = vpop.f32.mrf.mxu0  ;;  %v13647_v55 = vld [vmem:[%s19647_s1 + $0x28c] ss:$16 sps:$4 sm:$0xff]   ;;  %v13693_v16 = vld [vmem:[%s19647_s1 + $0x388] ss:$16 sps:$4 sm:$0xff]  }
 0x107   :  { %v3261_v27 = vadd.f32 %v3260_v25, %v565_v13  ;;  %3569 = vmatpush1.bf16.msra.mxu0 %v13630_v15  ;;  %v3303_v34 = vpop.f32.mrf.mxu1  ;;  %v13686_v13 = vld [vmem:[%s19647_s1 + $0x1ac] ss:$16 sps:$4 sm:$0xff]   ;;  %v13690_v15 = vld [vmem:[%s19647_s1 + $0x188] ss:$16 sps:$4 sm:$0xff]  }
 0x108   :  { %3612 = vmatpush1.bf16.msra.mxu1 %v13633_v17  ;;  %3570 = vmatprep.subr.bf16.mxu0 %v13638_v22  ;;  %v13695_v50 = vld [vmem:[%s19647_s1 + $0x38c] ss:$16 sps:$4 sm:$0xff]   ;;  %v13699_v25 = vld [vmem:[%s19647_s1 + $0x368] ss:$16 sps:$4 sm:$0xff]  }
 0x109   :  { %3613 = vmatprep.subr.bf16.mxu1 %v13641_v23  ;;  %v15416_v36 = vadd.f32 %v3303_v34, %v3261_v27  ;;  %v13698_v17 = vld [vmem:[%s19647_s1 + $0x16c] ss:$16 sps:$4 sm:$0xff]   ;;  %v13696_v23 = vld [vmem:[%s19647_s1 + $0x168] ss:$16 sps:$4 sm:$0xff]  }
 0x10a   :  { %v13701_v22 = vld [vmem:[%s19647_s1 + $0x36c] ss:$16 sps:$4 sm:$0xff]   ;;  %v13705_v34 = vld [vmem:[%s19647_s1 + $0x348] ss:$16 sps:$4 sm:$0xff]  }
 0x10b   :  { %3571 = vmatpush1.bf16.msra.mxu0 %v13636_v26  ;;  %v13704_v26 = vld [vmem:[%s19647_s1 + $0x14c] ss:$16 sps:$4 sm:$0xff]  }
 0x10c   :  { %3614 = vmatpush1.bf16.msra.mxu1 %v13639_v32  ;;  %3572 = vmatprep.subr.bf16.mxu0 %v13644_v53  ;;  %v13707_v27 = vld [vmem:[%s19647_s1 + $0x34c] ss:$16 sps:$4 sm:$0xff]   ;;  %v13702_v32 = vld [vmem:[%s19647_s1 + $0x148] ss:$16 sps:$4 sm:$0xff]  }
 0x10d   :  { %3615 = vmatprep.subr.bf16.mxu1 %v13647_v55  ;;  %v13710_v53 = vld [vmem:[%s19647_s1 + $0x12c] ss:$16 sps:$4 sm:$0xff]  }
 0x10e   :  { %v13713_v55 = vld [vmem:[%s19647_s1 + $0x32c] ss:$16 sps:$4 sm:$0xff]  }
 0x10f   :  { %3573 = vmatpush1.bf16.msra.mxu0 %v13642_v37  ;;  %v13708_v37 = vld [vmem:[%s19647_s1 + $0x128] ss:$16 sps:$4 sm:$0xff]  }
 0x110   :  { %3616 = vmatpush1.bf16.msra.mxu1 %v13645_v38  ;;  %3574 = vmatprep.subr.bf16.mxu0 %v13650_v39  ;;  %v13711_v38 = vld [vmem:[%s19647_s1 + $0x328] ss:$16 sps:$4 sm:$0xff]   ;;  %v13716_v39 = vld [vmem:[%s19647_s1 + $0x10c] ss:$16 sps:$4 sm:$0xff]  }
 0x111   :  { %3617 = vmatprep.subr.bf16.mxu1 %v13653_v40  ;;  %v13719_v40 = vld [vmem:[%s19647_s1 + $0x30c] ss:$16 sps:$4 sm:$0xff]  }
 0x113   :  { %3575 = vmatpush1.bf16.msra.mxu0 %v13648_v42  ;;  %v13714_v42 = vld [vmem:[%s19647_s1 + $0x108] ss:$16 sps:$4 sm:$0xff]  }
 0x114   :  { %3618 = vmatpush1.bf16.msra.mxu1 %v13651_v45  ;;  %3576 = vmatprep.subr.bf16.mxu0 %v13656_v51  ;;  %v13717_v45 = vld [vmem:[%s19647_s1 + $0x308] ss:$16 sps:$4 sm:$0xff]   ;;  %v13722_v51 = vld [vmem:[%s19647_s1 + $0x4ec] ss:$16 sps:$4 sm:$0xff]  }
 0x115   :  { %3619 = vmatprep.subr.bf16.mxu1 %v13659_v28  ;;  %v13725_v28 = vld [vmem:[%s19647_s1 + $0x6ec] ss:$16 sps:$4 sm:$0xff]  }
 0x117   :  { %3577 = vmatpush1.bf16.msra.mxu0 %v13654_v29  ;;  %v13720_v29 = vld [vmem:[%s19647_s1 + $0x4e8] ss:$16 sps:$4 sm:$0xff]  }
 0x118   :  { %3620 = vmatpush1.bf16.msra.mxu1 %v13657_v52  ;;  %3578 = vmatprep.subr.bf16.mxu0 %v13662_v54  ;;  %v13723_v52 = vld [vmem:[%s19647_s1 + $0x6e8] ss:$16 sps:$4 sm:$0xff]   ;;  %v15580_v54 = vpop.f32.mrf.mxu0 }
 0x119   :  { %3621 = vmatprep.subr.bf16.mxu1 %v13665_v56  ;;  %v15582_v56 = vpop.f32.mrf.mxu1 }
 0x11b   :  { %3579 = vmatpush1.bf16.msra.mxu0 %v13660_v57  ;;  %v13728_v57 = vld [vmem:[%s19647_s1 + $0x4cc] ss:$16 sps:$4 sm:$0xff]  }
 0x11c   :  { %3622 = vmatpush1.bf16.msra.mxu1 %v13663_v58  ;;  %3580 = vmatprep.subr.bf16.mxu0 %v13668_v59  ;;  %v13731_v58 = vld [vmem:[%s19647_s1 + $0x6cc] ss:$16 sps:$4 sm:$0xff]   ;;  %v13726_v59 = vld [vmem:[%s19647_s1 + $0x4c8] ss:$16 sps:$4 sm:$0xff]  }
 0x11d   :  { %3623 = vmatprep.subr.bf16.mxu1 %v13671_v60  ;;  %v13729_v60 = vld [vmem:[%s19647_s1 + $0x6c8] ss:$16 sps:$4 sm:$0xff]  }
 0x11f   :  { %3581 = vmatpush1.bf16.msra.mxu0 %v13666_v61 }
 0x120   :  { %3624 = vmatpush1.bf16.msra.mxu1 %v13669_v62  ;;  %3582 = vmatprep.subr.bf16.mxu0 %v13674_v0 }
 0x121   :  { %3625 = vmatprep.subr.bf16.mxu1 %v13677_v1 }
 0x123   :  { %3583 = vmatpush2.bf16.msra.mxu0 %v13672_v2 }
 0x124   :  { %3626 = vmatpush2.bf16.msra.mxu1 %v13675_v3  ;;  %3584 = vmatprep.subr.bf16.mxu0 %v13680_v4  ;;  %v13734_v3 = vld [vmem:[%s19647_s1 + $0x4ac] ss:$16 sps:$4 sm:$0xff]  }
 0x125   :  { %3627 = vmatprep.subr.bf16.mxu1 %v13683_v6  ;;  %v13732_v6 = vld [vmem:[%s19647_s1 + $0x4a8] ss:$16 sps:$4 sm:$0xff]  }
 0x127   :  { %3585 = vmatpush2.bf16.msra.mxu0 %v13678_v7  ;;  %v13735_v7 = vld [vmem:[%s19647_s1 + $0x6a8] ss:$16 sps:$4 sm:$0xff]  }
 0x128   :  { %3628 = vmatpush2.bf16.msra.mxu1 %v13681_v12  ;;  %3586 = vmatprep.subr.bf16.mxu0 %v13686_v13  ;;  %v13738_v13 = vld [vmem:[%s19647_s1 + $0x488] ss:$16 sps:$4 sm:$0xff]  }
 0x129   :  { %3629 = vmatprep.subr.bf16.mxu1 %v13689_v14  ;;  %v13741_v14 = vld [vmem:[%s19647_s1 + $0x688] ss:$16 sps:$4 sm:$0xff]  }
 0x12b   :  { %3587 = vmatpush2.bf16.msra.mxu0 %v13684_v44  ;;  %v13746_v44 = vld [vmem:[%s19647_s1 + $0x46c] ss:$16 sps:$4 sm:$0xff]  }
 0x12c   :  { %3630 = vmatpush2.bf16.msra.mxu1 %v13687_v46  ;;  %3588 = vmatprep.subr.bf16.mxu0 %v13692_v47  ;;  %v13749_v46 = vld [vmem:[%s19647_s1 + $0x66c] ss:$16 sps:$4 sm:$0xff]   ;;  %v13744_v47 = vld [vmem:[%s19647_s1 + $0x468] ss:$16 sps:$4 sm:$0xff]  }
 0x12d   :  { %3631 = vmatprep.subr.bf16.mxu1 %v13695_v50  ;;  %v13747_v50 = vld [vmem:[%s19647_s1 + $0x668] ss:$16 sps:$4 sm:$0xff]  }
 0x12f   :  { %3589 = vmatpush2.bf16.msra.mxu0 %v13690_v15  ;;  %v13752_v15 = vld [vmem:[%s19647_s1 + $0x44c] ss:$16 sps:$4 sm:$0xff]  }
 0x130   :  { %3632 = vmatpush2.bf16.msra.mxu1 %v13693_v16  ;;  %3590 = vmatprep.subr.bf16.mxu0 %v13698_v17  ;;  %v13755_v16 = vld [vmem:[%s19647_s1 + $0x64c] ss:$16 sps:$4 sm:$0xff]   ;;  %v13750_v17 = vld [vmem:[%s19647_s1 + $0x448] ss:$16 sps:$4 sm:$0xff]  }
 0x131   :  { %3633 = vmatprep.subr.bf16.mxu1 %v13701_v22  ;;  %v13753_v22 = vld [vmem:[%s19647_s1 + $0x648] ss:$16 sps:$4 sm:$0xff]  }
 0x133   :  { %3591 = vmatpush2.bf16.msra.mxu0 %v13696_v23  ;;  %v13758_v23 = vld [vmem:[%s19647_s1 + $0x42c] ss:$16 sps:$4 sm:$0xff]  }
 0x134   :  { %3634 = vmatpush2.bf16.msra.mxu1 %v13699_v25  ;;  %3592 = vmatprep.subr.bf16.mxu0 %v13704_v26  ;;  %v13761_v25 = vld [vmem:[%s19647_s1 + $0x62c] ss:$16 sps:$4 sm:$0xff]   ;;  %v13756_v26 = vld [vmem:[%s19647_s1 + $0x428] ss:$16 sps:$4 sm:$0xff]  }
 0x135   :  { %3635 = vmatprep.subr.bf16.mxu1 %v13707_v27  ;;  %v13759_v27 = vld [vmem:[%s19647_s1 + $0x628] ss:$16 sps:$4 sm:$0xff]  }
 0x137   :  { %3593 = vmatpush2.bf16.msra.mxu0 %v13702_v32  ;;  %v13764_v32 = vld [vmem:[%s19647_s1 + $0x40c] ss:$16 sps:$4 sm:$0xff]  }
 0x138   :  { %3636 = vmatpush2.bf16.msra.mxu1 %v13705_v34  ;;  %3594 = vmatprep.subr.bf16.mxu0 %v13710_v53  ;;  %v13767_v34 = vld [vmem:[%s19647_s1 + $0x60c] ss:$16 sps:$4 sm:$0xff]   ;;  %v13762_v53 = vld [vmem:[%s19647_s1 + $0x408] ss:$16 sps:$4 sm:$0xff]  }
 0x139   :  { %3637 = vmatprep.subr.bf16.mxu1 %v13713_v55  ;;  %v13765_v55 = vld [vmem:[%s19647_s1 + $0x608] ss:$16 sps:$4 sm:$0xff]  }
 0x13b   :  { %3595 = vmatpush2.bf16.msra.mxu0 %v13708_v37  ;;  %v13770_v37 = vld [vmem:[%s19647_s1 + $0x5ec] ss:$16 sps:$4 sm:$0xff]  }
 0x13c   :  { %3638 = vmatpush2.bf16.msra.mxu1 %v13711_v38  ;;  %3596 = vmatprep.subr.bf16.mxu0 %v13716_v39  ;;  %v13773_v38 = vld [vmem:[%s19647_s1 + $0x7ec] ss:$16 sps:$4 sm:$0xff]   ;;  %v13768_v39 = vld [vmem:[%s19647_s1 + $0x5e8] ss:$16 sps:$4 sm:$0xff]  }
 0x13d   :  { %3639 = vmatprep.subr.bf16.mxu1 %v13719_v40  ;;  %v13771_v40 = vld [vmem:[%s19647_s1 + $0x7e8] ss:$16 sps:$4 sm:$0xff]  }
 0x13f   :  { %3597 = vmatpush2.bf16.msra.mxu0 %v13714_v42  ;;  %v13776_v42 = vld [vmem:[%s19647_s1 + $0x5cc] ss:$16 sps:$4 sm:$0xff]  }
 0x140   :  { %3640 = vmatpush2.bf16.msra.mxu1 %v13717_v45  ;;  %3652 = vmatprep.subr.bf16.mxu0 %v13722_v51  ;;  %v13779_v45 = vld [vmem:[%s19647_s1 + $0x7cc] ss:$16 sps:$4 sm:$0xff]   ;;  %v13774_v51 = vld [vmem:[%s19647_s1 + $0x5c8] ss:$16 sps:$4 sm:$0xff]  }
 0x141   :  { %3695 = vmatprep.subr.bf16.mxu1 %v13725_v28  ;;  %v13777_v28 = vld [vmem:[%s19647_s1 + $0x7c8] ss:$16 sps:$4 sm:$0xff]  }
 0x142   :  { %v3342_v61 = vpop.f32.mrf.mxu0  ;;  %3599 = vmatmul.mubr.bf16.vlgmr.msra.gmra.mxu0 %v14661_v8  ;;  %v13737_v8 = vld [vmem:[%s19647_s1 + $0x6ac] ss:$16 sps:$4 sm:$0xff]  }
 0x143   :  { %v3385_v62 = vpop.f32.mrf.mxu1  ;;  %3642 = vmatmul.mubr.bf16.vlgmr.msra.gmra.mxu1 %v14663_v9  ;;  %v3343_v0 = vadd.f32 %v3342_v61, %v15400_v24  ;;  %3653 = vmatpush1.bf16.msra.mxu0 %v13720_v29  ;;  %v13782_v29 = vld [vmem:[%s19647_s1 + $0x5ac] ss:$16 sps:$4 sm:$0xff]   ;;  %v13786_v61 = vld [vmem:[%s19647_s1 + $0x588] ss:$16 sps:$4 sm:$0xff]  }
 0x144   :  { %3696 = vmatpush1.bf16.msra.mxu1 %v13723_v52  ;;  %v15599_v1 = vpop.f32.mrf.mxu0  ;;  %3654 = vmatprep.subr.bf16.mxu0 %v13728_v57  ;;  %v13785_v52 = vld [vmem:[%s19647_s1 + $0x7ac] ss:$16 sps:$4 sm:$0xff]   ;;  %v13780_v57 = vld [vmem:[%s19647_s1 + $0x5a8] ss:$16 sps:$4 sm:$0xff]  }
 0x145   :  { %v15601_v2 = vpop.f32.mrf.mxu1  ;;  %3697 = vmatprep.subr.bf16.mxu1 %v13731_v58  ;;  %v15609_v4 = vadd.f32 %v3385_v62, %v3343_v0  ;;  %3684 = vmatprep.mubr.bf16.mxu0 %v14770_v41  ;;  %v13740_v41 = vld [vmem:[%s19647_s1 + $0x48c] ss:$16 sps:$4 sm:$0xff]   ;;  %v13783_v58 = vld [vmem:[%s19647_s1 + $0x7a8] ss:$16 sps:$4 sm:$0xff]  }
 0x146   :  { %3727 = vmatprep.mubr.bf16.mxu1 %v14777_v43  ;;  %v3346_v9 = vpop.f32.mrf.mxu0  ;;  %v13743_v43 = vld [vmem:[%s19647_s1 + $0x68c] ss:$16 sps:$4 sm:$0xff]   ;;  %v13789_v62 = vld [vmem:[%s19647_s1 + $0x788] ss:$16 sps:$4 sm:$0xff]  }
 0x147   :  { %v3347_v24 = vadd.f32 %v3346_v9, %v15416_v36  ;;  %3655 = vmatpush1.bf16.msra.mxu0 %v13726_v59  ;;  %v3389_v12 = vpop.f32.mrf.mxu1  ;;  %v13788_v59 = vld [vmem:[%s19647_s1 + $0x58c] ss:$16 sps:$4 sm:$0xff]   ;;  %v13795_v9 = vld [vmem:[%s19647_s1 + $0x768] ss:$16 sps:$4 sm:$0xff]  }
 0x148   :  { %3698 = vmatpush1.bf16.msra.mxu1 %v13729_v60  ;;  %3656 = vmatprep.subr.bf16.mxu0 %v13734_v3  ;;  %v13791_v60 = vld [vmem:[%s19647_s1 + $0x78c] ss:$16 sps:$4 sm:$0xff]  }
 0x149   :  { %3699 = vmatprep.subr.bf16.mxu1 %v13737_v8  ;;  %v15626_v36 = vadd.f32 %v3389_v12, %v3347_v24  ;;  %v13794_v0 = vld [vmem:[%s19647_s1 + $0x56c] ss:$16 sps:$4 sm:$0xff]   ;;  %v13792_v8 = vld [vmem:[%s19647_s1 + $0x568] ss:$16 sps:$4 sm:$0xff]  }
 0x14a   :  { %v13797_v3 = vld [vmem:[%s19647_s1 + $0x76c] ss:$16 sps:$4 sm:$0xff]   ;;  %v13801_v12 = vld [vmem:[%s19647_s1 + $0x748] ss:$16 sps:$4 sm:$0xff]  }
 0x14b   :  { %3657 = vmatpush1.bf16.msra.mxu0 %v13732_v6  ;;  %v13800_v24 = vld [vmem:[%s19647_s1 + $0x54c] ss:$16 sps:$4 sm:$0xff]  }
 0x14c   :  { %3700 = vmatpush1.bf16.msra.mxu1 %v13735_v7  ;;  %3658 = vmatprep.subr.bf16.mxu0 %v13740_v41  ;;  %v13803_v6 = vld [vmem:[%s19647_s1 + $0x74c] ss:$16 sps:$4 sm:$0xff]   ;;  %v13798_v7 = vld [vmem:[%s19647_s1 + $0x548] ss:$16 sps:$4 sm:$0xff]  }
 0x14d   :  { %3701 = vmatprep.subr.bf16.mxu1 %v13743_v43  ;;  %v13806_v41 = vld [vmem:[%s19647_s1 + $0x52c] ss:$16 sps:$4 sm:$0xff]  }
 0x14e   :  { %v13809_v43 = vld [vmem:[%s19647_s1 + $0x72c] ss:$16 sps:$4 sm:$0xff]  }
 0x14f   :  { %3659 = vmatpush1.bf16.msra.mxu0 %v13738_v13  ;;  %v13804_v13 = vld [vmem:[%s19647_s1 + $0x528] ss:$16 sps:$4 sm:$0xff]  }
 0x150   :  { %3702 = vmatpush1.bf16.msra.mxu1 %v13741_v14  ;;  %3660 = vmatprep.subr.bf16.mxu0 %v13746_v44  ;;  %v13807_v14 = vld [vmem:[%s19647_s1 + $0x728] ss:$16 sps:$4 sm:$0xff]   ;;  %v13812_v44 = vld [vmem:[%s19647_s1 + $0x50c] ss:$16 sps:$4 sm:$0xff]  }
 0x151   :  { %3703 = vmatprep.subr.bf16.mxu1 %v13749_v46  ;;  %v13815_v46 = vld [vmem:[%s19647_s1 + $0x70c] ss:$16 sps:$4 sm:$0xff]  }
 0x153   :  { %3661 = vmatpush1.bf16.msra.mxu0 %v13744_v47  ;;  %v13810_v47 = vld [vmem:[%s19647_s1 + $0x508] ss:$16 sps:$4 sm:$0xff]  }
 0x154   :  { %3704 = vmatpush1.bf16.msra.mxu1 %v13747_v50  ;;  %3662 = vmatprep.subr.bf16.mxu0 %v13752_v15  ;;  %v13813_v50 = vld [vmem:[%s19647_s1 + $0x708] ss:$16 sps:$4 sm:$0xff]   ;;  %v13818_v15 = vld [vmem:[%s19647_s1 + $0x8ec] ss:$16 sps:$4 sm:$0xff]  }
 0x155   :  { %3705 = vmatprep.subr.bf16.mxu1 %v13755_v16  ;;  %v13821_v16 = vld [vmem:[%s19647_s1 + $0xaec] ss:$16 sps:$4 sm:$0xff]  }
 0x157   :  { %3663 = vmatpush1.bf16.msra.mxu0 %v13750_v17  ;;  %v13816_v17 = vld [vmem:[%s19647_s1 + $0x8e8] ss:$16 sps:$4 sm:$0xff]  }
 0x158   :  { %3706 = vmatpush1.bf16.msra.mxu1 %v13753_v22  ;;  %3664 = vmatprep.subr.bf16.mxu0 %v13758_v23  ;;  %v13819_v22 = vld [vmem:[%s19647_s1 + $0xae8] ss:$16 sps:$4 sm:$0xff]   ;;  %v13824_v23 = vld [vmem:[%s19647_s1 + $0x8cc] ss:$16 sps:$4 sm:$0xff]  }
 0x159   :  { %3707 = vmatprep.subr.bf16.mxu1 %v13761_v25  ;;  %v15793_v25 = vpop.f32.mrf.mxu0 }
 0x15b   :  { %3665 = vmatpush1.bf16.msra.mxu0 %v13756_v26  ;;  %v15795_v26 = vpop.f32.mrf.mxu1 }
 0x15c   :  { %3708 = vmatpush1.bf16.msra.mxu1 %v13759_v27  ;;  %3666 = vmatprep.subr.bf16.mxu0 %v13764_v32  ;;  %v13827_v27 = vld [vmem:[%s19647_s1 + $0xacc] ss:$16 sps:$4 sm:$0xff]   ;;  %v13822_v32 = vld [vmem:[%s19647_s1 + $0x8c8] ss:$16 sps:$4 sm:$0xff]  }
 0x15d   :  { %3709 = vmatprep.subr.bf16.mxu1 %v13767_v34  ;;  %v13825_v34 = vld [vmem:[%s19647_s1 + $0xac8] ss:$16 sps:$4 sm:$0xff]  }
 0x15f   :  { %3667 = vmatpush1.bf16.msra.mxu0 %v13762_v53 }
 0x160   :  { %3710 = vmatpush1.bf16.msra.mxu1 %v13765_v55  ;;  %3668 = vmatprep.subr.bf16.mxu0 %v13770_v37  ;;  %v13830_v37 = vld [vmem:[%s19647_s1 + $0x8ac] ss:$16 sps:$4 sm:$0xff]  }
 0x161   :  { %3711 = vmatprep.subr.bf16.mxu1 %v13773_v38 }
 0x163   :  { %3669 = vmatpush2.bf16.msra.mxu0 %v13768_v39 }
 0x164   :  { %3712 = vmatpush2.bf16.msra.mxu1 %v13771_v40  ;;  %3670 = vmatprep.subr.bf16.mxu0 %v13776_v42 }
 0x165   :  { %3713 = vmatprep.subr.bf16.mxu1 %v13779_v45 }
 0x167   :  { %3671 = vmatpush2.bf16.msra.mxu0 %v13774_v51  ;;  %v13836_v51 = vld [vmem:[%s19647_s1 + $0x88c] ss:$16 sps:$4 sm:$0xff]  }
 0x168   :  { %3714 = vmatpush2.bf16.msra.mxu1 %v13777_v28  ;;  %3672 = vmatprep.subr.bf16.mxu0 %v13782_v29 }
 0x169   :  { %3715 = vmatprep.subr.bf16.mxu1 %v13785_v52  ;;  %v13839_v52 = vld [vmem:[%s19647_s1 + $0xa8c] ss:$16 sps:$4 sm:$0xff]  }
 0x16b   :  { %3673 = vmatpush2.bf16.msra.mxu0 %v13780_v57 }
 0x16c   :  { %3716 = vmatpush2.bf16.msra.mxu1 %v13783_v58  ;;  %3674 = vmatprep.subr.bf16.mxu0 %v13788_v59  ;;  %v13845_v58 = vld [vmem:[%s19647_s1 + $0xa6c] ss:$16 sps:$4 sm:$0xff]   ;;  %v13840_v59 = vld [vmem:[%s19647_s1 + $0x868] ss:$16 sps:$4 sm:$0xff]  }
 0x16d   :  { %3717 = vmatprep.subr.bf16.mxu1 %v13791_v60  ;;  %v13843_v60 = vld [vmem:[%s19647_s1 + $0xa68] ss:$16 sps:$4 sm:$0xff]  }
 0x16f   :  { %3675 = vmatpush2.bf16.msra.mxu0 %v13786_v61  ;;  %v13848_v61 = vld [vmem:[%s19647_s1 + $0x84c] ss:$16 sps:$4 sm:$0xff]  }
 0x170   :  { %3718 = vmatpush2.bf16.msra.mxu1 %v13789_v62  ;;  %3676 = vmatprep.subr.bf16.mxu0 %v13794_v0  ;;  %v13851_v62 = vld [vmem:[%s19647_s1 + $0xa4c] ss:$16 sps:$4 sm:$0xff]   ;;  %v13846_v0 = vld [vmem:[%s19647_s1 + $0x848] ss:$16 sps:$4 sm:$0xff]  }
 0x171   :  { %3719 = vmatprep.subr.bf16.mxu1 %v13797_v3  ;;  %v13849_v3 = vld [vmem:[%s19647_s1 + $0xa48] ss:$16 sps:$4 sm:$0xff]  }
 0x173   :  { %3677 = vmatpush2.bf16.msra.mxu0 %v13792_v8  ;;  %v13854_v8 = vld [vmem:[%s19647_s1 + $0x82c] ss:$16 sps:$4 sm:$0xff]  }
 0x174   :  { %3720 = vmatpush2.bf16.msra.mxu1 %v13795_v9  ;;  %3678 = vmatprep.subr.bf16.mxu0 %v13800_v24  ;;  %v13857_v9 = vld [vmem:[%s19647_s1 + $0xa2c] ss:$16 sps:$4 sm:$0xff]   ;;  %v13852_v24 = vld [vmem:[%s19647_s1 + $0x828] ss:$16 sps:$4 sm:$0xff]  }
 0x175   :  { %3721 = vmatprep.subr.bf16.mxu1 %v13803_v6  ;;  %v13855_v6 = vld [vmem:[%s19647_s1 + $0xa28] ss:$16 sps:$4 sm:$0xff]  }
 0x177   :  { %3679 = vmatpush2.bf16.msra.mxu0 %v13798_v7  ;;  %v13860_v7 = vld [vmem:[%s19647_s1 + $0x80c] ss:$16 sps:$4 sm:$0xff]  }
 0x178   :  { %3722 = vmatpush2.bf16.msra.mxu1 %v13801_v12  ;;  %3680 = vmatprep.subr.bf16.mxu0 %v13806_v41  ;;  %v13863_v12 = vld [vmem:[%s19647_s1 + $0xa0c] ss:$16 sps:$4 sm:$0xff]   ;;  %v13858_v41 = vld [vmem:[%s19647_s1 + $0x808] ss:$16 sps:$4 sm:$0xff]  }
 0x179   :  { %3723 = vmatprep.subr.bf16.mxu1 %v13809_v43  ;;  %v13861_v43 = vld [vmem:[%s19647_s1 + $0xa08] ss:$16 sps:$4 sm:$0xff]  }
 0x17b   :  { %3681 = vmatpush2.bf16.msra.mxu0 %v13804_v13  ;;  %v13866_v13 = vld [vmem:[%s19647_s1 + $0x9ec] ss:$16 sps:$4 sm:$0xff]  }
 0x17c   :  { %3724 = vmatpush2.bf16.msra.mxu1 %v13807_v14  ;;  %3682 = vmatprep.subr.bf16.mxu0 %v13812_v44  ;;  %v13869_v14 = vld [vmem:[%s19647_s1 + $0xbec] ss:$16 sps:$4 sm:$0xff]   ;;  %v13864_v44 = vld [vmem:[%s19647_s1 + $0x9e8] ss:$16 sps:$4 sm:$0xff]  }
 0x17d   :  { %3725 = vmatprep.subr.bf16.mxu1 %v13815_v46  ;;  %v13867_v46 = vld [vmem:[%s19647_s1 + $0xbe8] ss:$16 sps:$4 sm:$0xff]  }
 0x17f   :  { %3683 = vmatpush2.bf16.msra.mxu0 %v13810_v47  ;;  %v13872_v47 = vld [vmem:[%s19647_s1 + $0x9cc] ss:$16 sps:$4 sm:$0xff]  }
 0x180   :  { %3726 = vmatpush2.bf16.msra.mxu1 %v13813_v50  ;;  %3738 = vmatprep.subr.bf16.mxu0 %v13818_v15  ;;  %v13875_v50 = vld [vmem:[%s19647_s1 + $0xbcc] ss:$16 sps:$4 sm:$0xff]   ;;  %v13870_v15 = vld [vmem:[%s19647_s1 + $0x9c8] ss:$16 sps:$4 sm:$0xff]  }
 0x181   :  { %3781 = vmatprep.subr.bf16.mxu1 %v13821_v16  ;;  %v13873_v16 = vld [vmem:[%s19647_s1 + $0xbc8] ss:$16 sps:$4 sm:$0xff]  }
 0x182   :  { %v3428_v53 = vpop.f32.mrf.mxu0  ;;  %3685 = vmatmul.mubr.bf16.vlgmr.msra.gmra.mxu0 %v14891_v20  ;;  %v13833_v20 = vld [vmem:[%s19647_s1 + $0xaac] ss:$16 sps:$4 sm:$0xff]  }
 0x183   :  { %v3471_v55 = vpop.f32.mrf.mxu1  ;;  %3728 = vmatmul.mubr.bf16.vlgmr.msra.gmra.mxu1 %v14895_v21  ;;  %v3429_v38 = vadd.f32 %v3428_v53, %v15609_v4  ;;  %3739 = vmatpush1.bf16.msra.mxu0 %v13816_v17  ;;  %v13828_v21 = vld [vmem:[%s19647_s1 + $0x8a8] ss:$16 sps:$4 sm:$0xff]   ;;  %v13878_v17 = vld [vmem:[%s19647_s1 + $0x9ac] ss:$16 sps:$4 sm:$0xff]  }
 0x184   :  { %3782 = vmatpush1.bf16.msra.mxu1 %v13819_v22  ;;  %v15812_v39 = vpop.f32.mrf.mxu0  ;;  %3740 = vmatprep.subr.bf16.mxu0 %v13824_v23  ;;  %v13831_v4 = vld [vmem:[%s19647_s1 + $0xaa8] ss:$16 sps:$4 sm:$0xff]   ;;  %v13881_v22 = vld [vmem:[%s19647_s1 + $0xbac] ss:$16 sps:$4 sm:$0xff]  }
 0x185   :  { %v15814_v40 = vpop.f32.mrf.mxu1  ;;  %3783 = vmatprep.subr.bf16.mxu1 %v13827_v27  ;;  %v15819_v42 = vadd.f32 %v3471_v55, %v3429_v38  ;;  %3770 = vmatprep.mubr.bf16.mxu0 %v14942_v33  ;;  %v13834_v33 = vld [vmem:[%s19647_s1 + $0x888] ss:$16 sps:$4 sm:$0xff]   ;;  %v13893_v38 = vld [vmem:[%s19647_s1 + $0xb6c] ss:$16 sps:$4 sm:$0xff]  }
 0x186   :  { %3813 = vmatprep.mubr.bf16.mxu1 %v14949_v35  ;;  %v3432_v45 = vpop.f32.mrf.mxu0  ;;  %v13837_v35 = vld [vmem:[%s19647_s1 + $0xa88] ss:$16 sps:$4 sm:$0xff]  }
 0x187   :  { %v3433_v28 = vadd.f32 %v3432_v45, %v15626_v36  ;;  %3741 = vmatpush1.bf16.msra.mxu0 %v13822_v32  ;;  %v3475_v29 = vpop.f32.mrf.mxu1  ;;  %v13842_v36 = vld [vmem:[%s19647_s1 + $0x86c] ss:$16 sps:$4 sm:$0xff]   ;;  %v13876_v23 = vld [vmem:[%s19647_s1 + $0x9a8] ss:$16 sps:$4 sm:$0xff]  }
 0x188   :  { %3784 = vmatpush1.bf16.msra.mxu1 %v13825_v34  ;;  %3742 = vmatprep.subr.bf16.mxu0 %v13830_v37  ;;  %v13879_v27 = vld [vmem:[%s19647_s1 + $0xba8] ss:$16 sps:$4 sm:$0xff]   ;;  %v13884_v32 = vld [vmem:[%s19647_s1 + $0x98c] ss:$16 sps:$4 sm:$0xff]  }
 0x189   :  { %3785 = vmatprep.subr.bf16.mxu1 %v13833_v20  ;;  %v15836_v57 = vadd.f32 %v3475_v29, %v3433_v28  ;;  %v13887_v34 = vld [vmem:[%s19647_s1 + $0xb8c] ss:$16 sps:$4 sm:$0xff]   ;;  %v13882_v53 = vld [vmem:[%s19647_s1 + $0x988] ss:$16 sps:$4 sm:$0xff]  }
 0x18a   :  { %v13885_v55 = vld [vmem:[%s19647_s1 + $0xb88] ss:$16 sps:$4 sm:$0xff]   ;;  %v13890_v37 = vld [vmem:[%s19647_s1 + $0x96c] ss:$16 sps:$4 sm:$0xff]  }
 0x18b   :  { %3743 = vmatpush1.bf16.msra.mxu0 %v13828_v21  ;;  %v13888_v20 = vld [vmem:[%s19647_s1 + $0x968] ss:$16 sps:$4 sm:$0xff]   ;;  %v13899_v45 = vld [vmem:[%s19647_s1 + $0xb4c] ss:$16 sps:$4 sm:$0xff]  }
 0x18c   :  { %3786 = vmatpush1.bf16.msra.mxu1 %v13831_v4  ;;  %3744 = vmatprep.subr.bf16.mxu0 %v13836_v51  ;;  %v13891_v21 = vld [vmem:[%s19647_s1 + $0xb68] ss:$16 sps:$4 sm:$0xff]   ;;  %v13896_v4 = vld [vmem:[%s19647_s1 + $0x94c] ss:$16 sps:$4 sm:$0xff]  }
 0x18d   :  { %3787 = vmatprep.subr.bf16.mxu1 %v13839_v52  ;;  %v13894_v51 = vld [vmem:[%s19647_s1 + $0x948] ss:$16 sps:$4 sm:$0xff]   ;;  %v13902_v29 = vld [vmem:[%s19647_s1 + $0x92c] ss:$16 sps:$4 sm:$0xff]  }
 0x18e   :  { %v13897_v28 = vld [vmem:[%s19647_s1 + $0xb48] ss:$16 sps:$4 sm:$0xff]   ;;  %v13905_v52 = vld [vmem:[%s19647_s1 + $0xb2c] ss:$16 sps:$4 sm:$0xff]  }
 0x18f   :  { %3745 = vmatpush1.bf16.msra.mxu0 %v13834_v33  ;;  %v13900_v33 = vld [vmem:[%s19647_s1 + $0x928] ss:$16 sps:$4 sm:$0xff]  }
 0x190   :  { %3788 = vmatpush1.bf16.msra.mxu1 %v13837_v35  ;;  %3746 = vmatprep.subr.bf16.mxu0 %v13842_v36  ;;  %v13903_v35 = vld [vmem:[%s19647_s1 + $0xb28] ss:$16 sps:$4 sm:$0xff]   ;;  %v13908_v36 = vld [vmem:[%s19647_s1 + $0x90c] ss:$16 sps:$4 sm:$0xff]  }
 0x191   :  { %3789 = vmatprep.subr.bf16.mxu1 %v13845_v58  ;;  %v13911_v58 = vld [vmem:[%s19647_s1 + $0xb0c] ss:$16 sps:$4 sm:$0xff]  }
 0x193   :  { %3747 = vmatpush1.bf16.msra.mxu0 %v13840_v59  ;;  %v13906_v59 = vld [vmem:[%s19647_s1 + $0x908] ss:$16 sps:$4 sm:$0xff]  }
 0x194   :  { %3790 = vmatpush1.bf16.msra.mxu1 %v13843_v60  ;;  %3748 = vmatprep.subr.bf16.mxu0 %v13848_v61  ;;  %v13909_v60 = vld [vmem:[%s19647_s1 + $0xb08] ss:$16 sps:$4 sm:$0xff]   ;;  %v13914_v61 = vld [vmem:[%s19647_s1 + $0xcec] ss:$16 sps:$4 sm:$0xff]  }
 0x195   :  { %3791 = vmatprep.subr.bf16.mxu1 %v13851_v62  ;;  %v13917_v62 = vld [vmem:[%s19647_s1 + $0xeec] ss:$16 sps:$4 sm:$0xff]  }
 0x197   :  { %3749 = vmatpush1.bf16.msra.mxu0 %v13846_v0  ;;  %v13912_v0 = vld [vmem:[%s19647_s1 + $0xce8] ss:$16 sps:$4 sm:$0xff]  }
 0x198   :  { %3792 = vmatpush1.bf16.msra.mxu1 %v13849_v3  ;;  %3750 = vmatprep.subr.bf16.mxu0 %v13854_v8  ;;  %v13915_v3 = vld [vmem:[%s19647_s1 + $0xee8] ss:$16 sps:$4 sm:$0xff]   ;;  %v16000_v8 = vpop.f32.mrf.mxu0 }
 0x199   :  { %3793 = vmatprep.subr.bf16.mxu1 %v13857_v9  ;;  %v16002_v9 = vpop.f32.mrf.mxu1 }
 0x19b   :  { %3751 = vmatpush1.bf16.msra.mxu0 %v13852_v24  ;;  %v13920_v24 = vld [vmem:[%s19647_s1 + $0xccc] ss:$16 sps:$4 sm:$0xff]  }
 0x19c   :  { %3794 = vmatpush1.bf16.msra.mxu1 %v13855_v6  ;;  %3752 = vmatprep.subr.bf16.mxu0 %v13860_v7  ;;  %v13923_v6 = vld [vmem:[%s19647_s1 + $0xecc] ss:$16 sps:$4 sm:$0xff]  }
 0x19d   :  { %3795 = vmatprep.subr.bf16.mxu1 %v13863_v12 }
 0x19f   :  { %3753 = vmatpush1.bf16.msra.mxu0 %v13858_v41 }
 0x1a0   :  { %3796 = vmatpush1.bf16.msra.mxu1 %v13861_v43  ;;  %3754 = vmatprep.subr.bf16.mxu0 %v13866_v13  ;;  %v13918_v43 = vld [vmem:[%s19647_s1 + $0xcc8] ss:$16 sps:$4 sm:$0xff]  }
 0x1a1   :  { %3797 = vmatprep.subr.bf16.mxu1 %v13869_v14  ;;  %v13921_v13 = vld [vmem:[%s19647_s1 + $0xec8] ss:$16 sps:$4 sm:$0xff]  }
 0x1a3   :  { %3755 = vmatpush2.bf16.msra.mxu0 %v13864_v44 }
 0x1a4   :  { %3798 = vmatpush2.bf16.msra.mxu1 %v13867_v46  ;;  %3756 = vmatprep.subr.bf16.mxu0 %v13872_v47 }
 0x1a5   :  { %3799 = vmatprep.subr.bf16.mxu1 %v13875_v50  ;;  %v13924_v50 = vld [vmem:[%s19647_s1 + $0xca8] ss:$16 sps:$4 sm:$0xff]  }
 0x1a7   :  { %3757 = vmatpush2.bf16.msra.mxu0 %v13870_v15  ;;  %v13927_v15 = vld [vmem:[%s19647_s1 + $0xea8] ss:$16 sps:$4 sm:$0xff]  }
 0x1a8   :  { %3800 = vmatpush2.bf16.msra.mxu1 %v13873_v16  ;;  %3758 = vmatprep.subr.bf16.mxu0 %v13878_v17 }
 0x1a9   :  { %3801 = vmatprep.subr.bf16.mxu1 %v13881_v22 }
 0x1ab   :  { %3759 = vmatpush2.bf16.msra.mxu0 %v13876_v23  ;;  %v13930_v23 = vld [vmem:[%s19647_s1 + $0xc88] ss:$16 sps:$4 sm:$0xff]  }
 0x1ac   :  { %3802 = vmatpush2.bf16.msra.mxu1 %v13879_v27  ;;  %3760 = vmatprep.subr.bf16.mxu0 %v13884_v32  ;;  %v13933_v27 = vld [vmem:[%s19647_s1 + $0xe88] ss:$16 sps:$4 sm:$0xff]   ;;  %v13938_v32 = vld [vmem:[%s19647_s1 + $0xc6c] ss:$16 sps:$4 sm:$0xff]  }
 0x1ad   :  { %3803 = vmatprep.subr.bf16.mxu1 %v13887_v34  ;;  %v13941_v34 = vld [vmem:[%s19647_s1 + $0xe6c] ss:$16 sps:$4 sm:$0xff]  }
 0x1af   :  { %3761 = vmatpush2.bf16.msra.mxu0 %v13882_v53 }
 0x1b0   :  { %3804 = vmatpush2.bf16.msra.mxu1 %v13885_v55  ;;  %3762 = vmatprep.subr.bf16.mxu0 %v13890_v37  ;;  %v13936_v55 = vld [vmem:[%s19647_s1 + $0xc68] ss:$16 sps:$4 sm:$0xff]  }
 0x1b1   :  { %3805 = vmatprep.subr.bf16.mxu1 %v13893_v38  ;;  %v13939_v37 = vld [vmem:[%s19647_s1 + $0xe68] ss:$16 sps:$4 sm:$0xff]   ;;  %v13944_v38 = vld [vmem:[%s19647_s1 + $0xc4c] ss:$16 sps:$4 sm:$0xff]  }
 0x1b3   :  { %3763 = vmatpush2.bf16.msra.mxu0 %v13888_v20  ;;  %v13947_v20 = vld [vmem:[%s19647_s1 + $0xe4c] ss:$16 sps:$4 sm:$0xff]  }
 0x1b4   :  { %3806 = vmatpush2.bf16.msra.mxu1 %v13891_v21  ;;  %3764 = vmatprep.subr.bf16.mxu0 %v13896_v4  ;;  %v13942_v21 = vld [vmem:[%s19647_s1 + $0xc48] ss:$16 sps:$4 sm:$0xff]  }
 0x1b5   :  { %3807 = vmatprep.subr.bf16.mxu1 %v13899_v45  ;;  %v13945_v4 = vld [vmem:[%s19647_s1 + $0xe48] ss:$16 sps:$4 sm:$0xff]   ;;  %v13950_v45 = vld [vmem:[%s19647_s1 + $0xc2c] ss:$16 sps:$4 sm:$0xff]  }
 0x1b7   :  { %3765 = vmatpush2.bf16.msra.mxu0 %v13894_v51  ;;  %v13953_v51 = vld [vmem:[%s19647_s1 + $0xe2c] ss:$16 sps:$4 sm:$0xff]  }
 0x1b8   :  { %3808 = vmatpush2.bf16.msra.mxu1 %v13897_v28  ;;  %3766 = vmatprep.subr.bf16.mxu0 %v13902_v29  ;;  %v13948_v28 = vld [vmem:[%s19647_s1 + $0xc28] ss:$16 sps:$4 sm:$0xff]  }
 0x1b9   :  { %3809 = vmatprep.subr.bf16.mxu1 %v13905_v52  ;;  %v13951_v29 = vld [vmem:[%s19647_s1 + $0xe28] ss:$16 sps:$4 sm:$0xff]   ;;  %v13956_v52 = vld [vmem:[%s19647_s1 + $0xc0c] ss:$16 sps:$4 sm:$0xff]  }
 0x1bb   :  { %3767 = vmatpush2.bf16.msra.mxu0 %v13900_v33  ;;  %v13959_v33 = vld [vmem:[%s19647_s1 + $0xe0c] ss:$16 sps:$4 sm:$0xff]  }
 0x1bc   :  { %3810 = vmatpush2.bf16.msra.mxu1 %v13903_v35  ;;  %3768 = vmatprep.subr.bf16.mxu0 %v13908_v36  ;;  %v13954_v35 = vld [vmem:[%s19647_s1 + $0xc08] ss:$16 sps:$4 sm:$0xff]  }
 0x1bd   :  { %3811 = vmatprep.subr.bf16.mxu1 %v13911_v58  ;;  %v13957_v36 = vld [vmem:[%s19647_s1 + $0xe08] ss:$16 sps:$4 sm:$0xff]   ;;  %v13962_v58 = vld [vmem:[%s19647_s1 + $0xdec] ss:$16 sps:$4 sm:$0xff]  }
 0x1bf   :  { %3769 = vmatpush2.bf16.msra.mxu0 %v13906_v59  ;;  %v13965_v59 = vld [vmem:[%s19647_s1 + $0xfec] ss:$16 sps:$4 sm:$0xff]  }
 0x1c0   :  { %3812 = vmatpush2.bf16.msra.mxu1 %v13909_v60  ;;  %3824 = vmatprep.subr.bf16.mxu0 %v13914_v61  ;;  %v16107_v60 = vsub.s32 1, %v15335_v63  ;;  %v13960_v61 = vld [vmem:[%s19647_s1 + $0xde8] ss:$16 sps:$4 sm:$0xff]  }
 0x1c1   :  { %3867 = vmatprep.subr.bf16.mxu1 %v13917_v62  ;;  %v13963_v62 = vld [vmem:[%s19647_s1 + $0xfe8] ss:$16 sps:$4 sm:$0xff]  }
 0x1c2   :  { %v3514_v7 = vpop.f32.mrf.mxu0  ;;  %3771 = vmatmul.mubr.bf16.vlgmr.msra.gmra.mxu0 %v15141_v48  ;;  %v13926_v48 = vld [vmem:[%s19647_s1 + $0xcac] ss:$16 sps:$4 sm:$0xff]  }
 0x1c3   :  { %v3557_v12 = vpop.f32.mrf.mxu1  ;;  %3814 = vmatmul.mubr.bf16.vlgmr.msra.gmra.mxu1 %v15145_v49  ;;  %v3515_v41 = vadd.f32 %v3514_v7, %v15819_v42  ;;  %3825 = vmatpush1.bf16.msra.mxu0 %v13912_v0  ;;  %v13929_v49 = vld [vmem:[%s19647_s1 + $0xeac] ss:$16 sps:$4 sm:$0xff]  }
 0x1c4   :  { %3868 = vmatpush1.bf16.msra.mxu1 %v13915_v3  ;;  %v16019_v14 = vpop.f32.mrf.mxu0  ;;  %3826 = vmatprep.subr.bf16.mxu0 %v13920_v24  ;;  %v13968_v0 = vld [vmem:[%s19647_s1 + $0xdcc] ss:$16 sps:$4 sm:$0xff]   ;;  %v16124_v24 = vld [vmem:[%s19649_s2] sm:$0xf] }
 0x1c5   :  { %v16021_v44 = vpop.f32.mrf.mxu1  ;;  %3869 = vmatprep.subr.bf16.mxu1 %v13923_v6  ;;  %v3558_v42 = vadd.f32 %v3557_v12, %v3515_v41  ;;  %3856 = vmatprep.mubr.bf16.mxu0 %v15163_v30  ;;  %v13932_v30 = vld [vmem:[%s19647_s1 + $0xc8c] ss:$16 sps:$4 sm:$0xff]   ;;  %v569_v6 = vrot.slane %v16124_v24, %v16107_v60  ;;  %v13966_v12 = vld [vmem:[%s19647_s1 + $0xdc8] ss:$16 sps:$4 sm:$0xff]  }
 0x1c6   :  { %3899 = vmatprep.mubr.bf16.mxu1 %v15167_v31  ;;  %v3518_v46 = vpop.f32.mrf.mxu0  ;;  %v13935_v31 = vld [vmem:[%s19647_s1 + $0xe8c] ss:$16 sps:$4 sm:$0xff]   ;;  %v13969_v41 = vld [vmem:[%s19647_s1 + $0xfc8] ss:$16 sps:$4 sm:$0xff]  }
 0x1c7   :  { %v3519_v47 = vadd.f32 %v3518_v46, %v15836_v57  ;;  %3827 = vmatpush1.bf16.msra.mxu0 %v13918_v43  ;;  %v3561_v16 = vpop.f32.mrf.mxu1  ;;  %v3910_v17 = vmax.f32 %v3558_v42, 0.0  ;;  %v13971_v3 = vld [vmem:[%s19647_s1 + $0xfcc] ss:$16 sps:$4 sm:$0xff]   ;;  %v3263_v7 = vadd.f32 %v15580_v54, %v569_v6  ;;  %v13975_v42 = vld [vmem:[%s19647_s1 + $0xfa8] ss:$16 sps:$4 sm:$0xff]  }
 0x1c8   :  { %3870 = vmatpush1.bf16.msra.mxu1 %v13921_v13  ;;  %3828 = vmatprep.subr.bf16.mxu0 %v13926_v48  ;;  %v13974_v43 = vld [vmem:[%s19647_s1 + $0xdac] ss:$16 sps:$4 sm:$0xff]   ;;  %v3259_v13 = vadd.f32 %v15390_v18, %v569_v6  ;;  %v14109_v6 = vld [vmem:[%s19650_s3 + $0x2c4] ss:$16 sps:$4 sm:$0xff]  }
 0x1c9   :  { %3871 = vmatprep.subr.bf16.mxu1 %v13929_v49  ;;  %v3562_v57 = vadd.f32 %v3561_v16, %v3519_v47  ;;  %v13977_v54 = vld [vmem:[%s19647_s1 + $0xfac] ss:$16 sps:$4 sm:$0xff]   ;;  %v3306_v48 = vadd.f32 %v15582_v56, %v3263_v7  ;;  %v13972_v49 = vld [vmem:[%s19647_s1 + $0xda8] ss:$16 sps:$4 sm:$0xff]   ;;  %v14107_v7 = vld [vmem:[%s19650_s3 + $0x2c0] ss:$16 sps:$4 sm:$0xff]  }
 0x1ca   :  { %v13980_v46 = vld [vmem:[%s19647_s1 + $0xd8c] ss:$16 sps:$4 sm:$0xff]   ;;  %v3302_v56 = vadd.f32 %v15392_v19, %v3259_v13  ;;  %v13981_v16 = vld [vmem:[%s19647_s1 + $0xf88] ss:$16 sps:$4 sm:$0xff]   ;;  %v14023_v13 = vld [vmem:[%s19650_s3 + $0x40] ss:$16 sps:$4 sm:$0xff]  }
 0x1cb   :  { %v3914_v22 = vmax.f32 %v3562_v57, 0.0  ;;  %3829 = vmatpush1.bf16.msra.mxu0 %v13924_v50  ;;  %v13983_v18 = vld [vmem:[%s19647_s1 + $0xf8c] ss:$16 sps:$4 sm:$0xff]   ;;  %v3349_v47 = vadd.f32 %v15793_v25, %v3306_v48  ;;  %v13984_v57 = vld [vmem:[%s19647_s1 + $0xd68] ss:$16 sps:$4 sm:$0xff]  }
 0x1cc   :  { %3872 = vmatpush1.bf16.msra.mxu1 %v13927_v15  ;;  %3830 = vmatprep.subr.bf16.mxu0 %v13932_v30  ;;  %v3345_v50 = vadd.f32 %v15599_v1, %v3302_v56  ;;  %v13978_v15 = vld [vmem:[%s19647_s1 + $0xd88] ss:$16 sps:$4 sm:$0xff]   ;;  %v13986_v19 = vld [vmem:[%s19647_s1 + $0xd6c] ss:$16 sps:$4 sm:$0xff]   ;;  %v14115_v48 = vld [vmem:[%s19650_s3 + $0x284] ss:$16 sps:$4 sm:$0xff]  }
 0x1cd   :  { %3873 = vmatprep.subr.bf16.mxu1 %v13935_v31  ;;  %v16056_v53 = vpack.c.bf16 %v3914_v22, %v3910_v17  ;;  %v13989_v1 = vld [vmem:[%s19647_s1 + $0xf6c] ss:$16 sps:$4 sm:$0xff]   ;;  %v3392_v25 = vadd.f32 %v15795_v26, %v3349_v47  ;;  %v13987_v17 = vld [vmem:[%s19647_s1 + $0xf68] ss:$16 sps:$4 sm:$0xff]   ;;  %v3520_v22 = vpop.f32.mrf.mxu0  ;;  %v14031_v56 = vld [vmem:[%s19650_s3 + $0x4] ss:$16 sps:$4 sm:$0xff]  }
 0x1ce   :  { %v3388_v30 = vadd.f32 %v15601_v2, %v3345_v50  ;;  %v13992_v26 = vld [vmem:[%s19647_s1 + $0xd4c] ss:$16 sps:$4 sm:$0xff]   ;;  %v14116_v47 = vld [vmem:[%s19650_s3 + $0x260] ss:$16 sps:$4 sm:$0xff]  }
 0x1cf   :  { %3831 = vmatpush1.bf16.msra.mxu0 %v13930_v23  ;;  %v3435_v31 = vadd.f32 %v16000_v8, %v3392_v25  ;;  %v13995_v2 = vld [vmem:[%s19647_s1 + $0xf4c] ss:$16 sps:$4 sm:$0xff]   ;;  %v14029_v50 = vld [vmem:[%s19650_s3] ss:$16 sps:$4 sm:$0xff]   ;;  %v14124_v25 = vld [vmem:[%s19650_s3 + $0x224] ss:$16 sps:$4 sm:$0xff]  }
 0x1d0   :  { %3874 = vmatpush1.bf16.msra.mxu1 %v13933_v27  ;;  %3832 = vmatprep.subr.bf16.mxu0 %v13938_v32  ;;  %v3431_v8 = vadd.f32 %v15812_v39, %v3388_v30  ;;  %v13990_v27 = vld [vmem:[%s19647_s1 + $0xd48] ss:$16 sps:$4 sm:$0xff]   ;;  %v14001_v39 = vld [vmem:[%s19647_s1 + $0xf2c] ss:$16 sps:$4 sm:$0xff]   ;;  %v14037_v30 = vld [vmem:[%s19650_s3 + $0x1c4] ss:$16 sps:$4 sm:$0xff]  }
 0x1d1   :  { %3875 = vmatprep.subr.bf16.mxu1 %v13941_v34  ;;  %v3478_v23 = vadd.f32 %v16002_v9, %v3435_v31  ;;  %v13993_v32 = vld [vmem:[%s19647_s1 + $0xf48] ss:$16 sps:$4 sm:$0xff]   ;;  %v13998_v34 = vld [vmem:[%s19647_s1 + $0xd2c] ss:$16 sps:$4 sm:$0xff]   ;;  %v14122_v31 = vld [vmem:[%s19650_s3 + $0x220] ss:$16 sps:$4 sm:$0xff]  }
 0x1d2   :  { %v3474_v9 = vadd.f32 %v15814_v40, %v3431_v8  ;;  %v14004_v40 = vld [vmem:[%s19647_s1 + $0xd0c] ss:$16 sps:$4 sm:$0xff]   ;;  %v14038_v8 = vld [vmem:[%s19650_s3 + $0x1a0] ss:$16 sps:$4 sm:$0xff]  }
 0x1d3   :  { %3833 = vmatpush1.bf16.msra.mxu0 %v13936_v55  ;;  %v3521_v55 = vadd.f32 %v3520_v22, %v3478_v23  ;;  %v14130_v22 = vld [vmem:[%s19650_s3 + $0x3e4] ss:$16 sps:$4 sm:$0xff]  }
 0x1d4   :  { %3876 = vmatpush1.bf16.msra.mxu1 %v13939_v37  ;;  %3834 = vmatprep.subr.bf16.mxu0 %v13944_v38  ;;  %v3517_v37 = vadd.f32 %v16019_v14, %v3474_v9  ;;  %v13996_v38 = vld [vmem:[%s19647_s1 + $0xd28] ss:$16 sps:$4 sm:$0xff]   ;;  %v14007_v14 = vld [vmem:[%s19647_s1 + $0xf0c] ss:$16 sps:$4 sm:$0xff]   ;;  %v14043_v23 = vld [vmem:[%s19650_s3 + $0x184] ss:$16 sps:$4 sm:$0xff]  }
 0x1d5   :  { %3877 = vmatprep.subr.bf16.mxu1 %v13947_v20  ;;  %v13999_v20 = vld [vmem:[%s19647_s1 + $0xf28] ss:$16 sps:$4 sm:$0xff]   ;;  %v14131_v9 = vld [vmem:[%s19650_s3 + $0x3c0] ss:$16 sps:$4 sm:$0xff]  }
 0x1d7   :  { %3835 = vmatpush1.bf16.msra.mxu0 %v13942_v21  ;;  %v3563_v21 = vpop.f32.mrf.mxu1 }
 0x1d8   :  { %3878 = vmatpush1.bf16.msra.mxu1 %v13945_v4  ;;  %3836 = vmatprep.subr.bf16.mxu0 %v13950_v45  ;;  %v3564_v4 = vadd.f32 %v3563_v21, %v3521_v55  ;;  %v3560_v45 = vadd.f32 %v16021_v44, %v3517_v37  ;;  %v14008_v44 = vld [vmem:[%s19650_s3 + $0xe0] ss:$16 sps:$4 sm:$0xff]   ;;  %v14136_v37 = vld [vmem:[%s19650_s3 + $0x3a4] ss:$16 sps:$4 sm:$0xff]  }
 0x1d9   :  { %3879 = vmatprep.subr.bf16.mxu1 %v13953_v51  ;;  %v14002_v51 = vld [vmem:[%s19647_s1 + $0xd08] ss:$16 sps:$4 sm:$0xff]   ;;  %v14044_v55 = vld [vmem:[%s19650_s3 + $0x160] ss:$16 sps:$4 sm:$0xff]  }
 0x1da   :  { %v14047_v21 = vld [vmem:[%s19650_s3 + $0x140] ss:$16 sps:$4 sm:$0xff]  }
 0x1db   :  { %3837 = vmatpush1.bf16.msra.mxu0 %v13948_v28  ;;  %v14005_v28 = vld [vmem:[%s19647_s1 + $0xf08] ss:$16 sps:$4 sm:$0xff]  }
 0x1dc   :  { %3880 = vmatpush1.bf16.msra.mxu1 %v13951_v29  ;;  %3838 = vmatprep.subr.bf16.mxu0 %v13956_v52  ;;  %v14010_v29 = vld [vmem:[%s19650_s3 + $0xe4] ss:$16 sps:$4 sm:$0xff]   ;;  %v3915_v52 = vmax.f32 %v3564_v4, 0.0  ;;  %v14137_v4 = vld [vmem:[%s19650_s3 + $0x380] ss:$16 sps:$4 sm:$0xff]  }
 0x1dd   :  { %3881 = vmatprep.subr.bf16.mxu1 %v13959_v33  ;;  %v3911_v33 = vmax.f32 %v3560_v45, 0.0  ;;  %v14050_v45 = vld [vmem:[%s19650_s3 + $0x120] ss:$16 sps:$4 sm:$0xff]  }
 0x1df   :  { %3839 = vmatpush1.bf16.msra.mxu0 %v13954_v35  ;;  %v14013_v35 = vld [vmem:[%s19650_s3 + $0xc4] ss:$16 sps:$4 sm:$0xff]  }
 0x1e0   :  { %3882 = vmatpush1.bf16.msra.mxu1 %v13957_v36  ;;  %3840 = vmatprep.subr.bf16.mxu0 %v13962_v58  ;;  %v16229_v36 = vpack.c.bf16 %v3915_v52, %v3911_v33  ;;  %v14011_v58 = vld [vmem:[%s19650_s3 + $0xc0] ss:$16 sps:$4 sm:$0xff]   ;;  %v14058_v33 = vld [vmem:[%s19650_s3 + $0xec] ss:$16 sps:$4 sm:$0xff]  }
 0x1e1   :  { %3883 = vmatprep.subr.bf16.mxu1 %v13965_v59  ;;  %v14016_v59 = vld [vmem:[%s19650_s3 + $0xa4] ss:$16 sps:$4 sm:$0xff]   ;;  %v14053_v52 = vld [vmem:[%s19650_s3 + $0x100] ss:$16 sps:$4 sm:$0xff]  }
 0x1e3   :  { %3841 = vmatpush2.bf16.msra.mxu0 %v13960_v61  ;;  %v14014_v61 = vld [vmem:[%s19650_s3 + $0xa0] ss:$16 sps:$4 sm:$0xff]  }
 0x1e4   :  { %3884 = vmatpush2.bf16.msra.mxu1 %v13963_v62  ;;  %3842 = vmatprep.subr.bf16.mxu0 %v13968_v0  ;;  %v14104_v62 = vld [vmem:[%s19650_s3 + $0x2e0] ss:$16 sps:$4 sm:$0xff]   ;;  %v14106_v0 = vld [vmem:[%s19650_s3 + $0x2e4] ss:$16 sps:$4 sm:$0xff]  }
 0x1e5   :  { %3885 = vmatprep.subr.bf16.mxu1 %v13971_v3  ;;  %v14022_v3 = vld [vmem:[%s19650_s3 + $0x64] ss:$16 sps:$4 sm:$0xff]  }
 0x1e7   :  { %3843 = vmatpush2.bf16.msra.mxu0 %v13966_v12  ;;  %v14020_v12 = vld [vmem:[%s19650_s3 + $0x60] ss:$16 sps:$4 sm:$0xff]  }
 0x1e8   :  { %3886 = vmatpush2.bf16.msra.mxu1 %v13969_v41  ;;  %3844 = vmatprep.subr.bf16.mxu0 %v13974_v43  ;;  %v14112_v41 = vld [vmem:[%s19650_s3 + $0x2a4] ss:$16 sps:$4 sm:$0xff]  }
 0x1e9   :  { %3887 = vmatprep.subr.bf16.mxu1 %v13977_v54  ;;  %v14025_v43 = vld [vmem:[%s19650_s3 + $0x44] ss:$16 sps:$4 sm:$0xff]   ;;  %v14110_v54 = vld [vmem:[%s19650_s3 + $0x2a0] ss:$16 sps:$4 sm:$0xff]  }
 0x1eb   :  { %3845 = vmatpush2.bf16.msra.mxu0 %v13972_v49  ;;  %v14028_v49 = vld [vmem:[%s19650_s3 + $0x24] ss:$16 sps:$4 sm:$0xff]  }
 0x1ec   :  { %3888 = vmatpush2.bf16.msra.mxu1 %v13975_v42  ;;  %3846 = vmatprep.subr.bf16.mxu0 %v13980_v46  ;;  %v14113_v42 = vld [vmem:[%s19650_s3 + $0x280] ss:$16 sps:$4 sm:$0xff]  }
 0x1ed   :  { %3889 = vmatprep.subr.bf16.mxu1 %v13983_v18  ;;  %v14026_v46 = vld [vmem:[%s19650_s3 + $0x20] ss:$16 sps:$4 sm:$0xff]   ;;  %v14118_v18 = vld [vmem:[%s19650_s3 + $0x264] ss:$16 sps:$4 sm:$0xff]  }
 0x1ef   :  { %3847 = vmatpush2.bf16.msra.mxu0 %v13978_v15  ;;  %v14121_v15 = vld [vmem:[%s19650_s3 + $0x244] ss:$16 sps:$4 sm:$0xff]  }
 0x1f0   :  { %3890 = vmatpush2.bf16.msra.mxu1 %v13981_v16  ;;  %3848 = vmatprep.subr.bf16.mxu0 %v13986_v19  ;;  %v14034_v16 = vld [vmem:[%s19650_s3 + $0x1e4] ss:$16 sps:$4 sm:$0xff]   ;;  %v14119_v19 = vld [vmem:[%s19650_s3 + $0x240] ss:$16 sps:$4 sm:$0xff]  }
 0x1f1   :  { %3891 = vmatprep.subr.bf16.mxu1 %v13989_v1  ;;  %v14032_v1 = vld [vmem:[%s19650_s3 + $0x1e0] ss:$16 sps:$4 sm:$0xff]  }
 0x1f3   :  { %3849 = vmatpush2.bf16.msra.mxu0 %v13984_v57  ;;  %v14035_v57 = vld [vmem:[%s19650_s3 + $0x1c0] ss:$16 sps:$4 sm:$0xff]  }
 0x1f4   :  { %3892 = vmatpush2.bf16.msra.mxu1 %v13987_v17  ;;  %3850 = vmatprep.subr.bf16.mxu0 %v13992_v26  ;;  %v14127_v17 = vld [vmem:[%s19650_s3 + $0x204] ss:$16 sps:$4 sm:$0xff]  }
 0x1f5   :  { %3893 = vmatprep.subr.bf16.mxu1 %v13995_v2  ;;  %v14040_v26 = vld [vmem:[%s19650_s3 + $0x1a4] ss:$16 sps:$4 sm:$0xff]   ;;  %v14125_v2 = vld [vmem:[%s19650_s3 + $0x200] ss:$16 sps:$4 sm:$0xff]  }
 0x1f7   :  { %3851 = vmatpush2.bf16.msra.mxu0 %v13990_v27  ;;  %v14128_v27 = vld [vmem:[%s19650_s3 + $0x3e0] ss:$16 sps:$4 sm:$0xff]  }
 0x1f8   :  { %3894 = vmatpush2.bf16.msra.mxu1 %v13993_v32  ;;  %3852 = vmatprep.subr.bf16.mxu0 %v13998_v34  ;;  %v14041_v32 = vld [vmem:[%s19650_s3 + $0x180] ss:$16 sps:$4 sm:$0xff]   ;;  %v14133_v34 = vld [vmem:[%s19650_s3 + $0x3c4] ss:$16 sps:$4 sm:$0xff]  }
 0x1f9   :  { %3895 = vmatprep.subr.bf16.mxu1 %v14001_v39  ;;  %v14046_v39 = vld [vmem:[%s19650_s3 + $0x164] ss:$16 sps:$4 sm:$0xff]  }
 0x1fb   :  { %3853 = vmatpush2.bf16.msra.mxu0 %v13996_v38  ;;  %v14049_v38 = vld [vmem:[%s19650_s3 + $0x144] ss:$16 sps:$4 sm:$0xff]  }
 0x1fc   :  { %3896 = vmatpush2.bf16.msra.mxu1 %v13999_v20  ;;  %3854 = vmatprep.subr.bf16.mxu0 %v14004_v40  ;;  %v14134_v20 = vld [vmem:[%s19650_s3 + $0x3a0] ss:$16 sps:$4 sm:$0xff]   ;;  %v14139_v40 = vld [vmem:[%s19650_s3 + $0x384] ss:$16 sps:$4 sm:$0xff]  }
 0x1fd   :  { %3897 = vmatprep.subr.bf16.mxu1 %v14007_v14  ;;  %v14052_v14 = vld [vmem:[%s19650_s3 + $0x124] ss:$16 sps:$4 sm:$0xff]  }
 0x1ff   :  { %3855 = vmatpush2.bf16.msra.mxu0 %v14002_v51  ;;  %v14142_v51 = vld [vmem:[%s19650_s3 + $0x364] ss:$16 sps:$4 sm:$0xff]  }
 0x200   :  { %3898 = vmatpush2.bf16.msra.mxu1 %v14005_v28  ;;  %4712 = vmatprep.subr.bf16.mxu0 %v14010_v29  ;;  %v14055_v28 = vld [vmem:[%s19650_s3 + $0x104] ss:$16 sps:$4 sm:$0xff]   ;;  %v14140_v29 = vld [vmem:[%s19650_s3 + $0x360] ss:$16 sps:$4 sm:$0xff]  }
 0x201   :  { %4755 = vmatprep.subr.bf16.mxu1 %v14106_v0  ;;  %v14146_v0 = vld [vmem:[%s19650_s3 + $0x320] ss:$16 sps:$4 sm:$0xff]  }
 0x202   :  { %3857 = vmatmul.mubr.bf16.vlgmr.msra.gmra.mxu0 %v15363_v10  ;;  %v14019_v10 = vld [vmem:[%s19650_s3 + $0x84] ss:$16 sps:$4 sm:$0xff]  }
 0x203   :  { %3900 = vmatmul.mubr.bf16.vlgmr.msra.gmra.mxu1 %v15367_v11  ;;  %4713 = vmatpush1.bf16.msra.mxu0 %v14008_v44  ;;  %v14017_v11 = vld [vmem:[%s19650_s3 + $0x80] ss:$16 sps:$4 sm:$0xff]   ;;  %v14056_v44 = vld [vmem:[%s19650_s3 + $0xe8] ss:$16 sps:$4 sm:$0xff]  }
 0x204   :  { %4744 = vmatprep.mubr.bf16.mxu0 %v16229_v36  ;;  %4714 = vmatprep.subr.bf16.mxu0 %v14013_v35  ;;  %v14061_v35 = vld [vmem:[%s19650_s3 + $0xcc] ss:$16 sps:$4 sm:$0xff]  }
 0x205   :  { %4756 = vmatpush1.bf16.msra.mxu1 %v14104_v62  ;;  %v14067_v62 = vld [vmem:[%s19650_s3 + $0x8c] ss:$16 sps:$4 sm:$0xff]  }
 0x206   :  { %4757 = vmatprep.subr.bf16.mxu1 %v14109_v6  ;;  %v14151_v6 = vld [vmem:[%s19650_s3 + $0x304] ss:$16 sps:$4 sm:$0xff]  }
 0x207   :  { %4715 = vmatpush1.bf16.msra.mxu0 %v14011_v58  ;;  %v14059_v58 = vld [vmem:[%s19650_s3 + $0xc8] ss:$16 sps:$4 sm:$0xff]  }
 0x208   :  { %4716 = vmatprep.subr.bf16.mxu0 %v14016_v59  ;;  %v14145_v59 = vld [vmem:[%s19650_s3 + $0x344] ss:$16 sps:$4 sm:$0xff]  }
 0x209   :  { %4758 = vmatpush1.bf16.msra.mxu1 %v14107_v7  ;;  %v14070_v7 = vld [vmem:[%s19650_s3 + $0x6c] ss:$16 sps:$4 sm:$0xff]  }
 0x20a   :  { %4759 = vmatprep.subr.bf16.mxu1 %v14112_v41  ;;  %v14068_v41 = vld [vmem:[%s19650_s3 + $0x68] ss:$16 sps:$4 sm:$0xff]  }
 0x20b   :  { %4717 = vmatpush1.bf16.msra.mxu0 %v14014_v61  ;;  %v14064_v61 = vld [vmem:[%s19650_s3 + $0xac] ss:$16 sps:$4 sm:$0xff]  }
 0x20c   :  { %4718 = vmatprep.subr.bf16.mxu0 %v14019_v10  ;;  %v14143_v10 = vld [vmem:[%s19650_s3 + $0x340] ss:$16 sps:$4 sm:$0xff]  }
 0x20d   :  { %4760 = vmatpush1.bf16.msra.mxu1 %v14110_v54  ;;  %v14073_v54 = vld [vmem:[%s19650_s3 + $0x4c] ss:$16 sps:$4 sm:$0xff]  }
 0x20e   :  { %4761 = vmatprep.subr.bf16.mxu1 %v14115_v48  ;;  %v14076_v48 = vld [vmem:[%s19650_s3 + $0x2c] ss:$16 sps:$4 sm:$0xff]  }
 0x20f   :  { %4719 = vmatpush1.bf16.msra.mxu0 %v14017_v11  ;;  %v14148_v11 = vld [vmem:[%s19650_s3 + $0x324] ss:$16 sps:$4 sm:$0xff]  }
 0x210   :  { %4720 = vmatprep.subr.bf16.mxu0 %v14022_v3  ;;  %v14065_v3 = vld [vmem:[%s19650_s3 + $0x88] ss:$16 sps:$4 sm:$0xff]  }
 0x211   :  { %4762 = vmatpush1.bf16.msra.mxu1 %v14113_v42  ;;  %v14079_v42 = vld [vmem:[%s19650_s3 + $0xc] ss:$16 sps:$4 sm:$0xff]  }
 0x212   :  { %4763 = vmatprep.subr.bf16.mxu1 %v14118_v18  ;;  %v14082_v18 = vld [vmem:[%s19650_s3 + $0x1ec] ss:$16 sps:$4 sm:$0xff]  }
 0x213   :  { %4721 = vmatpush1.bf16.msra.mxu0 %v14020_v12  ;;  %v14149_v12 = vld [vmem:[%s19650_s3 + $0x300] ss:$16 sps:$4 sm:$0xff]  }
 0x214   :  { %4722 = vmatprep.subr.bf16.mxu0 %v14025_v43  ;;  %v14154_v43 = vld [vmem:[%s19650_s3 + $0x2ec] ss:$16 sps:$4 sm:$0xff]  }
 0x215   :  { %4764 = vmatpush1.bf16.msra.mxu1 %v14116_v47  ;;  %v14085_v47 = vld [vmem:[%s19650_s3 + $0x1cc] ss:$16 sps:$4 sm:$0xff]  }
 0x216   :  { %4765 = vmatprep.subr.bf16.mxu1 %v14121_v15  ;;  %v14088_v15 = vld [vmem:[%s19650_s3 + $0x1ac] ss:$16 sps:$4 sm:$0xff]  }
 0x217   :  { %4723 = vmatpush1.bf16.msra.mxu0 %v14023_v13  ;;  %v14071_v13 = vld [vmem:[%s19650_s3 + $0x48] ss:$16 sps:$4 sm:$0xff]  }
 0x218   :  { %4724 = vmatprep.subr.bf16.mxu0 %v14028_v49  ;;  %v14074_v49 = vld [vmem:[%s19650_s3 + $0x28] ss:$16 sps:$4 sm:$0xff]  }
 0x219   :  { %4766 = vmatpush1.bf16.msra.mxu1 %v14119_v19  ;;  %v14091_v19 = vld [vmem:[%s19650_s3 + $0x18c] ss:$16 sps:$4 sm:$0xff]  }
 0x21a   :  { %4767 = vmatprep.subr.bf16.mxu1 %v14124_v25  ;;  %v14094_v25 = vld [vmem:[%s19650_s3 + $0x16c] ss:$16 sps:$4 sm:$0xff]  }
 0x21b   :  { %4725 = vmatpush1.bf16.msra.mxu0 %v14026_v46  ;;  %v14077_v46 = vld [vmem:[%s19650_s3 + $0x8] ss:$16 sps:$4 sm:$0xff]  }
 0x21c   :  { %4726 = vmatprep.subr.bf16.mxu0 %v14031_v56  ;;  %v14080_v56 = vld [vmem:[%s19650_s3 + $0x1e8] ss:$16 sps:$4 sm:$0xff]  }
 0x21d   :  { %4768 = vmatpush1.bf16.msra.mxu1 %v14122_v31  ;;  %v14097_v31 = vld [vmem:[%s19650_s3 + $0x14c] ss:$16 sps:$4 sm:$0xff]  }
 0x21e   :  { %4769 = vmatprep.subr.bf16.mxu1 %v14127_v17  ;;  %v14100_v17 = vld [vmem:[%s19650_s3 + $0x12c] ss:$16 sps:$4 sm:$0xff]  }
 0x21f   :  { %4727 = vmatpush1.bf16.msra.mxu0 %v14029_v50  ;;  %v14083_v50 = vld [vmem:[%s19650_s3 + $0x1c8] ss:$16 sps:$4 sm:$0xff]  }
 0x220   :  { %4728 = vmatprep.subr.bf16.mxu0 %v14034_v16  ;;  %v14086_v16 = vld [vmem:[%s19650_s3 + $0x1a8] ss:$16 sps:$4 sm:$0xff]  }
 0x221   :  { %4770 = vmatpush1.bf16.msra.mxu1 %v14125_v2  ;;  %v14103_v2 = vld [vmem:[%s19650_s3 + $0x10c] ss:$16 sps:$4 sm:$0xff]  }
 0x222   :  { %4771 = vmatprep.subr.bf16.mxu1 %v14130_v22  ;;  %v3600_v22 = vpop.f32.mrf.mxu0 }
 0x223   :  { %4729 = vmatpush2.bf16.msra.mxu0 %v14032_v1  ;;  %v14089_v1 = vld [vmem:[%s19650_s3 + $0x188] ss:$16 sps:$4 sm:$0xff]  }
 0x224   :  { %4730 = vmatprep.subr.bf16.mxu0 %v14037_v30  ;;  %v14092_v30 = vld [vmem:[%s19650_s3 + $0x168] ss:$16 sps:$4 sm:$0xff]  }
 0x225   :  { %4772 = vmatpush2.bf16.msra.mxu1 %v14128_v27  ;;  %v3602_v27 = vpop.f32.mrf.mxu0 }
 0x226   :  { %4773 = vmatprep.subr.bf16.mxu1 %v14133_v34 }
 0x227   :  { %4731 = vmatpush2.bf16.msra.mxu0 %v14035_v57  ;;  %v14095_v57 = vld [vmem:[%s19650_s3 + $0x148] ss:$16 sps:$4 sm:$0xff]   ;;  %v3604_v34 = vpop.f32.mrf.mxu0 }
 0x228   :  { %4732 = vmatprep.subr.bf16.mxu0 %v14040_v26  ;;  %v14098_v26 = vld [vmem:[%s19650_s3 + $0x128] ss:$16 sps:$4 sm:$0xff]  }
 0x229   :  { %4774 = vmatpush2.bf16.msra.mxu1 %v14131_v9  ;;  %v3606_v9 = vpop.f32.mrf.mxu0 }
 0x22a   :  { %4775 = vmatprep.subr.bf16.mxu1 %v14136_v37 }
 0x22b   :  { %4733 = vmatpush2.bf16.msra.mxu0 %v14038_v8  ;;  %v14101_v8 = vld [vmem:[%s19650_s3 + $0x108] ss:$16 sps:$4 sm:$0xff]  }
 0x22c   :  { %4734 = vmatprep.subr.bf16.mxu0 %v14043_v23  ;;  %v3643_v23 = vpop.f32.mrf.mxu1 }
 0x22d   :  { %4776 = vmatpush2.bf16.msra.mxu1 %v14134_v20 }
 0x22e   :  { %4777 = vmatprep.subr.bf16.mxu1 %v14139_v40  ;;  %v16520_v40 = vsub.s32 3, %v15335_v63 }
 0x22f   :  { %4735 = vmatpush2.bf16.msra.mxu0 %v14041_v32  ;;  %v3645_v32 = vpop.f32.mrf.mxu1 }
 0x230   :  { %4736 = vmatprep.subr.bf16.mxu0 %v14046_v39 }
 0x231   :  { %4778 = vmatpush2.bf16.msra.mxu1 %v14137_v4  ;;  %v3647_v39 = vpop.f32.mrf.mxu1 }
 0x232   :  { %4779 = vmatprep.subr.bf16.mxu1 %v14142_v51 }
 0x233   :  { %4737 = vmatpush2.bf16.msra.mxu0 %v14044_v55  ;;  %v3649_v55 = vpop.f32.mrf.mxu1 }
 0x234   :  { %4738 = vmatprep.subr.bf16.mxu0 %v14049_v38 }
 0x235   :  { %4780 = vmatpush2.bf16.msra.mxu1 %v14140_v29 }
 0x236   :  { %4781 = vmatprep.subr.bf16.mxu1 %v14145_v59 }
 0x237   :  { %4739 = vmatpush2.bf16.msra.mxu0 %v14047_v21 }
 0x238   :  { %4740 = vmatprep.subr.bf16.mxu0 %v14052_v14  ;;  %v16523_v14 = vsub.s32 2, %v15335_v63 }
 0x239   :  { %4782 = vmatpush2.bf16.msra.mxu1 %v14143_v10 }
 0x23a   :  { %4783 = vmatprep.subr.bf16.mxu1 %v14148_v11  ;;  %v573_v51 = vrot.slane %v16124_v24, %v16523_v14 }
 0x23b   :  { %4741 = vmatpush2.bf16.msra.mxu0 %v14050_v45  ;;  %v577_v45 = vrot.slane %v16124_v24, %v16520_v40 }
 0x23c   :  { %4742 = vmatprep.subr.bf16.mxu0 %v14055_v28 }
 0x23d   :  { %4784 = vmatpush2.bf16.msra.mxu1 %v14146_v0 }
 0x23e   :  { %4785 = vmatprep.subr.bf16.mxu1 %v14151_v6 }
 0x23f   :  { %4743 = vmatpush2.bf16.msra.mxu0 %v14053_v52  ;;  %v3603_v52 = vadd.f32 %v3602_v27, %v577_v45 }
 0x240   :  { %4798 = vmatprep.subr.bf16.mxu0 %v14058_v33  ;;  %v3601_v33 = vadd.f32 %v3600_v22, %v573_v51 }
 0x241   :  { %4786 = vmatpush2.bf16.msra.mxu1 %v14149_v12  ;;  %v3646_v59 = vadd.f32 %v3645_v32, %v3603_v52  ;;  %v14157_v52 = vld [vmem:[%s19650_s3 + $0x2cc] ss:$16 sps:$4 sm:$0xff]  }
 0x242   :  { %4745 = vmatmul.mubr.bf16.vlgmr.msra.gmra.mxu0 %v16056_v53  ;;  %4841 = vmatprep.subr.bf16.mxu1 %v14154_v43  ;;  %v3686_v37 = vpop.f32.mrf.mxu0  ;;  %v3644_v10 = vadd.f32 %v3643_v23, %v3601_v33  ;;  %v14208_v33 = vld [vmem:[%s19651_s5 + $0xa4] ss:$16 sps:$4 sm:$0xff]  }
 0x243   :  { %4799 = vmatpush1.bf16.msra.mxu0 %v14056_v44  ;;  %4830 = vmatprep.mubr.bf16.mxu0 %v16229_v36  ;;  %v14062_v36 = vld [vmem:[%s19650_s3 + $0xa8] ss:$16 sps:$4 sm:$0xff]   ;;  %v3729_v38 = vpop.f32.mrf.mxu1 }
 0x244   :  { %4800 = vmatprep.subr.bf16.mxu0 %v14061_v35  ;;  %v3688_v20 = vpop.f32.mrf.mxu0 }
 0x245   :  { %v3731_v21 = vpop.f32.mrf.mxu1  ;;  %v3689_v0 = vadd.f32 %v3688_v20, %v3646_v59  ;;  %v14205_v20 = vld [vmem:[%s19651_s5 + $0xc4] ss:$16 sps:$4 sm:$0xff]   ;;  %v14160_v59 = vld [vmem:[%s19650_s3 + $0x2ac] ss:$16 sps:$4 sm:$0xff]  }
 0x246   :  { %v3690_v4 = vpop.f32.mrf.mxu0 }
 0x247   :  { %4801 = vmatpush1.bf16.msra.mxu0 %v14059_v58  ;;  %v3605_v58 = vadd.f32 %v3604_v34, %v573_v51  ;;  %v3732_v24 = vadd.f32 %v3731_v21, %v3689_v0  ;;  %v14166_v0 = vld [vmem:[%s19650_s3 + $0x26c] ss:$16 sps:$4 sm:$0xff]  }
 0x248   :  { %4802 = vmatprep.subr.bf16.mxu0 %v14064_v61  ;;  %v3692_v28 = vpop.f32.mrf.mxu0  ;;  %v3607_v61 = vadd.f32 %v3606_v9, %v577_v45  ;;  %v14200_v9 = vld [vmem:[%s19651_s5 + $0xe0] ss:$16 sps:$4 sm:$0xff]  }
 0x249   :  { %v14203_v45 = vld [vmem:[%s19651_s5 + $0xc0] ss:$16 sps:$4 sm:$0xff]  }
 0x24a   :  { %v3650_v6 = vadd.f32 %v3649_v55, %v3607_v61  ;;  %v14158_v61 = vld [vmem:[%s19650_s3 + $0x2a8] ss:$16 sps:$4 sm:$0xff]  }
 0x24b   :  { %4803 = vmatpush1.bf16.msra.mxu0 %v14062_v36 }
 0x24c   :  { %4804 = vmatprep.subr.bf16.mxu0 %v14067_v62  ;;  %v3648_v62 = vadd.f32 %v3647_v39, %v3605_v58  ;;  %v3693_v43 = vadd.f32 %v3692_v28, %v3650_v6  ;;  %v14152_v28 = vld [vmem:[%s19650_s3 + $0x2e8] ss:$16 sps:$4 sm:$0xff]   ;;  %v14211_v58 = vld [vmem:[%s19651_s5 + $0x84] ss:$16 sps:$4 sm:$0xff]  }
 0x24d   :  { %v14217_v6 = vld [vmem:[%s19651_s5 + $0x44] ss:$16 sps:$4 sm:$0xff]  }
 0x24f   :  { %4805 = vmatpush1.bf16.msra.mxu0 %v14065_v3  ;;  %v3687_v3 = vadd.f32 %v3686_v37, %v3644_v10  ;;  %v14202_v37 = vld [vmem:[%s19651_s5 + $0xe4] ss:$16 sps:$4 sm:$0xff]   ;;  %v14209_v10 = vld [vmem:[%s19651_s5 + $0x80] ss:$16 sps:$4 sm:$0xff]  }
 0x250   :  { %4806 = vmatprep.subr.bf16.mxu0 %v14070_v7  ;;  %v3691_v7 = vadd.f32 %v3690_v4, %v3648_v62  ;;  %v14161_v62 = vld [vmem:[%s19650_s3 + $0x288] ss:$16 sps:$4 sm:$0xff]  }
 0x253   :  { %4807 = vmatpush1.bf16.msra.mxu0 %v14068_v41 }
 0x254   :  { %4808 = vmatprep.subr.bf16.mxu0 %v14073_v54  ;;  %v3730_v54 = vadd.f32 %v3729_v38, %v3687_v3  ;;  %v14212_v3 = vld [vmem:[%s19651_s5 + $0x60] ss:$16 sps:$4 sm:$0xff]  }
 0x257   :  { %4809 = vmatpush1.bf16.msra.mxu0 %v14071_v13 }
 0x258   :  { %4810 = vmatprep.subr.bf16.mxu0 %v14076_v48 }
 0x25b   :  { %4811 = vmatpush1.bf16.msra.mxu0 %v14074_v49 }
 0x25c   :  { %4812 = vmatprep.subr.bf16.mxu0 %v14079_v42 }
 0x25f   :  { %4813 = vmatpush1.bf16.msra.mxu0 %v14077_v46 }
 0x260   :  { %4814 = vmatprep.subr.bf16.mxu0 %v14082_v18 }
 0x263   :  { %4815 = vmatpush2.bf16.msra.mxu0 %v14080_v56 }
 0x264   :  { %4816 = vmatprep.subr.bf16.mxu0 %v14085_v47 }
 0x267   :  { %4817 = vmatpush2.bf16.msra.mxu0 %v14083_v50 }
 0x268   :  { %4818 = vmatprep.subr.bf16.mxu0 %v14088_v15 }
 0x26b   :  { %4819 = vmatpush2.bf16.msra.mxu0 %v14086_v16 }
 0x26c   :  { %4820 = vmatprep.subr.bf16.mxu0 %v14091_v19 }
 0x26f   :  { %4821 = vmatpush2.bf16.msra.mxu0 %v14089_v1 }
 0x270   :  { %4822 = vmatprep.subr.bf16.mxu0 %v14094_v25 }
 0x273   :  { %4823 = vmatpush2.bf16.msra.mxu0 %v14092_v30 }
 0x274   :  { %4824 = vmatprep.subr.bf16.mxu0 %v14097_v31 }
 0x277   :  { %4825 = vmatpush2.bf16.msra.mxu0 %v14095_v57 }
 0x278   :  { %4826 = vmatprep.subr.bf16.mxu0 %v14100_v17 }
 0x27b   :  { %4827 = vmatpush2.bf16.msra.mxu0 %v14098_v26 }
 0x27c   :  { %4828 = vmatprep.subr.bf16.mxu0 %v14103_v2 }
 0x27f   :  { %4829 = vmatpush2.bf16.msra.mxu0 %v14101_v8 }
 0x280   :  { %5686 = vmatprep.subr.bf16.mxu0 %v14202_v37  ;;  %v14194_v37 = vld [vmem:[%s19650_s3 + $0x328] ss:$16 sps:$4 sm:$0xff]  }
 0x282   :  { %4831 = vmatmul.mubr.bf16.vlgmr.msra.gmra.mxu0 %v16056_v53  ;;  %v3733_v53 = vpop.f32.mrf.mxu1  ;;  %v3772_v44 = vpop.f32.mrf.mxu0 }
 0x283   :  { %v3734_v13 = vadd.f32 %v3733_v53, %v3691_v7  ;;  %v3773_v49 = vadd.f32 %v3772_v44, %v3730_v54  ;;  %5687 = vmatpush1.bf16.msra.mxu0 %v14200_v9  ;;  %v14155_v44 = vld [vmem:[%s19650_s3 + $0x2c8] ss:$16 sps:$4 sm:$0xff]   ;;  %v14215_v7 = vld [vmem:[%s19651_s5 + $0x40] ss:$16 sps:$4 sm:$0xff]  }
 0x284   :  { %v3735_v29 = vpop.f32.mrf.mxu1  ;;  %v3774_v36 = vpop.f32.mrf.mxu0  ;;  %5688 = vmatprep.subr.bf16.mxu0 %v14205_v20  ;;  %v14167_v54 = vld [vmem:[%s19650_s3 + $0x248] ss:$16 sps:$4 sm:$0xff]  }
 0x285   :  { %v3775_v48 = vadd.f32 %v3774_v36, %v3732_v24  ;;  %v3736_v18 = vadd.f32 %v3735_v29, %v3693_v43  ;;  %v14214_v36 = vld [vmem:[%s19651_s5 + $0x64] ss:$16 sps:$4 sm:$0xff]   ;;  %v14169_v24 = vld [vmem:[%s19650_s3 + $0x24c] ss:$16 sps:$4 sm:$0xff]   ;;  %v14218_v43 = vld [vmem:[%s19651_s5 + $0x20] ss:$16 sps:$4 sm:$0xff]  }
 0x286   :  { %v3815_v35 = vpop.f32.mrf.mxu1  ;;  %v3776_v12 = vpop.f32.mrf.mxu0  ;;  %v14191_v9 = vld [vmem:[%s19650_s3 + $0x348] ss:$16 sps:$4 sm:$0xff]  }
 0x287   :  { %v3777_v56 = vadd.f32 %v3776_v12, %v3734_v13  ;;  %v3816_v19 = vadd.f32 %v3815_v35, %v3773_v49  ;;  %5689 = vmatpush1.bf16.msra.mxu0 %v14203_v45  ;;  %v14206_v35 = vld [vmem:[%s19651_s5 + $0xa0] ss:$16 sps:$4 sm:$0xff]   ;;  %v14164_v12 = vld [vmem:[%s19650_s3 + $0x268] ss:$16 sps:$4 sm:$0xff]   ;;  %v14223_v13 = vld [vmem:[%s19651_s5 + $0x4] ss:$16 sps:$4 sm:$0xff]  }
 0x288   :  { %v3817_v11 = vpop.f32.mrf.mxu1  ;;  %v3778_v42 = vpop.f32.mrf.mxu0  ;;  %5690 = vmatprep.subr.bf16.mxu0 %v14208_v33  ;;  %v14221_v49 = vld [vmem:[%s19651_s5] ss:$16 sps:$4 sm:$0xff]   ;;  %v14197_v20 = vld [vmem:[%s19650_s3 + $0x308] ss:$16 sps:$4 sm:$0xff]   ;;  %v14253_v33 = vld [vmem:[%s19651_s5 + $0xec] ss:$16 sps:$4 sm:$0xff]  }
 0x289   :  { %v3818_v15 = vadd.f32 %v3817_v11, %v3775_v48  ;;  %v3779_v16 = vadd.f32 %v3778_v42, %v3736_v18  ;;  %v14163_v11 = vld [vmem:[%s19650_s3 + $0x28c] ss:$16 sps:$4 sm:$0xff]   ;;  %v14170_v42 = vld [vmem:[%s19650_s3 + $0x228] ss:$16 sps:$4 sm:$0xff]   ;;  %v14242_v45 = vld [vmem:[%s19651_s5 + $0x120] ss:$16 sps:$4 sm:$0xff]  }
 0x28a   :  { %v3819_v41 = vpop.f32.mrf.mxu1  ;;  %v14172_v48 = vld [vmem:[%s19650_s3 + $0x22c] ss:$16 sps:$4 sm:$0xff]  }
 0x28b   :  { %v3820_v30 = vadd.f32 %v3819_v41, %v3777_v56  ;;  %5691 = vmatpush1.bf16.msra.mxu0 %v14206_v35  ;;  %v14220_v41 = vld [vmem:[%s19651_s5 + $0x24] ss:$16 sps:$4 sm:$0xff]   ;;  %v14175_v18 = vld [vmem:[%s19650_s3 + $0x20c] ss:$16 sps:$4 sm:$0xff]   ;;  %v14224_v56 = vld [vmem:[%s19651_s5 + $0x1e0] ss:$16 sps:$4 sm:$0xff]  }
 0x28c   :  { %v3821_v46 = vpop.f32.mrf.mxu1  ;;  %5692 = vmatprep.subr.bf16.mxu0 %v14211_v58  ;;  %v14256_v35 = vld [vmem:[%s19651_s5 + $0x2c4] ss:$16 sps:$4 sm:$0xff]   ;;  %v14260_v58 = vld [vmem:[%s19651_s5 + $0x2a0] ss:$16 sps:$4 sm:$0xff]  }
 0x28d   :  { %v3822_v2 = vadd.f32 %v3821_v46, %v3779_v16  ;;  %v14226_v46 = vld [vmem:[%s19651_s5 + $0x1e4] ss:$16 sps:$4 sm:$0xff]   ;;  %v14227_v16 = vld [vmem:[%s19651_s5 + $0x1c0] ss:$16 sps:$4 sm:$0xff]  }
 0x28f   :  { %5693 = vmatpush1.bf16.msra.mxu0 %v14209_v10  ;;  %v14268_v10 = vld [vmem:[%s19651_s5 + $0x284] ss:$16 sps:$4 sm:$0xff]  }
 0x290   :  { %5694 = vmatprep.subr.bf16.mxu0 %v14214_v36  ;;  %v14272_v36 = vld [vmem:[%s19651_s5 + $0x260] ss:$16 sps:$4 sm:$0xff]  }
 0x293   :  { %5695 = vmatpush1.bf16.msra.mxu0 %v14212_v3  ;;  %v14284_v3 = vld [vmem:[%s19651_s5 + $0x220] ss:$16 sps:$4 sm:$0xff]  }
 0x294   :  { %5696 = vmatprep.subr.bf16.mxu0 %v14217_v6  ;;  %v14286_v6 = vld [vmem:[%s19651_s5 + $0x224] ss:$16 sps:$4 sm:$0xff]  }
 0x297   :  { %5697 = vmatpush1.bf16.msra.mxu0 %v14215_v7  ;;  %v14290_v7 = vld [vmem:[%s19651_s5 + $0x200] ss:$16 sps:$4 sm:$0xff]  }
 0x298   :  { %5698 = vmatprep.subr.bf16.mxu0 %v14220_v41  ;;  %v14296_v41 = vld [vmem:[%s19651_s5 + $0x3e0] ss:$16 sps:$4 sm:$0xff]  }
 0x29b   :  { %5699 = vmatpush1.bf16.msra.mxu0 %v14218_v43  ;;  %v14302_v43 = vld [vmem:[%s19651_s5 + $0x3c0] ss:$16 sps:$4 sm:$0xff]  }
 0x29c   :  { %5700 = vmatprep.subr.bf16.mxu0 %v14223_v13  ;;  %v14308_v13 = vld [vmem:[%s19651_s5 + $0x3a0] ss:$16 sps:$4 sm:$0xff]  }
 0x29f   :  { %5701 = vmatpush1.bf16.msra.mxu0 %v14221_v49  ;;  %v14314_v49 = vld [vmem:[%s19651_s5 + $0x380] ss:$16 sps:$4 sm:$0xff]  }
 0x2a0   :  { %5702 = vmatprep.subr.bf16.mxu0 %v14226_v46  ;;  %v14320_v46 = vld [vmem:[%s19651_s5 + $0x360] ss:$16 sps:$4 sm:$0xff]  }
 0x2a3   :  { %5703 = vmatpush2.bf16.msra.mxu0 %v14224_v56  ;;  %v14328_v56 = vld [vmem:[%s19651_s5 + $0x344] ss:$16 sps:$4 sm:$0xff]  }
 0x2c2   :  { %v3858_v47 = vpop.f32.mrf.mxu0 }
 0x2c3   :  { %v3901_v50 = vpop.f32.mrf.mxu1  ;;  %v3859_v57 = vadd.f32 %v3858_v47, %v3816_v19  ;;  %v14173_v47 = vld [vmem:[%s19650_s3 + $0x208] ss:$16 sps:$4 sm:$0xff]  }
 0x2c4   :  { %v3860_v1 = vpop.f32.mrf.mxu0  ;;  %v14176_v19 = vld [vmem:[%s19650_s3 + $0x3e8] ss:$16 sps:$4 sm:$0xff]  }
 0x2c5   :  { %v3903_v25 = vpop.f32.mrf.mxu1  ;;  %v3861_v31 = vadd.f32 %v3860_v1, %v3818_v15  ;;  %v3902_v34 = vadd.f32 %v3901_v50, %v3859_v57  ;;  %v14229_v50 = vld [vmem:[%s19651_s5 + $0x1c4] ss:$16 sps:$4 sm:$0xff]   ;;  %v14178_v15 = vld [vmem:[%s19650_s3 + $0x3ec] ss:$16 sps:$4 sm:$0xff]  }
 0x2c6   :  { %v3862_v17 = vpop.f32.mrf.mxu0  ;;  %v14232_v1 = vld [vmem:[%s19651_s5 + $0x1a4] ss:$16 sps:$4 sm:$0xff]   ;;  %5704 = vmatprep.subr.bf16.mxu0 %v14229_v50 }
 0x2c7   :  { %v3905_v26 = vpop.f32.mrf.mxu1  ;;  %v3863_v8 = vadd.f32 %v3862_v17, %v3820_v30  ;;  %v3904_v23 = vadd.f32 %v3903_v25, %v3861_v31  ;;  %v3912_v53 = vmax.f32 %v3902_v34, 0.0  ;;  %v14181_v25 = vld [vmem:[%s19650_s3 + $0x3cc] ss:$16 sps:$4 sm:$0xff]   ;;  %v14230_v30 = vld [vmem:[%s19651_s5 + $0x1a0] ss:$16 sps:$4 sm:$0xff]   ;;  %5705 = vmatpush2.bf16.msra.mxu0 %v14227_v16 }
 0x2c8   :  { %v3864_v22 = vpop.f32.mrf.mxu0  ;;  %v14179_v31 = vld [vmem:[%s19650_s3 + $0x3c8] ss:$16 sps:$4 sm:$0xff]   ;;  %v14235_v57 = vld [vmem:[%s19651_s5 + $0x184] ss:$16 sps:$4 sm:$0xff]   ;;  %v14184_v17 = vld [vmem:[%s19650_s3 + $0x3ac] ss:$16 sps:$4 sm:$0xff]   ;;  %5706 = vmatprep.subr.bf16.mxu0 %v14232_v1 }
 0x2c9   :  { %v3906_v27 = vadd.f32 %v3905_v26, %v3863_v8  ;;  %v3865_v32 = vadd.f32 %v3864_v22, %v3822_v2  ;;  %v3907_v39 = vpop.f32.mrf.mxu1  ;;  %v3913_v21 = vmax.f32 %v3904_v23, 0.0  ;;  %v14233_v26 = vld [vmem:[%s19651_s5 + $0x180] ss:$16 sps:$4 sm:$0xff]   ;;  %v14182_v2 = vld [vmem:[%s19650_s3 + $0x3a8] ss:$16 sps:$4 sm:$0xff]  }
 0x2ca   :  { %v14238_v8 = vld [vmem:[%s19651_s5 + $0x164] ss:$16 sps:$4 sm:$0xff]   ;;  %v14187_v22 = vld [vmem:[%s19650_s3 + $0x38c] ss:$16 sps:$4 sm:$0xff]   ;;  %v14236_v23 = vld [vmem:[%s19651_s5 + $0x160] ss:$16 sps:$4 sm:$0xff]  }
 0x2cb   :  { %v3908_v55 = vadd.f32 %v3907_v39, %v3865_v32  ;;  %v3916_v38 = vmax.f32 %v3906_v27, 0.0  ;;  %5707 = vmatpush2.bf16.msra.mxu0 %v14230_v30  ;;  %v14185_v27 = vld [vmem:[%s19650_s3 + $0x388] ss:$16 sps:$4 sm:$0xff]   ;;  %v14190_v32 = vld [vmem:[%s19650_s3 + $0x36c] ss:$16 sps:$4 sm:$0xff]  }
 0x2cc   :  { %5708 = vmatprep.subr.bf16.mxu0 %v14235_v57  ;;  %v14188_v34 = vld [vmem:[%s19650_s3 + $0x368] ss:$16 sps:$4 sm:$0xff]   ;;  %v14193_v39 = vld [vmem:[%s19650_s3 + $0x34c] ss:$16 sps:$4 sm:$0xff]   ;;  %v14334_v50 = vld [vmem:[%s19651_s5 + $0x324] ss:$16 sps:$4 sm:$0xff]  }
 0x2cd   :  { %v3917_v4 = vmax.f32 %v3908_v55, 0.0  ;;  %v16544_v29 = vpack.c.bf16 %v3916_v38, %v3912_v53  ;;  %v14196_v55 = vld [vmem:[%s19650_s3 + $0x32c] ss:$16 sps:$4 sm:$0xff]   ;;  %v14244_v53 = vld [vmem:[%s19651_s5 + $0x124] ss:$16 sps:$4 sm:$0xff]  }
 0x2ce   :  { %v14199_v38 = vld [vmem:[%s19650_s3 + $0x30c] ss:$16 sps:$4 sm:$0xff]   ;;  %v14340_v16 = vld [vmem:[%s19651_s5 + $0x304] ss:$16 sps:$4 sm:$0xff]  }
 0x2cf   :  { %v3921_v51 = vpack.c.bf16 %v3917_v4, %v3913_v21  ;;  %5709 = vmatpush2.bf16.msra.mxu0 %v14233_v26  ;;  %v14241_v21 = vld [vmem:[%s19651_s5 + $0x144] ss:$16 sps:$4 sm:$0xff]   ;;  %v14239_v4 = vld [vmem:[%s19651_s5 + $0x140] ss:$16 sps:$4 sm:$0xff]   ;;  %v14346_v1 = vld [vmem:[%s19651_s5 + $0x2ec] ss:$16 sps:$4 sm:$0xff]  }
 0x2d0   :  { %5710 = vmatprep.subr.bf16.mxu0 %v14238_v8 }
 0x2d1   :  { %4787 = vmatprep.mubr.bf16.mxu1 %v3921_v51 }
 0x2d2   :  { %4788 = vmatmul.mubr.bf16.vlgmr.msra.gmra.mxu1 %v16544_v29 }
 0x2d3   :  { %4842 = vmatpush1.bf16.msra.mxu1 %v14152_v28  ;;  %4873 = vmatprep.mubr.bf16.mxu1 %v3921_v51  ;;  %v14247_v51 = vld [vmem:[%s19651_s5 + $0x104] ss:$16 sps:$4 sm:$0xff]   ;;  %v14245_v28 = vld [vmem:[%s19651_s5 + $0x100] ss:$16 sps:$4 sm:$0xff]  }
 0x2d4   :  { %4843 = vmatprep.subr.bf16.mxu1 %v14157_v52  ;;  %5711 = vmatpush2.bf16.msra.mxu0 %v14236_v23  ;;  %v14250_v52 = vld [vmem:[%s19651_s5 + $0x2e4] ss:$16 sps:$4 sm:$0xff]  }
 0x2d5   :  { %5712 = vmatprep.subr.bf16.mxu0 %v14241_v21 }
 0x2d7   :  { %4844 = vmatpush1.bf16.msra.mxu1 %v14155_v44  ;;  %v14254_v44 = vld [vmem:[%s19651_s5 + $0x2c0] ss:$16 sps:$4 sm:$0xff]  }
 0x2d8   :  { %4845 = vmatprep.subr.bf16.mxu1 %v14160_v59  ;;  %5713 = vmatpush2.bf16.msra.mxu0 %v14239_v4  ;;  %v14262_v59 = vld [vmem:[%s19651_s5 + $0x2a4] ss:$16 sps:$4 sm:$0xff]  }
 0x2d9   :  { %5714 = vmatprep.subr.bf16.mxu0 %v14244_v53 }
 0x2db   :  { %4846 = vmatpush1.bf16.msra.mxu1 %v14158_v61  ;;  %v14266_v61 = vld [vmem:[%s19651_s5 + $0x280] ss:$16 sps:$4 sm:$0xff]  }
 0x2dc   :  { %4847 = vmatprep.subr.bf16.mxu1 %v14163_v11  ;;  %5715 = vmatpush2.bf16.msra.mxu0 %v14242_v45  ;;  %v14274_v11 = vld [vmem:[%s19651_s5 + $0x264] ss:$16 sps:$4 sm:$0xff]  }
 0x2dd   :  { %5716 = vmatprep.subr.bf16.mxu0 %v14247_v51 }
 0x2df   :  { %4848 = vmatpush1.bf16.msra.mxu1 %v14161_v62  ;;  %v14278_v62 = vld [vmem:[%s19651_s5 + $0x240] ss:$16 sps:$4 sm:$0xff]  }
 0x2e0   :  { %4849 = vmatprep.subr.bf16.mxu1 %v14166_v0  ;;  %5717 = vmatpush2.bf16.msra.mxu0 %v14245_v28  ;;  %v14280_v0 = vld [vmem:[%s19651_s5 + $0x244] ss:$16 sps:$4 sm:$0xff]   ;;  %v14251_v28 = vld [vmem:[%s19651_s5 + $0xe8] ss:$16 sps:$4 sm:$0xff]  }
 0x2e1   :  { %5772 = vmatprep.subr.bf16.mxu0 %v14253_v33  ;;  %v14257_v33 = vld [vmem:[%s19651_s5 + $0xc8] ss:$16 sps:$4 sm:$0xff]  }
 0x2e3   :  { %4850 = vmatpush1.bf16.msra.mxu1 %v14164_v12  ;;  %v14292_v12 = vld [vmem:[%s19651_s5 + $0x204] ss:$16 sps:$4 sm:$0xff]  }
 0x2e4   :  { %4851 = vmatprep.subr.bf16.mxu1 %v14169_v24  ;;  %v14298_v24 = vld [vmem:[%s19651_s5 + $0x3e4] ss:$16 sps:$4 sm:$0xff]  }
 0x2e7   :  { %4852 = vmatpush1.bf16.msra.mxu1 %v14167_v54  ;;  %v14304_v54 = vld [vmem:[%s19651_s5 + $0x3c4] ss:$16 sps:$4 sm:$0xff]  }
 0x2e8   :  { %4853 = vmatprep.subr.bf16.mxu1 %v14172_v48  ;;  %v14310_v48 = vld [vmem:[%s19651_s5 + $0x3a4] ss:$16 sps:$4 sm:$0xff]  }
 0x2eb   :  { %4854 = vmatpush1.bf16.msra.mxu1 %v14170_v42  ;;  %v14316_v42 = vld [vmem:[%s19651_s5 + $0x384] ss:$16 sps:$4 sm:$0xff]  }
 0x2ec   :  { %4855 = vmatprep.subr.bf16.mxu1 %v14175_v18  ;;  %v14322_v18 = vld [vmem:[%s19651_s5 + $0x364] ss:$16 sps:$4 sm:$0xff]  }
 0x2ef   :  { %4856 = vmatpush1.bf16.msra.mxu1 %v14173_v47  ;;  %v14326_v47 = vld [vmem:[%s19651_s5 + $0x340] ss:$16 sps:$4 sm:$0xff]  }
 0x2f0   :  { %4857 = vmatprep.subr.bf16.mxu1 %v14178_v15  ;;  %v14332_v15 = vld [vmem:[%s19651_s5 + $0x320] ss:$16 sps:$4 sm:$0xff]  }
 0x2f3   :  { %4858 = vmatpush2.bf16.msra.mxu1 %v14176_v19  ;;  %v14338_v19 = vld [vmem:[%s19651_s5 + $0x300] ss:$16 sps:$4 sm:$0xff]  }
 0x2f4   :  { %4859 = vmatprep.subr.bf16.mxu1 %v14181_v25 }
 0x2f7   :  { %4860 = vmatpush2.bf16.msra.mxu1 %v14179_v31  ;;  %v16827_v31 = vld [vmem:[%s19652_s4] sm:$0xf] }
 0x2f8   :  { %4861 = vmatprep.subr.bf16.mxu1 %v14184_v17  ;;  %v4059_v17 = vrot.slane %v16827_v31, %v16107_v60  ;;  %v4055_v26 = vrot.slane %v16827_v31, %v15353_v5 }
 0x2fb   :  { %4862 = vmatpush2.bf16.msra.mxu1 %v14182_v2 }
 0x2fc   :  { %4863 = vmatprep.subr.bf16.mxu1 %v14187_v22 }
 0x2ff   :  { %4864 = vmatpush2.bf16.msra.mxu1 %v14185_v27 }
 0x300   :  { %4865 = vmatprep.subr.bf16.mxu1 %v14190_v32 }
 0x302   :  { %v4746_v25 = vpop.f32.mrf.mxu0 }
 0x303   :  { %4866 = vmatpush2.bf16.msra.mxu1 %v14188_v34  ;;  %v4747_v32 = vadd.f32 %v4746_v25, %v4055_v26 }
 0x304   :  { %4867 = vmatprep.subr.bf16.mxu1 %v14193_v39  ;;  %v4748_v30 = vpop.f32.mrf.mxu0 }
 0x305   :  { %v4749_v23 = vadd.f32 %v4748_v30, %v4059_v17 }
 0x306   :  { %v4750_v57 = vpop.f32.mrf.mxu0 }
 0x307   :  { %4868 = vmatpush2.bf16.msra.mxu1 %v14191_v9  ;;  %v4751_v27 = vadd.f32 %v4750_v57, %v4055_v26  ;;  %v14335_v26 = vld [vmem:[%s19651_s5 + $0x128] ss:$16 sps:$4 sm:$0xff]  }
 0x308   :  { %4869 = vmatprep.subr.bf16.mxu1 %v14196_v55  ;;  %v4752_v8 = vpop.f32.mrf.mxu0 }
 0x309   :  { %v4753_v39 = vadd.f32 %v4752_v8, %v4059_v17 }
 0x30b   :  { %4870 = vmatpush2.bf16.msra.mxu1 %v14194_v37 }
 0x30c   :  { %4871 = vmatprep.subr.bf16.mxu1 %v14199_v38 }
 0x30f   :  { %4872 = vmatpush2.bf16.msra.mxu1 %v14197_v20 }
 0x310   :  { %5729 = vmatprep.subr.bf16.mxu1 %v14250_v52  ;;  %v14259_v52 = vld [vmem:[%s19651_s5 + $0xcc] ss:$16 sps:$4 sm:$0xff]  }
 0x312   :  { %4874 = vmatmul.mubr.bf16.vlgmr.msra.gmra.mxu1 %v16544_v29  ;;  %v14248_v29 = vld [vmem:[%s19651_s5 + $0x2e0] ss:$16 sps:$4 sm:$0xff]  }
 0x313   :  { %5730 = vmatpush1.bf16.msra.mxu1 %v14248_v29 }
 0x314   :  { %5731 = vmatprep.subr.bf16.mxu1 %v14256_v35  ;;  %v14263_v35 = vld [vmem:[%s19651_s5 + $0xa8] ss:$16 sps:$4 sm:$0xff]  }
 0x317   :  { %5732 = vmatpush1.bf16.msra.mxu1 %v14254_v44  ;;  %v14265_v44 = vld [vmem:[%s19651_s5 + $0xac] ss:$16 sps:$4 sm:$0xff]  }
 0x318   :  { %5733 = vmatprep.subr.bf16.mxu1 %v14262_v59  ;;  %v14269_v59 = vld [vmem:[%s19651_s5 + $0x88] ss:$16 sps:$4 sm:$0xff]  }
 0x31b   :  { %5734 = vmatpush1.bf16.msra.mxu1 %v14260_v58  ;;  %v14271_v58 = vld [vmem:[%s19651_s5 + $0x8c] ss:$16 sps:$4 sm:$0xff]  }
 0x31c   :  { %5735 = vmatprep.subr.bf16.mxu1 %v14268_v10  ;;  %v14275_v10 = vld [vmem:[%s19651_s5 + $0x68] ss:$16 sps:$4 sm:$0xff]  }
 0x31f   :  { %5736 = vmatpush1.bf16.msra.mxu1 %v14266_v61  ;;  %v14277_v61 = vld [vmem:[%s19651_s5 + $0x6c] ss:$16 sps:$4 sm:$0xff]  }
 0x320   :  { %5737 = vmatprep.subr.bf16.mxu1 %v14274_v11  ;;  %v14281_v11 = vld [vmem:[%s19651_s5 + $0x48] ss:$16 sps:$4 sm:$0xff]  }
 0x323   :  { %5738 = vmatpush1.bf16.msra.mxu1 %v14272_v36  ;;  %v14283_v36 = vld [vmem:[%s19651_s5 + $0x4c] ss:$16 sps:$4 sm:$0xff]  }
 0x324   :  { %5739 = vmatprep.subr.bf16.mxu1 %v14280_v0  ;;  %v14287_v0 = vld [vmem:[%s19651_s5 + $0x28] ss:$16 sps:$4 sm:$0xff]  }
 0x327   :  { %5740 = vmatpush1.bf16.msra.mxu1 %v14278_v62  ;;  %v14289_v62 = vld [vmem:[%s19651_s5 + $0x2c] ss:$16 sps:$4 sm:$0xff]  }
 0x328   :  { %5741 = vmatprep.subr.bf16.mxu1 %v14286_v6  ;;  %v14293_v6 = vld [vmem:[%s19651_s5 + $0x8] ss:$16 sps:$4 sm:$0xff]  }
 0x32b   :  { %5742 = vmatpush1.bf16.msra.mxu1 %v14284_v3  ;;  %v14295_v3 = vld [vmem:[%s19651_s5 + $0xc] ss:$16 sps:$4 sm:$0xff]  }
 0x32c   :  { %5743 = vmatprep.subr.bf16.mxu1 %v14292_v12  ;;  %v14299_v12 = vld [vmem:[%s19651_s5 + $0x1e8] ss:$16 sps:$4 sm:$0xff]  }
 0x32f   :  { %5744 = vmatpush1.bf16.msra.mxu1 %v14290_v7  ;;  %v14301_v7 = vld [vmem:[%s19651_s5 + $0x1ec] ss:$16 sps:$4 sm:$0xff]  }
 0x330   :  { %5745 = vmatprep.subr.bf16.mxu1 %v14298_v24  ;;  %v14305_v24 = vld [vmem:[%s19651_s5 + $0x1c8] ss:$16 sps:$4 sm:$0xff]  }
 0x333   :  { %5746 = vmatpush2.bf16.msra.mxu1 %v14296_v41  ;;  %v14307_v41 = vld [vmem:[%s19651_s5 + $0x1cc] ss:$16 sps:$4 sm:$0xff]  }
 0x334   :  { %5747 = vmatprep.subr.bf16.mxu1 %v14304_v54  ;;  %v14311_v54 = vld [vmem:[%s19651_s5 + $0x1a8] ss:$16 sps:$4 sm:$0xff]  }
 0x337   :  { %5748 = vmatpush2.bf16.msra.mxu1 %v14302_v43  ;;  %v14313_v43 = vld [vmem:[%s19651_s5 + $0x1ac] ss:$16 sps:$4 sm:$0xff]  }
 0x338   :  { %5749 = vmatprep.subr.bf16.mxu1 %v14310_v48 }
 0x33b   :  { %5750 = vmatpush2.bf16.msra.mxu1 %v14308_v13  ;;  %v14319_v13 = vld [vmem:[%s19651_s5 + $0x18c] ss:$16 sps:$4 sm:$0xff]  }
 0x33c   :  { %5751 = vmatprep.subr.bf16.mxu1 %v14316_v42  ;;  %v14325_v42 = vld [vmem:[%s19651_s5 + $0x16c] ss:$16 sps:$4 sm:$0xff]  }
 0x33f   :  { %5752 = vmatpush2.bf16.msra.mxu1 %v14314_v49  ;;  %v14317_v49 = vld [vmem:[%s19651_s5 + $0x188] ss:$16 sps:$4 sm:$0xff]  }
 0x340   :  { %5753 = vmatprep.subr.bf16.mxu1 %v14322_v18  ;;  %v14323_v18 = vld [vmem:[%s19651_s5 + $0x168] ss:$16 sps:$4 sm:$0xff]  }
 0x342   :  { %v4832_v48 = vpop.f32.mrf.mxu0 }
 0x343   :  { %5754 = vmatpush2.bf16.msra.mxu1 %v14320_v46 }
 0x344   :  { %5755 = vmatprep.subr.bf16.mxu1 %v14328_v56  ;;  %v4834_v46 = vpop.f32.mrf.mxu0  ;;  %v14331_v56 = vld [vmem:[%s19651_s5 + $0x14c] ss:$16 sps:$4 sm:$0xff]  }
 0x347   :  { %5756 = vmatpush2.bf16.msra.mxu1 %v14326_v47  ;;  %v4836_v47 = vpop.f32.mrf.mxu0 }
 0x348   :  { %5757 = vmatprep.subr.bf16.mxu1 %v14334_v50  ;;  %v4067_v50 = vrot.slane %v16827_v31, %v16520_v40 }
 0x349   :  { %v4838_v25 = vpop.f32.mrf.mxu0 }
 0x34a   :  { %v4835_v57 = vadd.f32 %v4834_v46, %v4067_v50 }
 0x34b   :  { %5758 = vmatpush2.bf16.msra.mxu1 %v14332_v15  ;;  %v14329_v15 = vld [vmem:[%s19651_s5 + $0x148] ss:$16 sps:$4 sm:$0xff]  }
 0x34c   :  { %5759 = vmatprep.subr.bf16.mxu1 %v14340_v16  ;;  %v4063_v16 = vrot.slane %v16827_v31, %v16523_v14  ;;  %v14343_v31 = vld [vmem:[%s19651_s5 + $0x10c] ss:$16 sps:$4 sm:$0xff]  }
 0x34e   :  { %v4837_v17 = vadd.f32 %v4836_v47, %v4063_v16  ;;  %v14367_v47 = vld [vmem:[%s19651_s5 + $0x20c] ss:$16 sps:$4 sm:$0xff]  }
 0x34f   :  { %5760 = vmatpush2.bf16.msra.mxu1 %v14338_v19 }
 0x350   :  { %5815 = vmatprep.subr.bf16.mxu1 %v14346_v1  ;;  %v14337_v1 = vld [vmem:[%s19651_s5 + $0x12c] ss:$16 sps:$4 sm:$0xff]  }
 0x392   :  { %v4789_v2 = vpop.f32.mrf.mxu1 }
 0x393   :  { %v4790_v37 = vadd.f32 %v4789_v2, %v4747_v32  ;;  %v4833_v2 = vadd.f32 %v4832_v48, %v4063_v16  ;;  %v14364_v48 = vld [vmem:[%s19651_s5 + $0x22c] ss:$16 sps:$4 sm:$0xff]  }
 0x394   :  { %v4791_v22 = vpop.f32.mrf.mxu1 }
 0x395   :  { %v4792_v9 = vadd.f32 %v4791_v22, %v4749_v23  ;;  %v4884_v45 = vmax.f32 %v4790_v37, 0.0  ;;  %v4839_v22 = vadd.f32 %v4838_v25, %v4067_v50  ;;  %v5918_v50 = vld [vmem:[%s19653_s7 + $0x180] sm:$0xff]  ;;  %v14370_v25 = vld [vmem:[%s19651_s5 + $0x3ec] ss:$16 sps:$4 sm:$0xff]  }
 0x396   :  { %v4793_v34 = vpop.f32.mrf.mxu1 }
 0x397   :  { %v4794_v55 = vadd.f32 %v4793_v34, %v4751_v27  ;;  %v4885_v4 = vmax.f32 %v4792_v9, 0.0  ;;  %v14341_v9 = vld [vmem:[%s19651_s5 + $0x108] ss:$16 sps:$4 sm:$0xff]  }
 0x398   :  { %v4795_v38 = vpop.f32.mrf.mxu1 }
 0x399   :  { %v4796_v20 = vadd.f32 %v4795_v38, %v4753_v39  ;;  %v4888_v21 = vmax.f32 %v4794_v55, 0.0 }
 0x39b   :  { %v4889_v53 = vmax.f32 %v4796_v20, 0.0  ;;  %v16836_v29 = vpack.c.bf16 %v4888_v21, %v4884_v45  ;;  %v14349_v45 = vld [vmem:[%s19651_s5 + $0x2cc] ss:$16 sps:$4 sm:$0xff]  }
 0x39d   :  { %v4893_v51 = vpack.c.bf16 %v4889_v53, %v4885_v4  ;;  %v14344_v4 = vld [vmem:[%s19651_s5 + $0x2e8] ss:$16 sps:$4 sm:$0xff]  }
 0x39f   :  { %5718 = vmatprep.mubr.bf16.mxu0 %v4893_v51 }
 0x3a0   :  { %5719 = vmatmul.mubr.bf16.vlgmr.msra.gmra.mxu0 %v16836_v29 }
 0x3a1   :  { %5773 = vmatpush1.bf16.msra.mxu0 %v14251_v28  ;;  %5804 = vmatprep.mubr.bf16.mxu0 %v4893_v51  ;;  %v14347_v51 = vld [vmem:[%s19651_s5 + $0x2c8] ss:$16 sps:$4 sm:$0xff]   ;;  %v14352_v28 = vld [vmem:[%s19651_s5 + $0x2ac] ss:$16 sps:$4 sm:$0xff]  }
 0x3a2   :  { %5774 = vmatprep.subr.bf16.mxu0 %v14259_v52  ;;  %v14350_v52 = vld [vmem:[%s19651_s5 + $0x2a8] ss:$16 sps:$4 sm:$0xff]  }
 0x3a5   :  { %5775 = vmatpush1.bf16.msra.mxu0 %v14257_v33  ;;  %v6038_v33 = vld [vmem:[%s19653_s7 + $0x540] sm:$0xff] }
 0x3a6   :  { %5776 = vmatprep.subr.bf16.mxu0 %v14265_v44  ;;  %v6050_v44 = vld [vmem:[%s19653_s7 + $0x5a0] sm:$0xff] }
 0x3a9   :  { %5777 = vmatpush1.bf16.msra.mxu0 %v14263_v35  ;;  %v6014_v35 = vld [vmem:[%s19653_s7 + $0x480] sm:$0xff] }
 0x3aa   :  { %5778 = vmatprep.subr.bf16.mxu0 %v14271_v58  ;;  %v14353_v58 = vld [vmem:[%s19651_s5 + $0x288] ss:$16 sps:$4 sm:$0xff]  }
 0x3ad   :  { %5779 = vmatpush1.bf16.msra.mxu0 %v14269_v59  ;;  %v12640_v59 = vcombine.low %v6038_v33, %v6050_v44 }
 0x3ae   :  { %5780 = vmatprep.subr.bf16.mxu0 %v14277_v61  ;;  %v12641_v61 = vcombine.high %v6038_v33, %v6050_v44  ;;  %v6194_v33 = vld [vmem:[%s19653_s7 + $0xa20] sm:$0xff] }
 0x3b1   :  { %5781 = vmatpush1.bf16.msra.mxu0 %v14275_v10  ;;  %v6026_v10 = vld [vmem:[%s19653_s7 + $0x4e0] sm:$0xff] }
 0x3b2   :  { %5782 = vmatprep.subr.bf16.mxu0 %v14283_v36  ;;  %v14358_v36 = vld [vmem:[%s19651_s5 + $0x26c] ss:$16 sps:$4 sm:$0xff]  }
 0x3b5   :  { %5783 = vmatpush1.bf16.msra.mxu0 %v14281_v11  ;;  %v12617_v11 = vcombine.high %v6014_v35, %v6026_v10 }
 0x3b6   :  { %5784 = vmatprep.subr.bf16.mxu0 %v14289_v62  ;;  %v5990_v62 = vld [vmem:[%s19653_s7 + $0x3c0] sm:$0xff] }
 0x3b9   :  { %5785 = vmatpush1.bf16.msra.mxu0 %v14287_v0  ;;  %v6002_v0 = vld [vmem:[%s19653_s7 + $0x420] sm:$0xff] }
 0x3ba   :  { %5786 = vmatprep.subr.bf16.mxu0 %v14295_v3  ;;  %v12616_v3 = vcombine.low %v6014_v35, %v6026_v10  ;;  %v14380_v35 = vld [vmem:[%s19651_s5 + $0x368] ss:$16 sps:$4 sm:$0xff]   ;;  %v6170_v10 = vld [vmem:[%s19653_s7 + $0x960] sm:$0xff] }
 0x3bd   :  { %5787 = vmatpush1.bf16.msra.mxu0 %v14293_v6  ;;  %v14356_v6 = vld [vmem:[%s19651_s5 + $0x268] ss:$16 sps:$4 sm:$0xff]  }
 0x3be   :  { %5788 = vmatprep.subr.bf16.mxu0 %v14301_v7  ;;  %v12593_v7 = vcombine.high %v5990_v62, %v6002_v0 }
 0x3c1   :  { %5789 = vmatpush2.bf16.msra.mxu0 %v14299_v12  ;;  %v14361_v12 = vld [vmem:[%s19651_s5 + $0x24c] ss:$16 sps:$4 sm:$0xff]  }
 0x3c2   :  { %5790 = vmatprep.subr.bf16.mxu0 %v14307_v41  ;;  %v5966_v41 = vld [vmem:[%s19653_s7 + $0x300] sm:$0xff] }
 0x3c5   :  { %5791 = vmatpush2.bf16.msra.mxu0 %v14305_v24  ;;  %v5978_v24 = vld [vmem:[%s19653_s7 + $0x360] sm:$0xff] }
 0x3c6   :  { %5792 = vmatprep.subr.bf16.mxu0 %v14313_v43  ;;  %v12592_v43 = vcombine.low %v5990_v62, %v6002_v0  ;;  %v12568_v46 = vcombine.low %v5966_v41, %v5978_v24  ;;  %v14388_v0 = vld [vmem:[%s19651_s5 + $0x32c] ss:$16 sps:$4 sm:$0xff]  }
 0x3c9   :  { %5793 = vmatpush2.bf16.msra.mxu0 %v14311_v54  ;;  %v14359_v54 = vld [vmem:[%s19651_s5 + $0x248] ss:$16 sps:$4 sm:$0xff]  }
 0x3ca   :  { %5794 = vmatprep.subr.bf16.mxu0 %v14319_v13  ;;  %v12569_v13 = vcombine.high %v5966_v41, %v5978_v24  ;;  %v14391_v24 = vld [vmem:[%s19651_s5 + $0x30c] ss:$16 sps:$4 sm:$0xff]  }
 0x3cd   :  { %5795 = vmatpush2.bf16.msra.mxu0 %v14317_v49  ;;  %v5942_v49 = vld [vmem:[%s19653_s7 + $0x240] sm:$0xff] }
 0x3ce   :  { %5796 = vmatprep.subr.bf16.mxu0 %v14325_v42  ;;  %v5954_v42 = vld [vmem:[%s19653_s7 + $0x2a0] sm:$0xff] }
 0x3cf   :  { %v12544_v16 = vcombine.low %v5942_v49, %v5954_v42 }
 0x3d1   :  { %5797 = vmatpush2.bf16.msra.mxu0 %v14323_v18  ;;  %v14362_v18 = vld [vmem:[%s19651_s5 + $0x228] ss:$16 sps:$4 sm:$0xff]  }
 0x3d2   :  { %v4875_v19 = vpop.f32.mrf.mxu1  ;;  %5798 = vmatprep.subr.bf16.mxu0 %v14331_v56  ;;  %v12545_v56 = vcombine.high %v5942_v49, %v5954_v42 }
 0x3d3   :  { %v4876_v32 = vadd.f32 %v4875_v19, %v4833_v2  ;;  %v14365_v19 = vld [vmem:[%s19651_s5 + $0x208] ss:$16 sps:$4 sm:$0xff]  }
 0x3d4   :  { %v4877_v30 = vpop.f32.mrf.mxu1 }
 0x3d5   :  { %5799 = vmatpush2.bf16.msra.mxu0 %v14329_v15  ;;  %v4878_v23 = vadd.f32 %v4877_v30, %v4835_v57  ;;  %v4886_v20 = vmax.f32 %v4876_v32, 0.0  ;;  %v5930_v15 = vld [vmem:[%s19653_s7 + $0x1e0] sm:$0xff] }
 0x3d6   :  { %v4879_v8 = vpop.f32.mrf.mxu1  ;;  %5800 = vmatprep.subr.bf16.mxu0 %v14337_v1  ;;  %v12521_v1 = vcombine.high %v5918_v50, %v5930_v15  ;;  %v5894_v30 = vld [vmem:[%s19653_s7 + $0xc0] sm:$0xff] }
 0x3d7   :  { %v4880_v27 = vadd.f32 %v4879_v8, %v4837_v17  ;;  %v4887_v37 = vmax.f32 %v4878_v23, 0.0  ;;  %v5906_v57 = vld [vmem:[%s19653_s7 + $0x120] sm:$0xff]  ;;  %v12520_v17 = vcombine.low %v5918_v50, %v5930_v15  ;;  %v14373_v8 = vld [vmem:[%s19651_s5 + $0x3cc] ss:$16 sps:$4 sm:$0xff]  }
 0x3d8   :  { %v4881_v34 = vpop.f32.mrf.mxu1  ;;  %v12497_v2 = vcombine.high %v5894_v30, %v5906_v57  ;;  %v12496_v23 = vcombine.low %v5894_v30, %v5906_v57  ;;  %v6074_v50 = vld [vmem:[%s19653_s7 + $0x660] sm:$0xff]  ;;  %v17136_v57 = vld [vmem:[%s19653_s7 + $0x548] sm:$0xff] }
 0x3d9   :  { %v4882_v39 = vadd.f32 %v4881_v34, %v4839_v22  ;;  %5801 = vmatpush2.bf16.msra.mxu0 %v14335_v26  ;;  %v4890_v55 = vmax.f32 %v4880_v27, 0.0  ;;  %v14368_v26 = vld [vmem:[%s19651_s5 + $0x3e8] ss:$16 sps:$4 sm:$0xff]   ;;  %v5882_v22 = vld [vmem:[%s19653_s7 + $0x60] sm:$0xff]  ;;  %v14376_v34 = vld [vmem:[%s19651_s5 + $0x3ac] ss:$16 sps:$4 sm:$0xff]  }
 0x3da   :  { %5802 = vmatprep.subr.bf16.mxu0 %v14343_v31  ;;  %v5870_v31 = vld [vmem:[%s19653_s7] sm:$0xff]  ;;  %v14371_v27 = vld [vmem:[%s19651_s5 + $0x3c8] ss:$16 sps:$4 sm:$0xff]  }
 0x3db   :  { %v4891_v38 = vmax.f32 %v4882_v39, 0.0  ;;  %v16936_v53 = vpack.c.bf16 %v4890_v55, %v4886_v20  ;;  %v12473_v32 = vcombine.high %v5870_v31, %v5882_v22  ;;  %v6230_v39 = vld [vmem:[%s19653_s7 + $0xb40] sm:$0xff]  ;;  %v12472_v55 = vcombine.low %v5870_v31, %v5882_v22  ;;  %v14379_v20 = vld [vmem:[%s19651_s5 + $0x38c] ss:$16 sps:$4 sm:$0xff]  }
 0x3dc   :  { %v6410_v31 = vld [vmem:[%s19653_s7 + $0x10e0] sm:$0xff] }
 0x3dd   :  { %v4895_v21 = vpack.c.bf16 %v4891_v38, %v4887_v37  ;;  %5803 = vmatpush2.bf16.msra.mxu0 %v14341_v9  ;;  %v6242_v9 = vld [vmem:[%s19653_s7 + $0xba0] sm:$0xff]  ;;  %v14374_v37 = vld [vmem:[%s19651_s5 + $0x3a8] ss:$16 sps:$4 sm:$0xff]  }
 0x3de   :  { %10604 = vmatprep.subr.bf16.mxu0 %v12641_v61  ;;  %v12833_v38 = vcombine.high %v6230_v39, %v6242_v9  ;;  %v6158_v61 = vld [vmem:[%s19653_s7 + $0x900] sm:$0xff] }
 0x3df   :  { %5761 = vmatprep.mubr.bf16.mxu1 %v4895_v21  ;;  %v12761_v62 = vcombine.high %v6158_v61, %v6170_v10 }
 0x3e0   :  { %5762 = vmatmul.mubr.bf16.vlgmr.msra.gmra.mxu1 %v16936_v53  ;;  %5805 = vmatmul.mubr.bf16.vlgmr.msra.gmra.mxu0 %v16836_v29  ;;  %v14355_v29 = vld [vmem:[%s19651_s5 + $0x28c] ss:$16 sps:$4 sm:$0xff]  }
 0x3e1   :  { %5816 = vmatpush1.bf16.msra.mxu1 %v14344_v4  ;;  %5847 = vmatprep.mubr.bf16.mxu1 %v4895_v21  ;;  %v6206_v21 = vld [vmem:[%s19653_s7 + $0xa80] sm:$0xff] }
 0x3e2   :  { %5817 = vmatprep.subr.bf16.mxu1 %v14349_v45  ;;  %10605 = vmatpush1.bf16.msra.mxu0 %v12640_v59  ;;  %v6218_v4 = vld [vmem:[%s19653_s7 + $0xae0] sm:$0xff]  ;;  %v12832_v45 = vcombine.low %v6230_v39, %v6242_v9  ;;  %v14385_v59 = vld [vmem:[%s19651_s5 + $0x34c] ss:$16 sps:$4 sm:$0xff]  }
 0x3e3   :  { %10606 = vmatprep.subr.bf16.mxu0 %v12617_v11  ;;  %v12808_v44 = vcombine.low %v6206_v21, %v6218_v4  ;;  %v14383_v11 = vld [vmem:[%s19651_s5 + $0x348] ss:$16 sps:$4 sm:$0xff]   ;;  %v6350_v9 = vld [vmem:[%s19653_s7 + $0xf00] sm:$0xff] }
 0x3e5   :  { %5818 = vmatpush1.bf16.msra.mxu1 %v14347_v51  ;;  %v14377_v51 = vld [vmem:[%s19651_s5 + $0x388] ss:$16 sps:$4 sm:$0xff]  }
 0x3e6   :  { %5819 = vmatprep.subr.bf16.mxu1 %v14352_v28  ;;  %10607 = vmatpush1.bf16.msra.mxu0 %v12616_v3  ;;  %v12809_v28 = vcombine.high %v6206_v21, %v6218_v4  ;;  %v6134_v3 = vld [vmem:[%s19653_s7 + $0x840] sm:$0xff] }
 0x3e7   :  { %10608 = vmatprep.subr.bf16.mxu0 %v12593_v7  ;;  %v12760_v7 = vcombine.low %v6158_v61, %v6170_v10  ;;  %v6338_v21 = vld [vmem:[%s19653_s7 + $0xea0] sm:$0xff] }
 0x3e8   :  { %v6266_v61 = vld [vmem:[%s19653_s7 + $0xc60] sm:$0xff] }
 0x3e9   :  { %5820 = vmatpush1.bf16.msra.mxu1 %v14350_v52  ;;  %v14382_v52 = vld [vmem:[%s19651_s5 + $0x36c] ss:$16 sps:$4 sm:$0xff]  }
 0x3ea   :  { %5821 = vmatprep.subr.bf16.mxu1 %v14355_v29  ;;  %10609 = vmatpush1.bf16.msra.mxu0 %v12592_v43  ;;  %v6182_v29 = vld [vmem:[%s19653_s7 + $0x9c0] sm:$0xff] }
 0x3eb   :  { %10610 = vmatprep.subr.bf16.mxu0 %v12569_v13  ;;  %v6110_v13 = vld [vmem:[%s19653_s7 + $0x780] sm:$0xff] }
 0x3ed   :  { %5822 = vmatpush1.bf16.msra.mxu1 %v14353_v58  ;;  %v12785_v58 = vcombine.high %v6182_v29, %v6194_v33 }
 0x3ee   :  { %5823 = vmatprep.subr.bf16.mxu1 %v14358_v36  ;;  %10611 = vmatpush1.bf16.msra.mxu0 %v12568_v46  ;;  %v12784_v36 = vcombine.low %v6182_v29, %v6194_v33  ;;  %v6086_v46 = vld [vmem:[%s19653_s7 + $0x6c0] sm:$0xff] }
 0x3ef   :  { %10612 = vmatprep.subr.bf16.mxu0 %v12545_v56  ;;  %v6278_v33 = vld [vmem:[%s19653_s7 + $0xcc0] sm:$0xff] }
 0x3f1   :  { %5824 = vmatpush1.bf16.msra.mxu1 %v14356_v6  ;;  %v6146_v6 = vld [vmem:[%s19653_s7 + $0x8a0] sm:$0xff] }
 0x3f2   :  { %5825 = vmatprep.subr.bf16.mxu1 %v14361_v12  ;;  %10613 = vmatpush1.bf16.msra.mxu0 %v12544_v16  ;;  %v14386_v12 = vld [vmem:[%s19651_s5 + $0x328] ss:$16 sps:$4 sm:$0xff]   ;;  %v12737_v41 = vcombine.high %v6134_v3, %v6146_v6  ;;  %v12736_v43 = vcombine.low %v6134_v3, %v6146_v6  ;;  %v6590_v6 = vld [vmem:[%s19653_s7 + $0x1680] sm:$0xff] }
 0x3f3   :  { %10614 = vmatprep.subr.bf16.mxu0 %v12521_v1  ;;  %v6434_v1 = vld [vmem:[%s19653_s7 + $0x11a0] sm:$0xff] }
 0x3f5   :  { %5826 = vmatpush1.bf16.msra.mxu1 %v14359_v54  ;;  %v14389_v54 = vld [vmem:[%s19651_s5 + $0x308] ss:$16 sps:$4 sm:$0xff]  }
 0x3f6   :  { %5827 = vmatprep.subr.bf16.mxu1 %v14364_v48  ;;  %10615 = vmatpush1.bf16.msra.mxu0 %v12520_v17  ;;  %v6122_v48 = vld [vmem:[%s19653_s7 + $0x7e0] sm:$0xff]  ;;  %v17141_v17 = vld [vmem:[%s19653_s7 + $0x5a8] sm:$0xff] }
 0x3f7   :  { %10616 = vmatprep.subr.bf16.mxu0 %v12497_v2  ;;  %v12713_v49 = vcombine.high %v6110_v13, %v6122_v48  ;;  %v12712_v42 = vcombine.low %v6110_v13, %v6122_v48  ;;  %v12642_v2 = vcombine.low %v17136_v57, %v17141_v17  ;;  %v6542_v48 = vld [vmem:[%s19653_s7 + $0x1500] sm:$0xff] }
 0x3f9   :  { %5828 = vmatpush1.bf16.msra.mxu1 %v14362_v18  ;;  %v6098_v18 = vld [vmem:[%s19653_s7 + $0x720] sm:$0xff] }
 0x3fa   :  { %5829 = vmatprep.subr.bf16.mxu1 %v14367_v47  ;;  %10617 = vmatpush1.bf16.msra.mxu0 %v12496_v23  ;;  %v12689_v56 = vcombine.high %v6086_v46, %v6098_v18  ;;  %v12688_v47 = vcombine.low %v6086_v46, %v6098_v18  ;;  %v6518_v18 = vld [vmem:[%s19653_s7 + $0x1440] sm:$0xff] }
 0x3fb   :  { %10618 = vmatprep.subr.bf16.mxu0 %v12473_v32  ;;  %v6386_v32 = vld [vmem:[%s19653_s7 + $0x1020] sm:$0xff] }
 0x3fd   :  { %5830 = vmatpush1.bf16.msra.mxu1 %v14365_v19  ;;  %v6422_v19 = vld [vmem:[%s19653_s7 + $0x1140] sm:$0xff] }
 0x3fe   :  { %5831 = vmatprep.subr.bf16.mxu1 %v14370_v25  ;;  %10619 = vmatpush1.bf16.msra.mxu0 %v12472_v55  ;;  %v13024_v25 = vcombine.low %v6422_v19, %v6434_v1  ;;  %v13025_v30 = vcombine.high %v6422_v19, %v6434_v1  ;;  %v6362_v55 = vld [vmem:[%s19653_s7 + $0xf60] sm:$0xff] }
 0x3ff   :  { %10620 = vmatprep.subr.bf16.mxu0 %v12833_v38  ;;  %v12953_v38 = vcombine.high %v6350_v9, %v6362_v55  ;;  %v6470_v1 = vld [vmem:[%s19653_s7 + $0x12c0] sm:$0xff] }
 0x401   :  { %5832 = vmatpush2.bf16.msra.mxu1 %v14368_v26  ;;  %v12643_v26 = vcombine.high %v17136_v57, %v17141_v17  ;;  %v5943_v57 = vld [vmem:[%s19653_s7 + $0x248] sm:$0xff] }
 0x402   :  { %5833 = vmatprep.subr.bf16.mxu1 %v14373_v8  ;;  %10621 = vmatpush2.bf16.msra.mxu0 %v12832_v45  ;;  %v6398_v8 = vld [vmem:[%s19653_s7 + $0x1080] sm:$0xff]  ;;  %v5955_v17 = vld [vmem:[%s19653_s7 + $0x2a8] sm:$0xff] }
 0x403   :  { %10622 = vmatprep.subr.bf16.mxu0 %v12809_v28  ;;  %v13000_v22 = vcombine.low %v6398_v8, %v6410_v31  ;;  %v13001_v23 = vcombine.high %v6398_v8, %v6410_v31  ;;  %v6314_v28 = vld [vmem:[%s19653_s7 + $0xde0] sm:$0xff] }
 0x404   :  { %v6446_v8 = vld [vmem:[%s19653_s7 + $0x1200] sm:$0xff] }
 0x405   :  { %5834 = vmatpush2.bf16.msra.mxu1 %v14371_v27  ;;  %v6374_v27 = vld [vmem:[%s19653_s7 + $0xfc0] sm:$0xff] }
 0x406   :  { %5835 = vmatprep.subr.bf16.mxu1 %v14376_v34  ;;  %10623 = vmatpush2.bf16.msra.mxu0 %v12808_v44  ;;  %v12976_v34 = vcombine.low %v6374_v27, %v6386_v32  ;;  %v12977_v39 = vcombine.high %v6374_v27, %v6386_v32  ;;  %v6290_v44 = vld [vmem:[%s19653_s7 + $0xd20] sm:$0xff]  ;;  %v17240_v27 = vld [vmem:[%s19653_s7 + $0x1148] sm:$0xff] }
 0x407   :  { %10624 = vmatprep.subr.bf16.mxu0 %v12785_v58  ;;  %v12881_v58 = vcombine.high %v6278_v33, %v6290_v44  ;;  %v6458_v31 = vld [vmem:[%s19653_s7 + $0x1260] sm:$0xff]  ;;  %v17245_v32 = vld [vmem:[%s19653_s7 + $0x11a8] sm:$0xff] }
 0x409   :  { %5836 = vmatpush2.bf16.msra.mxu1 %v14374_v37  ;;  %v12952_v37 = vcombine.low %v6350_v9, %v6362_v55 }
 0x40a   :  { %5837 = vmatprep.subr.bf16.mxu1 %v14379_v20  ;;  %10625 = vmatpush2.bf16.msra.mxu0 %v12784_v36  ;;  %v6326_v20 = vld [vmem:[%s19653_s7 + $0xe40] sm:$0xff] }
 0x40b   :  { %10626 = vmatprep.subr.bf16.mxu0 %v12761_v62  ;;  %v12928_v4 = vcombine.low %v6326_v20, %v6338_v21  ;;  %v12929_v45 = vcombine.high %v6326_v20, %v6338_v21  ;;  %v6626_v62 = vld [vmem:[%s19653_s7 + $0x17a0] sm:$0xff] }
 0x40d   :  { %5838 = vmatpush2.bf16.msra.mxu1 %v14377_v51  ;;  %v6302_v51 = vld [vmem:[%s19653_s7 + $0xd80] sm:$0xff] }
 0x40e   :  { %5839 = vmatprep.subr.bf16.mxu1 %v14382_v52  ;;  %10627 = vmatpush2.bf16.msra.mxu0 %v12760_v7  ;;  %v12904_v52 = vcombine.low %v6302_v51, %v6314_v28  ;;  %v12905_v29 = vcombine.high %v6302_v51, %v6314_v28  ;;  %v6602_v7 = vld [vmem:[%s19653_s7 + $0x16e0] sm:$0xff] }
 0x40f   :  { %10628 = vmatprep.subr.bf16.mxu0 %v12737_v41  ;;  %v13193_v41 = vcombine.high %v6590_v6, %v6602_v7 }
 0x411   :  { %5840 = vmatpush2.bf16.msra.mxu1 %v14380_v35  ;;  %v12880_v35 = vcombine.low %v6278_v33, %v6290_v44 }
 0x412   :  { %5841 = vmatprep.subr.bf16.mxu1 %v14385_v59  ;;  %10629 = vmatpush2.bf16.msra.mxu0 %v12736_v43  ;;  %v6254_v59 = vld [vmem:[%s19653_s7 + $0xc00] sm:$0xff] }
 0x413   :  { %10630 = vmatprep.subr.bf16.mxu0 %v12713_v49  ;;  %v12856_v10 = vcombine.low %v6254_v59, %v6266_v61  ;;  %v12857_v36 = vcombine.high %v6254_v59, %v6266_v61  ;;  %v6578_v43 = vld [vmem:[%s19653_s7 + $0x1620] sm:$0xff] }
 0x414   :  { %v6554_v49 = vld [vmem:[%s19653_s7 + $0x1560] sm:$0xff] }
 0x415   :  { %5842 = vmatpush2.bf16.msra.mxu1 %v14383_v11  ;;  %v6614_v11 = vld [vmem:[%s19653_s7 + $0x1740] sm:$0xff]  ;;  %v13145_v46 = vcombine.high %v6542_v48, %v6554_v49 }
 0x416   :  { %5843 = vmatprep.subr.bf16.mxu1 %v14388_v0  ;;  %10631 = vmatpush2.bf16.msra.mxu0 %v12712_v42  ;;  %v13216_v0 = vcombine.low %v6614_v11, %v6626_v62  ;;  %v13217_v3 = vcombine.high %v6614_v11, %v6626_v62  ;;  %v13144_v42 = vcombine.low %v6542_v48, %v6554_v49  ;;  %v5967_v48 = vld [vmem:[%s19653_s7 + $0x308] sm:$0xff] }
 0x417   :  { %10632 = vmatprep.subr.bf16.mxu0 %v12689_v56  ;;  %v6530_v56 = vld [vmem:[%s19653_s7 + $0x14a0] sm:$0xff]  ;;  %v5979_v49 = vld [vmem:[%s19653_s7 + $0x368] sm:$0xff] }
 0x419   :  { %5844 = vmatpush2.bf16.msra.mxu1 %v14386_v12  ;;  %v13192_v12 = vcombine.low %v6590_v6, %v6602_v7 }
 0x41a   :  { %5845 = vmatprep.subr.bf16.mxu1 %v14391_v24  ;;  %10633 = vmatpush2.bf16.msra.mxu0 %v12688_v47  ;;  %v6566_v24 = vld [vmem:[%s19653_s7 + $0x15c0] sm:$0xff]  ;;  %v13120_v47 = vcombine.low %v6518_v18, %v6530_v56 }
 0x41b   :  { %v13169_v13 = vcombine.high %v6566_v24, %v6578_v43 }
 0x41d   :  { %5846 = vmatpush2.bf16.msra.mxu1 %v14389_v54  ;;  %v13168_v54 = vcombine.low %v6566_v24, %v6578_v43  ;;  %v5991_v24 = vld [vmem:[%s19653_s7 + $0x3c8] sm:$0xff] }
 0x41e   :  { %10647 = vmatprep.subr.bf16.mxu1 %v13025_v30  ;;  %v6003_v43 = vld [vmem:[%s19653_s7 + $0x428] sm:$0xff] }
 0x420   :  { %5848 = vmatmul.mubr.bf16.vlgmr.msra.gmra.mxu1 %v16936_v53  ;;  %v6062_v53 = vld [vmem:[%s19653_s7 + $0x600] sm:$0xff] }
 0x421   :  { %v12665_v15 = vcombine.high %v6062_v53, %v6074_v50  ;;  %v12664_v16 = vcombine.low %v6062_v53, %v6074_v50  ;;  %10648 = vmatpush1.bf16.msra.mxu1 %v13024_v25  ;;  %v13121_v53 = vcombine.high %v6518_v18, %v6530_v56  ;;  %v6494_v50 = vld [vmem:[%s19653_s7 + $0x1380] sm:$0xff]  ;;  %v12547_v18 = vcombine.high %v5943_v57, %v5955_v17  ;;  %v5919_v56 = vld [vmem:[%s19653_s7 + $0x188] sm:$0xff] }
 0x422   :  { %10649 = vmatprep.subr.bf16.mxu1 %v13001_v23  ;;  %v6482_v25 = vld [vmem:[%s19653_s7 + $0x1320] sm:$0xff]  ;;  %v13048_v23 = vcombine.low %v6446_v8, %v6458_v31 }
 0x423   :  { %10634 = vmatprep.subr.bf16.mxu0 %v12665_v15  ;;  %v6506_v15 = vld [vmem:[%s19653_s7 + $0x13e0] sm:$0xff]  ;;  %v13073_v30 = vcombine.high %v6470_v1, %v6482_v25 }
 0x424   :  { %10635 = vmatpush2.bf16.msra.mxu0 %v12664_v16  ;;  %v13097_v16 = vcombine.high %v6494_v50, %v6506_v15  ;;  %v13096_v19 = vcombine.low %v6494_v50, %v6506_v15  ;;  %v5895_v15 = vld [vmem:[%s19653_s7 + $0xc8] sm:$0xff] }
 0x425   :  { %10690 = vmatprep.subr.bf16.mxu0 %v12643_v26  ;;  %10650 = vmatpush1.bf16.msra.mxu1 %v13000_v22  ;;  %v13072_v26 = vcombine.low %v6470_v1, %v6482_v25  ;;  %v13049_v22 = vcombine.high %v6446_v8, %v6458_v31  ;;  %v5871_v25 = vld [vmem:[%s19653_s7 + $0x8] sm:$0xff] }
 0x426   :  { %10651 = vmatprep.subr.bf16.mxu1 %v12977_v39  ;;  %v13026_v39 = vcombine.low %v17240_v27, %v17245_v32  ;;  %v6231_v31 = vld [vmem:[%s19653_s7 + $0xb48] sm:$0xff] }
 0x429   :  { %10652 = vmatpush1.bf16.msra.mxu1 %v12976_v34  ;;  %v13027_v34 = vcombine.high %v17240_v27, %v17245_v32  ;;  %v6363_v27 = vld [vmem:[%s19653_s7 + $0xf68] sm:$0xff]  ;;  %v5968_v32 = vld [vmem:[%s19653_s7 + $0x310] sm:$0xff] }
 0x42a   :  { %10653 = vmatprep.subr.bf16.mxu1 %v12953_v38 }
 0x42d   :  { %10654 = vmatpush1.bf16.msra.mxu1 %v12952_v37  ;;  %v17254_v37 = vld [vmem:[%s19654_s6] sm:$0xf] }
 0x42e   :  { %10655 = vmatprep.subr.bf16.mxu1 %v12929_v45  ;;  %v5033_v20 = vrot.slane %v17254_v37, %v16107_v60  ;;  %v5029_v21 = vrot.slane %v17254_v37, %v15353_v5 }
 0x431   :  { %10656 = vmatpush1.bf16.msra.mxu1 %v12928_v4 }
 0x432   :  { %10657 = vmatprep.subr.bf16.mxu1 %v12905_v29 }
 0x435   :  { %10658 = vmatpush1.bf16.msra.mxu1 %v12904_v52 }
 0x436   :  { %10659 = vmatprep.subr.bf16.mxu1 %v12881_v58 }
 0x439   :  { %10660 = vmatpush1.bf16.msra.mxu1 %v12880_v35 }
 0x43a   :  { %10661 = vmatprep.subr.bf16.mxu1 %v12857_v36 }
 0x43d   :  { %10662 = vmatpush1.bf16.msra.mxu1 %v12856_v10 }
 0x43e   :  { %10663 = vmatprep.subr.bf16.mxu1 %v13217_v3  ;;  %v6027_v3 = vld [vmem:[%s19653_s7 + $0x4e8] sm:$0xff] }
 0x441   :  { %10664 = vmatpush2.bf16.msra.mxu1 %v13216_v0  ;;  %v6015_v0 = vld [vmem:[%s19653_s7 + $0x488] sm:$0xff] }
 0x442   :  { %10665 = vmatprep.subr.bf16.mxu1 %v13193_v41  ;;  %v12619_v41 = vcombine.high %v6015_v0, %v6027_v3 }
 0x445   :  { %10666 = vmatpush2.bf16.msra.mxu1 %v13192_v12 }
 0x446   :  { %10667 = vmatprep.subr.bf16.mxu1 %v13169_v13  ;;  %v12595_v13 = vcombine.high %v5991_v24, %v6003_v43 }
 0x449   :  { %10668 = vmatpush2.bf16.msra.mxu1 %v13168_v54  ;;  %v12618_v54 = vcombine.low %v6015_v0, %v6027_v3  ;;  %v6087_v3 = vld [vmem:[%s19653_s7 + $0x6c8] sm:$0xff] }
 0x44a   :  { %10669 = vmatprep.subr.bf16.mxu1 %v13145_v46  ;;  %v12571_v46 = vcombine.high %v5967_v48, %v5979_v49 }
 0x44d   :  { %10670 = vmatpush2.bf16.msra.mxu1 %v13144_v42  ;;  %v12594_v42 = vcombine.low %v5991_v24, %v6003_v43  ;;  %v5041_v24 = vrot.slane %v17254_v37, %v16520_v40 }
 0x44e   :  { %10671 = vmatprep.subr.bf16.mxu1 %v13121_v53  ;;  %v12546_v53 = vcombine.low %v5943_v57, %v5955_v17 }
 0x451   :  { %10672 = vmatpush2.bf16.msra.mxu1 %v13120_v47  ;;  %v5931_v47 = vld [vmem:[%s19653_s7 + $0x1e8] sm:$0xff] }
 0x452   :  { %10673 = vmatprep.subr.bf16.mxu1 %v13097_v16  ;;  %v12523_v50 = vcombine.high %v5919_v56, %v5931_v47  ;;  %v5907_v16 = vld [vmem:[%s19653_s7 + $0x128] sm:$0xff] }
 0x453   :  { %v12499_v1 = vcombine.high %v5895_v15, %v5907_v16 }
 0x455   :  { %10674 = vmatpush2.bf16.msra.mxu1 %v13096_v19  ;;  %v12522_v19 = vcombine.low %v5919_v56, %v5931_v47 }
 0x456   :  { %10675 = vmatprep.subr.bf16.mxu1 %v13073_v30  ;;  %v5883_v30 = vld [vmem:[%s19653_s7 + $0x68] sm:$0xff] }
 0x457   :  { %v12475_v8 = vcombine.high %v5871_v25, %v5883_v30 }
 0x459   :  { %10676 = vmatpush2.bf16.msra.mxu1 %v13072_v26  ;;  %v12498_v26 = vcombine.low %v5895_v15, %v5907_v16  ;;  %v6040_v16 = vld [vmem:[%s19653_s7 + $0x550] sm:$0xff] }
 0x45a   :  { %10677 = vmatprep.subr.bf16.mxu1 %v13049_v22  ;;  %v6243_v22 = vld [vmem:[%s19653_s7 + $0xba8] sm:$0xff] }
 0x45d   :  { %10678 = vmatpush2.bf16.msra.mxu1 %v13048_v23  ;;  %v12474_v23 = vcombine.low %v5871_v25, %v5883_v30 }
 0x45e   :  { %10733 = vmatprep.subr.bf16.mxu1 %v13027_v34  ;;  %v12835_v34 = vcombine.high %v6231_v31, %v6243_v22 }
 0x460   :  { %v5720_v9 = vpop.f32.mrf.mxu0 }
 0x461   :  { %v5721_v29 = vadd.f32 %v5720_v9, %v5029_v21  ;;  %v6207_v9 = vld [vmem:[%s19653_s7 + $0xa88] sm:$0xff] }
 0x462   :  { %v5722_v55 = vpop.f32.mrf.mxu0 }
 0x463   :  { %v5723_v28 = vadd.f32 %v5722_v55, %v5033_v20  ;;  %v6219_v55 = vld [vmem:[%s19653_s7 + $0xae8] sm:$0xff] }
 0x464   :  { %v5724_v38 = vpop.f32.mrf.mxu0 }
 0x465   :  { %v5725_v52 = vadd.f32 %v5724_v38, %v5029_v21  ;;  %v12834_v38 = vcombine.low %v6231_v31, %v6243_v22  ;;  %v6183_v21 = vld [vmem:[%s19653_s7 + $0x9c8] sm:$0xff] }
 0x466   :  { %v5726_v45 = vpop.f32.mrf.mxu0 }
 0x467   :  { %v5727_v44 = vadd.f32 %v5726_v45, %v5033_v20  ;;  %v12811_v20 = vcombine.high %v6207_v9, %v6219_v55  ;;  %v12810_v45 = vcombine.low %v6207_v9, %v6219_v55  ;;  %v6411_v55 = vld [vmem:[%s19653_s7 + $0x10e8] sm:$0xff] }
 0x4a0   :  { %v5763_v4 = vpop.f32.mrf.mxu1 }
 0x4a1   :  { %v5764_v59 = vadd.f32 %v5763_v4, %v5721_v29  ;;  %v6195_v4 = vld [vmem:[%s19653_s7 + $0xa28] sm:$0xff] }
 0x4a2   :  { %v5765_v51 = vpop.f32.mrf.mxu1  ;;  %v12786_v29 = vcombine.low %v6183_v21, %v6195_v4 }
 0x4a3   :  { %v5766_v35 = vadd.f32 %v5765_v51, %v5723_v28  ;;  %v5858_v6 = vmax.f32 %v5764_v59, 0.0  ;;  %v12787_v51 = vcombine.high %v6183_v21, %v6195_v4  ;;  %v6159_v28 = vld [vmem:[%s19653_s7 + $0x908] sm:$0xff] }
 0x4a4   :  { %v5767_v33 = vpop.f32.mrf.mxu1 }
 0x4a5   :  { %v5768_v58 = vadd.f32 %v5767_v33, %v5725_v52  ;;  %v5859_v11 = vmax.f32 %v5766_v35, 0.0  ;;  %v6171_v52 = vld [vmem:[%s19653_s7 + $0x968] sm:$0xff] }
 0x4a6   :  { %v5769_v61 = vpop.f32.mrf.mxu1  ;;  %v12763_v33 = vcombine.high %v6159_v28, %v6171_v52  ;;  %v6147_v35 = vld [vmem:[%s19653_s7 + $0x8a8] sm:$0xff]  ;;  %v12762_v59 = vcombine.low %v6159_v28, %v6171_v52 }
 0x4a7   :  { %v5770_v10 = vadd.f32 %v5769_v61, %v5727_v44  ;;  %v5862_v36 = vmax.f32 %v5768_v58, 0.0  ;;  %v6135_v44 = vld [vmem:[%s19653_s7 + $0x848] sm:$0xff]  ;;  %v5806_v58 = vpop.f32.mrf.mxu0 }
 0x4a8   :  { %v12739_v61 = vcombine.high %v6135_v44, %v6147_v35  ;;  %v6375_v52 = vld [vmem:[%s19653_s7 + $0xfc8] sm:$0xff] }
 0x4a9   :  { %v5863_v62 = vmax.f32 %v5770_v10, 0.0  ;;  %v17268_v12 = vpack.c.bf16 %v5862_v36, %v5858_v6  ;;  %v6111_v10 = vld [vmem:[%s19653_s7 + $0x788] sm:$0xff] }
 0x4aa   :  { %v6123_v36 = vld [vmem:[%s19653_s7 + $0x7e8] sm:$0xff] }
 0x4ab   :  { %v17266_v7 = vpack.c.bf16 %v5863_v62, %v5859_v11  ;;  %v5808_v11 = vpop.f32.mrf.mxu0  ;;  %v12738_v62 = vcombine.low %v6135_v44, %v6147_v35  ;;  %v12715_v0 = vcombine.high %v6111_v10, %v6123_v36  ;;  %v6099_v6 = vld [vmem:[%s19653_s7 + $0x728] sm:$0xff]  ;;  %v12714_v43 = vcombine.low %v6111_v10, %v6123_v36  ;;  %v6004_v44 = vld [vmem:[%s19653_s7 + $0x430] sm:$0xff] }
 0x4ac   :  { %v5809_v17 = vadd.f32 %v5808_v11, %v5041_v24  ;;  %v6351_v10 = vld [vmem:[%s19653_s7 + $0xf08] sm:$0xff] }
 0x4ad   :  { %10636 = vmatprep.mubr.bf16.mxu0 %v17266_v7 }
 0x4ae   :  { %10637 = vmatmul.mubr.bf16.vlgmr.msra.gmra.mxu0 %v17268_v12 }
 0x4af   :  { %10691 = vmatpush1.bf16.msra.mxu0 %v12642_v2  ;;  %10722 = vmatprep.mubr.bf16.mxu0 %v17266_v7  ;;  %v12570_v2 = vcombine.low %v5967_v48, %v5979_v49  ;;  %v12691_v48 = vcombine.high %v6087_v3, %v6099_v6  ;;  %v6063_v49 = vld [vmem:[%s19653_s7 + $0x608] sm:$0xff] }
 0x4b0   :  { %10692 = vmatprep.subr.bf16.mxu0 %v12619_v41  ;;  %v5810_v41 = vpop.f32.mrf.mxu0 }
 0x4b3   :  { %10693 = vmatpush1.bf16.msra.mxu0 %v12618_v54  ;;  %v5037_v54 = vrot.slane %v17254_v37, %v16523_v14 }
 0x4b4   :  { %10694 = vmatprep.subr.bf16.mxu0 %v12595_v13 }
 0x4b5   :  { %v5807_v56 = vadd.f32 %v5806_v58, %v5037_v54 }
 0x4b7   :  { %10695 = vmatpush1.bf16.msra.mxu0 %v12594_v42  ;;  %v6075_v42 = vld [vmem:[%s19653_s7 + $0x668] sm:$0xff] }
 0x4b8   :  { %10696 = vmatprep.subr.bf16.mxu0 %v12571_v46  ;;  %v5812_v46 = vpop.f32.mrf.mxu0  ;;  %v12667_v37 = vcombine.high %v6063_v49, %v6075_v42 }
 0x4bb   :  { %10697 = vmatpush1.bf16.msra.mxu0 %v12570_v2  ;;  %v5811_v2 = vadd.f32 %v5810_v41, %v5037_v54  ;;  %v5944_v41 = vld [vmem:[%s19653_s7 + $0x250] sm:$0xff] }
 0x4bc   :  { %10698 = vmatprep.subr.bf16.mxu0 %v12547_v18  ;;  %v12690_v18 = vcombine.low %v6087_v3, %v6099_v6  ;;  %v6327_v3 = vld [vmem:[%s19653_s7 + $0xe48] sm:$0xff] }
 0x4bd   :  { %v6339_v6 = vld [vmem:[%s19653_s7 + $0xea8] sm:$0xff] }
 0x4bf   :  { %10699 = vmatpush1.bf16.msra.mxu0 %v12546_v53  ;;  %v5813_v53 = vadd.f32 %v5812_v46, %v5041_v24  ;;  %v5956_v24 = vld [vmem:[%s19653_s7 + $0x2b0] sm:$0xff] }
 0x4c0   :  { %10700 = vmatprep.subr.bf16.mxu0 %v12523_v50  ;;  %v5920_v46 = vld [vmem:[%s19653_s7 + $0x190] sm:$0xff] }
 0x4c3   :  { %10701 = vmatpush1.bf16.msra.mxu0 %v12522_v19  ;;  %v6052_v19 = vld [vmem:[%s19653_s7 + $0x5b0] sm:$0xff] }
 0x4c4   :  { %10702 = vmatprep.subr.bf16.mxu0 %v12499_v1  ;;  %v12645_v31 = vcombine.high %v6040_v16, %v6052_v19 }
 0x4c7   :  { %10703 = vmatpush1.bf16.msra.mxu0 %v12498_v26  ;;  %v12666_v26 = vcombine.low %v6063_v49, %v6075_v42  ;;  %v6303_v49 = vld [vmem:[%s19653_s7 + $0xd88] sm:$0xff] }
 0x4c8   :  { %10704 = vmatprep.subr.bf16.mxu0 %v12475_v8  ;;  %v6315_v42 = vld [vmem:[%s19653_s7 + $0xde8] sm:$0xff] }
 0x4cb   :  { %10705 = vmatpush1.bf16.msra.mxu0 %v12474_v23 }
 0x4cc   :  { %10706 = vmatprep.subr.bf16.mxu0 %v12835_v34  ;;  %v6399_v34 = vld [vmem:[%s19653_s7 + $0x1088] sm:$0xff] }
 0x4cd   :  { %v13002_v35 = vcombine.low %v6399_v34, %v6411_v55 }
 0x4cf   :  { %10707 = vmatpush2.bf16.msra.mxu0 %v12834_v38  ;;  %v6016_v38 = vld [vmem:[%s19653_s7 + $0x490] sm:$0xff] }
 0x4d0   :  { %10708 = vmatprep.subr.bf16.mxu0 %v12811_v20  ;;  %v6028_v20 = vld [vmem:[%s19653_s7 + $0x4f0] sm:$0xff] }
 0x4d1   :  { %v12621_v28 = vcombine.high %v6016_v38, %v6028_v20  ;;  %v12620_v58 = vcombine.low %v6016_v38, %v6028_v20  ;;  %v6232_v38 = vld [vmem:[%s19653_s7 + $0xb50] sm:$0xff] }
 0x4d2   :  { %v6244_v20 = vld [vmem:[%s19653_s7 + $0xbb0] sm:$0xff] }
 0x4d3   :  { %10709 = vmatpush2.bf16.msra.mxu0 %v12810_v45  ;;  %v12644_v45 = vcombine.low %v6040_v16, %v6052_v19 }
 0x4d4   :  { %10710 = vmatprep.subr.bf16.mxu0 %v12787_v51  ;;  %v13003_v51 = vcombine.high %v6399_v34, %v6411_v55  ;;  %v6627_v55 = vld [vmem:[%s19653_s7 + $0x17a8] sm:$0xff] }
 0x4d7   :  { %10711 = vmatpush2.bf16.msra.mxu0 %v12786_v29  ;;  %v6387_v29 = vld [vmem:[%s19653_s7 + $0x1028] sm:$0xff] }
 0x4d8   :  { %10712 = vmatprep.subr.bf16.mxu0 %v12763_v33  ;;  %v5992_v33 = vld [vmem:[%s19653_s7 + $0x3d0] sm:$0xff]  ;;  %v12978_v36 = vcombine.low %v6375_v52, %v6387_v29 }
 0x4d9   :  { %v12596_v11 = vcombine.low %v5992_v33, %v6004_v44 }
 0x4db   :  { %10713 = vmatpush2.bf16.msra.mxu0 %v12762_v59  ;;  %v12979_v59 = vcombine.high %v6375_v52, %v6387_v29  ;;  %v12837_v52 = vcombine.high %v6232_v38, %v6244_v20  ;;  %v6591_v29 = vld [vmem:[%s19653_s7 + $0x1688] sm:$0xff] }
 0x4dc   :  { %10714 = vmatprep.subr.bf16.mxu0 %v12739_v61  ;;  %v12597_v61 = vcombine.high %v5992_v33, %v6004_v44  ;;  %v6603_v33 = vld [vmem:[%s19653_s7 + $0x16e8] sm:$0xff]  ;;  %v6208_v44 = vld [vmem:[%s19653_s7 + $0xa90] sm:$0xff] }
 0x4df   :  { %10715 = vmatpush2.bf16.msra.mxu0 %v12738_v62  ;;  %v12955_v62 = vcombine.high %v6351_v10, %v6363_v27 }
 0x4e0   :  { %v5849_v13 = vpop.f32.mrf.mxu1  ;;  %10716 = vmatprep.subr.bf16.mxu0 %v12715_v0 }
 0x4e1   :  { %v5850_v1 = vadd.f32 %v5849_v13, %v5807_v56  ;;  %v12931_v13 = vcombine.high %v6327_v3, %v6339_v6 }
 0x4e2   :  { %v5851_v57 = vpop.f32.mrf.mxu1 }
 0x4e3   :  { %10717 = vmatpush2.bf16.msra.mxu0 %v12714_v43  ;;  %v5852_v50 = vadd.f32 %v5851_v57, %v5809_v17  ;;  %v5860_v9 = vmax.f32 %v5850_v1, 0.0  ;;  %v12954_v43 = vcombine.low %v6351_v10, %v6363_v27  ;;  %v5932_v57 = vld [vmem:[%s19653_s7 + $0x1f0] sm:$0xff]  ;;  %v12930_v17 = vcombine.low %v6327_v3, %v6339_v6  ;;  %v6567_v27 = vld [vmem:[%s19653_s7 + $0x15c8] sm:$0xff] }
 0x4e4   :  { %v5853_v47 = vpop.f32.mrf.mxu1  ;;  %10718 = vmatprep.subr.bf16.mxu0 %v12691_v48  ;;  %v12549_v48 = vcombine.high %v5944_v41, %v5956_v24  ;;  %v12525_v56 = vcombine.high %v5920_v46, %v5932_v57  ;;  %v12524_v16 = vcombine.low %v5920_v46, %v5932_v57  ;;  %v6543_v6 = vld [vmem:[%s19653_s7 + $0x1508] sm:$0xff]  ;;  %v6136_v57 = vld [vmem:[%s19653_s7 + $0x850] sm:$0xff] }
 0x4e5   :  { %v5854_v15 = vadd.f32 %v5853_v47, %v5811_v2  ;;  %v5861_v22 = vmax.f32 %v5852_v50, 0.0  ;;  %v12548_v2 = vcombine.low %v5944_v41, %v5956_v24  ;;  %v6279_v47 = vld [vmem:[%s19653_s7 + $0xcc8] sm:$0xff]  ;;  %v5908_v50 = vld [vmem:[%s19653_s7 + $0x130] sm:$0xff] }
 0x4e6   :  { %v5855_v25 = vpop.f32.mrf.mxu1  ;;  %v6555_v41 = vld [vmem:[%s19653_s7 + $0x1568] sm:$0xff]  ;;  %v6160_v24 = vld [vmem:[%s19653_s7 + $0x910] sm:$0xff] }
 0x4e7   :  { %v5856_v30 = vadd.f32 %v5855_v25, %v5813_v53  ;;  %10719 = vmatpush2.bf16.msra.mxu0 %v12690_v18  ;;  %v5864_v8 = vmax.f32 %v5854_v15, 0.0  ;;  %v12907_v18 = vcombine.high %v6303_v49, %v6315_v42  ;;  %v5896_v53 = vld [vmem:[%s19653_s7 + $0xd0] sm:$0xff]  ;;  %v12906_v15 = vcombine.low %v6303_v49, %v6315_v42  ;;  %v6255_v25 = vld [vmem:[%s19653_s7 + $0xc08] sm:$0xff] }
 0x4e8   :  { %10720 = vmatprep.subr.bf16.mxu0 %v12667_v37  ;;  %v6291_v37 = vld [vmem:[%s19653_s7 + $0xd28] sm:$0xff]  ;;  %v12501_v1 = vcombine.high %v5896_v53, %v5908_v50 }
 0x4e9   :  { %v5865_v23 = vmax.f32 %v5856_v30, 0.0  ;;  %v17384_v4 = vpack.c.bf16 %v5864_v8, %v5860_v9  ;;  %v12883_v19 = vcombine.high %v6279_v47, %v6291_v37  ;;  %v6267_v30 = vld [vmem:[%s19653_s7 + $0xc68] sm:$0xff]  ;;  %v5884_v8 = vld [vmem:[%s19653_s7 + $0x70] sm:$0xff] }
 0x4ea   :  { %v6615_v9 = vld [vmem:[%s19653_s7 + $0x1748] sm:$0xff] }
 0x4eb   :  { %v17382_v21 = vpack.c.bf16 %v5865_v23, %v5861_v22  ;;  %10721 = vmatpush2.bf16.msra.mxu0 %v12666_v26  ;;  %v5872_v26 = vld [vmem:[%s19653_s7 + $0x10] sm:$0xff]  ;;  %v12500_v22 = vcombine.low %v5896_v53, %v5908_v50  ;;  %v12859_v23 = vcombine.high %v6255_v25, %v6267_v30  ;;  %v6519_v42 = vld [vmem:[%s19653_s7 + $0x1448] sm:$0xff] }
 0x4ec   :  { %10776 = vmatprep.subr.bf16.mxu0 %v12645_v31  ;;  %v12882_v31 = vcombine.low %v6279_v47, %v6291_v37  ;;  %v12477_v34 = vcombine.high %v5872_v26, %v5884_v8  ;;  %v6531_v46 = vld [vmem:[%s19653_s7 + $0x14a8] sm:$0xff]  ;;  %v6112_v50 = vld [vmem:[%s19653_s7 + $0x790] sm:$0xff] }
 0x4ed   :  { %10679 = vmatprep.mubr.bf16.mxu1 %v17382_v21  ;;  %v6495_v37 = vld [vmem:[%s19653_s7 + $0x1388] sm:$0xff] }
 0x4ee   :  { %10680 = vmatmul.mubr.bf16.vlgmr.msra.gmra.mxu1 %v17384_v4  ;;  %10723 = vmatmul.mubr.bf16.vlgmr.msra.gmra.mxu0 %v17268_v12  ;;  %v6507_v53 = vld [vmem:[%s19653_s7 + $0x13e8] sm:$0xff] }
 0x4ef   :  { %10734 = vmatpush1.bf16.msra.mxu1 %v13026_v39  ;;  %10765 = vmatprep.mubr.bf16.mxu1 %v17382_v21  ;;  %v5980_v39 = vld [vmem:[%s19653_s7 + $0x370] sm:$0xff] }
 0x4f0   :  { %10777 = vmatpush1.bf16.msra.mxu0 %v12644_v45  ;;  %10808 = vmatprep.mubr.bf16.mxu0 %v17266_v7  ;;  %v12573_v0 = vcombine.high %v5968_v32, %v5980_v39  ;;  %v12572_v54 = vcombine.low %v5968_v32, %v5980_v39  ;;  %v12858_v45 = vcombine.low %v6255_v25, %v6267_v30  ;;  %v6579_v32 = vld [vmem:[%s19653_s7 + $0x1628] sm:$0xff]  ;;  %v6184_v39 = vld [vmem:[%s19653_s7 + $0x9d0] sm:$0xff] }
 0x4f1   :  { %10735 = vmatprep.subr.bf16.mxu1 %v13003_v51  ;;  %10778 = vmatprep.subr.bf16.mxu0 %v12621_v28  ;;  %v12476_v51 = vcombine.low %v5872_v26, %v5884_v8  ;;  %v13219_v28 = vcombine.high %v6615_v9, %v6627_v55  ;;  %v6471_v30 = vld [vmem:[%s19653_s7 + $0x12c8] sm:$0xff]  ;;  %v6088_v8 = vld [vmem:[%s19653_s7 + $0x6d0] sm:$0xff] }
 0x4f2   :  { %v6483_v26 = vld [vmem:[%s19653_s7 + $0x1328] sm:$0xff] }
 0x4f3   :  { %10736 = vmatpush1.bf16.msra.mxu1 %v13002_v35  ;;  %v6220_v35 = vld [vmem:[%s19653_s7 + $0xaf0] sm:$0xff] }
 0x4f4   :  { %10779 = vmatpush1.bf16.msra.mxu0 %v12620_v58  ;;  %10737 = vmatprep.subr.bf16.mxu1 %v12979_v59  ;;  %v13218_v58 = vcombine.low %v6615_v9, %v6627_v55  ;;  %v12836_v59 = vcombine.low %v6232_v38, %v6244_v20  ;;  %v12813_v10 = vcombine.high %v6208_v44, %v6220_v35  ;;  %v6447_v55 = vld [vmem:[%s19653_s7 + $0x1208] sm:$0xff]  ;;  %v6064_v20 = vld [vmem:[%s19653_s7 + $0x610] sm:$0xff] }
 0x4f5   :  { %10780 = vmatprep.subr.bf16.mxu0 %v12597_v61  ;;  %v13195_v61 = vcombine.high %v6591_v29, %v6603_v33  ;;  %v6459_v38 = vld [vmem:[%s19653_s7 + $0x1268] sm:$0xff] }
 0x4f7   :  { %10738 = vmatpush1.bf16.msra.mxu1 %v12978_v36  ;;  %v6196_v36 = vld [vmem:[%s19653_s7 + $0xa30] sm:$0xff] }
 0x4f8   :  { %10781 = vmatpush1.bf16.msra.mxu0 %v12596_v11  ;;  %10739 = vmatprep.subr.bf16.mxu1 %v12955_v62  ;;  %v13194_v11 = vcombine.low %v6591_v29, %v6603_v33  ;;  %v12812_v62 = vcombine.low %v6208_v44, %v6220_v35  ;;  %v12789_v3 = vcombine.high %v6184_v39, %v6196_v36  ;;  %v6424_v33 = vld [vmem:[%s19653_s7 + $0x1150] sm:$0xff]  ;;  %v6041_v35 = vld [vmem:[%s19653_s7 + $0x558] sm:$0xff] }
 0x4f9   :  { %10782 = vmatprep.subr.bf16.mxu0 %v12573_v0  ;;  %v13171_v0 = vcombine.high %v6567_v27, %v6579_v32  ;;  %v6436_v44 = vld [vmem:[%s19653_s7 + $0x11b0] sm:$0xff] }
 0x4fb   :  { %10740 = vmatpush1.bf16.msra.mxu1 %v12954_v43  ;;  %v6172_v43 = vld [vmem:[%s19653_s7 + $0x970] sm:$0xff] }
 0x4fc   :  { %10783 = vmatpush1.bf16.msra.mxu0 %v12572_v54  ;;  %10741 = vmatprep.subr.bf16.mxu1 %v12931_v13  ;;  %v13170_v54 = vcombine.low %v6567_v27, %v6579_v32  ;;  %v12788_v13 = vcombine.low %v6184_v39, %v6196_v36  ;;  %v12765_v49 = vcombine.high %v6160_v24, %v6172_v43  ;;  %v6400_v32 = vld [vmem:[%s19653_s7 + $0x1090] sm:$0xff] }
 0x4fd   :  { %10784 = vmatprep.subr.bf16.mxu0 %v12549_v48  ;;  %v13147_v48 = vcombine.high %v6543_v6, %v6555_v41  ;;  %v6412_v39 = vld [vmem:[%s19653_s7 + $0x10f0] sm:$0xff]  ;;  %v13028_v36 = vcombine.low %v6424_v33, %v6436_v44 }
 0x4ff   :  { %10742 = vmatpush1.bf16.msra.mxu1 %v12930_v17  ;;  %v6148_v17 = vld [vmem:[%s19653_s7 + $0x8b0] sm:$0xff] }
 0x500   :  { %10785 = vmatpush1.bf16.msra.mxu0 %v12548_v2  ;;  %10743 = vmatprep.subr.bf16.mxu1 %v12907_v18  ;;  %v13146_v2 = vcombine.low %v6543_v6, %v6555_v41  ;;  %v12764_v18 = vcombine.low %v6160_v24, %v6172_v43  ;;  %v12741_v47 = vcombine.high %v6136_v57, %v6148_v17  ;;  %v6376_v6 = vld [vmem:[%s19653_s7 + $0xfd0] sm:$0xff]  ;;  %v5993_v43 = vld [vmem:[%s19653_s7 + $0x3d8] sm:$0xff] }
 0x501   :  { %10786 = vmatprep.subr.bf16.mxu0 %v12525_v56  ;;  %v13123_v56 = vcombine.high %v6519_v42, %v6531_v46  ;;  %v6388_v41 = vld [vmem:[%s19653_s7 + $0x1030] sm:$0xff] }
 0x503   :  { %10744 = vmatpush1.bf16.msra.mxu1 %v12906_v15  ;;  %v6124_v15 = vld [vmem:[%s19653_s7 + $0x7f0] sm:$0xff] }
 0x504   :  { %10787 = vmatpush1.bf16.msra.mxu0 %v12524_v16  ;;  %10745 = vmatprep.subr.bf16.mxu1 %v12883_v19  ;;  %v13122_v16 = vcombine.low %v6519_v42, %v6531_v46  ;;  %v12740_v19 = vcombine.low %v6136_v57, %v6148_v17  ;;  %v12717_v25 = vcombine.high %v6112_v50, %v6124_v15  ;;  %v6352_v46 = vld [vmem:[%s19653_s7 + $0xf10] sm:$0xff]  ;;  %v5969_v17 = vld [vmem:[%s19653_s7 + $0x318] sm:$0xff] }
 0x505   :  { %10788 = vmatprep.subr.bf16.mxu0 %v12501_v1  ;;  %v13099_v1 = vcombine.high %v6495_v37, %v6507_v53  ;;  %v6364_v57 = vld [vmem:[%s19653_s7 + $0xf70] sm:$0xff] }
 0x507   :  { %10746 = vmatpush1.bf16.msra.mxu1 %v12882_v31  ;;  %v6100_v31 = vld [vmem:[%s19653_s7 + $0x730] sm:$0xff] }
 0x508   :  { %10789 = vmatpush1.bf16.msra.mxu0 %v12500_v22  ;;  %10747 = vmatprep.subr.bf16.mxu1 %v12859_v23  ;;  %v13098_v22 = vcombine.low %v6495_v37, %v6507_v53  ;;  %v12716_v23 = vcombine.low %v6112_v50, %v6124_v15  ;;  %v12693_v9 = vcombine.high %v6088_v8, %v6100_v31  ;;  %v6328_v53 = vld [vmem:[%s19653_s7 + $0xe50] sm:$0xff]  ;;  %v5945_v15 = vld [vmem:[%s19653_s7 + $0x258] sm:$0xff] }
 0x509   :  { %10790 = vmatprep.subr.bf16.mxu0 %v12477_v34  ;;  %v13075_v34 = vcombine.high %v6471_v30, %v6483_v26  ;;  %v6340_v50 = vld [vmem:[%s19653_s7 + $0xeb0] sm:$0xff] }
 0x50b   :  { %10748 = vmatpush1.bf16.msra.mxu1 %v12858_v45  ;;  %v6076_v45 = vld [vmem:[%s19653_s7 + $0x670] sm:$0xff] }
 0x50c   :  { %10791 = vmatpush1.bf16.msra.mxu0 %v12476_v51  ;;  %10749 = vmatprep.subr.bf16.mxu1 %v13219_v28  ;;  %v13074_v51 = vcombine.low %v6471_v30, %v6483_v26  ;;  %v12692_v28 = vcombine.low %v6088_v8, %v6100_v31  ;;  %v12669_v29 = vcombine.high %v6064_v20, %v6076_v45  ;;  %v6304_v26 = vld [vmem:[%s19653_s7 + $0xd90] sm:$0xff]  ;;  %v5921_v31 = vld [vmem:[%s19653_s7 + $0x198] sm:$0xff] }
 0x50d   :  { %10792 = vmatprep.subr.bf16.mxu0 %v12837_v52  ;;  %v13051_v52 = vcombine.high %v6447_v55, %v6459_v38  ;;  %v6316_v8 = vld [vmem:[%s19653_s7 + $0xdf0] sm:$0xff] }
 0x50f   :  { %10750 = vmatpush2.bf16.msra.mxu1 %v13218_v58  ;;  %v6053_v58 = vld [vmem:[%s19653_s7 + $0x5b8] sm:$0xff] }
 0x510   :  { %10793 = vmatpush2.bf16.msra.mxu0 %v12836_v59  ;;  %10751 = vmatprep.subr.bf16.mxu1 %v13195_v61  ;;  %v13050_v59 = vcombine.low %v6447_v55, %v6459_v38  ;;  %v12668_v61 = vcombine.low %v6064_v20, %v6076_v45  ;;  %v12647_v27 = vcombine.high %v6041_v35, %v6053_v58  ;;  %v6280_v38 = vld [vmem:[%s19653_s7 + $0xcd0] sm:$0xff]  ;;  %v5897_v45 = vld [vmem:[%s19653_s7 + $0xd8] sm:$0xff] }
 0x511   :  { %10794 = vmatprep.subr.bf16.mxu0 %v12813_v10  ;;  %v13029_v10 = vcombine.high %v6424_v33, %v6436_v44  ;;  %v6292_v20 = vld [vmem:[%s19653_s7 + $0xd30] sm:$0xff] }
 0x512   :  { %v6256_v44 = vld [vmem:[%s19653_s7 + $0xc10] sm:$0xff] }
 0x513   :  { %10752 = vmatpush2.bf16.msra.mxu1 %v13194_v11  ;;  %v6017_v11 = vld [vmem:[%s19653_s7 + $0x498] sm:$0xff] }
 0x514   :  { %10795 = vmatpush2.bf16.msra.mxu0 %v12812_v62  ;;  %10753 = vmatprep.subr.bf16.mxu1 %v13171_v0  ;;  %v6029_v62 = vld [vmem:[%s19653_s7 + $0x4f8] sm:$0xff]  ;;  %v12646_v0 = vcombine.low %v6041_v35, %v6053_v58  ;;  %v6268_v35 = vld [vmem:[%s19653_s7 + $0xc70] sm:$0xff] }
 0x515   :  { %10796 = vmatprep.subr.bf16.mxu0 %v12789_v3  ;;  %v13005_v3 = vcombine.high %v6400_v32, %v6412_v39  ;;  %v12623_v24 = vcombine.high %v6017_v11, %v6029_v62  ;;  %v5873_v58 = vld [vmem:[%s19653_s7 + $0x18] sm:$0xff] }
 0x517   :  { %10754 = vmatpush2.bf16.msra.mxu1 %v13170_v54  ;;  %v6005_v54 = vld [vmem:[%s19653_s7 + $0x438] sm:$0xff] }
 0x518   :  { %10797 = vmatpush2.bf16.msra.mxu0 %v12788_v13  ;;  %10755 = vmatprep.subr.bf16.mxu1 %v13147_v48  ;;  %v13004_v13 = vcombine.low %v6400_v32, %v6412_v39  ;;  %v12622_v48 = vcombine.low %v6017_v11, %v6029_v62  ;;  %v12599_v42 = vcombine.high %v5993_v43, %v6005_v54  ;;  %v6616_v39 = vld [vmem:[%s19653_s7 + $0x1750] sm:$0xff]  ;;  %v6233_v11 = vld [vmem:[%s19653_s7 + $0xb58] sm:$0xff] }
 0x519   :  { %10798 = vmatprep.subr.bf16.mxu0 %v12765_v49  ;;  %v12981_v49 = vcombine.high %v6376_v6, %v6388_v41  ;;  %v6245_v62 = vld [vmem:[%s19653_s7 + $0xbb8] sm:$0xff] }
 0x51b   :  { %10756 = vmatpush2.bf16.msra.mxu1 %v13146_v2  ;;  %v5981_v2 = vld [vmem:[%s19653_s7 + $0x378] sm:$0xff] }
 0x51c   :  { %10799 = vmatpush2.bf16.msra.mxu0 %v12764_v18  ;;  %10757 = vmatprep.subr.bf16.mxu1 %v13123_v56  ;;  %v12980_v18 = vcombine.low %v6376_v6, %v6388_v41  ;;  %v12598_v56 = vcombine.low %v5993_v43, %v6005_v54  ;;  %v12575_v37 = vcombine.high %v5969_v17, %v5981_v2  ;;  %v6604_v43 = vld [vmem:[%s19653_s7 + $0x16f0] sm:$0xff]  ;;  %v6209_v54 = vld [vmem:[%s19653_s7 + $0xa98] sm:$0xff] }
 0x51d   :  { %10800 = vmatprep.subr.bf16.mxu0 %v12741_v47  ;;  %v12957_v47 = vcombine.high %v6352_v46, %v6364_v57  ;;  %v12839_v41 = vcombine.high %v6233_v11, %v6245_v62 }
 0x51f   :  { %10758 = vmatpush2.bf16.msra.mxu1 %v13122_v16  ;;  %v5957_v16 = vld [vmem:[%s19653_s7 + $0x2b8] sm:$0xff] }
 0x520   :  { %10801 = vmatpush2.bf16.msra.mxu0 %v12740_v19  ;;  %10759 = vmatprep.subr.bf16.mxu1 %v13099_v1  ;;  %v12956_v19 = vcombine.low %v6352_v46, %v6364_v57  ;;  %v12574_v1 = vcombine.low %v5969_v17, %v5981_v2  ;;  %v12551_v30 = vcombine.high %v5945_v15, %v5957_v16  ;;  %v6568_v57 = vld [vmem:[%s19653_s7 + $0x15d0] sm:$0xff]  ;;  %v6185_v2 = vld [vmem:[%s19653_s7 + $0x9d8] sm:$0xff] }
 0x521   :  { %10802 = vmatprep.subr.bf16.mxu0 %v12717_v25  ;;  %v12933_v25 = vcombine.high %v6328_v53, %v6340_v50  ;;  %v6580_v17 = vld [vmem:[%s19653_s7 + $0x1630] sm:$0xff] }
 0x523   :  { %10760 = vmatpush2.bf16.msra.mxu1 %v13098_v22  ;;  %v5933_v22 = vld [vmem:[%s19653_s7 + $0x1f8] sm:$0xff] }
 0x524   :  { %10803 = vmatpush2.bf16.msra.mxu0 %v12716_v23  ;;  %10761 = vmatprep.subr.bf16.mxu1 %v13075_v34  ;;  %v12932_v23 = vcombine.low %v6328_v53, %v6340_v50  ;;  %v12550_v34 = vcombine.low %v5945_v15, %v5957_v16  ;;  %v12527_v55 = vcombine.high %v5921_v31, %v5933_v22  ;;  %v6544_v50 = vld [vmem:[%s19653_s7 + $0x1510] sm:$0xff]  ;;  %v6161_v16 = vld [vmem:[%s19653_s7 + $0x918] sm:$0xff] }
 0x525   :  { %10804 = vmatprep.subr.bf16.mxu0 %v12693_v9  ;;  %v12909_v9 = vcombine.high %v6304_v26, %v6316_v8  ;;  %v6556_v15 = vld [vmem:[%s19653_s7 + $0x1570] sm:$0xff] }
 0x527   :  { %10762 = vmatpush2.bf16.msra.mxu1 %v13074_v51  ;;  %v5909_v51 = vld [vmem:[%s19653_s7 + $0x138] sm:$0xff] }
 0x528   :  { %10805 = vmatpush2.bf16.msra.mxu0 %v12692_v28  ;;  %10763 = vmatprep.subr.bf16.mxu1 %v13051_v52  ;;  %v12908_v28 = vcombine.low %v6304_v26, %v6316_v8  ;;  %v12526_v52 = vcombine.low %v5921_v31, %v5933_v22  ;;  %v12503_v33 = vcombine.high %v5897_v45, %v5909_v51  ;;  %v6520_v8 = vld [vmem:[%s19653_s7 + $0x1450] sm:$0xff]  ;;  %v6137_v22 = vld [vmem:[%s19653_s7 + $0x858] sm:$0xff] }
 0x529   :  { %10806 = vmatprep.subr.bf16.mxu0 %v12669_v29  ;;  %v12885_v29 = vcombine.high %v6280_v38, %v6292_v20  ;;  %v6532_v31 = vld [vmem:[%s19653_s7 + $0x14b0] sm:$0xff] }
 0x52b   :  { %10764 = vmatpush2.bf16.msra.mxu1 %v13050_v59  ;;  %v5885_v59 = vld [vmem:[%s19653_s7 + $0x78] sm:$0xff] }
 0x52c   :  { %10807 = vmatpush2.bf16.msra.mxu0 %v12668_v61  ;;  %10819 = vmatprep.subr.bf16.mxu1 %v13029_v10  ;;  %v12884_v61 = vcombine.low %v6280_v38, %v6292_v20  ;;  %v12502_v10 = vcombine.low %v5897_v45, %v5909_v51  ;;  %v12479_v32 = vcombine.high %v5873_v58, %v5885_v59  ;;  %v6496_v20 = vld [vmem:[%s19653_s7 + $0x1390] sm:$0xff]  ;;  %v6113_v51 = vld [vmem:[%s19653_s7 + $0x798] sm:$0xff] }
 0x52d   :  { %10862 = vmatprep.subr.bf16.mxu0 %v12647_v27  ;;  %v12861_v27 = vcombine.high %v6256_v44, %v6268_v35  ;;  %v6508_v45 = vld [vmem:[%s19653_s7 + $0x13f0] sm:$0xff] }
 0x52e   :  { %10766 = vmatmul.mubr.bf16.vlgmr.msra.gmra.mxu1 %v17384_v4 }
 0x52f   :  { %10809 = vmatmul.mubr.bf16.vlgmr.msra.gmra.mxu0 %v17268_v12  ;;  %10820 = vmatpush1.bf16.msra.mxu1 %v13028_v36  ;;  %v6628_v36 = vld [vmem:[%s19653_s7 + $0x17b0] sm:$0xff] }
 0x530   :  { %10851 = vmatprep.mubr.bf16.mxu1 %v17382_v21  ;;  %10863 = vmatpush1.bf16.msra.mxu0 %v12646_v0  ;;  %v12860_v0 = vcombine.low %v6256_v44, %v6268_v35  ;;  %v13221_v6 = vcombine.high %v6616_v39, %v6628_v36  ;;  %v6472_v35 = vld [vmem:[%s19653_s7 + $0x12d0] sm:$0xff] }
 0x531   :  { %10894 = vmatprep.mubr.bf16.mxu0 %v17266_v7  ;;  %10821 = vmatprep.subr.bf16.mxu1 %v13005_v3  ;;  %v12478_v3 = vcombine.low %v5873_v58, %v5885_v59  ;;  %v6484_v58 = vld [vmem:[%s19653_s7 + $0x1330] sm:$0xff]  ;;  %v6089_v59 = vld [vmem:[%s19653_s7 + $0x6d8] sm:$0xff] }
 0x532   :  { %10864 = vmatprep.subr.bf16.mxu0 %v12623_v24  ;;  %v6592_v24 = vld [vmem:[%s19653_s7 + $0x1690] sm:$0xff] }
 0x533   :  { %10822 = vmatpush1.bf16.msra.mxu1 %v13004_v13  ;;  %v6221_v13 = vld [vmem:[%s19653_s7 + $0xaf8] sm:$0xff] }
 0x534   :  { %10865 = vmatpush1.bf16.msra.mxu0 %v12622_v48  ;;  %10823 = vmatprep.subr.bf16.mxu1 %v12981_v49  ;;  %v13220_v48 = vcombine.low %v6616_v39, %v6628_v36  ;;  %v12838_v49 = vcombine.low %v6233_v11, %v6245_v62  ;;  %v12815_v46 = vcombine.high %v6209_v54, %v6221_v13  ;;  %v6448_v36 = vld [vmem:[%s19653_s7 + $0x1210] sm:$0xff]  ;;  %v6065_v62 = vld [vmem:[%s19653_s7 + $0x618] sm:$0xff] }
 0x535   :  { %10866 = vmatprep.subr.bf16.mxu0 %v12599_v42  ;;  %v13197_v42 = vcombine.high %v6592_v24, %v6604_v43  ;;  %v6460_v11 = vld [vmem:[%s19653_s7 + $0x1270] sm:$0xff] }
 0x537   :  { %10824 = vmatpush1.bf16.msra.mxu1 %v12980_v18  ;;  %v6197_v18 = vld [vmem:[%s19653_s7 + $0xa38] sm:$0xff] }
 0x538   :  { %10867 = vmatpush1.bf16.msra.mxu0 %v12598_v56  ;;  %10825 = vmatprep.subr.bf16.mxu1 %v12957_v47  ;;  %v13196_v56 = vcombine.low %v6592_v24, %v6604_v43  ;;  %v12814_v47 = vcombine.low %v6209_v54, %v6221_v13  ;;  %v12791_v53 = vcombine.high %v6185_v2, %v6197_v18  ;;  %v6425_v43 = vld [vmem:[%s19653_s7 + $0x1158] sm:$0xff]  ;;  %v6042_v13 = vld [vmem:[%s19653_s7 + $0x560] sm:$0xff] }
 0x539   :  { %10868 = vmatprep.subr.bf16.mxu0 %v12575_v37  ;;  %v13173_v37 = vcombine.high %v6568_v57, %v6580_v17  ;;  %v6437_v54 = vld [vmem:[%s19653_s7 + $0x11b8] sm:$0xff] }
 0x53b   :  { %10826 = vmatpush1.bf16.msra.mxu1 %v12956_v19  ;;  %v6173_v19 = vld [vmem:[%s19653_s7 + $0x978] sm:$0xff] }
 0x53c   :  { %10869 = vmatpush1.bf16.msra.mxu0 %v12574_v1  ;;  %10827 = vmatprep.subr.bf16.mxu1 %v12933_v25  ;;  %v13172_v1 = vcombine.low %v6568_v57, %v6580_v17  ;;  %v12790_v25 = vcombine.low %v6185_v2, %v6197_v18  ;;  %v12767_v26 = vcombine.high %v6161_v16, %v6173_v19  ;;  %v6401_v17 = vld [vmem:[%s19653_s7 + $0x1098] sm:$0xff] }
 0x53d   :  { %10870 = vmatprep.subr.bf16.mxu0 %v12551_v30  ;;  %v13149_v30 = vcombine.high %v6544_v50, %v6556_v15  ;;  %v6413_v2 = vld [vmem:[%s19653_s7 + $0x10f8] sm:$0xff]  ;;  %v13030_v18 = vcombine.low %v6425_v43, %v6437_v54 }
 0x53f   :  { %10828 = vmatpush1.bf16.msra.mxu1 %v12932_v23  ;;  %v6149_v23 = vld [vmem:[%s19653_s7 + $0x8b8] sm:$0xff] }
 0x540   :  { %10871 = vmatpush1.bf16.msra.mxu0 %v12550_v34  ;;  %10829 = vmatprep.subr.bf16.mxu1 %v12909_v9  ;;  %v13148_v34 = vcombine.low %v6544_v50, %v6556_v15  ;;  %v12766_v9 = vcombine.low %v6161_v16, %v6173_v19  ;;  %v12743_v38 = vcombine.high %v6137_v22, %v6149_v23  ;;  %v6377_v50 = vld [vmem:[%s19653_s7 + $0xfd8] sm:$0xff]  ;;  %v5994_v19 = vld [vmem:[%s19653_s7 + $0x3e0] sm:$0xff] }
 0x541   :  { %10872 = vmatprep.subr.bf16.mxu0 %v12527_v55  ;;  %v13125_v55 = vcombine.high %v6520_v8, %v6532_v31  ;;  %v6389_v15 = vld [vmem:[%s19653_s7 + $0x1038] sm:$0xff] }
 0x543   :  { %10830 = vmatpush1.bf16.msra.mxu1 %v12908_v28  ;;  %v6125_v28 = vld [vmem:[%s19653_s7 + $0x7f8] sm:$0xff] }
 0x544   :  { %10873 = vmatpush1.bf16.msra.mxu0 %v12526_v52  ;;  %10831 = vmatprep.subr.bf16.mxu1 %v12885_v29  ;;  %v13124_v52 = vcombine.low %v6520_v8, %v6532_v31  ;;  %v12742_v29 = vcombine.low %v6137_v22, %v6149_v23  ;;  %v12719_v44 = vcombine.high %v6113_v51, %v6125_v28  ;;  %v6353_v31 = vld [vmem:[%s19653_s7 + $0xf18] sm:$0xff]  ;;  %v5970_v23 = vld [vmem:[%s19653_s7 + $0x320] sm:$0xff] }
 0x545   :  { %10874 = vmatprep.subr.bf16.mxu0 %v12503_v33  ;;  %v13101_v33 = vcombine.high %v6496_v20, %v6508_v45  ;;  %v6365_v22 = vld [vmem:[%s19653_s7 + $0xf78] sm:$0xff] }
 0x547   :  { %10832 = vmatpush1.bf16.msra.mxu1 %v12884_v61  ;;  %v6101_v61 = vld [vmem:[%s19653_s7 + $0x738] sm:$0xff] }
 0x548   :  { %10875 = vmatpush1.bf16.msra.mxu0 %v12502_v10  ;;  %10833 = vmatprep.subr.bf16.mxu1 %v12861_v27  ;;  %v13100_v10 = vcombine.low %v6496_v20, %v6508_v45  ;;  %v12718_v27 = vcombine.low %v6113_v51, %v6125_v28  ;;  %v12695_v39 = vcombine.high %v6089_v59, %v6101_v61  ;;  %v6329_v45 = vld [vmem:[%s19653_s7 + $0xe58] sm:$0xff]  ;;  %v5946_v28 = vld [vmem:[%s19653_s7 + $0x260] sm:$0xff] }
 0x549   :  { %10876 = vmatprep.subr.bf16.mxu0 %v12479_v32  ;;  %v13077_v32 = vcombine.high %v6472_v35, %v6484_v58  ;;  %v6341_v51 = vld [vmem:[%s19653_s7 + $0xeb8] sm:$0xff] }
 0x54b   :  { %10834 = vmatpush1.bf16.msra.mxu1 %v12860_v0  ;;  %v6077_v0 = vld [vmem:[%s19653_s7 + $0x678] sm:$0xff] }
 0x54c   :  { %10877 = vmatpush1.bf16.msra.mxu0 %v12478_v3  ;;  %10835 = vmatprep.subr.bf16.mxu1 %v13221_v6  ;;  %v13076_v3 = vcombine.low %v6472_v35, %v6484_v58  ;;  %v12694_v6 = vcombine.low %v6089_v59, %v6101_v61  ;;  %v12671_v24 = vcombine.high %v6065_v62, %v6077_v0  ;;  %v6305_v58 = vld [vmem:[%s19653_s7 + $0xd98] sm:$0xff]  ;;  %v5922_v61 = vld [vmem:[%s19653_s7 + $0x1a0] sm:$0xff] }
 0x54d   :  { %10878 = vmatprep.subr.bf16.mxu0 %v12839_v41  ;;  %v13053_v41 = vcombine.high %v6448_v36, %v6460_v11  ;;  %v6317_v59 = vld [vmem:[%s19653_s7 + $0xdf8] sm:$0xff] }
 0x54f   :  { %10836 = vmatpush2.bf16.msra.mxu1 %v13220_v48  ;;  %v6054_v48 = vld [vmem:[%s19653_s7 + $0x5c0] sm:$0xff] }
 0x550   :  { %10879 = vmatpush2.bf16.msra.mxu0 %v12838_v49  ;;  %10837 = vmatprep.subr.bf16.mxu1 %v13197_v42  ;;  %v13052_v49 = vcombine.low %v6448_v36, %v6460_v11  ;;  %v12670_v42 = vcombine.low %v6065_v62, %v6077_v0  ;;  %v12649_v57 = vcombine.high %v6042_v13, %v6054_v48  ;;  %v6281_v11 = vld [vmem:[%s19653_s7 + $0xcd8] sm:$0xff]  ;;  %v5898_v0 = vld [vmem:[%s19653_s7 + $0xe0] sm:$0xff] }
 0x551   :  { %10880 = vmatprep.subr.bf16.mxu0 %v12815_v46  ;;  %v13031_v46 = vcombine.high %v6425_v43, %v6437_v54  ;;  %v6293_v62 = vld [vmem:[%s19653_s7 + $0xd38] sm:$0xff] }
 0x552   :  { %v6257_v54 = vld [vmem:[%s19653_s7 + $0xc18] sm:$0xff] }
 0x553   :  { %10838 = vmatpush2.bf16.msra.mxu1 %v13196_v56  ;;  %v6018_v56 = vld [vmem:[%s19653_s7 + $0x4a0] sm:$0xff] }
 0x554   :  { %10881 = vmatpush2.bf16.msra.mxu0 %v12814_v47  ;;  %10839 = vmatprep.subr.bf16.mxu1 %v13173_v37  ;;  %v6030_v47 = vld [vmem:[%s19653_s7 + $0x500] sm:$0xff]  ;;  %v12648_v37 = vcombine.low %v6042_v13, %v6054_v48  ;;  %v6269_v13 = vld [vmem:[%s19653_s7 + $0xc78] sm:$0xff] }
 0x555   :  { %10882 = vmatprep.subr.bf16.mxu0 %v12791_v53  ;;  %v13007_v53 = vcombine.high %v6401_v17, %v6413_v2  ;;  %v12625_v16 = vcombine.high %v6018_v56, %v6030_v47  ;;  %v5874_v48 = vld [vmem:[%s19653_s7 + $0x20] sm:$0xff] }
 0x557   :  { %10840 = vmatpush2.bf16.msra.mxu1 %v13172_v1  ;;  %v6006_v1 = vld [vmem:[%s19653_s7 + $0x440] sm:$0xff] }
 0x558   :  { %10883 = vmatpush2.bf16.msra.mxu0 %v12790_v25  ;;  %10841 = vmatprep.subr.bf16.mxu1 %v13149_v30  ;;  %v13006_v25 = vcombine.low %v6401_v17, %v6413_v2  ;;  %v12624_v30 = vcombine.low %v6018_v56, %v6030_v47  ;;  %v12601_v8 = vcombine.high %v5994_v19, %v6006_v1  ;;  %v6617_v2 = vld [vmem:[%s19653_s7 + $0x1758] sm:$0xff]  ;;  %v6234_v56 = vld [vmem:[%s19653_s7 + $0xb60] sm:$0xff] }
 0x559   :  { %10884 = vmatprep.subr.bf16.mxu0 %v12767_v26  ;;  %v12983_v26 = vcombine.high %v6377_v50, %v6389_v15  ;;  %v6246_v47 = vld [vmem:[%s19653_s7 + $0xbc0] sm:$0xff] }
 0x55b   :  { %10842 = vmatpush2.bf16.msra.mxu1 %v13148_v34  ;;  %v5982_v34 = vld [vmem:[%s19653_s7 + $0x380] sm:$0xff] }
 0x55c   :  { %10885 = vmatpush2.bf16.msra.mxu0 %v12766_v9  ;;  %10843 = vmatprep.subr.bf16.mxu1 %v13125_v55  ;;  %v12982_v9 = vcombine.low %v6377_v50, %v6389_v15  ;;  %v12600_v55 = vcombine.low %v5994_v19, %v6006_v1  ;;  %v12577_v20 = vcombine.high %v5970_v23, %v5982_v34  ;;  %v6605_v19 = vld [vmem:[%s19653_s7 + $0x16f8] sm:$0xff]  ;;  %v6210_v1 = vld [vmem:[%s19653_s7 + $0xaa0] sm:$0xff] }
 0x55d   :  { %10886 = vmatprep.subr.bf16.mxu0 %v12743_v38  ;;  %v12959_v38 = vcombine.high %v6353_v31, %v6365_v22  ;;  %v12841_v15 = vcombine.high %v6234_v56, %v6246_v47 }
 0x55f   :  { %10844 = vmatpush2.bf16.msra.mxu1 %v13124_v52  ;;  %v5958_v52 = vld [vmem:[%s19653_s7 + $0x2c0] sm:$0xff] }
 0x560   :  { %10887 = vmatpush2.bf16.msra.mxu0 %v12742_v29  ;;  %10845 = vmatprep.subr.bf16.mxu1 %v13101_v33  ;;  %v12958_v29 = vcombine.low %v6353_v31, %v6365_v22  ;;  %v12576_v33 = vcombine.low %v5970_v23, %v5982_v34  ;;  %v12553_v35 = vcombine.high %v5946_v28, %v5958_v52  ;;  %v6569_v22 = vld [vmem:[%s19653_s7 + $0x15d8] sm:$0xff]  ;;  %v6186_v34 = vld [vmem:[%s19653_s7 + $0x9e0] sm:$0xff] }
 0x561   :  { %10888 = vmatprep.subr.bf16.mxu0 %v12719_v44  ;;  %v12935_v44 = vcombine.high %v6329_v45, %v6341_v51  ;;  %v6581_v23 = vld [vmem:[%s19653_s7 + $0x1638] sm:$0xff] }
 0x563   :  { %10846 = vmatpush2.bf16.msra.mxu1 %v13100_v10  ;;  %v5934_v10 = vld [vmem:[%s19653_s7 + $0x200] sm:$0xff] }
 0x564   :  { %10889 = vmatpush2.bf16.msra.mxu0 %v12718_v27  ;;  %10847 = vmatprep.subr.bf16.mxu1 %v13077_v32  ;;  %v12934_v27 = vcombine.low %v6329_v45, %v6341_v51  ;;  %v12552_v32 = vcombine.low %v5946_v28, %v5958_v52  ;;  %v12529_v36 = vcombine.high %v5922_v61, %v5934_v10  ;;  %v6545_v51 = vld [vmem:[%s19653_s7 + $0x1518] sm:$0xff]  ;;  %v6162_v52 = vld [vmem:[%s19653_s7 + $0x920] sm:$0xff] }
 0x565   :  { %10890 = vmatprep.subr.bf16.mxu0 %v12695_v39  ;;  %v12911_v39 = vcombine.high %v6305_v58, %v6317_v59  ;;  %v6557_v28 = vld [vmem:[%s19653_s7 + $0x1578] sm:$0xff] }
 0x567   :  { %10848 = vmatpush2.bf16.msra.mxu1 %v13076_v3  ;;  %v5910_v3 = vld [vmem:[%s19653_s7 + $0x140] sm:$0xff] }
 0x568   :  { %10891 = vmatpush2.bf16.msra.mxu0 %v12694_v6  ;;  %10849 = vmatprep.subr.bf16.mxu1 %v13053_v41  ;;  %v12910_v6 = vcombine.low %v6305_v58, %v6317_v59  ;;  %v12528_v41 = vcombine.low %v5922_v61, %v5934_v10  ;;  %v12505_v43 = vcombine.high %v5898_v0, %v5910_v3  ;;  %v6521_v59 = vld [vmem:[%s19653_s7 + $0x1458] sm:$0xff]  ;;  %v6138_v10 = vld [vmem:[%s19653_s7 + $0x860] sm:$0xff] }
 0x569   :  { %10892 = vmatprep.subr.bf16.mxu0 %v12671_v24  ;;  %v12887_v24 = vcombine.high %v6281_v11, %v6293_v62  ;;  %v6533_v61 = vld [vmem:[%s19653_s7 + $0x14b8] sm:$0xff] }
 0x56b   :  { %10850 = vmatpush2.bf16.msra.mxu1 %v13052_v49  ;;  %v5886_v49 = vld [vmem:[%s19653_s7 + $0x80] sm:$0xff] }
 0x56c   :  { %10893 = vmatpush2.bf16.msra.mxu0 %v12670_v42  ;;  %10905 = vmatprep.subr.bf16.mxu1 %v13031_v46  ;;  %v12886_v42 = vcombine.low %v6281_v11, %v6293_v62  ;;  %v12504_v46 = vcombine.low %v5898_v0, %v5910_v3  ;;  %v12481_v17 = vcombine.high %v5874_v48, %v5886_v49  ;;  %v6497_v62 = vld [vmem:[%s19653_s7 + $0x1398] sm:$0xff]  ;;  %v6114_v3 = vld [vmem:[%s19653_s7 + $0x7a0] sm:$0xff] }
 0x56d   :  { %10948 = vmatprep.subr.bf16.mxu0 %v12649_v57  ;;  %v12863_v57 = vcombine.high %v6257_v54, %v6269_v13  ;;  %v6509_v0 = vld [vmem:[%s19653_s7 + $0x13f8] sm:$0xff] }
 0x56e   :  { %10852 = vmatmul.mubr.bf16.vlgmr.msra.gmra.mxu1 %v17384_v4 }
 0x56f   :  { %10895 = vmatmul.mubr.bf16.vlgmr.msra.gmra.mxu0 %v17268_v12  ;;  %10906 = vmatpush1.bf16.msra.mxu1 %v13030_v18  ;;  %v6629_v18 = vld [vmem:[%s19653_s7 + $0x17b8] sm:$0xff] }
 0x570   :  { %10937 = vmatprep.mubr.bf16.mxu1 %v17382_v21  ;;  %10949 = vmatpush1.bf16.msra.mxu0 %v12648_v37  ;;  %v12862_v37 = vcombine.low %v6257_v54, %v6269_v13  ;;  %v13223_v50 = vcombine.high %v6617_v2, %v6629_v18  ;;  %v6473_v13 = vld [vmem:[%s19653_s7 + $0x12d8] sm:$0xff] }
 0x571   :  { %10980 = vmatprep.mubr.bf16.mxu0 %v17266_v7  ;;  %10907 = vmatprep.subr.bf16.mxu1 %v13007_v53  ;;  %v12480_v53 = vcombine.low %v5874_v48, %v5886_v49  ;;  %v6485_v48 = vld [vmem:[%s19653_s7 + $0x1338] sm:$0xff]  ;;  %v6090_v49 = vld [vmem:[%s19653_s7 + $0x6e0] sm:$0xff] }
 0x572   :  { %10950 = vmatprep.subr.bf16.mxu0 %v12625_v16  ;;  %v6593_v16 = vld [vmem:[%s19653_s7 + $0x1698] sm:$0xff] }
 0x573   :  { %10908 = vmatpush1.bf16.msra.mxu1 %v13006_v25  ;;  %v6222_v25 = vld [vmem:[%s19653_s7 + $0xb00] sm:$0xff] }
 0x574   :  { %10951 = vmatpush1.bf16.msra.mxu0 %v12624_v30  ;;  %10909 = vmatprep.subr.bf16.mxu1 %v12983_v26  ;;  %v13222_v30 = vcombine.low %v6617_v2, %v6629_v18  ;;  %v12840_v26 = vcombine.low %v6234_v56, %v6246_v47  ;;  %v12817_v31 = vcombine.high %v6210_v1, %v6222_v25  ;;  %v6449_v18 = vld [vmem:[%s19653_s7 + $0x1218] sm:$0xff]  ;;  %v6066_v47 = vld [vmem:[%s19653_s7 + $0x620] sm:$0xff] }
 0x575   :  { %10952 = vmatprep.subr.bf16.mxu0 %v12601_v8  ;;  %v13199_v8 = vcombine.high %v6593_v16, %v6605_v19  ;;  %v6461_v56 = vld [vmem:[%s19653_s7 + $0x1278] sm:$0xff] }
 0x577   :  { %10910 = vmatpush1.bf16.msra.mxu1 %v12982_v9  ;;  %v6198_v9 = vld [vmem:[%s19653_s7 + $0xa40] sm:$0xff] }
 0x578   :  { %10953 = vmatpush1.bf16.msra.mxu0 %v12600_v55  ;;  %10911 = vmatprep.subr.bf16.mxu1 %v12959_v38  ;;  %v13198_v55 = vcombine.low %v6593_v16, %v6605_v19  ;;  %v12816_v38 = vcombine.low %v6210_v1, %v6222_v25  ;;  %v12793_v45 = vcombine.high %v6186_v34, %v6198_v9  ;;  %v6426_v1 = vld [vmem:[%s19653_s7 + $0x1160] sm:$0xff] }
 0x579   :  { %10954 = vmatprep.subr.bf16.mxu0 %v12577_v20  ;;  %v13175_v20 = vcombine.high %v6569_v22, %v6581_v23  ;;  %v13055_v16 = vcombine.high %v6449_v18, %v6461_v56  ;;  %v6438_v25 = vld [vmem:[%s19653_s7 + $0x11c0] sm:$0xff] }
 0x57b   :  { %10912 = vmatpush1.bf16.msra.mxu1 %v12958_v29  ;;  %v6174_v29 = vld [vmem:[%s19653_s7 + $0x980] sm:$0xff] }
 0x57c   :  { %10955 = vmatpush1.bf16.msra.mxu0 %v12576_v33  ;;  %10913 = vmatprep.subr.bf16.mxu1 %v12935_v44  ;;  %v13174_v33 = vcombine.low %v6569_v22, %v6581_v23  ;;  %v12792_v44 = vcombine.low %v6186_v34, %v6198_v9  ;;  %v12769_v58 = vcombine.high %v6162_v52, %v6174_v29 }
 0x57d   :  { %10956 = vmatprep.subr.bf16.mxu0 %v12553_v35  ;;  %v13151_v35 = vcombine.high %v6545_v51, %v6557_v28  ;;  %v13033_v34 = vcombine.high %v6426_v1, %v6438_v25 }
 0x57f   :  { %10914 = vmatpush1.bf16.msra.mxu1 %v12934_v27  ;;  %v6150_v27 = vld [vmem:[%s19653_s7 + $0x8c0] sm:$0xff] }
 0x580   :  { %10957 = vmatpush1.bf16.msra.mxu0 %v12552_v32  ;;  %10915 = vmatprep.subr.bf16.mxu1 %v12911_v39  ;;  %v13150_v32 = vcombine.low %v6545_v51, %v6557_v28  ;;  %v12768_v39 = vcombine.low %v6162_v52, %v6174_v29  ;;  %v12745_v11 = vcombine.high %v6138_v10, %v6150_v27  ;;  %v6019_v28 = vld [vmem:[%s19653_s7 + $0x4a8] sm:$0xff] }
 0x581   :  { %10958 = vmatprep.subr.bf16.mxu0 %v12529_v36  ;;  %v13127_v36 = vcombine.high %v6521_v59, %v6533_v61  ;;  %v13032_v51 = vcombine.low %v6426_v1, %v6438_v25  ;;  %v6031_v52 = vld [vmem:[%s19653_s7 + $0x508] sm:$0xff] }
 0x583   :  { %10916 = vmatpush1.bf16.msra.mxu1 %v12910_v6  ;;  %v6126_v6 = vld [vmem:[%s19653_s7 + $0x800] sm:$0xff] }
 0x584   :  { %10959 = vmatpush1.bf16.msra.mxu0 %v12528_v41  ;;  %10917 = vmatprep.subr.bf16.mxu1 %v12887_v24  ;;  %v13126_v41 = vcombine.low %v6521_v59, %v6533_v61  ;;  %v12744_v24 = vcombine.low %v6138_v10, %v6150_v27  ;;  %v12721_v54 = vcombine.high %v6114_v3, %v6126_v6  ;;  %v6390_v59 = vld [vmem:[%s19653_s7 + $0x1040] sm:$0xff]  ;;  %v5995_v27 = vld [vmem:[%s19653_s7 + $0x3e8] sm:$0xff] }
 0x585   :  { %10960 = vmatprep.subr.bf16.mxu0 %v12505_v43  ;;  %v13103_v43 = vcombine.high %v6497_v62, %v6509_v0  ;;  %v12627_v10 = vcombine.high %v6019_v28, %v6031_v52 }
 0x587   :  { %10918 = vmatpush1.bf16.msra.mxu1 %v12886_v42  ;;  %v6102_v42 = vld [vmem:[%s19653_s7 + $0x740] sm:$0xff] }
 0x588   :  { %10961 = vmatpush1.bf16.msra.mxu0 %v12504_v46  ;;  %10919 = vmatprep.subr.bf16.mxu1 %v12863_v57  ;;  %v13102_v46 = vcombine.low %v6497_v62, %v6509_v0  ;;  %v12720_v57 = vcombine.low %v6114_v3, %v6126_v6  ;;  %v12697_v2 = vcombine.high %v6090_v49, %v6102_v42 }
 0x589   :  { %10962 = vmatprep.subr.bf16.mxu0 %v12481_v17  ;;  %v13079_v17 = vcombine.high %v6473_v13, %v6485_v48  ;;  %v12626_v3 = vcombine.low %v6019_v28, %v6031_v52  ;;  %v5911_v28 = vld [vmem:[%s19653_s7 + $0x148] sm:$0xff] }
 0x58b   :  { %10920 = vmatpush1.bf16.msra.mxu1 %v12862_v37  ;;  %v6078_v37 = vld [vmem:[%s19653_s7 + $0x680] sm:$0xff] }
 0x58c   :  { %10963 = vmatpush1.bf16.msra.mxu0 %v12480_v53  ;;  %10921 = vmatprep.subr.bf16.mxu1 %v13223_v50  ;;  %v13078_v53 = vcombine.low %v6473_v13, %v6485_v48  ;;  %v10638_v50 = vpop.f32.mrf.mxu0  ;;  %v12673_v19 = vcombine.high %v6066_v47, %v6078_v37  ;;  %v12672_v23 = vcombine.low %v6066_v47, %v6078_v37  ;;  %v6366_v13 = vld [vmem:[%s19653_s7 + $0xf80] sm:$0xff] }
 0x58d   :  { %10964 = vmatprep.subr.bf16.mxu0 %v12841_v15  ;;  %v12696_v15 = vcombine.low %v6090_v49, %v6102_v42  ;;  %v5971_v49 = vld [vmem:[%s19653_s7 + $0x328] sm:$0xff] }
 0x58e   :  { %v10640_v22 = vpop.f32.mrf.mxu0  ;;  %v5983_v42 = vld [vmem:[%s19653_s7 + $0x388] sm:$0xff] }
 0x58f   :  { %10922 = vmatpush2.bf16.msra.mxu1 %v13222_v30  ;;  %v17963_v30 = vld [vmem:[%s19655_s8] sm:$0xff]  ;;  %v12579_v37 = vcombine.high %v5971_v49, %v5983_v42  ;;  %v12578_v1 = vcombine.low %v5971_v49, %v5983_v42 }
 0x590   :  { %10965 = vmatpush2.bf16.msra.mxu0 %v12840_v26  ;;  %10923 = vmatprep.subr.bf16.mxu1 %v13199_v8  ;;  %v6043_v26 = vld [vmem:[%s19653_s7 + $0x568] sm:$0xff]  ;;  %v6647_v9 = vrot.slane %v17963_v30, %v15353_v5  ;;  %v10642_v29 = vpop.f32.mrf.mxu0 }
 0x591   :  { %10966 = vmatprep.subr.bf16.mxu0 %v12817_v31  ;;  %v6055_v8 = vld [vmem:[%s19653_s7 + $0x5c8] sm:$0xff]  ;;  %v13054_v31 = vcombine.low %v6449_v18, %v6461_v56 }
 0x592   :  { %v10644_v62 = vpop.f32.mrf.mxu0 }
 0x593   :  { %10924 = vmatpush2.bf16.msra.mxu1 %v13198_v55  ;;  %v12651_v55 = vcombine.high %v6043_v26, %v6055_v8 }
 0x594   :  { %10967 = vmatpush2.bf16.msra.mxu0 %v12816_v38  ;;  %10925 = vmatprep.subr.bf16.mxu1 %v13175_v20  ;;  %v6402_v38 = vld [vmem:[%s19653_s7 + $0x10a0] sm:$0xff] }
 0x595   :  { %10968 = vmatprep.subr.bf16.mxu0 %v12793_v45  ;;  %v6414_v20 = vld [vmem:[%s19653_s7 + $0x1100] sm:$0xff]  ;;  %v6651_v45 = vrot.slane %v17963_v30, %v16107_v60 }
 0x597   :  { %10926 = vmatpush2.bf16.msra.mxu1 %v13174_v33  ;;  %v12650_v33 = vcombine.low %v6043_v26, %v6055_v8  ;;  %v6306_v8 = vld [vmem:[%s19653_s7 + $0xda0] sm:$0xff] }
 0x598   :  { %10969 = vmatpush2.bf16.msra.mxu0 %v12792_v44  ;;  %10927 = vmatprep.subr.bf16.mxu1 %v13151_v35  ;;  %v10639_v44 = vadd.f32 %v10638_v50, %v6647_v9  ;;  %v13009_v35 = vcombine.high %v6402_v38, %v6414_v20  ;;  %v6342_v50 = vld [vmem:[%s19653_s7 + $0xec0] sm:$0xff] }
 0x599   :  { %10970 = vmatprep.subr.bf16.mxu0 %v12769_v58  ;;  %v6378_v58 = vld [vmem:[%s19653_s7 + $0xfe0] sm:$0xff] }
 0x59a   :  { %v12985_v6 = vcombine.high %v6378_v58, %v6390_v59 }
 0x59b   :  { %10928 = vmatpush2.bf16.msra.mxu1 %v13150_v32  ;;  %v6007_v32 = vld [vmem:[%s19653_s7 + $0x448] sm:$0xff] }
 0x59c   :  { %10971 = vmatpush2.bf16.msra.mxu0 %v12768_v39  ;;  %10929 = vmatprep.subr.bf16.mxu1 %v13127_v36  ;;  %v10641_v39 = vadd.f32 %v10640_v22, %v6651_v45  ;;  %v12602_v18 = vcombine.low %v5995_v27, %v6007_v32  ;;  %v5923_v22 = vld [vmem:[%s19653_s7 + $0x1a8] sm:$0xff] }
 0x59d   :  { %10972 = vmatprep.subr.bf16.mxu0 %v12745_v11  ;;  %v13008_v11 = vcombine.low %v6402_v38, %v6414_v20  ;;  %v6282_v20 = vld [vmem:[%s19653_s7 + $0xce0] sm:$0xff] }
 0x59f   :  { %10930 = vmatpush2.bf16.msra.mxu1 %v13126_v41  ;;  %v10643_v41 = vadd.f32 %v10642_v29, %v6647_v9 }
 0x5a0   :  { %10973 = vmatpush2.bf16.msra.mxu0 %v12744_v24  ;;  %10931 = vmatprep.subr.bf16.mxu1 %v13103_v43  ;;  %v12603_v43 = vcombine.high %v5995_v27, %v6007_v32 }
 0x5a1   :  { %10974 = vmatprep.subr.bf16.mxu0 %v12721_v54  ;;  %v6354_v54 = vld [vmem:[%s19653_s7 + $0xf20] sm:$0xff] }
 0x5a2   :  { %v12961_v56 = vcombine.high %v6354_v54, %v6366_v13 }
 0x5a3   :  { %10932 = vmatpush2.bf16.msra.mxu1 %v13102_v46  ;;  %v10645_v46 = vadd.f32 %v10644_v62, %v6651_v45  ;;  %v6294_v45 = vld [vmem:[%s19653_s7 + $0xd40] sm:$0xff]  ;;  %v6235_v62 = vld [vmem:[%s19653_s7 + $0xb68] sm:$0xff] }
 0x5a4   :  { %10975 = vmatpush2.bf16.msra.mxu0 %v12720_v57  ;;  %10933 = vmatprep.subr.bf16.mxu1 %v13079_v17  ;;  %v12984_v17 = vcombine.low %v6378_v58, %v6390_v59  ;;  %v6270_v58 = vld [vmem:[%s19653_s7 + $0xc80] sm:$0xff]  ;;  %v5875_v59 = vld [vmem:[%s19653_s7 + $0x28] sm:$0xff] }
 0x5a5   :  { %10976 = vmatprep.subr.bf16.mxu0 %v12697_v2 }
 0x5a7   :  { %10934 = vmatpush2.bf16.msra.mxu1 %v13078_v53  ;;  %v6330_v53 = vld [vmem:[%s19653_s7 + $0xe60] sm:$0xff] }
 0x5a8   :  { %10977 = vmatpush2.bf16.msra.mxu0 %v12696_v15  ;;  %10935 = vmatprep.subr.bf16.mxu1 %v13055_v16  ;;  %v5947_v15 = vld [vmem:[%s19653_s7 + $0x268] sm:$0xff]  ;;  %v12937_v25 = vcombine.high %v6330_v53, %v6342_v50 }
 0x5a9   :  { %10978 = vmatprep.subr.bf16.mxu0 %v12673_v19  ;;  %v5959_v16 = vld [vmem:[%s19653_s7 + $0x2c8] sm:$0xff]  ;;  %v12960_v19 = vcombine.low %v6354_v54, %v6366_v13  ;;  %v6606_v54 = vld [vmem:[%s19653_s7 + $0x1700] sm:$0xff] }
 0x5aa   :  { %v12555_v26 = vcombine.high %v5947_v15, %v5959_v16  ;;  %v12554_v9 = vcombine.low %v5947_v15, %v5959_v16  ;;  %v6211_v13 = vld [vmem:[%s19653_s7 + $0xaa8] sm:$0xff]  ;;  %v6546_v15 = vld [vmem:[%s19653_s7 + $0x1520] sm:$0xff] }
 0x5ab   :  { %10936 = vmatpush2.bf16.msra.mxu1 %v13054_v31  ;;  %v6318_v31 = vld [vmem:[%s19653_s7 + $0xe00] sm:$0xff] }
 0x5ac   :  { %10979 = vmatpush2.bf16.msra.mxu0 %v12672_v23  ;;  %10991 = vmatprep.subr.bf16.mxu1 %v13033_v34  ;;  %v5935_v23 = vld [vmem:[%s19653_s7 + $0x208] sm:$0xff]  ;;  %v12936_v34 = vcombine.low %v6330_v53, %v6342_v50  ;;  %v12912_v52 = vcombine.low %v6306_v8, %v6318_v31  ;;  %v6558_v16 = vld [vmem:[%s19653_s7 + $0x1580] sm:$0xff] }
 0x5ad   :  { %11034 = vmatprep.subr.bf16.mxu0 %v12651_v55  ;;  %v12913_v55 = vcombine.high %v6306_v8, %v6318_v31  ;;  %v12531_v38 = vcombine.high %v5923_v22, %v5935_v23  ;;  %v12530_v29 = vcombine.low %v5923_v22, %v5935_v23  ;;  %v13153_v8 = vcombine.high %v6546_v15, %v6558_v16  ;;  %v6522_v22 = vld [vmem:[%s19653_s7 + $0x1460] sm:$0xff] }
 0x5ae   :  { %10938 = vmatmul.mubr.bf16.vlgmr.msra.gmra.mxu1 %v17384_v4  ;;  %v10681_v61 = vpop.f32.mrf.mxu1  ;;  %v6534_v23 = vld [vmem:[%s19653_s7 + $0x14c0] sm:$0xff] }
 0x5af   :  { %v10682_v36 = vadd.f32 %v10681_v61, %v10639_v44  ;;  %10981 = vmatmul.mubr.bf16.vlgmr.msra.gmra.mxu0 %v17268_v12  ;;  %10992 = vmatpush1.bf16.msra.mxu1 %v13032_v51  ;;  %v5899_v51 = vld [vmem:[%s19653_s7 + $0xe8] sm:$0xff] }
 0x5b0   :  { %11023 = vmatprep.mubr.bf16.mxu1 %v17382_v21  ;;  %11035 = vmatpush1.bf16.msra.mxu0 %v12650_v33  ;;  %v10683_v0 = vpop.f32.mrf.mxu1  ;;  %v12889_v33 = vcombine.high %v6282_v20, %v6294_v45  ;;  %v12507_v44 = vcombine.high %v5899_v51, %v5911_v28  ;;  %v5887_v61 = vld [vmem:[%s19653_s7 + $0x88] sm:$0xff]  ;;  %v12506_v27 = vcombine.low %v5899_v51, %v5911_v28  ;;  %v6498_v51 = vld [vmem:[%s19653_s7 + $0x13a0] sm:$0xff] }
 0x5b1   :  { %11636 = vst [vmem:[%s19656_s9] sm:$0xff] %v10682_v36  ;;  %11066 = vmatprep.mubr.bf16.mxu0 %v17266_v7  ;;  %v10684_v24 = vadd.f32 %v10683_v0, %v10641_v39  ;;  %10993 = vmatprep.subr.bf16.mxu1 %v13009_v35  ;;  %v6258_v35 = vld [vmem:[%s19653_s7 + $0xc20] sm:$0xff]  ;;  %v12483_v39 = vcombine.high %v5875_v59, %v5887_v61  ;;  %v6247_v0 = vld [vmem:[%s19653_s7 + $0xbc8] sm:$0xff] }
 0x5b2   :  { %v10685_v48 = vpop.f32.mrf.mxu1  ;;  %11036 = vmatprep.subr.bf16.mxu0 %v12627_v10  ;;  %v12888_v10 = vcombine.low %v6282_v20, %v6294_v45  ;;  %v12865_v32 = vcombine.high %v6258_v35, %v6270_v58  ;;  %v6618_v36 = vld [vmem:[%s19653_s7 + $0x1760] sm:$0xff]  ;;  %v12842_v42 = vcombine.low %v6235_v62, %v6247_v0  ;;  %v13129_v20 = vcombine.high %v6522_v22, %v6534_v23 }
 0x5b3   :  { %11637 = vst [vmem:[%s19656_s9 + $0x8] sm:$0xff] %v10684_v24  ;;  %v10686_v57 = vadd.f32 %v10685_v48, %v10643_v41  ;;  %10994 = vmatpush1.bf16.msra.mxu1 %v13008_v11  ;;  %v6630_v11 = vld [vmem:[%s19653_s7 + $0x17c0] sm:$0xff]  ;;  %v12843_v24 = vcombine.high %v6235_v62, %v6247_v0  ;;  %v6223_v48 = vld [vmem:[%s19653_s7 + $0xb08] sm:$0xff] }
 0x5b4   :  { %11037 = vmatpush1.bf16.msra.mxu0 %v12626_v3  ;;  %v10687_v2 = vpop.f32.mrf.mxu1  ;;  %10995 = vmatprep.subr.bf16.mxu1 %v12985_v6  ;;  %v12864_v3 = vcombine.low %v6258_v35, %v6270_v58  ;;  %v12482_v6 = vcombine.low %v5875_v59, %v5887_v61  ;;  %v13225_v41 = vcombine.high %v6618_v36, %v6630_v11  ;;  %v6510_v28 = vld [vmem:[%s19653_s7 + $0x1400] sm:$0xff] }
 0x5b5   :  { %11660 = vst [vmem:[%s19656_s9 + $0xc0] sm:$0xff] %v10686_v57  ;;  %v10688_v47 = vadd.f32 %v10687_v2, %v10645_v46  ;;  %11038 = vmatprep.subr.bf16.mxu0 %v12603_v43  ;;  %v6594_v43 = vld [vmem:[%s19653_s7 + $0x16a0] sm:$0xff]  ;;  %v13224_v49 = vcombine.low %v6618_v36, %v6630_v11  ;;  %v12819_v57 = vcombine.high %v6211_v13, %v6223_v48 }
 0x5b6   :  { %v13201_v46 = vcombine.high %v6594_v43, %v6606_v54  ;;  %v6582_v2 = vld [vmem:[%s19653_s7 + $0x1640] sm:$0xff]  ;;  %v13105_v35 = vcombine.high %v6498_v51, %v6510_v28 }
 0x5b7   :  { %11661 = vst [vmem:[%s19656_s9 + $0xc8] sm:$0xff] %v10688_v47  ;;  %10996 = vmatpush1.bf16.msra.mxu1 %v12984_v17  ;;  %v6570_v17 = vld [vmem:[%s19653_s7 + $0x15e0] sm:$0xff]  ;;  %v13200_v47 = vcombine.low %v6594_v43, %v6606_v54 }
 0x5b8   :  { %11039 = vmatpush1.bf16.msra.mxu0 %v12602_v18  ;;  %10997 = vmatprep.subr.bf16.mxu1 %v12961_v56  ;;  %v6187_v18 = vld [vmem:[%s19653_s7 + $0x9e8] sm:$0xff]  ;;  %v13177_v53 = vcombine.high %v6570_v17, %v6582_v2  ;;  %v6474_v59 = vld [vmem:[%s19653_s7 + $0x12e0] sm:$0xff] }
 0x5b9   :  { %11040 = vmatprep.subr.bf16.mxu0 %v12579_v37  ;;  %v6199_v56 = vld [vmem:[%s19653_s7 + $0xa48] sm:$0xff]  ;;  %v12818_v37 = vcombine.low %v6211_v13, %v6223_v48  ;;  %v6486_v61 = vld [vmem:[%s19653_s7 + $0x1340] sm:$0xff] }
 0x5ba   :  { %v12795_v50 = vcombine.high %v6187_v18, %v6199_v56  ;;  %v13081_v36 = vcombine.high %v6474_v59, %v6486_v61  ;;  %v6450_v62 = vld [vmem:[%s19653_s7 + $0x1220] sm:$0xff]  ;;  %v6427_v48 = vld [vmem:[%s19653_s7 + $0x1168] sm:$0xff] }
 0x5bb   :  { %10998 = vmatpush1.bf16.msra.mxu1 %v12960_v19  ;;  %v6163_v19 = vld [vmem:[%s19653_s7 + $0x928] sm:$0xff]  ;;  %v6462_v0 = vld [vmem:[%s19653_s7 + $0x1280] sm:$0xff] }
 0x5bc   :  { %11041 = vmatpush1.bf16.msra.mxu0 %v12578_v1  ;;  %10999 = vmatprep.subr.bf16.mxu1 %v12937_v25  ;;  %v6175_v1 = vld [vmem:[%s19653_s7 + $0x988] sm:$0xff]  ;;  %v13176_v25 = vcombine.low %v6570_v17, %v6582_v2  ;;  %v13057_v54 = vcombine.high %v6450_v62, %v6462_v0 }
 0x5bd   :  { %11042 = vmatprep.subr.bf16.mxu0 %v12555_v26  ;;  %v12794_v26 = vcombine.low %v6187_v18, %v6199_v56  ;;  %v12771_v31 = vcombine.high %v6163_v19, %v6175_v1  ;;  %v6655_v56 = vrot.slane %v17963_v30, %v16523_v14 }
 0x5bf   :  { %11000 = vmatpush1.bf16.msra.mxu1 %v12936_v34  ;;  %v6139_v34 = vld [vmem:[%s19653_s7 + $0x868] sm:$0xff] }
 0x5c0   :  { %11043 = vmatpush1.bf16.msra.mxu0 %v12554_v9  ;;  %11001 = vmatprep.subr.bf16.mxu1 %v12913_v55  ;;  %v6151_v9 = vld [vmem:[%s19653_s7 + $0x8c8] sm:$0xff]  ;;  %v13152_v55 = vcombine.low %v6546_v15, %v6558_v16  ;;  %v6020_v16 = vld [vmem:[%s19653_s7 + $0x4b0] sm:$0xff] }
 0x5c1   :  { %11044 = vmatprep.subr.bf16.mxu0 %v12531_v38  ;;  %v12770_v38 = vcombine.low %v6163_v19, %v6175_v1  ;;  %v12747_v45 = vcombine.high %v6139_v34, %v6151_v9  ;;  %v6032_v19 = vld [vmem:[%s19653_s7 + $0x510] sm:$0xff] }
 0x5c3   :  { %11002 = vmatpush1.bf16.msra.mxu1 %v12912_v52  ;;  %v6115_v52 = vld [vmem:[%s19653_s7 + $0x7a8] sm:$0xff] }
 0x5c4   :  { %11045 = vmatpush1.bf16.msra.mxu0 %v12530_v29  ;;  %11003 = vmatprep.subr.bf16.mxu1 %v12889_v33  ;;  %v6127_v29 = vld [vmem:[%s19653_s7 + $0x808] sm:$0xff]  ;;  %v13128_v33 = vcombine.low %v6522_v22, %v6534_v23 }
 0x5c5   :  { %11046 = vmatprep.subr.bf16.mxu0 %v12507_v44  ;;  %v12746_v44 = vcombine.low %v6139_v34, %v6151_v9  ;;  %v12723_v58 = vcombine.high %v6115_v52, %v6127_v29  ;;  %v6391_v22 = vld [vmem:[%s19653_s7 + $0x1048] sm:$0xff]  ;;  %v12629_v34 = vcombine.high %v6020_v16, %v6032_v19  ;;  %v5996_v9 = vld [vmem:[%s19653_s7 + $0x3f0] sm:$0xff] }
 0x5c7   :  { %11004 = vmatpush1.bf16.msra.mxu1 %v12888_v10  ;;  %v6091_v10 = vld [vmem:[%s19653_s7 + $0x6e8] sm:$0xff] }
 0x5c8   :  { %11047 = vmatpush1.bf16.msra.mxu0 %v12506_v27  ;;  %11005 = vmatprep.subr.bf16.mxu1 %v12865_v32  ;;  %v6103_v27 = vld [vmem:[%s19653_s7 + $0x748] sm:$0xff]  ;;  %v13104_v32 = vcombine.low %v6498_v51, %v6510_v28 }
 0x5c9   :  { %11048 = vmatprep.subr.bf16.mxu0 %v12483_v39  ;;  %v12722_v39 = vcombine.low %v6115_v52, %v6127_v29  ;;  %v12699_v11 = vcombine.high %v6091_v10, %v6103_v27  ;;  %v12698_v43 = vcombine.low %v6091_v10, %v6103_v27  ;;  %v12628_v52 = vcombine.low %v6020_v16, %v6032_v19  ;;  %v5972_v10 = vld [vmem:[%s19653_s7 + $0x330] sm:$0xff] }
 0x5ca   :  { %v5984_v27 = vld [vmem:[%s19653_s7 + $0x390] sm:$0xff] }
 0x5cb   :  { %11006 = vmatpush1.bf16.msra.mxu1 %v12864_v3  ;;  %v6067_v3 = vld [vmem:[%s19653_s7 + $0x628] sm:$0xff]  ;;  %v5912_v16 = vld [vmem:[%s19653_s7 + $0x150] sm:$0xff] }
 0x5cc   :  { %11049 = vmatpush1.bf16.msra.mxu0 %v12482_v6  ;;  %11007 = vmatprep.subr.bf16.mxu1 %v13225_v41  ;;  %v6079_v6 = vld [vmem:[%s19653_s7 + $0x688] sm:$0xff]  ;;  %v13080_v41 = vcombine.low %v6474_v59, %v6486_v61 }
 0x5cd   :  { %11050 = vmatprep.subr.bf16.mxu0 %v12843_v24  ;;  %v10724_v24 = vpop.f32.mrf.mxu0  ;;  %v12675_v13 = vcombine.high %v6067_v3, %v6079_v6  ;;  %v12674_v2 = vcombine.low %v6067_v3, %v6079_v6  ;;  %v6367_v59 = vld [vmem:[%s19653_s7 + $0xf88] sm:$0xff]  ;;  %v12581_v6 = vcombine.high %v5972_v10, %v5984_v27 }
 0x5cf   :  { %11008 = vmatpush2.bf16.msra.mxu1 %v13224_v49  ;;  %v6439_v49 = vld [vmem:[%s19653_s7 + $0x11c8] sm:$0xff]  ;;  %v10726_v17 = vpop.f32.mrf.mxu0 }
 0x5d0   :  { %11051 = vmatpush2.bf16.msra.mxu0 %v12842_v42  ;;  %11009 = vmatprep.subr.bf16.mxu1 %v13201_v46  ;;  %v6044_v42 = vld [vmem:[%s19653_s7 + $0x570] sm:$0xff]  ;;  %v13035_v18 = vcombine.high %v6427_v48, %v6439_v49  ;;  %v13034_v15 = vcombine.low %v6427_v48, %v6439_v49  ;;  %v12580_v48 = vcombine.low %v5972_v10, %v5984_v27 }
 0x5d1   :  { %11052 = vmatprep.subr.bf16.mxu0 %v12819_v57  ;;  %v6056_v46 = vld [vmem:[%s19653_s7 + $0x5d0] sm:$0xff]  ;;  %v13056_v57 = vcombine.low %v6450_v62, %v6462_v0  ;;  %v10728_v1 = vpop.f32.mrf.mxu0 }
 0x5d3   :  { %11010 = vmatpush2.bf16.msra.mxu1 %v13200_v47  ;;  %v12653_v47 = vcombine.high %v6044_v42, %v6056_v46  ;;  %v10730_v51 = vpop.f32.mrf.mxu0 }
 0x5d4   :  { %11053 = vmatpush2.bf16.msra.mxu0 %v12818_v37  ;;  %11011 = vmatprep.subr.bf16.mxu1 %v13177_v53  ;;  %v6403_v37 = vld [vmem:[%s19653_s7 + $0x10a8] sm:$0xff] }
 0x5d5   :  { %11054 = vmatprep.subr.bf16.mxu0 %v12795_v50  ;;  %v6415_v53 = vld [vmem:[%s19653_s7 + $0x1108] sm:$0xff]  ;;  %v6659_v50 = vrot.slane %v17963_v30, %v16520_v40 }
 0x5d7   :  { %11012 = vmatpush2.bf16.msra.mxu1 %v13176_v25  ;;  %v12652_v25 = vcombine.low %v6044_v42, %v6056_v46  ;;  %v6307_v46 = vld [vmem:[%s19653_s7 + $0xda8] sm:$0xff] }
 0x5d8   :  { %11055 = vmatpush2.bf16.msra.mxu0 %v12794_v26  ;;  %11013 = vmatprep.subr.bf16.mxu1 %v13153_v8  ;;  %v10725_v26 = vadd.f32 %v10724_v24, %v6655_v56  ;;  %v13011_v8 = vcombine.high %v6403_v37, %v6415_v53  ;;  %v6343_v24 = vld [vmem:[%s19653_s7 + $0xec8] sm:$0xff] }
 0x5d9   :  { %11056 = vmatprep.subr.bf16.mxu0 %v12771_v31  ;;  %v6379_v31 = vld [vmem:[%s19653_s7 + $0xfe8] sm:$0xff] }
 0x5da   :  { %v12987_v29 = vcombine.high %v6379_v31, %v6391_v22 }
 0x5db   :  { %11014 = vmatpush2.bf16.msra.mxu1 %v13152_v55  ;;  %v6008_v55 = vld [vmem:[%s19653_s7 + $0x450] sm:$0xff] }
 0x5dc   :  { %11057 = vmatpush2.bf16.msra.mxu0 %v12770_v38  ;;  %11015 = vmatprep.subr.bf16.mxu1 %v13129_v20  ;;  %v10727_v38 = vadd.f32 %v10726_v17, %v6659_v50  ;;  %v12604_v62 = vcombine.low %v5996_v9, %v6008_v55  ;;  %v5924_v17 = vld [vmem:[%s19653_s7 + $0x1b0] sm:$0xff] }
 0x5dd   :  { %11058 = vmatprep.subr.bf16.mxu0 %v12747_v45  ;;  %v13010_v45 = vcombine.low %v6403_v37, %v6415_v53  ;;  %v6283_v53 = vld [vmem:[%s19653_s7 + $0xce8] sm:$0xff] }
 0x5df   :  { %11016 = vmatpush2.bf16.msra.mxu1 %v13128_v33  ;;  %v10729_v33 = vadd.f32 %v10728_v1, %v6655_v56 }
 0x5e0   :  { %11059 = vmatpush2.bf16.msra.mxu0 %v12746_v44  ;;  %11017 = vmatprep.subr.bf16.mxu1 %v13105_v35  ;;  %v12605_v35 = vcombine.high %v5996_v9, %v6008_v55 }
 0x5e1   :  { %11060 = vmatprep.subr.bf16.mxu0 %v12723_v58  ;;  %v6355_v58 = vld [vmem:[%s19653_s7 + $0xf28] sm:$0xff] }
 0x5e2   :  { %v12963_v0 = vcombine.high %v6355_v58, %v6367_v59 }
 0x5e3   :  { %11018 = vmatpush2.bf16.msra.mxu1 %v13104_v32  ;;  %v10731_v32 = vadd.f32 %v10730_v51, %v6659_v50  ;;  %v6295_v50 = vld [vmem:[%s19653_s7 + $0xd48] sm:$0xff]  ;;  %v6236_v51 = vld [vmem:[%s19653_s7 + $0xb70] sm:$0xff] }
 0x5e4   :  { %11061 = vmatpush2.bf16.msra.mxu0 %v12722_v39  ;;  %11019 = vmatprep.subr.bf16.mxu1 %v13081_v36  ;;  %v12986_v36 = vcombine.low %v6379_v31, %v6391_v22  ;;  %v6271_v31 = vld [vmem:[%s19653_s7 + $0xc88] sm:$0xff]  ;;  %v5876_v22 = vld [vmem:[%s19653_s7 + $0x30] sm:$0xff] }
 0x5e5   :  { %11062 = vmatprep.subr.bf16.mxu0 %v12699_v11 }
 0x5e7   :  { %11020 = vmatpush2.bf16.msra.mxu1 %v13080_v41  ;;  %v6331_v41 = vld [vmem:[%s19653_s7 + $0xe68] sm:$0xff] }
 0x5e8   :  { %11063 = vmatpush2.bf16.msra.mxu0 %v12698_v43  ;;  %11021 = vmatprep.subr.bf16.mxu1 %v13057_v54  ;;  %v5948_v43 = vld [vmem:[%s19653_s7 + $0x270] sm:$0xff]  ;;  %v12939_v49 = vcombine.high %v6331_v41, %v6343_v24 }
 0x5e9   :  { %11064 = vmatprep.subr.bf16.mxu0 %v12675_v13  ;;  %v5960_v54 = vld [vmem:[%s19653_s7 + $0x2d0] sm:$0xff]  ;;  %v12962_v13 = vcombine.low %v6355_v58, %v6367_v59  ;;  %v6607_v58 = vld [vmem:[%s19653_s7 + $0x1708] sm:$0xff] }
 0x5ea   :  { %v12557_v42 = vcombine.high %v5948_v43, %v5960_v54  ;;  %v12556_v56 = vcombine.low %v5948_v43, %v5960_v54  ;;  %v6212_v59 = vld [vmem:[%s19653_s7 + $0xab0] sm:$0xff]  ;;  %v6547_v43 = vld [vmem:[%s19653_s7 + $0x1528] sm:$0xff] }
 0x5eb   :  { %11022 = vmatpush2.bf16.msra.mxu1 %v13056_v57  ;;  %v6319_v57 = vld [vmem:[%s19653_s7 + $0xe08] sm:$0xff] }
 0x5ec   :  { %11065 = vmatpush2.bf16.msra.mxu0 %v12674_v2  ;;  %11077 = vmatprep.subr.bf16.mxu1 %v13035_v18  ;;  %v5936_v2 = vld [vmem:[%s19653_s7 + $0x210] sm:$0xff]  ;;  %v12938_v18 = vcombine.low %v6331_v41, %v6343_v24  ;;  %v12914_v19 = vcombine.low %v6307_v46, %v6319_v57  ;;  %v6559_v54 = vld [vmem:[%s19653_s7 + $0x1588] sm:$0xff] }
 0x5ed   :  { %11120 = vmatprep.subr.bf16.mxu0 %v12653_v47  ;;  %v12915_v47 = vcombine.high %v6307_v46, %v6319_v57  ;;  %v12533_v37 = vcombine.high %v5924_v17, %v5936_v2  ;;  %v12532_v1 = vcombine.low %v5924_v17, %v5936_v2  ;;  %v13155_v46 = vcombine.high %v6547_v43, %v6559_v54  ;;  %v6523_v17 = vld [vmem:[%s19653_s7 + $0x1468] sm:$0xff] }
 0x5ee   :  { %v10767_v23 = vpop.f32.mrf.mxu1  ;;  %11024 = vmatmul.mubr.bf16.vlgmr.msra.gmra.mxu1 %v17384_v4  ;;  %v6535_v2 = vld [vmem:[%s19653_s7 + $0x14c8] sm:$0xff] }
 0x5ef   :  { %v10768_v20 = vadd.f32 %v10767_v23, %v10725_v26  ;;  %11067 = vmatmul.mubr.bf16.vlgmr.msra.gmra.mxu0 %v17268_v12  ;;  %11078 = vmatpush1.bf16.msra.mxu1 %v13034_v15  ;;  %v5900_v15 = vld [vmem:[%s19653_s7 + $0xf0] sm:$0xff] }
 0x5f0   :  { %11109 = vmatprep.mubr.bf16.mxu1 %v17382_v21  ;;  %v10769_v28 = vpop.f32.mrf.mxu1  ;;  %11121 = vmatpush1.bf16.msra.mxu0 %v12652_v25  ;;  %v12891_v25 = vcombine.high %v6283_v53, %v6295_v50  ;;  %v12509_v26 = vcombine.high %v5900_v15, %v5912_v16  ;;  %v5888_v23 = vld [vmem:[%s19653_s7 + $0x90] sm:$0xff]  ;;  %v12508_v9 = vcombine.low %v5900_v15, %v5912_v16  ;;  %v6499_v15 = vld [vmem:[%s19653_s7 + $0x13a8] sm:$0xff] }
 0x5f1   :  { %11638 = vst [vmem:[%s19656_s9 + $0x10] sm:$0xff] %v10768_v20  ;;  %v10770_v44 = vadd.f32 %v10769_v28, %v10727_v38  ;;  %11152 = vmatprep.mubr.bf16.mxu0 %v17266_v7  ;;  %11079 = vmatprep.subr.bf16.mxu1 %v13011_v8  ;;  %v6259_v8 = vld [vmem:[%s19653_s7 + $0xc28] sm:$0xff]  ;;  %v12485_v38 = vcombine.high %v5876_v22, %v5888_v23  ;;  %v6248_v28 = vld [vmem:[%s19653_s7 + $0xbd0] sm:$0xff] }
 0x5f2   :  { %v10771_v61 = vpop.f32.mrf.mxu1  ;;  %11122 = vmatprep.subr.bf16.mxu0 %v12629_v34  ;;  %v12890_v34 = vcombine.low %v6283_v53, %v6295_v50  ;;  %v12867_v55 = vcombine.high %v6259_v8, %v6271_v31  ;;  %v6619_v20 = vld [vmem:[%s19653_s7 + $0x1768] sm:$0xff]  ;;  %v12844_v27 = vcombine.low %v6236_v51, %v6248_v28  ;;  %v13131_v53 = vcombine.high %v6523_v17, %v6535_v2 }
 0x5f3   :  { %11639 = vst [vmem:[%s19656_s9 + $0x18] sm:$0xff] %v10770_v44  ;;  %v10772_v39 = vadd.f32 %v10771_v61, %v10729_v33  ;;  %11080 = vmatpush1.bf16.msra.mxu1 %v13010_v45  ;;  %v6631_v45 = vld [vmem:[%s19653_s7 + $0x17c8] sm:$0xff]  ;;  %v12845_v44 = vcombine.high %v6236_v51, %v6248_v28  ;;  %v6224_v61 = vld [vmem:[%s19653_s7 + $0xb10] sm:$0xff] }
 0x5f4   :  { %v10773_v11 = vpop.f32.mrf.mxu1  ;;  %11123 = vmatpush1.bf16.msra.mxu0 %v12628_v52  ;;  %11081 = vmatprep.subr.bf16.mxu1 %v12987_v29  ;;  %v12866_v52 = vcombine.low %v6259_v8, %v6271_v31  ;;  %v12484_v29 = vcombine.low %v5876_v22, %v5888_v23  ;;  %v13227_v33 = vcombine.high %v6619_v20, %v6631_v45  ;;  %v6511_v16 = vld [vmem:[%s19653_s7 + $0x1408] sm:$0xff] }
 0x5f5   :  { %11662 = vst [vmem:[%s19656_s9 + $0xd0] sm:$0xff] %v10772_v39  ;;  %v10774_v3 = vadd.f32 %v10773_v11, %v10731_v32  ;;  %11124 = vmatprep.subr.bf16.mxu0 %v12605_v35  ;;  %v6595_v35 = vld [vmem:[%s19653_s7 + $0x16a8] sm:$0xff]  ;;  %v13226_v10 = vcombine.low %v6619_v20, %v6631_v45  ;;  %v12821_v39 = vcombine.high %v6212_v59, %v6224_v61 }
 0x5f6   :  { %v13203_v32 = vcombine.high %v6595_v35, %v6607_v58  ;;  %v6583_v11 = vld [vmem:[%s19653_s7 + $0x1648] sm:$0xff]  ;;  %v13107_v8 = vcombine.high %v6499_v15, %v6511_v16 }
 0x5f7   :  { %11663 = vst [vmem:[%s19656_s9 + $0xd8] sm:$0xff] %v10774_v3  ;;  %11082 = vmatpush1.bf16.msra.mxu1 %v12986_v36  ;;  %v6571_v36 = vld [vmem:[%s19653_s7 + $0x15e8] sm:$0xff]  ;;  %v13202_v3 = vcombine.low %v6595_v35, %v6607_v58 }
 0x5f8   :  { %11125 = vmatpush1.bf16.msra.mxu0 %v12604_v62  ;;  %11083 = vmatprep.subr.bf16.mxu1 %v12963_v0  ;;  %v6188_v62 = vld [vmem:[%s19653_s7 + $0x9f0] sm:$0xff]  ;;  %v13179_v41 = vcombine.high %v6571_v36, %v6583_v11  ;;  %v6475_v22 = vld [vmem:[%s19653_s7 + $0x12e8] sm:$0xff] }
 0x5f9   :  { %11126 = vmatprep.subr.bf16.mxu0 %v12581_v6  ;;  %v6200_v0 = vld [vmem:[%s19653_s7 + $0xa50] sm:$0xff]  ;;  %v12820_v6 = vcombine.low %v6212_v59, %v6224_v61  ;;  %v6487_v23 = vld [vmem:[%s19653_s7 + $0x1348] sm:$0xff]  ;;  %v18384_v59 = vsub.s32 4, %v15335_v63 }
 0x5fa   :  { %v12797_v24 = vcombine.high %v6188_v62, %v6200_v0  ;;  %v13083_v20 = vcombine.high %v6475_v22, %v6487_v23  ;;  %v6451_v51 = vld [vmem:[%s19653_s7 + $0x1228] sm:$0xff] }
 0x5fb   :  { %11084 = vmatpush1.bf16.msra.mxu1 %v12962_v13  ;;  %v6164_v13 = vld [vmem:[%s19653_s7 + $0x930] sm:$0xff]  ;;  %v6463_v28 = vld [vmem:[%s19653_s7 + $0x1288] sm:$0xff] }
 0x5fc   :  { %11127 = vmatpush1.bf16.msra.mxu0 %v12580_v48  ;;  %11085 = vmatprep.subr.bf16.mxu1 %v12939_v49  ;;  %v6176_v48 = vld [vmem:[%s19653_s7 + $0x990] sm:$0xff]  ;;  %v13178_v49 = vcombine.low %v6571_v36, %v6583_v11  ;;  %v13059_v58 = vcombine.high %v6451_v51, %v6463_v28  ;;  %v18399_v36 = vsub.s32 5, %v15335_v63  ;;  %v13058_v11 = vcombine.low %v6451_v51, %v6463_v28 }
 0x5fd   :  { %11128 = vmatprep.subr.bf16.mxu0 %v12557_v42  ;;  %v12796_v42 = vcombine.low %v6188_v62, %v6200_v0  ;;  %v12773_v57 = vcombine.high %v6164_v13, %v6176_v48 }
 0x5ff   :  { %11086 = vmatpush1.bf16.msra.mxu1 %v12938_v18  ;;  %v6140_v18 = vld [vmem:[%s19653_s7 + $0x870] sm:$0xff] }
 0x600   :  { %11129 = vmatpush1.bf16.msra.mxu0 %v12556_v56  ;;  %11087 = vmatprep.subr.bf16.mxu1 %v12915_v47  ;;  %v6152_v56 = vld [vmem:[%s19653_s7 + $0x8d0] sm:$0xff]  ;;  %v13154_v47 = vcombine.low %v6547_v43, %v6559_v54  ;;  %v6667_v54 = vrot.slane %v17963_v30, %v18399_v36 }
 0x601   :  { %11130 = vmatprep.subr.bf16.mxu0 %v12533_v37  ;;  %v12772_v37 = vcombine.low %v6164_v13, %v6176_v48  ;;  %v12749_v50 = vcombine.high %v6140_v18, %v6152_v56  ;;  %v6416_v43 = vld [vmem:[%s19653_s7 + $0x1110] sm:$0xff]  ;;  %v6021_v48 = vld [vmem:[%s19653_s7 + $0x4b8] sm:$0xff] }
 0x603   :  { %11088 = vmatpush1.bf16.msra.mxu1 %v12914_v19  ;;  %v6116_v19 = vld [vmem:[%s19653_s7 + $0x7b0] sm:$0xff] }
 0x604   :  { %11131 = vmatpush1.bf16.msra.mxu0 %v12532_v1  ;;  %11089 = vmatprep.subr.bf16.mxu1 %v12891_v25  ;;  %v6128_v1 = vld [vmem:[%s19653_s7 + $0x810] sm:$0xff]  ;;  %v13130_v25 = vcombine.low %v6523_v17, %v6535_v2 }
 0x605   :  { %11132 = vmatprep.subr.bf16.mxu0 %v12509_v26  ;;  %v12748_v26 = vcombine.low %v6140_v18, %v6152_v56  ;;  %v12725_v31 = vcombine.high %v6116_v19, %v6128_v1  ;;  %v6392_v2 = vld [vmem:[%s19653_s7 + $0x1050] sm:$0xff] }
 0x607   :  { %11090 = vmatpush1.bf16.msra.mxu1 %v12890_v34  ;;  %v6092_v34 = vld [vmem:[%s19653_s7 + $0x6f0] sm:$0xff] }
 0x608   :  { %11133 = vmatpush1.bf16.msra.mxu0 %v12508_v9  ;;  %11091 = vmatprep.subr.bf16.mxu1 %v12867_v55  ;;  %v6104_v9 = vld [vmem:[%s19653_s7 + $0x750] sm:$0xff]  ;;  %v13106_v55 = vcombine.low %v6499_v15, %v6511_v16 }
 0x609   :  { %11134 = vmatprep.subr.bf16.mxu0 %v12485_v38  ;;  %v12724_v38 = vcombine.low %v6116_v19, %v6128_v1  ;;  %v12701_v45 = vcombine.high %v6092_v34, %v6104_v9  ;;  %v12700_v35 = vcombine.low %v6092_v34, %v6104_v9  ;;  %v5973_v9 = vld [vmem:[%s19653_s7 + $0x338] sm:$0xff] }
 0x60b   :  { %11092 = vmatpush1.bf16.msra.mxu1 %v12866_v52  ;;  %v6068_v52 = vld [vmem:[%s19653_s7 + $0x630] sm:$0xff] }
 0x60c   :  { %11135 = vmatpush1.bf16.msra.mxu0 %v12484_v29  ;;  %11093 = vmatprep.subr.bf16.mxu1 %v13227_v33  ;;  %v6080_v29 = vld [vmem:[%s19653_s7 + $0x690] sm:$0xff]  ;;  %v13082_v33 = vcombine.low %v6475_v22, %v6487_v23 }
 0x60d   :  { %11136 = vmatprep.subr.bf16.mxu0 %v12845_v44  ;;  %v10810_v44 = vpop.f32.mrf.mxu0  ;;  %v12677_v61 = vcombine.high %v6068_v52, %v6080_v29  ;;  %v12676_v0 = vcombine.low %v6068_v52, %v6080_v29  ;;  %v6356_v22 = vld [vmem:[%s19653_s7 + $0xf30] sm:$0xff] }
 0x60e   :  { %v6368_v23 = vld [vmem:[%s19653_s7 + $0xf90] sm:$0xff] }
 0x60f   :  { %11094 = vmatpush2.bf16.msra.mxu1 %v13226_v10  ;;  %v6428_v10 = vld [vmem:[%s19653_s7 + $0x1170] sm:$0xff]  ;;  %v10812_v62 = vpop.f32.mrf.mxu0  ;;  %v12965_v52 = vcombine.high %v6356_v22, %v6368_v23 }
 0x610   :  { %11137 = vmatpush2.bf16.msra.mxu0 %v12844_v27  ;;  %11095 = vmatprep.subr.bf16.mxu1 %v13203_v32  ;;  %v6440_v27 = vld [vmem:[%s19653_s7 + $0x11d0] sm:$0xff]  ;;  %v6045_v32 = vld [vmem:[%s19653_s7 + $0x578] sm:$0xff] }
 0x611   :  { %11138 = vmatprep.subr.bf16.mxu0 %v12821_v39  ;;  %v6057_v39 = vld [vmem:[%s19653_s7 + $0x5d8] sm:$0xff]  ;;  %v13036_v13 = vcombine.low %v6428_v10, %v6440_v27 }
 0x613   :  { %11096 = vmatpush2.bf16.msra.mxu1 %v13202_v3  ;;  %v13037_v3 = vcombine.high %v6428_v10, %v6440_v27  ;;  %v12964_v10 = vcombine.low %v6356_v22, %v6368_v23  ;;  %v6596_v22 = vld [vmem:[%s19653_s7 + $0x16b0] sm:$0xff] }
 0x614   :  { %11139 = vmatpush2.bf16.msra.mxu0 %v12820_v6  ;;  %11097 = vmatprep.subr.bf16.mxu1 %v13179_v41  ;;  %v6663_v6 = vrot.slane %v17963_v30, %v18384_v59  ;;  %v12655_v41 = vcombine.high %v6045_v32, %v6057_v39  ;;  %v6380_v30 = vld [vmem:[%s19653_s7 + $0xff0] sm:$0xff] }
 0x615   :  { %11140 = vmatprep.subr.bf16.mxu0 %v12797_v24  ;;  %v6404_v24 = vld [vmem:[%s19653_s7 + $0x10b0] sm:$0xff] }
 0x616   :  { %v13013_v17 = vcombine.high %v6404_v24, %v6416_v43  ;;  %v13012_v15 = vcombine.low %v6404_v24, %v6416_v43  ;;  %v6608_v23 = vld [vmem:[%s19653_s7 + $0x1710] sm:$0xff] }
 0x617   :  { %11098 = vmatpush2.bf16.msra.mxu1 %v13178_v49  ;;  %v6033_v49 = vld [vmem:[%s19653_s7 + $0x518] sm:$0xff] }
 0x618   :  { %11141 = vmatpush2.bf16.msra.mxu0 %v12796_v42  ;;  %11099 = vmatprep.subr.bf16.mxu1 %v13155_v46  ;;  %v10814_v42 = vpop.f32.mrf.mxu0  ;;  %v12654_v46 = vcombine.low %v6045_v32, %v6057_v39  ;;  %v12631_v56 = vcombine.high %v6021_v48, %v6033_v49  ;;  %v12630_v1 = vcombine.low %v6021_v48, %v6033_v49  ;;  %v5901_v48 = vld [vmem:[%s19653_s7 + $0xf8] sm:$0xff] }
 0x619   :  { %11142 = vmatprep.subr.bf16.mxu0 %v12773_v57  ;;  %v10811_v57 = vadd.f32 %v10810_v44, %v6663_v6  ;;  %v6332_v44 = vld [vmem:[%s19653_s7 + $0xe70] sm:$0xff]  ;;  %v5913_v49 = vld [vmem:[%s19653_s7 + $0x158] sm:$0xff] }
 0x61a   :  { %v10816_v16 = vpop.f32.mrf.mxu0 }
 0x61b   :  { %11100 = vmatpush2.bf16.msra.mxu1 %v13154_v47  ;;  %v5997_v47 = vld [vmem:[%s19653_s7 + $0x3f8] sm:$0xff] }
 0x61c   :  { %11143 = vmatpush2.bf16.msra.mxu0 %v12772_v37  ;;  %11101 = vmatprep.subr.bf16.mxu1 %v13131_v53  ;;  %v6009_v37 = vld [vmem:[%s19653_s7 + $0x458] sm:$0xff]  ;;  %v10813_v53 = vadd.f32 %v10812_v62, %v6667_v54  ;;  %v6320_v62 = vld [vmem:[%s19653_s7 + $0xe10] sm:$0xff] }
 0x61d   :  { %11144 = vmatprep.subr.bf16.mxu0 %v12749_v50  ;;  %v12606_v28 = vcombine.low %v5997_v47, %v6009_v37 }
 0x61f   :  { %11102 = vmatpush2.bf16.msra.mxu1 %v13130_v25  ;;  %v12989_v25 = vcombine.high %v6380_v30, %v6392_v2 }
 0x620   :  { %11145 = vmatpush2.bf16.msra.mxu0 %v12748_v26  ;;  %11103 = vmatprep.subr.bf16.mxu1 %v13107_v8  ;;  %v10815_v26 = vadd.f32 %v10814_v42, %v6663_v6 }
 0x621   :  { %11146 = vmatprep.subr.bf16.mxu0 %v12725_v31  ;;  %v12607_v31 = vcombine.high %v5997_v47, %v6009_v37  ;;  %v12510_v37 = vcombine.low %v5901_v48, %v5913_v49 }
 0x623   :  { %11104 = vmatpush2.bf16.msra.mxu1 %v13106_v55  ;;  %v5985_v55 = vld [vmem:[%s19653_s7 + $0x398] sm:$0xff] }
 0x624   :  { %11147 = vmatpush2.bf16.msra.mxu0 %v12724_v38  ;;  %11105 = vmatprep.subr.bf16.mxu1 %v13083_v20  ;;  %v10817_v38 = vadd.f32 %v10816_v16, %v6667_v54  ;;  %v12582_v27 = vcombine.low %v5973_v9, %v5985_v55  ;;  %v6284_v54 = vld [vmem:[%s19653_s7 + $0xcf0] sm:$0xff] }
 0x625   :  { %11148 = vmatprep.subr.bf16.mxu0 %v12701_v45  ;;  %v12988_v45 = vcombine.low %v6380_v30, %v6392_v2  ;;  %v6260_v30 = vld [vmem:[%s19653_s7 + $0xc30] sm:$0xff] }
 0x626   :  { %v6272_v2 = vld [vmem:[%s19653_s7 + $0xc90] sm:$0xff] }
 0x627   :  { %11106 = vmatpush2.bf16.msra.mxu1 %v13082_v33  ;;  %v12583_v33 = vcombine.high %v5973_v9, %v5985_v55  ;;  %v6632_v16 = vld [vmem:[%s19653_s7 + $0x17d0] sm:$0xff]  ;;  %v6225_v9 = vld [vmem:[%s19653_s7 + $0xb18] sm:$0xff] }
 0x628   :  { %11149 = vmatpush2.bf16.msra.mxu0 %v12700_v35  ;;  %11107 = vmatprep.subr.bf16.mxu1 %v13059_v58  ;;  %v6344_v35 = vld [vmem:[%s19653_s7 + $0xed0] sm:$0xff]  ;;  %v5949_v58 = vld [vmem:[%s19653_s7 + $0x278] sm:$0xff] }
 0x629   :  { %11150 = vmatprep.subr.bf16.mxu0 %v12677_v61  ;;  %v5961_v61 = vld [vmem:[%s19653_s7 + $0x2d8] sm:$0xff]  ;;  %v12941_v32 = vcombine.high %v6332_v44, %v6344_v35  ;;  %v12940_v6 = vcombine.low %v6332_v44, %v6344_v35 }
 0x62a   :  { %v12559_v39 = vcombine.high %v5949_v58, %v5961_v61 }
 0x62b   :  { %11108 = vmatpush2.bf16.msra.mxu1 %v13058_v11  ;;  %v6308_v11 = vld [vmem:[%s19653_s7 + $0xdb0] sm:$0xff] }
 0x62c   :  { %11151 = vmatpush2.bf16.msra.mxu0 %v12676_v0  ;;  %11163 = vmatprep.subr.bf16.mxu1 %v13037_v3  ;;  %v5925_v0 = vld [vmem:[%s19653_s7 + $0x1b8] sm:$0xff]  ;;  %v12917_v24 = vcombine.high %v6308_v11, %v6320_v62  ;;  %v12916_v42 = vcombine.low %v6308_v11, %v6320_v62 }
 0x62d   :  { %11206 = vmatprep.subr.bf16.mxu0 %v12655_v41  ;;  %v5937_v3 = vld [vmem:[%s19653_s7 + $0x218] sm:$0xff]  ;;  %v12558_v41 = vcombine.low %v5949_v58, %v5961_v61  ;;  %v6548_v61 = vld [vmem:[%s19653_s7 + $0x1530] sm:$0xff] }
 0x62e   :  { %v10853_v18 = vpop.f32.mrf.mxu1  ;;  %11110 = vmatmul.mubr.bf16.vlgmr.msra.gmra.mxu1 %v17384_v4  ;;  %v12535_v43 = vcombine.high %v5925_v0, %v5937_v3 }
 0x62f   :  { %v10854_v50 = vadd.f32 %v10853_v18, %v10811_v57  ;;  %11153 = vmatmul.mubr.bf16.vlgmr.msra.gmra.mxu0 %v17268_v12  ;;  %11164 = vmatpush1.bf16.msra.mxu1 %v13036_v13  ;;  %v6296_v13 = vld [vmem:[%s19653_s7 + $0xd50] sm:$0xff]  ;;  %v5877_v18 = vld [vmem:[%s19653_s7 + $0x38] sm:$0xff] }
 0x630   :  { %11195 = vmatprep.mubr.bf16.mxu1 %v17382_v21  ;;  %v10855_v19 = vpop.f32.mrf.mxu1  ;;  %11207 = vmatpush1.bf16.msra.mxu0 %v12654_v46  ;;  %v12534_v46 = vcombine.low %v5925_v0, %v5937_v3  ;;  %v12893_v57 = vcombine.high %v6284_v54, %v6296_v13  ;;  %v12892_v47 = vcombine.low %v6284_v54, %v6296_v13  ;;  %v6524_v3 = vld [vmem:[%s19653_s7 + $0x1470] sm:$0xff] }
 0x631   :  { %11640 = vst [vmem:[%s19656_s9 + $0x20] sm:$0xff] %v10854_v50  ;;  %v10856_v8 = vadd.f32 %v10855_v19, %v10813_v53  ;;  %11238 = vmatprep.mubr.bf16.mxu0 %v17266_v7  ;;  %11165 = vmatprep.subr.bf16.mxu1 %v13013_v17  ;;  %v12511_v17 = vcombine.high %v5901_v48, %v5913_v49  ;;  %v6237_v19 = vld [vmem:[%s19653_s7 + $0xb78] sm:$0xff]  ;;  %v6500_v49 = vld [vmem:[%s19653_s7 + $0x13b0] sm:$0xff] }
 0x632   :  { %v10857_v34 = vpop.f32.mrf.mxu1  ;;  %11208 = vmatprep.subr.bf16.mxu0 %v12631_v56  ;;  %v5889_v56 = vld [vmem:[%s19653_s7 + $0x98] sm:$0xff]  ;;  %v12869_v53 = vcombine.high %v6260_v30, %v6272_v2 }
 0x633   :  { %11641 = vst [vmem:[%s19656_s9 + $0x28] sm:$0xff] %v10856_v8  ;;  %v10858_v20 = vadd.f32 %v10857_v34, %v10815_v26  ;;  %11166 = vmatpush1.bf16.msra.mxu1 %v13012_v15  ;;  %v12487_v50 = vcombine.high %v5877_v18, %v5889_v56  ;;  %v6620_v15 = vld [vmem:[%s19653_s7 + $0x1770] sm:$0xff]  ;;  %v12486_v26 = vcombine.low %v5877_v18, %v5889_v56  ;;  %v6213_v34 = vld [vmem:[%s19653_s7 + $0xab8] sm:$0xff] }
 0x634   :  { %v10859_v51 = vpop.f32.mrf.mxu1  ;;  %11209 = vmatpush1.bf16.msra.mxu0 %v12630_v1  ;;  %11167 = vmatprep.subr.bf16.mxu1 %v12989_v25  ;;  %v6249_v1 = vld [vmem:[%s19653_s7 + $0xbd8] sm:$0xff]  ;;  %v12868_v25 = vcombine.low %v6260_v30, %v6272_v2  ;;  %v13229_v8 = vcombine.high %v6620_v15, %v6632_v16  ;;  %v13228_v55 = vcombine.low %v6620_v15, %v6632_v16  ;;  %v6476_v56 = vld [vmem:[%s19653_s7 + $0x12f0] sm:$0xff] }
 0x635   :  { %11664 = vst [vmem:[%s19656_s9 + $0xe0] sm:$0xff] %v10858_v20  ;;  %v10860_v29 = vadd.f32 %v10859_v51, %v10817_v38  ;;  %11210 = vmatprep.subr.bf16.mxu0 %v12607_v31  ;;  %v12847_v31 = vcombine.high %v6237_v19, %v6249_v1  ;;  %v12846_v38 = vcombine.low %v6237_v19, %v6249_v1  ;;  %v6572_v51 = vld [vmem:[%s19653_s7 + $0x15f0] sm:$0xff] }
 0x636   :  { %v13205_v20 = vcombine.high %v6596_v22, %v6608_v23  ;;  %v12822_v44 = vcombine.low %v6213_v34, %v6225_v9  ;;  %v6452_v1 = vld [vmem:[%s19653_s7 + $0x1230] sm:$0xff] }
 0x637   :  { %11665 = vst [vmem:[%s19656_s9 + $0xe8] sm:$0xff] %v10860_v29  ;;  %11168 = vmatpush1.bf16.msra.mxu1 %v12988_v45  ;;  %v12823_v45 = vcombine.high %v6213_v34, %v6225_v9  ;;  %v6201_v29 = vld [vmem:[%s19653_s7 + $0xa58] sm:$0xff]  ;;  %v18602_v9 = vsub.s32 6, %v15335_v63 }
 0x638   :  { %11211 = vmatpush1.bf16.msra.mxu0 %v12606_v28  ;;  %11169 = vmatprep.subr.bf16.mxu1 %v12965_v52  ;;  %v6584_v28 = vld [vmem:[%s19653_s7 + $0x1650] sm:$0xff]  ;;  %v6189_v52 = vld [vmem:[%s19653_s7 + $0x9f8] sm:$0xff] }
 0x639   :  { %11212 = vmatprep.subr.bf16.mxu0 %v12583_v33  ;;  %v13204_v33 = vcombine.low %v6596_v22, %v6608_v23  ;;  %v13181_v35 = vcombine.high %v6572_v51, %v6584_v28  ;;  %v12799_v58 = vcombine.high %v6189_v52, %v6201_v29  ;;  %v12798_v11 = vcombine.low %v6189_v52, %v6201_v29  ;;  %v10896_v22 = vpop.f32.mrf.mxu0 }
 0x63b   :  { %11170 = vmatpush1.bf16.msra.mxu1 %v12964_v10  ;;  %v6560_v10 = vld [vmem:[%s19653_s7 + $0x1590] sm:$0xff]  ;;  %v10898_v29 = vpop.f32.mrf.mxu0 }
 0x63c   :  { %11213 = vmatpush1.bf16.msra.mxu0 %v12582_v27  ;;  %11171 = vmatprep.subr.bf16.mxu1 %v12941_v32  ;;  %v6165_v27 = vld [vmem:[%s19653_s7 + $0x938] sm:$0xff]  ;;  %v13157_v62 = vcombine.high %v6548_v61, %v6560_v10 }
 0x63d   :  { %11214 = vmatprep.subr.bf16.mxu0 %v12559_v39  ;;  %v6177_v32 = vld [vmem:[%s19653_s7 + $0x998] sm:$0xff]  ;;  %v13180_v39 = vcombine.low %v6572_v51, %v6584_v28  ;;  %v6058_v51 = vld [vmem:[%s19653_s7 + $0x5e0] sm:$0xff]  ;;  %v18617_v28 = vsub.s32 7, %v15335_v63 }
 0x63e   :  { %v12775_v0 = vcombine.high %v6165_v27, %v6177_v32  ;;  %v12774_v54 = vcombine.low %v6165_v27, %v6177_v32  ;;  %v6405_v63 = vld [vmem:[%s19653_s7 + $0x10b8] sm:$0xff] }
 0x63f   :  { %11172 = vmatpush1.bf16.msra.mxu1 %v12940_v6  ;;  %v6536_v6 = vld [vmem:[%s19653_s7 + $0x14d0] sm:$0xff] }
 0x640   :  { %11215 = vmatpush1.bf16.msra.mxu0 %v12558_v41  ;;  %11173 = vmatprep.subr.bf16.mxu1 %v12917_v24  ;;  %v6141_v41 = vld [vmem:[%s19653_s7 + $0x878] sm:$0xff]  ;;  %v13133_v13 = vcombine.high %v6524_v3, %v6536_v6 }
 0x641   :  { %11216 = vmatprep.subr.bf16.mxu0 %v12535_v43  ;;  %v6153_v24 = vld [vmem:[%s19653_s7 + $0x8d8] sm:$0xff]  ;;  %v13156_v43 = vcombine.low %v6548_v61, %v6560_v10 }
 0x642   :  { %v12751_v48 = vcombine.high %v6141_v41, %v6153_v24  ;;  %v12750_v30 = vcombine.low %v6141_v41, %v6153_v24  ;;  %v6417_v10 = vld [vmem:[%s19653_s7 + $0x1118] sm:$0xff] }
 0x643   :  { %11174 = vmatpush1.bf16.msra.mxu1 %v12916_v42  ;;  %v6512_v42 = vld [vmem:[%s19653_s7 + $0x1410] sm:$0xff]  ;;  %v6381_v41 = vld [vmem:[%s19653_s7 + $0xff8] sm:$0xff] }
 0x644   :  { %11217 = vmatpush1.bf16.msra.mxu0 %v12534_v46  ;;  %11175 = vmatprep.subr.bf16.mxu1 %v12893_v57  ;;  %v6117_v46 = vld [vmem:[%s19653_s7 + $0x7b8] sm:$0xff]  ;;  %v13109_v2 = vcombine.high %v6500_v49, %v6512_v42 }
 0x645   :  { %11218 = vmatprep.subr.bf16.mxu0 %v12511_v17  ;;  %v6129_v57 = vld [vmem:[%s19653_s7 + $0x818] sm:$0xff]  ;;  %v13132_v17 = vcombine.low %v6524_v3, %v6536_v6  ;;  %v13015_v6 = vcombine.high %v6405_v63, %v6417_v10 }
 0x646   :  { %v12727_v18 = vcombine.high %v6117_v46, %v6129_v57  ;;  %v12726_v15 = vcombine.low %v6117_v46, %v6129_v57  ;;  %v6393_v24 = vld [vmem:[%s19653_s7 + $0x1058] sm:$0xff]  ;;  %v13014_v46 = vcombine.low %v6405_v63, %v6417_v10 }
 0x647   :  { %11176 = vmatpush1.bf16.msra.mxu1 %v12892_v47  ;;  %v6488_v47 = vld [vmem:[%s19653_s7 + $0x1350] sm:$0xff] }
 0x648   :  { %11219 = vmatpush1.bf16.msra.mxu0 %v12510_v37  ;;  %11177 = vmatprep.subr.bf16.mxu1 %v12869_v53  ;;  %v6093_v37 = vld [vmem:[%s19653_s7 + $0x6f8] sm:$0xff]  ;;  %v13085_v16 = vcombine.high %v6476_v56, %v6488_v47 }
 0x649   :  { %11220 = vmatprep.subr.bf16.mxu0 %v12487_v50  ;;  %v6105_v53 = vld [vmem:[%s19653_s7 + $0x758] sm:$0xff]  ;;  %v13108_v50 = vcombine.low %v6500_v49, %v6512_v42 }
 0x64a   :  { %v12703_v19 = vcombine.high %v6093_v37, %v6105_v53  ;;  %v12702_v23 = vcombine.low %v6093_v37, %v6105_v53  ;;  %v6357_v37 = vld [vmem:[%s19653_s7 + $0xf38] sm:$0xff] }
 0x64b   :  { %11178 = vmatpush1.bf16.msra.mxu1 %v12868_v25  ;;  %v6464_v25 = vld [vmem:[%s19653_s7 + $0x1290] sm:$0xff]  ;;  %v6369_v53 = vld [vmem:[%s19653_s7 + $0xf98] sm:$0xff] }
 0x64c   :  { %11221 = vmatpush1.bf16.msra.mxu0 %v12486_v26  ;;  %11179 = vmatprep.subr.bf16.mxu1 %v13229_v8  ;;  %v6069_v26 = vld [vmem:[%s19653_s7 + $0x638] sm:$0xff]  ;;  %v13061_v34 = vcombine.high %v6452_v1, %v6464_v25  ;;  %v13060_v52 = vcombine.low %v6452_v1, %v6464_v25  ;;  %v12990_v25 = vcombine.low %v6381_v41, %v6393_v24 }
 0x64d   :  { %11222 = vmatprep.subr.bf16.mxu0 %v12847_v31  ;;  %v6081_v8 = vld [vmem:[%s19653_s7 + $0x698] sm:$0xff]  ;;  %v13084_v31 = vcombine.low %v6476_v56, %v6488_v47 }
 0x64f   :  { %11180 = vmatpush2.bf16.msra.mxu1 %v13228_v55  ;;  %v12679_v55 = vcombine.high %v6069_v26, %v6081_v8 }
 0x650   :  { %11223 = vmatpush2.bf16.msra.mxu0 %v12846_v38  ;;  %11181 = vmatprep.subr.bf16.mxu1 %v13205_v20  ;;  %v6429_v38 = vld [vmem:[%s19653_s7 + $0x1178] sm:$0xff] }
 0x651   :  { %11224 = vmatprep.subr.bf16.mxu0 %v12823_v45  ;;  %v6441_v20 = vld [vmem:[%s19653_s7 + $0x11d8] sm:$0xff]  ;;  %v6046_v45 = vld [vmem:[%s19653_s7 + $0x580] sm:$0xff] }
 0x652   :  { %v12657_v61 = vcombine.high %v6046_v45, %v6058_v51  ;;  %v13038_v32 = vcombine.low %v6429_v38, %v6441_v20 }
 0x653   :  { %11182 = vmatpush2.bf16.msra.mxu1 %v13204_v33  ;;  %v12678_v33 = vcombine.low %v6069_v26, %v6081_v8 }
 0x654   :  { %11225 = vmatpush2.bf16.msra.mxu0 %v12822_v44  ;;  %11183 = vmatprep.subr.bf16.mxu1 %v13181_v35  ;;  %v13039_v44 = vcombine.high %v6429_v38, %v6441_v20  ;;  %v14393_v35 = vld [vmem:[%s19655_s8] sm:$0xff] }
 0x655   :  { %11226 = vmatprep.subr.bf16.mxu0 %v12799_v58  ;;  %v6671_v58 = vrot.slane %v14393_v35, %v18602_v9  ;;  %v6675_v27 = vrot.slane %v14393_v35, %v18617_v28  ;;  %v5950_v38 = vld [vmem:[%s19653_s7 + $0x280] sm:$0xff] }
 0x656   :  { %v5962_v20 = vld [vmem:[%s19653_s7 + $0x2e0] sm:$0xff] }
 0x657   :  { %11184 = vmatpush2.bf16.msra.mxu1 %v13180_v39  ;;  %v6022_v39 = vld [vmem:[%s19653_s7 + $0x4c0] sm:$0xff]  ;;  %v10897_v3 = vadd.f32 %v10896_v22, %v6671_v58  ;;  %v10899_v49 = vadd.f32 %v10898_v29, %v6675_v27  ;;  %v12561_v29 = vcombine.high %v5950_v38, %v5962_v20  ;;  %v12560_v63 = vcombine.low %v5950_v38, %v5962_v20 }
 0x658   :  { %11227 = vmatpush2.bf16.msra.mxu0 %v12798_v11  ;;  %11185 = vmatprep.subr.bf16.mxu1 %v13157_v62  ;;  %v6034_v11 = vld [vmem:[%s19653_s7 + $0x520] sm:$0xff]  ;;  %v10900_v62 = vpop.f32.mrf.mxu0 }
 0x659   :  { %11228 = vmatprep.subr.bf16.mxu0 %v12775_v0  ;;  %v12656_v0 = vcombine.low %v6046_v45, %v6058_v51  ;;  %v12966_v45 = vcombine.low %v6357_v37, %v6369_v53  ;;  %v5926_v35 = vld [vmem:[%s19653_s7 + $0x1c0] sm:$0xff] }
 0x65a   :  { %v10902_v57 = vpop.f32.mrf.mxu0 }
 0x65b   :  { %11186 = vmatpush2.bf16.msra.mxu1 %v13156_v43 }
 0x65c   :  { %11229 = vmatpush2.bf16.msra.mxu0 %v12774_v54  ;;  %11187 = vmatprep.subr.bf16.mxu1 %v13133_v13  ;;  %v12633_v54 = vcombine.high %v6022_v39, %v6034_v11  ;;  %v5998_v13 = vld [vmem:[%s19653_s7 + $0x400] sm:$0xff] }
 0x65d   :  { %11230 = vmatprep.subr.bf16.mxu0 %v12751_v48  ;;  %v6010_v48 = vld [vmem:[%s19653_s7 + $0x460] sm:$0xff] }
 0x65e   :  { %v12609_v47 = vcombine.high %v5998_v13, %v6010_v48  ;;  %v12608_v8 = vcombine.low %v5998_v13, %v6010_v48  ;;  %v5890_v13 = vld [vmem:[%s19653_s7 + $0xa0] sm:$0xff] }
 0x65f   :  { %11188 = vmatpush2.bf16.msra.mxu1 %v13132_v17 }
 0x660   :  { %11231 = vmatpush2.bf16.msra.mxu0 %v12750_v30  ;;  %11189 = vmatprep.subr.bf16.mxu1 %v13109_v2  ;;  %v12632_v30 = vcombine.low %v6022_v39, %v6034_v11  ;;  %v12991_v2 = vcombine.high %v6381_v41, %v6393_v24  ;;  %v6297_v39 = vld [vmem:[%s19653_s7 + $0xd58] sm:$0xff]  ;;  %v5902_v11 = vld [vmem:[%s19653_s7 + $0x100] sm:$0xff] }
 0x661   :  { %11232 = vmatprep.subr.bf16.mxu0 %v12727_v18  ;;  %v10901_v18 = vadd.f32 %v10900_v62, %v6671_v58  ;;  %v5938_v58 = vld [vmem:[%s19653_s7 + $0x220] sm:$0xff]  ;;  %v6261_v24 = vld [vmem:[%s19653_s7 + $0xc38] sm:$0xff] }
 0x662   :  { %v5914_v62 = vld [vmem:[%s19653_s7 + $0x160] sm:$0xff] }
 0x663   :  { %11190 = vmatpush2.bf16.msra.mxu1 %v13108_v50  ;;  %v12513_v41 = vcombine.high %v5902_v11, %v5914_v62 }
 0x664   :  { %11233 = vmatpush2.bf16.msra.mxu0 %v12726_v15  ;;  %11191 = vmatprep.subr.bf16.mxu1 %v13085_v16  ;;  %v5974_v15 = vld [vmem:[%s19653_s7 + $0x340] sm:$0xff] }
 0x665   :  { %11234 = vmatprep.subr.bf16.mxu0 %v12703_v19  ;;  %v5986_v16 = vld [vmem:[%s19653_s7 + $0x3a0] sm:$0xff]  ;;  %v10903_v19 = vadd.f32 %v10902_v57, %v6675_v27  ;;  %v12537_v27 = vcombine.high %v5926_v35, %v5938_v58  ;;  %v6621_v57 = vld [vmem:[%s19653_s7 + $0x1778] sm:$0xff] }
 0x666   :  { %v12584_v51 = vcombine.low %v5974_v15, %v5986_v16 }
 0x667   :  { %11192 = vmatpush2.bf16.msra.mxu1 %v13084_v31  ;;  %v12967_v31 = vcombine.high %v6357_v37, %v6369_v53  ;;  %v6597_v53 = vld [vmem:[%s19653_s7 + $0x16b8] sm:$0xff] }
 0x668   :  { %11235 = vmatpush2.bf16.msra.mxu0 %v12702_v23  ;;  %11193 = vmatprep.subr.bf16.mxu1 %v13061_v34  ;;  %v12585_v23 = vcombine.high %v5974_v15, %v5986_v16  ;;  %v6333_v34 = vld [vmem:[%s19653_s7 + $0xe78] sm:$0xff]  ;;  %v6214_v15 = vld [vmem:[%s19653_s7 + $0xac0] sm:$0xff] }
 0x669   :  { %11236 = vmatprep.subr.bf16.mxu0 %v12679_v55  ;;  %v6345_v55 = vld [vmem:[%s19653_s7 + $0xed8] sm:$0xff]  ;;  %v6226_v16 = vld [vmem:[%s19653_s7 + $0xb20] sm:$0xff] }
 0x66b   :  { %11194 = vmatpush2.bf16.msra.mxu1 %v13060_v52  ;;  %v12943_v52 = vcombine.high %v6333_v34, %v6345_v55 }
 0x66c   :  { %11237 = vmatpush2.bf16.msra.mxu0 %v12678_v33  ;;  %11249 = vmatprep.subr.bf16.mxu1 %v13039_v44  ;;  %v6309_v33 = vld [vmem:[%s19653_s7 + $0xdb8] sm:$0xff] }
 0x66d   :  { %11292 = vmatprep.subr.bf16.mxu0 %v12657_v61  ;;  %v6321_v44 = vld [vmem:[%s19653_s7 + $0xe18] sm:$0xff]  ;;  %v12942_v61 = vcombine.low %v6333_v34, %v6345_v55  ;;  %v12824_v55 = vcombine.low %v6214_v15, %v6226_v16 }
 0x66e   :  { %v10939_v43 = vpop.f32.mrf.mxu1  ;;  %11196 = vmatmul.mubr.bf16.vlgmr.msra.gmra.mxu1 %v17384_v4  ;;  %v12919_v10 = vcombine.high %v6309_v33, %v6321_v44 }
 0x66f   :  { %v10940_v42 = vadd.f32 %v10939_v43, %v10897_v3  ;;  %11239 = vmatmul.mubr.bf16.vlgmr.msra.gmra.mxu0 %v17268_v12  ;;  %11250 = vmatpush1.bf16.msra.mxu1 %v13038_v32  ;;  %v6285_v32 = vld [vmem:[%s19653_s7 + $0xcf8] sm:$0xff]  ;;  %v12536_v3 = vcombine.low %v5926_v35, %v5938_v58 }
 0x670   :  { %11281 = vmatprep.mubr.bf16.mxu1 %v17382_v21  ;;  %v10941_v17 = vpop.f32.mrf.mxu1  ;;  %11293 = vmatpush1.bf16.msra.mxu0 %v12656_v0  ;;  %v12918_v0 = vcombine.low %v6309_v33, %v6321_v44  ;;  %v6273_v43 = vld [vmem:[%s19653_s7 + $0xc98] sm:$0xff]  ;;  %v12894_v48 = vcombine.low %v6285_v32, %v6297_v39 }
 0x671   :  { %11642 = vst [vmem:[%s19656_s9 + $0x30] sm:$0xff] %v10940_v42  ;;  %v10942_v56 = vadd.f32 %v10941_v17, %v10899_v49  ;;  %11324 = vmatprep.mubr.bf16.mxu0 %v17266_v7  ;;  %11251 = vmatprep.subr.bf16.mxu1 %v13015_v6  ;;  %v12895_v6 = vcombine.high %v6285_v32, %v6297_v39  ;;  %v6633_v17 = vld [vmem:[%s19653_s7 + $0x17d8] sm:$0xff] }
 0x672   :  { %v10943_v50 = vpop.f32.mrf.mxu1  ;;  %11294 = vmatprep.subr.bf16.mxu0 %v12633_v54  ;;  %v5878_v54 = vld [vmem:[%s19653_s7 + $0x40] sm:$0xff]  ;;  %v12512_v49 = vcombine.low %v5902_v11, %v5914_v62  ;;  %v12871_v42 = vcombine.high %v6261_v24, %v6273_v43 }
 0x673   :  { %11643 = vst [vmem:[%s19656_s9 + $0x38] sm:$0xff] %v10942_v56  ;;  %v10944_v1 = vadd.f32 %v10943_v50, %v10901_v18  ;;  %11252 = vmatpush1.bf16.msra.mxu1 %v13014_v46  ;;  %v12489_v46 = vcombine.high %v5878_v54, %v5890_v13  ;;  %v12870_v18 = vcombine.low %v6261_v24, %v6273_v43  ;;  %v6609_v50 = vld [vmem:[%s19653_s7 + $0x1718] sm:$0xff] }
 0x674   :  { %v10945_v26 = vpop.f32.mrf.mxu1  ;;  %11295 = vmatpush1.bf16.msra.mxu0 %v12632_v30  ;;  %11253 = vmatprep.subr.bf16.mxu1 %v12991_v2  ;;  %v6238_v30 = vld [vmem:[%s19653_s7 + $0xb80] sm:$0xff]  ;;  %v12488_v56 = vcombine.low %v5878_v54, %v5890_v13  ;;  %v13206_v34 = vcombine.low %v6597_v53, %v6609_v50 }
 0x675   :  { %11666 = vst [vmem:[%s19656_s9 + $0xf0] sm:$0xff] %v10944_v1  ;;  %v10946_v22 = vadd.f32 %v10945_v26, %v10903_v19  ;;  %11296 = vmatprep.subr.bf16.mxu0 %v12609_v47  ;;  %v6250_v2 = vld [vmem:[%s19653_s7 + $0xbe0] sm:$0xff]  ;;  %v13231_v47 = vcombine.high %v6621_v57, %v6633_v17  ;;  %v13230_v19 = vcombine.low %v6621_v57, %v6633_v17 }
 0x676   :  { %v12849_v37 = vcombine.high %v6238_v30, %v6250_v2  ;;  %v12848_v1 = vcombine.low %v6238_v30, %v6250_v2  ;;  %v12825_v26 = vcombine.high %v6214_v15, %v6226_v16 }
 0x677   :  { %11667 = vst [vmem:[%s19656_s9 + $0xf8] sm:$0xff] %v10946_v22  ;;  %11254 = vmatpush1.bf16.msra.mxu1 %v12990_v25  ;;  %v13207_v25 = vcombine.high %v6597_v53, %v6609_v50  ;;  %v6190_v22 = vld [vmem:[%s19653_s7 + $0xa00] sm:$0xff]  ;;  %v10982_v50 = vpop.f32.mrf.mxu0 }
 0x678   :  { %11297 = vmatpush1.bf16.msra.mxu0 %v12608_v8  ;;  %11255 = vmatprep.subr.bf16.mxu1 %v12967_v31  ;;  %v6573_v8 = vld [vmem:[%s19653_s7 + $0x15f8] sm:$0xff] }
 0x679   :  { %11298 = vmatprep.subr.bf16.mxu0 %v12585_v23  ;;  %v6585_v31 = vld [vmem:[%s19653_s7 + $0x1658] sm:$0xff]  ;;  %v6202_v23 = vld [vmem:[%s19653_s7 + $0xa60] sm:$0xff] }
 0x67a   :  { %v13183_v38 = vcombine.high %v6573_v8, %v6585_v31  ;;  %v12801_v20 = vcombine.high %v6190_v22, %v6202_v23  ;;  %v13182_v33 = vcombine.low %v6573_v8, %v6585_v31  ;;  %v12800_v44 = vcombine.low %v6190_v22, %v6202_v23  ;;  %v6047_v8 = vld [vmem:[%s19653_s7 + $0x588] sm:$0xff]  ;;  %v10984_v23 = vpop.f32.mrf.mxu0 }
 0x67b   :  { %11256 = vmatpush1.bf16.msra.mxu1 %v12966_v45  ;;  %v6549_v45 = vld [vmem:[%s19653_s7 + $0x1538] sm:$0xff]  ;;  %v6059_v31 = vld [vmem:[%s19653_s7 + $0x5e8] sm:$0xff] }
 0x67c   :  { %11299 = vmatpush1.bf16.msra.mxu0 %v12584_v51  ;;  %11257 = vmatprep.subr.bf16.mxu1 %v12943_v52  ;;  %v6561_v51 = vld [vmem:[%s19653_s7 + $0x1598] sm:$0xff]  ;;  %v6166_v52 = vld [vmem:[%s19653_s7 + $0x940] sm:$0xff] }
 0x67d   :  { %11300 = vmatprep.subr.bf16.mxu0 %v12561_v29  ;;  %v6178_v29 = vld [vmem:[%s19653_s7 + $0x9a0] sm:$0xff]  ;;  %v13159_v35 = vcombine.high %v6549_v45, %v6561_v51  ;;  %v13158_v32 = vcombine.low %v6549_v45, %v6561_v51 }
 0x67e   :  { %v12777_v58 = vcombine.high %v6166_v52, %v6178_v29  ;;  %v12776_v39 = vcombine.low %v6166_v52, %v6178_v29  ;;  %v6406_v45 = vld [vmem:[%s19653_s7 + $0x10c0] sm:$0xff] }
 0x67f   :  { %11258 = vmatpush1.bf16.msra.mxu1 %v12942_v61  ;;  %v6525_v61 = vld [vmem:[%s19653_s7 + $0x1478] sm:$0xff]  ;;  %v6418_v51 = vld [vmem:[%s19653_s7 + $0x1120] sm:$0xff] }
 0x680   :  { %11301 = vmatpush1.bf16.msra.mxu0 %v12560_v63  ;;  %11259 = vmatprep.subr.bf16.mxu1 %v12919_v10  ;;  %v6537_v63 = vld [vmem:[%s19653_s7 + $0x14d8] sm:$0xff]  ;;  %v6142_v10 = vld [vmem:[%s19653_s7 + $0x880] sm:$0xff] }
 0x681   :  { %11302 = vmatprep.subr.bf16.mxu0 %v12537_v27  ;;  %v6154_v27 = vld [vmem:[%s19653_s7 + $0x8e0] sm:$0xff]  ;;  %v13135_v11 = vcombine.high %v6525_v61, %v6537_v63  ;;  %v13134_v24 = vcombine.low %v6525_v61, %v6537_v63  ;;  %v13017_v63 = vcombine.high %v6406_v45, %v6418_v51 }
 0x682   :  { %v12753_v62 = vcombine.high %v6142_v10, %v6154_v27  ;;  %v12752_v43 = vcombine.low %v6142_v10, %v6154_v27  ;;  %v6382_v10 = vld [vmem:[%s19653_s7 + $0x1000] sm:$0xff] }
 0x683   :  { %11260 = vmatpush1.bf16.msra.mxu1 %v12918_v0  ;;  %v6501_v0 = vld [vmem:[%s19653_s7 + $0x13b8] sm:$0xff]  ;;  %v6394_v27 = vld [vmem:[%s19653_s7 + $0x1060] sm:$0xff] }
 0x684   :  { %11303 = vmatpush1.bf16.msra.mxu0 %v12536_v3  ;;  %11261 = vmatprep.subr.bf16.mxu1 %v12895_v6  ;;  %v6513_v3 = vld [vmem:[%s19653_s7 + $0x1418] sm:$0xff]  ;;  %v6118_v6 = vld [vmem:[%s19653_s7 + $0x7c0] sm:$0xff] }
 0x685   :  { %11304 = vmatprep.subr.bf16.mxu0 %v12513_v41  ;;  %v6130_v41 = vld [vmem:[%s19653_s7 + $0x820] sm:$0xff]  ;;  %v13111_v54 = vcombine.high %v6501_v0, %v6513_v3  ;;  %v13110_v57 = vcombine.low %v6501_v0, %v6513_v3 }
 0x686   :  { %v12729_v13 = vcombine.high %v6118_v6, %v6130_v41  ;;  %v12728_v17 = vcombine.low %v6118_v6, %v6130_v41  ;;  %v13016_v6 = vcombine.low %v6406_v45, %v6418_v51 }
 0x687   :  { %11262 = vmatpush1.bf16.msra.mxu1 %v12894_v48  ;;  %v6477_v48 = vld [vmem:[%s19653_s7 + $0x12f8] sm:$0xff] }
 0x688   :  { %11305 = vmatpush1.bf16.msra.mxu0 %v12512_v49  ;;  %11263 = vmatprep.subr.bf16.mxu1 %v12871_v42  ;;  %v6489_v49 = vld [vmem:[%s19653_s7 + $0x1358] sm:$0xff]  ;;  %v6094_v42 = vld [vmem:[%s19653_s7 + $0x700] sm:$0xff] }
 0x689   :  { %11306 = vmatprep.subr.bf16.mxu0 %v12489_v46  ;;  %v6106_v46 = vld [vmem:[%s19653_s7 + $0x760] sm:$0xff]  ;;  %v13087_v30 = vcombine.high %v6477_v48, %v6489_v49  ;;  %v13086_v53 = vcombine.low %v6477_v48, %v6489_v49 }
 0x68a   :  { %v12705_v2 = vcombine.high %v6094_v42, %v6106_v46  ;;  %v12704_v15 = vcombine.low %v6094_v42, %v6106_v46  ;;  %v6358_v42 = vld [vmem:[%s19653_s7 + $0xf40] sm:$0xff] }
 0x68b   :  { %11264 = vmatpush1.bf16.msra.mxu1 %v12870_v18  ;;  %v6453_v18 = vld [vmem:[%s19653_s7 + $0x1238] sm:$0xff]  ;;  %v6370_v46 = vld [vmem:[%s19653_s7 + $0xfa0] sm:$0xff] }
 0x68c   :  { %11307 = vmatpush1.bf16.msra.mxu0 %v12488_v56  ;;  %11265 = vmatprep.subr.bf16.mxu1 %v13231_v47  ;;  %v6465_v56 = vld [vmem:[%s19653_s7 + $0x1298] sm:$0xff]  ;;  %v6070_v47 = vld [vmem:[%s19653_s7 + $0x640] sm:$0xff] }
 0x68d   :  { %11308 = vmatprep.subr.bf16.mxu0 %v12849_v37  ;;  %v6082_v37 = vld [vmem:[%s19653_s7 + $0x6a0] sm:$0xff]  ;;  %v13063_v16 = vcombine.high %v6453_v18, %v6465_v56  ;;  %v13062_v22 = vcombine.low %v6453_v18, %v6465_v56  ;;  %v12992_v56 = vcombine.low %v6382_v10, %v6394_v27 }
 0x68f   :  { %11266 = vmatpush2.bf16.msra.mxu1 %v13230_v19  ;;  %v12681_v19 = vcombine.high %v6070_v47, %v6082_v37 }
 0x690   :  { %11309 = vmatpush2.bf16.msra.mxu0 %v12848_v1  ;;  %11267 = vmatprep.subr.bf16.mxu1 %v13207_v25  ;;  %v6430_v1 = vld [vmem:[%s19653_s7 + $0x1180] sm:$0xff] }
 0x691   :  { %11310 = vmatprep.subr.bf16.mxu0 %v12825_v26  ;;  %v6442_v25 = vld [vmem:[%s19653_s7 + $0x11e0] sm:$0xff]  ;;  %v18829_v26 = vld [vmem:[%s19655_s8 + $0x8] sm:$0xff] }
 0x692   :  { %v6683_v52 = vrot.slane %v18829_v26, %v16107_v60  ;;  %v13040_v29 = vcombine.low %v6430_v1, %v6442_v25 }
 0x693   :  { %11268 = vmatpush2.bf16.msra.mxu1 %v13206_v34  ;;  %v12680_v34 = vcombine.low %v6070_v47, %v6082_v37 }
 0x694   :  { %11311 = vmatpush2.bf16.msra.mxu0 %v12824_v55  ;;  %11269 = vmatprep.subr.bf16.mxu1 %v13183_v38  ;;  %v13041_v55 = vcombine.high %v6430_v1, %v6442_v25  ;;  %v6679_v38 = vrot.slane %v18829_v26, %v15353_v5  ;;  %v10985_v0 = vadd.f32 %v10984_v23, %v6683_v52  ;;  %v5951_v1 = vld [vmem:[%s19653_s7 + $0x288] sm:$0xff] }
 0x695   :  { %11312 = vmatprep.subr.bf16.mxu0 %v12801_v20  ;;  %v12659_v20 = vcombine.high %v6047_v8, %v6059_v31  ;;  %v5963_v25 = vld [vmem:[%s19653_s7 + $0x2e8] sm:$0xff] }
 0x696   :  { %v10983_v61 = vadd.f32 %v10982_v50, %v6679_v38  ;;  %v12563_v23 = vcombine.high %v5951_v1, %v5963_v25  ;;  %v12562_v51 = vcombine.low %v5951_v1, %v5963_v25 }
 0x697   :  { %11270 = vmatpush2.bf16.msra.mxu1 %v13182_v33  ;;  %v6023_v33 = vld [vmem:[%s19653_s7 + $0x4c8] sm:$0xff] }
 0x698   :  { %11313 = vmatpush2.bf16.msra.mxu0 %v12800_v44  ;;  %11271 = vmatprep.subr.bf16.mxu1 %v13159_v35  ;;  %v6035_v44 = vld [vmem:[%s19653_s7 + $0x528] sm:$0xff]  ;;  %v10986_v35 = vpop.f32.mrf.mxu0 }
 0x699   :  { %11314 = vmatprep.subr.bf16.mxu0 %v12777_v58  ;;  %v12658_v58 = vcombine.low %v6047_v8, %v6059_v31  ;;  %v12968_v8 = vcombine.low %v6358_v42, %v6370_v46 }
 0x69a   :  { %v10988_v41 = vpop.f32.mrf.mxu0 }
 0x69b   :  { %11272 = vmatpush2.bf16.msra.mxu1 %v13158_v32 }
 0x69c   :  { %11315 = vmatpush2.bf16.msra.mxu0 %v12776_v39  ;;  %11273 = vmatprep.subr.bf16.mxu1 %v13135_v11  ;;  %v12635_v39 = vcombine.high %v6023_v33, %v6035_v44  ;;  %v5999_v11 = vld [vmem:[%s19653_s7 + $0x408] sm:$0xff] }
 0x69d   :  { %11316 = vmatprep.subr.bf16.mxu0 %v12753_v62  ;;  %v6011_v62 = vld [vmem:[%s19653_s7 + $0x468] sm:$0xff] }
 0x69e   :  { %v12611_v49 = vcombine.high %v5999_v11, %v6011_v62  ;;  %v12610_v37 = vcombine.low %v5999_v11, %v6011_v62  ;;  %v5879_v11 = vld [vmem:[%s19653_s7 + $0x48] sm:$0xff] }
 0x69f   :  { %11274 = vmatpush2.bf16.msra.mxu1 %v13134_v24  ;;  %v5891_v62 = vld [vmem:[%s19653_s7 + $0xa8] sm:$0xff] }
 0x6a0   :  { %11317 = vmatpush2.bf16.msra.mxu0 %v12752_v43  ;;  %11275 = vmatprep.subr.bf16.mxu1 %v13111_v54  ;;  %v12634_v43 = vcombine.low %v6023_v33, %v6035_v44  ;;  %v12993_v54 = vcombine.high %v6382_v10, %v6394_v27  ;;  %v6286_v33 = vld [vmem:[%s19653_s7 + $0xd00] sm:$0xff] }
 0x6a1   :  { %11318 = vmatprep.subr.bf16.mxu0 %v12729_v13  ;;  %v10987_v13 = vadd.f32 %v10986_v35, %v6679_v38  ;;  %v5927_v38 = vld [vmem:[%s19653_s7 + $0x1c8] sm:$0xff]  ;;  %v6298_v44 = vld [vmem:[%s19653_s7 + $0xd60] sm:$0xff] }
 0x6a2   :  { %v5903_v35 = vld [vmem:[%s19653_s7 + $0x108] sm:$0xff]  ;;  %v12897_v10 = vcombine.high %v6286_v33, %v6298_v44 }
 0x6a3   :  { %11276 = vmatpush2.bf16.msra.mxu1 %v13110_v57 }
 0x6a4   :  { %11319 = vmatpush2.bf16.msra.mxu0 %v12728_v17  ;;  %11277 = vmatprep.subr.bf16.mxu1 %v13087_v30  ;;  %v5975_v17 = vld [vmem:[%s19653_s7 + $0x348] sm:$0xff] }
 0x6a5   :  { %11320 = vmatprep.subr.bf16.mxu0 %v12705_v2  ;;  %v5987_v30 = vld [vmem:[%s19653_s7 + $0x3a8] sm:$0xff]  ;;  %v10989_v2 = vadd.f32 %v10988_v41, %v6683_v52  ;;  %v12491_v41 = vcombine.high %v5879_v11, %v5891_v62 }
 0x6a6   :  { %v12586_v31 = vcombine.low %v5975_v17, %v5987_v30 }
 0x6a7   :  { %11278 = vmatpush2.bf16.msra.mxu1 %v13086_v53  ;;  %v12969_v53 = vcombine.high %v6358_v42, %v6370_v46 }
 0x6a8   :  { %11321 = vmatpush2.bf16.msra.mxu0 %v12704_v15  ;;  %11279 = vmatprep.subr.bf16.mxu1 %v13063_v16  ;;  %v12587_v15 = vcombine.high %v5975_v17, %v5987_v30  ;;  %v6334_v16 = vld [vmem:[%s19653_s7 + $0xe80] sm:$0xff]  ;;  %v6215_v30 = vld [vmem:[%s19653_s7 + $0xac8] sm:$0xff] }
 0x6a9   :  { %11322 = vmatprep.subr.bf16.mxu0 %v12681_v19  ;;  %v6346_v19 = vld [vmem:[%s19653_s7 + $0xee0] sm:$0xff] }
 0x6aa   :  { %v12944_v45 = vcombine.low %v6334_v16, %v6346_v19  ;;  %v6610_v17 = vld [vmem:[%s19653_s7 + $0x1720] sm:$0xff] }
 0x6ab   :  { %11280 = vmatpush2.bf16.msra.mxu1 %v13062_v22  ;;  %v12945_v22 = vcombine.high %v6334_v16, %v6346_v19  ;;  %v6203_v16 = vld [vmem:[%s19653_s7 + $0xa68] sm:$0xff] }
 0x6ac   :  { %11323 = vmatpush2.bf16.msra.mxu0 %v12680_v34  ;;  %11335 = vmatprep.subr.bf16.mxu1 %v13041_v55  ;;  %v6310_v34 = vld [vmem:[%s19653_s7 + $0xdc0] sm:$0xff] }
 0x6ad   :  { %11378 = vmatprep.subr.bf16.mxu0 %v12659_v20  ;;  %v6322_v55 = vld [vmem:[%s19653_s7 + $0xe20] sm:$0xff]  ;;  %v5939_v20 = vld [vmem:[%s19653_s7 + $0x228] sm:$0xff] }
 0x6ae   :  { %v11025_v32 = vpop.f32.mrf.mxu1  ;;  %11282 = vmatmul.mubr.bf16.vlgmr.msra.gmra.mxu1 %v17384_v4  ;;  %v12921_v52 = vcombine.high %v6310_v34, %v6322_v55 }
 0x6af   :  { %v11026_v3 = vadd.f32 %v11025_v32, %v10983_v61  ;;  %11325 = vmatmul.mubr.bf16.vlgmr.msra.gmra.mxu0 %v17268_v12  ;;  %11336 = vmatpush1.bf16.msra.mxu1 %v13040_v29  ;;  %v12539_v29 = vcombine.high %v5927_v38, %v5939_v20  ;;  %v12920_v61 = vcombine.low %v6310_v34, %v6322_v55  ;;  %v6262_v32 = vld [vmem:[%s19653_s7 + $0xc40] sm:$0xff]  ;;  %v6179_v34 = vld [vmem:[%s19653_s7 + $0x9a8] sm:$0xff] }
 0x6b0   :  { %11367 = vmatprep.mubr.bf16.mxu1 %v17382_v21  ;;  %v11027_v24 = vpop.f32.mrf.mxu1  ;;  %11379 = vmatpush1.bf16.msra.mxu0 %v12658_v58  ;;  %v5915_v58 = vld [vmem:[%s19653_s7 + $0x168] sm:$0xff] }
 0x6b1   :  { %11644 = vst [vmem:[%s19656_s9 + $0x40] sm:$0xff] %v11026_v3  ;;  %v11028_v48 = vadd.f32 %v11027_v24, %v10985_v0  ;;  %11410 = vmatprep.mubr.bf16.mxu0 %v17266_v7  ;;  %11337 = vmatprep.subr.bf16.mxu1 %v13017_v63  ;;  %v12538_v63 = vcombine.low %v5927_v38, %v5939_v20  ;;  %v6622_v24 = vld [vmem:[%s19653_s7 + $0x1780] sm:$0xff] }
 0x6b2   :  { %v11029_v57 = vpop.f32.mrf.mxu1  ;;  %11380 = vmatprep.subr.bf16.mxu0 %v12635_v39  ;;  %v12515_v27 = vcombine.high %v5903_v35, %v5915_v58  ;;  %v6274_v39 = vld [vmem:[%s19653_s7 + $0xca0] sm:$0xff]  ;;  %v12896_v0 = vcombine.low %v6286_v33, %v6298_v44  ;;  %v12514_v3 = vcombine.low %v5903_v35, %v5915_v58  ;;  %v6155_v33 = vld [vmem:[%s19653_s7 + $0x8e8] sm:$0xff] }
 0x6b3   :  { %11645 = vst [vmem:[%s19656_s9 + $0x48] sm:$0xff] %v11028_v48  ;;  %v11030_v18 = vadd.f32 %v11029_v57, %v10987_v13  ;;  %11338 = vmatpush1.bf16.msra.mxu1 %v13016_v6  ;;  %v12873_v6 = vcombine.high %v6262_v32, %v6274_v39  ;;  %v6251_v13 = vld [vmem:[%s19653_s7 + $0xbe8] sm:$0xff]  ;;  %v12872_v48 = vcombine.low %v6262_v32, %v6274_v39  ;;  %v6598_v57 = vld [vmem:[%s19653_s7 + $0x16c0] sm:$0xff] }
 0x6b4   :  { %v11031_v47 = vpop.f32.mrf.mxu1  ;;  %11381 = vmatpush1.bf16.msra.mxu0 %v12634_v43  ;;  %11339 = vmatprep.subr.bf16.mxu1 %v12993_v54  ;;  %v6634_v43 = vld [vmem:[%s19653_s7 + $0x17e0] sm:$0xff]  ;;  %v6239_v54 = vld [vmem:[%s19653_s7 + $0xb88] sm:$0xff]  ;;  %v13208_v19 = vcombine.low %v6598_v57, %v6610_v17 }
 0x6b5   :  { %11668 = vst [vmem:[%s19656_s9 + $0x100] sm:$0xff] %v11030_v18  ;;  %v11032_v50 = vadd.f32 %v11031_v47, %v10989_v2  ;;  %11382 = vmatprep.subr.bf16.mxu0 %v12611_v49  ;;  %v12490_v49 = vcombine.low %v5879_v11, %v5891_v62  ;;  %v13233_v42 = vcombine.high %v6622_v24, %v6634_v43  ;;  %v6227_v2 = vld [vmem:[%s19653_s7 + $0xb28] sm:$0xff] }
 0x6b6   :  { %v12851_v46 = vcombine.high %v6239_v54, %v6251_v13  ;;  %v13232_v18 = vcombine.low %v6622_v24, %v6634_v43  ;;  %v13209_v47 = vcombine.high %v6598_v57, %v6610_v17  ;;  %v12826_v1 = vcombine.low %v6215_v30, %v6227_v2  ;;  %v6131_v32 = vld [vmem:[%s19653_s7 + $0x828] sm:$0xff] }
 0x6b7   :  { %11669 = vst [vmem:[%s19656_s9 + $0x108] sm:$0xff] %v11032_v50  ;;  %11340 = vmatpush1.bf16.msra.mxu1 %v12992_v56  ;;  %v12850_v56 = vcombine.low %v6239_v54, %v6251_v13  ;;  %v6586_v50 = vld [vmem:[%s19653_s7 + $0x1660] sm:$0xff]  ;;  %v6107_v24 = vld [vmem:[%s19653_s7 + $0x768] sm:$0xff] }
 0x6b8   :  { %11383 = vmatpush1.bf16.msra.mxu0 %v12610_v37  ;;  %11341 = vmatprep.subr.bf16.mxu1 %v12969_v53  ;;  %v12827_v37 = vcombine.high %v6215_v30, %v6227_v2  ;;  %v6574_v53 = vld [vmem:[%s19653_s7 + $0x1600] sm:$0xff]  ;;  %v6083_v57 = vld [vmem:[%s19653_s7 + $0x6a8] sm:$0xff]  ;;  %v11068_v30 = vpop.f32.mrf.mxu0 }
 0x6b9   :  { %11384 = vmatprep.subr.bf16.mxu0 %v12587_v15  ;;  %v6191_v15 = vld [vmem:[%s19653_s7 + $0xa08] sm:$0xff]  ;;  %v13185_v25 = vcombine.high %v6574_v53, %v6586_v50  ;;  %v13184_v55 = vcombine.low %v6574_v53, %v6586_v50  ;;  %v6048_v53 = vld [vmem:[%s19653_s7 + $0x590] sm:$0xff] }
 0x6ba   :  { %v12802_v38 = vcombine.low %v6191_v15, %v6203_v16  ;;  %v6060_v50 = vld [vmem:[%s19653_s7 + $0x5f0] sm:$0xff] }
 0x6bb   :  { %11342 = vmatpush1.bf16.msra.mxu1 %v12968_v8  ;;  %v12803_v8 = vcombine.high %v6191_v15, %v6203_v16  ;;  %v11070_v16 = vpop.f32.mrf.mxu0 }
 0x6bc   :  { %11385 = vmatpush1.bf16.msra.mxu0 %v12586_v31  ;;  %11343 = vmatprep.subr.bf16.mxu1 %v12945_v22  ;;  %v6550_v31 = vld [vmem:[%s19653_s7 + $0x1540] sm:$0xff] }
 0x6bd   :  { %11386 = vmatprep.subr.bf16.mxu0 %v12563_v23  ;;  %v6562_v22 = vld [vmem:[%s19653_s7 + $0x15a0] sm:$0xff]  ;;  %v6167_v23 = vld [vmem:[%s19653_s7 + $0x948] sm:$0xff] }
 0x6be   :  { %v13161_v20 = vcombine.high %v6550_v31, %v6562_v22  ;;  %v13160_v44 = vcombine.low %v6550_v31, %v6562_v22  ;;  %v12778_v35 = vcombine.low %v6167_v23, %v6179_v34  ;;  %v6407_v31 = vld [vmem:[%s19653_s7 + $0x10c8] sm:$0xff] }
 0x6bf   :  { %11344 = vmatpush1.bf16.msra.mxu1 %v12944_v45  ;;  %v12779_v45 = vcombine.high %v6167_v23, %v6179_v34  ;;  %v6419_v22 = vld [vmem:[%s19653_s7 + $0x1128] sm:$0xff]  ;;  %v6691_v23 = vrot.slane %v18829_v26, %v16520_v40 }
 0x6c0   :  { %11387 = vmatpush1.bf16.msra.mxu0 %v12562_v51  ;;  %11345 = vmatprep.subr.bf16.mxu1 %v12921_v52  ;;  %v6526_v51 = vld [vmem:[%s19653_s7 + $0x1480] sm:$0xff] }
 0x6c1   :  { %11388 = vmatprep.subr.bf16.mxu0 %v12539_v29  ;;  %v6538_v52 = vld [vmem:[%s19653_s7 + $0x14e0] sm:$0xff]  ;;  %v6143_v29 = vld [vmem:[%s19653_s7 + $0x888] sm:$0xff] }
 0x6c2   :  { %v13137_v58 = vcombine.high %v6526_v51, %v6538_v52  ;;  %v13136_v39 = vcombine.low %v6526_v51, %v6538_v52  ;;  %v12754_v11 = vcombine.low %v6143_v29, %v6155_v33  ;;  %v13019_v52 = vcombine.high %v6407_v31, %v6419_v22 }
 0x6c3   :  { %11346 = vmatpush1.bf16.msra.mxu1 %v12920_v61  ;;  %v12755_v61 = vcombine.high %v6143_v29, %v6155_v33  ;;  %v6383_v29 = vld [vmem:[%s19653_s7 + $0x1008] sm:$0xff] }
 0x6c4   :  { %11389 = vmatpush1.bf16.msra.mxu0 %v12538_v63  ;;  %11347 = vmatprep.subr.bf16.mxu1 %v12897_v10  ;;  %v6502_v63 = vld [vmem:[%s19653_s7 + $0x13c0] sm:$0xff]  ;;  %v6395_v33 = vld [vmem:[%s19653_s7 + $0x1068] sm:$0xff] }
 0x6c5   :  { %11390 = vmatprep.subr.bf16.mxu0 %v12515_v27  ;;  %v6514_v10 = vld [vmem:[%s19653_s7 + $0x1420] sm:$0xff]  ;;  %v6119_v27 = vld [vmem:[%s19653_s7 + $0x7c8] sm:$0xff] }
 0x6c6   :  { %v13113_v62 = vcombine.high %v6502_v63, %v6514_v10  ;;  %v13112_v43 = vcombine.low %v6502_v63, %v6514_v10  ;;  %v12730_v54 = vcombine.low %v6119_v27, %v6131_v32  ;;  %v11071_v63 = vadd.f32 %v11070_v16, %v6691_v23 }
 0x6c7   :  { %11348 = vmatpush1.bf16.msra.mxu1 %v12896_v0  ;;  %v12731_v0 = vcombine.high %v6119_v27, %v6131_v32  ;;  %v13018_v27 = vcombine.low %v6407_v31, %v6419_v22 }
 0x6c8   :  { %11391 = vmatpush1.bf16.msra.mxu0 %v12514_v3  ;;  %11349 = vmatprep.subr.bf16.mxu1 %v12873_v6  ;;  %v6478_v3 = vld [vmem:[%s19653_s7 + $0x1300] sm:$0xff] }
 0x6c9   :  { %11392 = vmatprep.subr.bf16.mxu0 %v12491_v41  ;;  %v6490_v6 = vld [vmem:[%s19653_s7 + $0x1360] sm:$0xff]  ;;  %v6095_v41 = vld [vmem:[%s19653_s7 + $0x708] sm:$0xff] }
 0x6ca   :  { %v13089_v13 = vcombine.high %v6478_v3, %v6490_v6  ;;  %v13088_v17 = vcombine.low %v6478_v3, %v6490_v6  ;;  %v12706_v2 = vcombine.low %v6095_v41, %v6107_v24 }
 0x6cb   :  { %11350 = vmatpush1.bf16.msra.mxu1 %v12872_v48  ;;  %v12707_v48 = vcombine.high %v6095_v41, %v6107_v24  ;;  %v6359_v41 = vld [vmem:[%s19653_s7 + $0xf48] sm:$0xff] }
 0x6cc   :  { %11393 = vmatpush1.bf16.msra.mxu0 %v12490_v49  ;;  %11351 = vmatprep.subr.bf16.mxu1 %v13233_v42  ;;  %v6454_v49 = vld [vmem:[%s19653_s7 + $0x1240] sm:$0xff]  ;;  %v6371_v24 = vld [vmem:[%s19653_s7 + $0xfa8] sm:$0xff] }
 0x6cd   :  { %11394 = vmatprep.subr.bf16.mxu0 %v12851_v46  ;;  %v6466_v42 = vld [vmem:[%s19653_s7 + $0x12a0] sm:$0xff]  ;;  %v6071_v46 = vld [vmem:[%s19653_s7 + $0x648] sm:$0xff] }
 0x6ce   :  { %v13064_v15 = vcombine.low %v6454_v49, %v6466_v42 }
 0x6cf   :  { %11352 = vmatpush2.bf16.msra.mxu1 %v13232_v18  ;;  %v13065_v18 = vcombine.high %v6454_v49, %v6466_v42  ;;  %v12994_v42 = vcombine.low %v6383_v29, %v6395_v33 }
 0x6d0   :  { %11395 = vmatpush2.bf16.msra.mxu0 %v12850_v56  ;;  %11353 = vmatprep.subr.bf16.mxu1 %v13209_v47  ;;  %v12683_v56 = vcombine.high %v6071_v46, %v6083_v57  ;;  %v6431_v47 = vld [vmem:[%s19653_s7 + $0x1188] sm:$0xff] }
 0x6d1   :  { %11396 = vmatprep.subr.bf16.mxu0 %v12827_v37  ;;  %v6443_v37 = vld [vmem:[%s19653_s7 + $0x11e8] sm:$0xff] }
 0x6d2   :  { %v13042_v34 = vcombine.low %v6431_v47, %v6443_v37 }
 0x6d3   :  { %11354 = vmatpush2.bf16.msra.mxu1 %v13208_v19  ;;  %v12682_v19 = vcombine.low %v6071_v46, %v6083_v57 }
 0x6d4   :  { %11397 = vmatpush2.bf16.msra.mxu0 %v12826_v1  ;;  %11355 = vmatprep.subr.bf16.mxu1 %v13185_v25  ;;  %v13043_v1 = vcombine.high %v6431_v47, %v6443_v37  ;;  %v6687_v25 = vrot.slane %v18829_v26, %v16523_v14  ;;  %v5952_v47 = vld [vmem:[%s19653_s7 + $0x290] sm:$0xff] }
 0x6d5   :  { %11398 = vmatprep.subr.bf16.mxu0 %v12803_v8  ;;  %v12661_v8 = vcombine.high %v6048_v53, %v6060_v50  ;;  %v5964_v37 = vld [vmem:[%s19653_s7 + $0x2f0] sm:$0xff] }
 0x6d6   :  { %v11069_v51 = vadd.f32 %v11068_v30, %v6687_v25  ;;  %v12565_v16 = vcombine.high %v5952_v47, %v5964_v37  ;;  %v12564_v22 = vcombine.low %v5952_v47, %v5964_v37 }
 0x6d7   :  { %11356 = vmatpush2.bf16.msra.mxu1 %v13184_v55  ;;  %v6024_v55 = vld [vmem:[%s19653_s7 + $0x4d0] sm:$0xff] }
 0x6d8   :  { %11399 = vmatpush2.bf16.msra.mxu0 %v12802_v38  ;;  %11357 = vmatprep.subr.bf16.mxu1 %v13161_v20  ;;  %v6036_v38 = vld [vmem:[%s19653_s7 + $0x530] sm:$0xff]  ;;  %v11072_v20 = vpop.f32.mrf.mxu0 }
 0x6d9   :  { %11400 = vmatprep.subr.bf16.mxu0 %v12779_v45  ;;  %v12660_v45 = vcombine.low %v6048_v53, %v6060_v50  ;;  %v12970_v53 = vcombine.low %v6359_v41, %v6371_v24 }
 0x6da   :  { %v11074_v32 = vpop.f32.mrf.mxu0 }
 0x6db   :  { %11358 = vmatpush2.bf16.msra.mxu1 %v13160_v44 }
 0x6dc   :  { %11401 = vmatpush2.bf16.msra.mxu0 %v12778_v35  ;;  %11359 = vmatprep.subr.bf16.mxu1 %v13137_v58  ;;  %v12637_v35 = vcombine.high %v6024_v55, %v6036_v38  ;;  %v6000_v58 = vld [vmem:[%s19653_s7 + $0x410] sm:$0xff] }
 0x6dd   :  { %11402 = vmatprep.subr.bf16.mxu0 %v12755_v61  ;;  %v6012_v61 = vld [vmem:[%s19653_s7 + $0x470] sm:$0xff] }
 0x6de   :  { %v12613_v6 = vcombine.high %v6000_v58, %v6012_v61  ;;  %v12612_v57 = vcombine.low %v6000_v58, %v6012_v61  ;;  %v5880_v58 = vld [vmem:[%s19653_s7 + $0x50] sm:$0xff] }
 0x6df   :  { %11360 = vmatpush2.bf16.msra.mxu1 %v13136_v39  ;;  %v5892_v61 = vld [vmem:[%s19653_s7 + $0xb0] sm:$0xff] }
 0x6e0   :  { %11403 = vmatpush2.bf16.msra.mxu0 %v12754_v11  ;;  %11361 = vmatprep.subr.bf16.mxu1 %v13113_v62  ;;  %v12636_v11 = vcombine.low %v6024_v55, %v6036_v38  ;;  %v12995_v62 = vcombine.high %v6383_v29, %v6395_v33  ;;  %v6287_v55 = vld [vmem:[%s19653_s7 + $0xd08] sm:$0xff] }
 0x6e1   :  { %11404 = vmatprep.subr.bf16.mxu0 %v12731_v0  ;;  %v11073_v0 = vadd.f32 %v11072_v20, %v6687_v25  ;;  %v5928_v25 = vld [vmem:[%s19653_s7 + $0x1d0] sm:$0xff]  ;;  %v6299_v38 = vld [vmem:[%s19653_s7 + $0xd68] sm:$0xff] }
 0x6e2   :  { %v5904_v20 = vld [vmem:[%s19653_s7 + $0x110] sm:$0xff]  ;;  %v12899_v29 = vcombine.high %v6287_v55, %v6299_v38 }
 0x6e3   :  { %11362 = vmatpush2.bf16.msra.mxu1 %v13112_v43 }
 0x6e4   :  { %11405 = vmatpush2.bf16.msra.mxu0 %v12730_v54  ;;  %11363 = vmatprep.subr.bf16.mxu1 %v13089_v13  ;;  %v5976_v54 = vld [vmem:[%s19653_s7 + $0x350] sm:$0xff] }
 0x6e5   :  { %11406 = vmatprep.subr.bf16.mxu0 %v12707_v48  ;;  %v5988_v13 = vld [vmem:[%s19653_s7 + $0x3b0] sm:$0xff]  ;;  %v11075_v48 = vadd.f32 %v11074_v32, %v6691_v23  ;;  %v12493_v32 = vcombine.high %v5880_v58, %v5892_v61 }
 0x6e6   :  { %v12588_v50 = vcombine.low %v5976_v54, %v5988_v13 }
 0x6e7   :  { %11364 = vmatpush2.bf16.msra.mxu1 %v13088_v17  ;;  %v12971_v17 = vcombine.high %v6359_v41, %v6371_v24 }
 0x6e8   :  { %11407 = vmatpush2.bf16.msra.mxu0 %v12706_v2  ;;  %11365 = vmatprep.subr.bf16.mxu1 %v13065_v18  ;;  %v12589_v2 = vcombine.high %v5976_v54, %v5988_v13  ;;  %v6335_v18 = vld [vmem:[%s19653_s7 + $0xe88] sm:$0xff]  ;;  %v6216_v13 = vld [vmem:[%s19653_s7 + $0xad0] sm:$0xff] }
 0x6e9   :  { %11408 = vmatprep.subr.bf16.mxu0 %v12683_v56  ;;  %v6347_v56 = vld [vmem:[%s19653_s7 + $0xee8] sm:$0xff] }
 0x6ea   :  { %v12946_v31 = vcombine.low %v6335_v18, %v6347_v56  ;;  %v6611_v54 = vld [vmem:[%s19653_s7 + $0x1728] sm:$0xff] }
 0x6eb   :  { %11366 = vmatpush2.bf16.msra.mxu1 %v13064_v15  ;;  %v12947_v15 = vcombine.high %v6335_v18, %v6347_v56  ;;  %v6204_v18 = vld [vmem:[%s19653_s7 + $0xa70] sm:$0xff] }
 0x6ec   :  { %11409 = vmatpush2.bf16.msra.mxu0 %v12682_v19  ;;  %11421 = vmatprep.subr.bf16.mxu1 %v13043_v1  ;;  %v6311_v19 = vld [vmem:[%s19653_s7 + $0xdc8] sm:$0xff] }
 0x6ed   :  { %11464 = vmatprep.subr.bf16.mxu0 %v12661_v8  ;;  %v6323_v1 = vld [vmem:[%s19653_s7 + $0xe28] sm:$0xff]  ;;  %v5940_v8 = vld [vmem:[%s19653_s7 + $0x230] sm:$0xff] }
 0x6ee   :  { %v11111_v44 = vpop.f32.mrf.mxu1  ;;  %11368 = vmatmul.mubr.bf16.vlgmr.msra.gmra.mxu1 %v17384_v4  ;;  %v12923_v23 = vcombine.high %v6311_v19, %v6323_v1 }
 0x6ef   :  { %v11112_v10 = vadd.f32 %v11111_v44, %v11069_v51  ;;  %11411 = vmatmul.mubr.bf16.vlgmr.msra.gmra.mxu0 %v17268_v12  ;;  %11422 = vmatpush1.bf16.msra.mxu1 %v13042_v34  ;;  %v12541_v34 = vcombine.high %v5928_v25, %v5940_v8  ;;  %v12922_v51 = vcombine.low %v6311_v19, %v6323_v1  ;;  %v6263_v44 = vld [vmem:[%s19653_s7 + $0xc48] sm:$0xff]  ;;  %v6180_v19 = vld [vmem:[%s19653_s7 + $0x9b0] sm:$0xff] }
 0x6f0   :  { %11453 = vmatprep.mubr.bf16.mxu1 %v17382_v21  ;;  %v11113_v39 = vpop.f32.mrf.mxu1  ;;  %11465 = vmatpush1.bf16.msra.mxu0 %v12660_v45  ;;  %v5916_v45 = vld [vmem:[%s19653_s7 + $0x170] sm:$0xff] }
 0x6f1   :  { %11646 = vst [vmem:[%s19656_s9 + $0x50] sm:$0xff] %v11112_v10  ;;  %v11114_v3 = vadd.f32 %v11113_v39, %v11071_v63  ;;  %11496 = vmatprep.mubr.bf16.mxu0 %v17266_v7  ;;  %11423 = vmatprep.subr.bf16.mxu1 %v13019_v52  ;;  %v12540_v52 = vcombine.low %v5928_v25, %v5940_v8  ;;  %v6623_v39 = vld [vmem:[%s19653_s7 + $0x1788] sm:$0xff] }
 0x6f2   :  { %v11115_v43 = vpop.f32.mrf.mxu1  ;;  %11466 = vmatprep.subr.bf16.mxu0 %v12637_v35  ;;  %v12517_v33 = vcombine.high %v5904_v20, %v5916_v45  ;;  %v6275_v35 = vld [vmem:[%s19653_s7 + $0xca8] sm:$0xff]  ;;  %v12898_v63 = vcombine.low %v6287_v55, %v6299_v38  ;;  %v12516_v10 = vcombine.low %v5904_v20, %v5916_v45  ;;  %v6156_v55 = vld [vmem:[%s19653_s7 + $0x8f0] sm:$0xff] }
 0x6f3   :  { %11647 = vst [vmem:[%s19656_s9 + $0x58] sm:$0xff] %v11114_v3  ;;  %v11116_v49 = vadd.f32 %v11115_v43, %v11073_v0  ;;  %11424 = vmatpush1.bf16.msra.mxu1 %v13018_v27  ;;  %v12875_v27 = vcombine.high %v6263_v44, %v6275_v35  ;;  %v6252_v0 = vld [vmem:[%s19653_s7 + $0xbf0] sm:$0xff]  ;;  %v12874_v3 = vcombine.low %v6263_v44, %v6275_v35  ;;  %v6599_v43 = vld [vmem:[%s19653_s7 + $0x16c8] sm:$0xff] }
 0x6f4   :  { %v11117_v46 = vpop.f32.mrf.mxu1  ;;  %11467 = vmatpush1.bf16.msra.mxu0 %v12636_v11  ;;  %11425 = vmatprep.subr.bf16.mxu1 %v12995_v62  ;;  %v6635_v11 = vld [vmem:[%s19653_s7 + $0x17e8] sm:$0xff]  ;;  %v6240_v62 = vld [vmem:[%s19653_s7 + $0xb90] sm:$0xff]  ;;  %v13210_v56 = vcombine.low %v6599_v43, %v6611_v54 }
 0x6f5   :  { %11670 = vst [vmem:[%s19656_s9 + $0x110] sm:$0xff] %v11116_v49  ;;  %v11118_v30 = vadd.f32 %v11117_v46, %v11075_v48  ;;  %11468 = vmatprep.subr.bf16.mxu0 %v12613_v6  ;;  %v12492_v6 = vcombine.low %v5880_v58, %v5892_v61  ;;  %v13235_v41 = vcombine.high %v6623_v39, %v6635_v11  ;;  %v6228_v48 = vld [vmem:[%s19653_s7 + $0xb30] sm:$0xff] }
 0x6f6   :  { %v12853_v24 = vcombine.high %v6240_v62, %v6252_v0  ;;  %v13234_v49 = vcombine.low %v6623_v39, %v6635_v11  ;;  %v13211_v46 = vcombine.high %v6599_v43, %v6611_v54  ;;  %v12828_v47 = vcombine.low %v6216_v13, %v6228_v48  ;;  %v6132_v44 = vld [vmem:[%s19653_s7 + $0x830] sm:$0xff] }
 0x6f7   :  { %11671 = vst [vmem:[%s19656_s9 + $0x118] sm:$0xff] %v11118_v30  ;;  %11426 = vmatpush1.bf16.msra.mxu1 %v12994_v42  ;;  %v12852_v42 = vcombine.low %v6240_v62, %v6252_v0  ;;  %v6587_v30 = vld [vmem:[%s19653_s7 + $0x1668] sm:$0xff]  ;;  %v6108_v39 = vld [vmem:[%s19653_s7 + $0x770] sm:$0xff] }
 0x6f8   :  { %11469 = vmatpush1.bf16.msra.mxu0 %v12612_v57  ;;  %11427 = vmatprep.subr.bf16.mxu1 %v12971_v17  ;;  %v12829_v57 = vcombine.high %v6216_v13, %v6228_v48  ;;  %v6575_v17 = vld [vmem:[%s19653_s7 + $0x1608] sm:$0xff]  ;;  %v6084_v43 = vld [vmem:[%s19653_s7 + $0x6b0] sm:$0xff]  ;;  %v11154_v13 = vpop.f32.mrf.mxu0 }
 0x6f9   :  { %11470 = vmatprep.subr.bf16.mxu0 %v12589_v2  ;;  %v6192_v2 = vld [vmem:[%s19653_s7 + $0xa10] sm:$0xff]  ;;  %v13187_v37 = vcombine.high %v6575_v17, %v6587_v30  ;;  %v13186_v1 = vcombine.low %v6575_v17, %v6587_v30  ;;  %v6049_v17 = vld [vmem:[%s19653_s7 + $0x598] sm:$0xff] }
 0x6fa   :  { %v12804_v25 = vcombine.low %v6192_v2, %v6204_v18  ;;  %v6061_v30 = vld [vmem:[%s19653_s7 + $0x5f8] sm:$0xff] }
 0x6fb   :  { %11428 = vmatpush1.bf16.msra.mxu1 %v12970_v53  ;;  %v12805_v53 = vcombine.high %v6192_v2, %v6204_v18  ;;  %v11156_v18 = vpop.f32.mrf.mxu0 }
 0x6fc   :  { %11471 = vmatpush1.bf16.msra.mxu0 %v12588_v50  ;;  %11429 = vmatprep.subr.bf16.mxu1 %v12947_v15  ;;  %v6551_v50 = vld [vmem:[%s19653_s7 + $0x1548] sm:$0xff] }
 0x6fd   :  { %11472 = vmatprep.subr.bf16.mxu0 %v12565_v16  ;;  %v6563_v15 = vld [vmem:[%s19653_s7 + $0x15a8] sm:$0xff]  ;;  %v6168_v16 = vld [vmem:[%s19653_s7 + $0x950] sm:$0xff] }
 0x6fe   :  { %v13163_v8 = vcombine.high %v6551_v50, %v6563_v15  ;;  %v13162_v38 = vcombine.low %v6551_v50, %v6563_v15  ;;  %v12780_v20 = vcombine.low %v6168_v16, %v6180_v19  ;;  %v6408_v50 = vld [vmem:[%s19653_s7 + $0x10d0] sm:$0xff] }
 0x6ff   :  { %11430 = vmatpush1.bf16.msra.mxu1 %v12946_v31  ;;  %v12781_v31 = vcombine.high %v6168_v16, %v6180_v19  ;;  %v6420_v15 = vld [vmem:[%s19653_s7 + $0x1130] sm:$0xff]  ;;  %v6699_v16 = vrot.slane %v18829_v26, %v18399_v36 }
 0x700   :  { %11473 = vmatpush1.bf16.msra.mxu0 %v12564_v22  ;;  %11431 = vmatprep.subr.bf16.mxu1 %v12923_v23  ;;  %v6527_v22 = vld [vmem:[%s19653_s7 + $0x1488] sm:$0xff] }
 0x701   :  { %11474 = vmatprep.subr.bf16.mxu0 %v12541_v34  ;;  %v6539_v23 = vld [vmem:[%s19653_s7 + $0x14e8] sm:$0xff]  ;;  %v6144_v34 = vld [vmem:[%s19653_s7 + $0x890] sm:$0xff] }
 0x702   :  { %v13139_v45 = vcombine.high %v6527_v22, %v6539_v23  ;;  %v13138_v35 = vcombine.low %v6527_v22, %v6539_v23  ;;  %v12756_v58 = vcombine.low %v6144_v34, %v6156_v55  ;;  %v13021_v23 = vcombine.high %v6408_v50, %v6420_v15 }
 0x703   :  { %11432 = vmatpush1.bf16.msra.mxu1 %v12922_v51  ;;  %v12757_v51 = vcombine.high %v6144_v34, %v6156_v55  ;;  %v6396_v34 = vld [vmem:[%s19653_s7 + $0x1070] sm:$0xff] }
 0x704   :  { %11475 = vmatpush1.bf16.msra.mxu0 %v12540_v52  ;;  %11433 = vmatprep.subr.bf16.mxu1 %v12899_v29  ;;  %v6503_v52 = vld [vmem:[%s19653_s7 + $0x13c8] sm:$0xff] }
 0x705   :  { %11476 = vmatprep.subr.bf16.mxu0 %v12517_v33  ;;  %v6515_v29 = vld [vmem:[%s19653_s7 + $0x1428] sm:$0xff]  ;;  %v6120_v33 = vld [vmem:[%s19653_s7 + $0x7d0] sm:$0xff] }
 0x706   :  { %v13115_v61 = vcombine.high %v6503_v52, %v6515_v29  ;;  %v13114_v11 = vcombine.low %v6503_v52, %v6515_v29  ;;  %v12732_v62 = vcombine.low %v6120_v33, %v6132_v44  ;;  %v13020_v29 = vcombine.low %v6408_v50, %v6420_v15 }
 0x707   :  { %11434 = vmatpush1.bf16.msra.mxu1 %v12898_v63  ;;  %v12733_v63 = vcombine.high %v6120_v33, %v6132_v44 }
 0x708   :  { %11477 = vmatpush1.bf16.msra.mxu0 %v12516_v10  ;;  %11435 = vmatprep.subr.bf16.mxu1 %v12875_v27  ;;  %v6479_v10 = vld [vmem:[%s19653_s7 + $0x1308] sm:$0xff] }
 0x709   :  { %11478 = vmatprep.subr.bf16.mxu0 %v12493_v32  ;;  %v6491_v27 = vld [vmem:[%s19653_s7 + $0x1368] sm:$0xff]  ;;  %v6096_v32 = vld [vmem:[%s19653_s7 + $0x710] sm:$0xff] }
 0x70a   :  { %v13091_v0 = vcombine.high %v6479_v10, %v6491_v27  ;;  %v13090_v54 = vcombine.low %v6479_v10, %v6491_v27  ;;  %v12708_v48 = vcombine.low %v6096_v32, %v6108_v39  ;;  %v6360_v27 = vld [vmem:[%s19653_s7 + $0xf50] sm:$0xff] }
 0x70b   :  { %11436 = vmatpush1.bf16.msra.mxu1 %v12874_v3  ;;  %v12709_v3 = vcombine.high %v6096_v32, %v6108_v39  ;;  %v6372_v32 = vld [vmem:[%s19653_s7 + $0xfb0] sm:$0xff] }
 0x70c   :  { %11479 = vmatpush1.bf16.msra.mxu0 %v12492_v6  ;;  %11437 = vmatprep.subr.bf16.mxu1 %v13235_v41  ;;  %v6455_v6 = vld [vmem:[%s19653_s7 + $0x1248] sm:$0xff] }
 0x70d   :  { %11480 = vmatprep.subr.bf16.mxu0 %v12853_v24  ;;  %v6467_v41 = vld [vmem:[%s19653_s7 + $0x12a8] sm:$0xff]  ;;  %v6072_v24 = vld [vmem:[%s19653_s7 + $0x650] sm:$0xff] }
 0x70e   :  { %v13066_v2 = vcombine.low %v6455_v6, %v6467_v41 }
 0x70f   :  { %11438 = vmatpush2.bf16.msra.mxu1 %v13234_v49  ;;  %v13067_v49 = vcombine.high %v6455_v6, %v6467_v41 }
 0x710   :  { %11481 = vmatpush2.bf16.msra.mxu0 %v12852_v42  ;;  %11439 = vmatprep.subr.bf16.mxu1 %v13211_v46  ;;  %v12685_v42 = vcombine.high %v6072_v24, %v6084_v43  ;;  %v6432_v46 = vld [vmem:[%s19653_s7 + $0x1190] sm:$0xff] }
 0x711   :  { %11482 = vmatprep.subr.bf16.mxu0 %v12829_v57  ;;  %v6444_v57 = vld [vmem:[%s19653_s7 + $0x11f0] sm:$0xff] }
 0x712   :  { %v13044_v19 = vcombine.low %v6432_v46, %v6444_v57 }
 0x713   :  { %11440 = vmatpush2.bf16.msra.mxu1 %v13210_v56  ;;  %v12684_v56 = vcombine.low %v6072_v24, %v6084_v43  ;;  %v12973_v24 = vcombine.high %v6360_v27, %v6372_v32 }
 0x714   :  { %11483 = vmatpush2.bf16.msra.mxu0 %v12828_v47  ;;  %11441 = vmatprep.subr.bf16.mxu1 %v13187_v37  ;;  %v13045_v47 = vcombine.high %v6432_v46, %v6444_v57  ;;  %v6695_v37 = vrot.slane %v18829_v26, %v18384_v59  ;;  %v6384_v26 = vld [vmem:[%s19653_s7 + $0x1010] sm:$0xff]  ;;  %v12972_v46 = vcombine.low %v6360_v27, %v6372_v32 }
 0x715   :  { %11484 = vmatprep.subr.bf16.mxu0 %v12805_v53  ;;  %v12663_v53 = vcombine.high %v6049_v17, %v6061_v30  ;;  %v6600_v27 = vld [vmem:[%s19653_s7 + $0x16d0] sm:$0xff] }
 0x716   :  { %v11155_v22 = vadd.f32 %v11154_v13, %v6695_v37  ;;  %v6336_v13 = vld [vmem:[%s19653_s7 + $0xe90] sm:$0xff] }
 0x717   :  { %11442 = vmatpush2.bf16.msra.mxu1 %v13186_v1  ;;  %v6025_v1 = vld [vmem:[%s19653_s7 + $0x4d8] sm:$0xff]  ;;  %v6612_v32 = vld [vmem:[%s19653_s7 + $0x1730] sm:$0xff] }
 0x718   :  { %11485 = vmatpush2.bf16.msra.mxu0 %v12804_v25  ;;  %11443 = vmatprep.subr.bf16.mxu1 %v13163_v8  ;;  %v6037_v25 = vld [vmem:[%s19653_s7 + $0x538] sm:$0xff]  ;;  %v11158_v8 = vpop.f32.mrf.mxu0 }
 0x719   :  { %11486 = vmatprep.subr.bf16.mxu0 %v12781_v31  ;;  %v12662_v31 = vcombine.low %v6049_v17, %v6061_v30 }
 0x71a   :  { %v11160_v33 = vpop.f32.mrf.mxu0 }
 0x71b   :  { %11444 = vmatpush2.bf16.msra.mxu1 %v13162_v38  ;;  %v12639_v38 = vcombine.high %v6025_v1, %v6037_v25 }
 0x71c   :  { %11487 = vmatpush2.bf16.msra.mxu0 %v12780_v20  ;;  %11445 = vmatprep.subr.bf16.mxu1 %v13139_v45  ;;  %v6001_v20 = vld [vmem:[%s19653_s7 + $0x418] sm:$0xff] }
 0x71d   :  { %11488 = vmatprep.subr.bf16.mxu0 %v12757_v51  ;;  %v6013_v45 = vld [vmem:[%s19653_s7 + $0x478] sm:$0xff]  ;;  %v11157_v51 = vadd.f32 %v11156_v18, %v6699_v16  ;;  %v6324_v18 = vld [vmem:[%s19653_s7 + $0xe30] sm:$0xff] }
 0x71e   :  { %v12615_v10 = vcombine.high %v6001_v20, %v6013_v45  ;;  %v12614_v41 = vcombine.low %v6001_v20, %v6013_v45 }
 0x71f   :  { %11446 = vmatpush2.bf16.msra.mxu1 %v13138_v35  ;;  %v12638_v35 = vcombine.low %v6025_v1, %v6037_v25  ;;  %v5905_v1 = vld [vmem:[%s19653_s7 + $0x118] sm:$0xff] }
 0x720   :  { %11489 = vmatpush2.bf16.msra.mxu0 %v12756_v58  ;;  %11447 = vmatprep.subr.bf16.mxu1 %v13115_v61  ;;  %v12997_v58 = vcombine.high %v6384_v26, %v6396_v34  ;;  %v11159_v61 = vadd.f32 %v11158_v8, %v6695_v37  ;;  %v5917_v25 = vld [vmem:[%s19653_s7 + $0x178] sm:$0xff] }
 0x721   :  { %11490 = vmatprep.subr.bf16.mxu0 %v12733_v63  ;;  %v12518_v45 = vcombine.low %v5905_v1, %v5917_v25 }
 0x723   :  { %11448 = vmatpush2.bf16.msra.mxu1 %v13114_v11  ;;  %v5977_v11 = vld [vmem:[%s19653_s7 + $0x358] sm:$0xff] }
 0x724   :  { %11491 = vmatpush2.bf16.msra.mxu0 %v12732_v62  ;;  %11449 = vmatprep.subr.bf16.mxu1 %v13091_v0  ;;  %v11161_v62 = vadd.f32 %v11160_v33, %v6699_v16  ;;  %v6288_v16 = vld [vmem:[%s19653_s7 + $0xd10] sm:$0xff] }
 0x725   :  { %11492 = vmatprep.subr.bf16.mxu0 %v12709_v3  ;;  %v12996_v3 = vcombine.low %v6384_v26, %v6396_v34  ;;  %v6264_v26 = vld [vmem:[%s19653_s7 + $0xc50] sm:$0xff] }
 0x726   :  { %v6276_v34 = vld [vmem:[%s19653_s7 + $0xcb0] sm:$0xff] }
 0x727   :  { %11450 = vmatpush2.bf16.msra.mxu1 %v13090_v54  ;;  %v6636_v33 = vld [vmem:[%s19653_s7 + $0x17f0] sm:$0xff] }
 0x728   :  { %11493 = vmatpush2.bf16.msra.mxu0 %v12708_v48  ;;  %11451 = vmatprep.subr.bf16.mxu1 %v13067_v49  ;;  %v6348_v48 = vld [vmem:[%s19653_s7 + $0xef0] sm:$0xff]  ;;  %v5953_v49 = vld [vmem:[%s19653_s7 + $0x298] sm:$0xff] }
 0x729   :  { %11494 = vmatprep.subr.bf16.mxu0 %v12685_v42  ;;  %v5965_v42 = vld [vmem:[%s19653_s7 + $0x2f8] sm:$0xff]  ;;  %v12949_v17 = vcombine.high %v6336_v13, %v6348_v48  ;;  %v12948_v37 = vcombine.low %v6336_v13, %v6348_v48 }
 0x72a   :  { %v12567_v30 = vcombine.high %v5953_v49, %v5965_v42 }
 0x72b   :  { %11452 = vmatpush2.bf16.msra.mxu1 %v13066_v2  ;;  %v6312_v2 = vld [vmem:[%s19653_s7 + $0xdd0] sm:$0xff] }
 0x72c   :  { %11495 = vmatpush2.bf16.msra.mxu0 %v12684_v56  ;;  %11507 = vmatprep.subr.bf16.mxu1 %v13045_v47  ;;  %v5929_v56 = vld [vmem:[%s19653_s7 + $0x1d8] sm:$0xff]  ;;  %v12925_v50 = vcombine.high %v6312_v2, %v6324_v18  ;;  %v12924_v8 = vcombine.low %v6312_v2, %v6324_v18 }
 0x72d   :  { %11550 = vmatprep.subr.bf16.mxu0 %v12663_v53  ;;  %v5941_v47 = vld [vmem:[%s19653_s7 + $0x238] sm:$0xff]  ;;  %v12566_v53 = vcombine.low %v5953_v49, %v5965_v42  ;;  %v6552_v42 = vld [vmem:[%s19653_s7 + $0x1550] sm:$0xff] }
 0x72e   :  { %v11197_v55 = vpop.f32.mrf.mxu1  ;;  %11454 = vmatmul.mubr.bf16.vlgmr.msra.gmra.mxu1 %v17384_v4  ;;  %v12543_v15 = vcombine.high %v5929_v56, %v5941_v47 }
 0x72f   :  { %v11198_v52 = vadd.f32 %v11197_v55, %v11155_v22  ;;  %11497 = vmatmul.mubr.bf16.vlgmr.msra.gmra.mxu0 %v17268_v12  ;;  %11508 = vmatpush1.bf16.msra.mxu1 %v13044_v19  ;;  %v6300_v19 = vld [vmem:[%s19653_s7 + $0xd70] sm:$0xff]  ;;  %v5881_v55 = vld [vmem:[%s19653_s7 + $0x58] sm:$0xff] }
 0x730   :  { %11539 = vmatprep.mubr.bf16.mxu1 %v17382_v21  ;;  %v11199_v44 = vpop.f32.mrf.mxu1  ;;  %11551 = vmatpush1.bf16.msra.mxu0 %v12662_v31  ;;  %v12542_v31 = vcombine.low %v5929_v56, %v5941_v47  ;;  %v12901_v22 = vcombine.high %v6288_v16, %v6300_v19  ;;  %v12900_v20 = vcombine.low %v6288_v16, %v6300_v19  ;;  %v6528_v47 = vld [vmem:[%s19653_s7 + $0x1490] sm:$0xff] }
 0x731   :  { %11648 = vst [vmem:[%s19656_s9 + $0x60] sm:$0xff] %v11198_v52  ;;  %v11200_v63 = vadd.f32 %v11199_v44, %v11157_v51  ;;  %11582 = vmatprep.mubr.bf16.mxu0 %v17266_v7  ;;  %11509 = vmatprep.subr.bf16.mxu1 %v13021_v23  ;;  %v5989_v7 = vld [vmem:[%s19653_s7 + $0x3b8] sm:$0xff]  ;;  %v12519_v23 = vcombine.high %v5905_v1, %v5917_v25  ;;  %v6504_v25 = vld [vmem:[%s19653_s7 + $0x13d0] sm:$0xff] }
 0x732   :  { %v11201_v39 = vpop.f32.mrf.mxu1  ;;  %11552 = vmatprep.subr.bf16.mxu0 %v12639_v38  ;;  %v12591_v54 = vcombine.high %v5977_v11, %v5989_v7  ;;  %v12590_v57 = vcombine.low %v5977_v11, %v5989_v7  ;;  %v5893_v38 = vld [vmem:[%s19653_s7 + $0xb8] sm:$0xff]  ;;  %v12877_v51 = vcombine.high %v6264_v26, %v6276_v34 }
 0x733   :  { %11649 = vst [vmem:[%s19656_s9 + $0x68] sm:$0xff] %v11200_v63  ;;  %v11202_v0 = vadd.f32 %v11201_v39, %v11159_v61  ;;  %11510 = vmatpush1.bf16.msra.mxu1 %v13020_v29  ;;  %v12495_v52 = vcombine.high %v5881_v55, %v5893_v38  ;;  %v6624_v29 = vld [vmem:[%s19653_s7 + $0x1790] sm:$0xff]  ;;  %v6241_v44 = vld [vmem:[%s19653_s7 + $0xb98] sm:$0xff]  ;;  %v12494_v61 = vcombine.low %v5881_v55, %v5893_v38 }
 0x734   :  { %v11203_v6 = vpop.f32.mrf.mxu1  ;;  %11553 = vmatpush1.bf16.msra.mxu0 %v12638_v35  ;;  %11511 = vmatprep.subr.bf16.mxu1 %v12997_v58  ;;  %v6253_v35 = vld [vmem:[%s19653_s7 + $0xbf8] sm:$0xff]  ;;  %v12876_v58 = vcombine.low %v6264_v26, %v6276_v34  ;;  %v13237_v63 = vcombine.high %v6624_v29, %v6636_v33  ;;  %v13236_v7 = vcombine.low %v6624_v29, %v6636_v33  ;;  %v6480_v38 = vld [vmem:[%s19653_s7 + $0x1310] sm:$0xff] }
 0x735   :  { %11672 = vst [vmem:[%s19656_s9 + $0x120] sm:$0xff] %v11202_v0  ;;  %v11204_v43 = vadd.f32 %v11203_v6, %v11161_v62  ;;  %11554 = vmatprep.subr.bf16.mxu0 %v12615_v10  ;;  %v12855_v10 = vcombine.high %v6241_v44, %v6253_v35  ;;  %v6217_v39 = vld [vmem:[%s19653_s7 + $0xad8] sm:$0xff]  ;;  %v12854_v62 = vcombine.low %v6241_v44, %v6253_v35  ;;  %v6576_v6 = vld [vmem:[%s19653_s7 + $0x1610] sm:$0xff] }
 0x736   :  { %v6229_v11 = vld [vmem:[%s19653_s7 + $0xb38] sm:$0xff]  ;;  %v13213_v0 = vcombine.high %v6600_v27, %v6612_v32  ;;  %v6456_v35 = vld [vmem:[%s19653_s7 + $0x1250] sm:$0xff] }
 0x737   :  { %11673 = vst [vmem:[%s19656_s9 + $0x128] sm:$0xff] %v11204_v43  ;;  %11512 = vmatpush1.bf16.msra.mxu1 %v12996_v3  ;;  %v12831_v3 = vcombine.high %v6217_v39, %v6229_v11  ;;  %v6205_v43 = vld [vmem:[%s19653_s7 + $0xa78] sm:$0xff]  ;;  %v12830_v13 = vcombine.low %v6217_v39, %v6229_v11 }
 0x738   :  { %11555 = vmatpush1.bf16.msra.mxu0 %v12614_v41  ;;  %11513 = vmatprep.subr.bf16.mxu1 %v12973_v24  ;;  %v6588_v41 = vld [vmem:[%s19653_s7 + $0x1670] sm:$0xff]  ;;  %v6193_v24 = vld [vmem:[%s19653_s7 + $0xa18] sm:$0xff] }
 0x739   :  { %11556 = vmatprep.subr.bf16.mxu0 %v12591_v54  ;;  %v13212_v54 = vcombine.low %v6600_v27, %v6612_v32  ;;  %v13189_v48 = vcombine.high %v6576_v6, %v6588_v41  ;;  %v12807_v49 = vcombine.high %v6193_v24, %v6205_v43  ;;  %v12806_v2 = vcombine.low %v6193_v24, %v6205_v43  ;;  %v11240_v27 = vpop.f32.mrf.mxu0  ;;  %v14394_v24 = vld [vmem:[%s19655_s8 + $0x8] sm:$0xff] }
 0x73a   :  { %v6703_v43 = vrot.slane %v14394_v24, %v18602_v9 }
 0x73b   :  { %11514 = vmatpush1.bf16.msra.mxu1 %v12972_v46  ;;  %v6564_v46 = vld [vmem:[%s19653_s7 + $0x15b0] sm:$0xff] }
 0x73c   :  { %11557 = vmatpush1.bf16.msra.mxu0 %v12590_v57  ;;  %11515 = vmatprep.subr.bf16.mxu1 %v12949_v17  ;;  %v6169_v57 = vld [vmem:[%s19653_s7 + $0x958] sm:$0xff]  ;;  %v13165_v18 = vcombine.high %v6552_v42, %v6564_v46 }
 0x73d   :  { %11558 = vmatprep.subr.bf16.mxu0 %v12567_v30  ;;  %v6181_v17 = vld [vmem:[%s19653_s7 + $0x9b8] sm:$0xff]  ;;  %v13188_v30 = vcombine.low %v6576_v6, %v6588_v41 }
 0x73e   :  { %v12783_v56 = vcombine.high %v6169_v57, %v6181_v17  ;;  %v12782_v16 = vcombine.low %v6169_v57, %v6181_v17  ;;  %v11241_v57 = vadd.f32 %v11240_v27, %v6703_v43  ;;  %v6385_v17 = vld [vmem:[%s19653_s7 + $0x1018] sm:$0xff] }
 0x73f   :  { %11516 = vmatpush1.bf16.msra.mxu1 %v12948_v37  ;;  %v6540_v37 = vld [vmem:[%s19653_s7 + $0x14f0] sm:$0xff]  ;;  %v6625_v27 = vld [vmem:[%s19653_s7 + $0x1798] sm:$0xff] }
 0x740   :  { %11559 = vmatpush1.bf16.msra.mxu0 %v12566_v53  ;;  %11517 = vmatprep.subr.bf16.mxu1 %v12925_v50  ;;  %v6145_v53 = vld [vmem:[%s19653_s7 + $0x898] sm:$0xff]  ;;  %v13141_v19 = vcombine.high %v6528_v47, %v6540_v37 }
 0x741   :  { %11560 = vmatprep.subr.bf16.mxu0 %v12543_v15  ;;  %v6157_v50 = vld [vmem:[%s19653_s7 + $0x8f8] sm:$0xff]  ;;  %v13164_v15 = vcombine.low %v6552_v42, %v6564_v46 }
 0x742   :  { %v12759_v1 = vcombine.high %v6145_v53, %v6157_v50  ;;  %v12758_v26 = vcombine.low %v6145_v53, %v6157_v50 }
 0x743   :  { %11518 = vmatpush1.bf16.msra.mxu1 %v12924_v8  ;;  %v6516_v8 = vld [vmem:[%s19653_s7 + $0x1430] sm:$0xff] }
 0x744   :  { %11561 = vmatpush1.bf16.msra.mxu0 %v12542_v31  ;;  %11519 = vmatprep.subr.bf16.mxu1 %v12901_v22  ;;  %v6121_v31 = vld [vmem:[%s19653_s7 + $0x7d8] sm:$0xff]  ;;  %v13117_v34 = vcombine.high %v6504_v25, %v6516_v8 }
 0x745   :  { %11562 = vmatprep.subr.bf16.mxu0 %v12519_v23  ;;  %v6133_v22 = vld [vmem:[%s19653_s7 + $0x838] sm:$0xff]  ;;  %v13140_v23 = vcombine.low %v6528_v47, %v6540_v37 }
 0x746   :  { %v12735_v55 = vcombine.high %v6121_v31, %v6133_v22  ;;  %v12734_v29 = vcombine.low %v6121_v31, %v6133_v22 }
 0x747   :  { %11520 = vmatpush1.bf16.msra.mxu1 %v12900_v20  ;;  %v6492_v20 = vld [vmem:[%s19653_s7 + $0x1370] sm:$0xff] }
 0x748   :  { %11563 = vmatpush1.bf16.msra.mxu0 %v12518_v45  ;;  %11521 = vmatprep.subr.bf16.mxu1 %v12877_v51  ;;  %v6097_v45 = vld [vmem:[%s19653_s7 + $0x718] sm:$0xff]  ;;  %v13093_v33 = vcombine.high %v6480_v38, %v6492_v20 }
 0x749   :  { %11564 = vmatprep.subr.bf16.mxu0 %v12495_v52  ;;  %v6109_v51 = vld [vmem:[%s19653_s7 + $0x778] sm:$0xff]  ;;  %v13116_v52 = vcombine.low %v6504_v25, %v6516_v8 }
 0x74a   :  { %v12711_v44 = vcombine.high %v6097_v45, %v6109_v51  ;;  %v12710_v32 = vcombine.low %v6097_v45, %v6109_v51  ;;  %v6325_v45 = vld [vmem:[%s19653_s7 + $0xe38] sm:$0xff] }
 0x74b   :  { %11522 = vmatpush1.bf16.msra.mxu1 %v12876_v58  ;;  %v6468_v58 = vld [vmem:[%s19653_s7 + $0x12b0] sm:$0xff] }
 0x74c   :  { %11565 = vmatpush1.bf16.msra.mxu0 %v12494_v61  ;;  %11523 = vmatprep.subr.bf16.mxu1 %v13237_v63  ;;  %v6073_v61 = vld [vmem:[%s19653_s7 + $0x658] sm:$0xff]  ;;  %v13069_v39 = vcombine.high %v6456_v35, %v6468_v58 }
 0x74d   :  { %11566 = vmatprep.subr.bf16.mxu0 %v12855_v10  ;;  %v6085_v63 = vld [vmem:[%s19653_s7 + $0x6b8] sm:$0xff]  ;;  %v13092_v10 = vcombine.low %v6480_v38, %v6492_v20 }
 0x74e   :  { %v12687_v11 = vcombine.high %v6073_v61, %v6085_v63  ;;  %v12686_v6 = vcombine.low %v6073_v61, %v6085_v63  ;;  %v6313_v20 = vld [vmem:[%s19653_s7 + $0xdd8] sm:$0xff] }
 0x74f   :  { %11524 = vmatpush2.bf16.msra.mxu1 %v13236_v7  ;;  %v6433_v7 = vld [vmem:[%s19653_s7 + $0x1198] sm:$0xff] }
 0x750   :  { %11567 = vmatpush2.bf16.msra.mxu0 %v12854_v62  ;;  %11525 = vmatprep.subr.bf16.mxu1 %v13213_v0  ;;  %v6445_v62 = vld [vmem:[%s19653_s7 + $0x11f8] sm:$0xff]  ;;  %v13068_v0 = vcombine.low %v6456_v35, %v6468_v58 }
 0x751   :  { %11568 = vmatprep.subr.bf16.mxu0 %v12831_v3  ;;  %v11242_v3 = vpop.f32.mrf.mxu0  ;;  %v13047_v41 = vcombine.high %v6433_v7, %v6445_v62  ;;  %v6265_v58 = vld [vmem:[%s19653_s7 + $0xc58] sm:$0xff] }
 0x752   :  { %v6277_v61 = vld [vmem:[%s19653_s7 + $0xcb8] sm:$0xff] }
 0x753   :  { %11526 = vmatpush2.bf16.msra.mxu1 %v13212_v54  ;;  %v6409_v54 = vld [vmem:[%s19653_s7 + $0x10d8] sm:$0xff]  ;;  %v11244_v42 = vpop.f32.mrf.mxu0 }
 0x754   :  { %11569 = vmatpush2.bf16.msra.mxu0 %v12830_v13  ;;  %11527 = vmatprep.subr.bf16.mxu1 %v13189_v48  ;;  %v6421_v13 = vld [vmem:[%s19653_s7 + $0x1138] sm:$0xff]  ;;  %v6707_v48 = vrot.slane %v14394_v24, %v18617_v28 }
 0x755   :  { %11570 = vmatprep.subr.bf16.mxu0 %v12807_v49  ;;  %v13046_v49 = vcombine.low %v6433_v7, %v6445_v62  ;;  %v13023_v46 = vcombine.high %v6409_v54, %v6421_v13  ;;  %v13022_v47 = vcombine.low %v6409_v54, %v6421_v13  ;;  %v11246_v37 = vpop.f32.mrf.mxu0  ;;  %v6601_v7 = vld [vmem:[%s19653_s7 + $0x16d8] sm:$0xff] }
 0x756   :  { %v11247_v25 = vadd.f32 %v11246_v37, %v6707_v48  ;;  %v6613_v62 = vld [vmem:[%s19653_s7 + $0x1738] sm:$0xff] }
 0x757   :  { %11528 = vmatpush2.bf16.msra.mxu1 %v13188_v30  ;;  %v6397_v30 = vld [vmem:[%s19653_s7 + $0x1078] sm:$0xff]  ;;  %v13214_v24 = vcombine.low %v6601_v7, %v6613_v62 }
 0x758   :  { %11571 = vmatpush2.bf16.msra.mxu0 %v12806_v2  ;;  %11529 = vmatprep.subr.bf16.mxu1 %v13165_v18  ;;  %v11243_v18 = vadd.f32 %v11242_v3, %v6707_v48  ;;  %v12999_v50 = vcombine.high %v6385_v17, %v6397_v30  ;;  %v12998_v8 = vcombine.low %v6385_v17, %v6397_v30  ;;  %v6553_v54 = vld [vmem:[%s19653_s7 + $0x1558] sm:$0xff] }
 0x759   :  { %11572 = vmatprep.subr.bf16.mxu0 %v12783_v56  ;;  %v13215_v3 = vcombine.high %v6601_v7, %v6613_v62  ;;  %v6565_v13 = vld [vmem:[%s19653_s7 + $0x15b8] sm:$0xff] }
 0x75a   :  { %v6505_v30 = vld [vmem:[%s19653_s7 + $0x13d8] sm:$0xff] }
 0x75b   :  { %11530 = vmatpush2.bf16.msra.mxu1 %v13164_v15  ;;  %v11245_v15 = vadd.f32 %v11244_v42, %v6703_v43  ;;  %v6529_v42 = vld [vmem:[%s19653_s7 + $0x1498] sm:$0xff] }
 0x75c   :  { %11573 = vmatpush2.bf16.msra.mxu0 %v12782_v16  ;;  %11531 = vmatprep.subr.bf16.mxu1 %v13141_v19  ;;  %v6361_v19 = vld [vmem:[%s19653_s7 + $0xf58] sm:$0xff] }
 0x75d   :  { %11574 = vmatprep.subr.bf16.mxu0 %v12759_v1  ;;  %v6493_v37 = vld [vmem:[%s19653_s7 + $0x1378] sm:$0xff] }
 0x75f   :  { %11532 = vmatpush2.bf16.msra.mxu1 %v13140_v23 }
 0x760   :  { %11575 = vmatpush2.bf16.msra.mxu0 %v12758_v26  ;;  %11533 = vmatprep.subr.bf16.mxu1 %v13117_v34  ;;  %v6337_v26 = vld [vmem:[%s19653_s7 + $0xe98] sm:$0xff] }
 0x761   :  { %11576 = vmatprep.subr.bf16.mxu0 %v12735_v55  ;;  %v6349_v34 = vld [vmem:[%s19653_s7 + $0xef8] sm:$0xff] }
 0x762   :  { %v12951_v38 = vcombine.high %v6337_v26, %v6349_v34  ;;  %v12950_v51 = vcombine.low %v6337_v26, %v6349_v34 }
 0x763   :  { %11534 = vmatpush2.bf16.msra.mxu1 %v13116_v52  ;;  %v12927_v52 = vcombine.high %v6313_v20, %v6325_v45 }
 0x764   :  { %11577 = vmatpush2.bf16.msra.mxu0 %v12734_v29  ;;  %11535 = vmatprep.subr.bf16.mxu1 %v13093_v33  ;;  %v6289_v29 = vld [vmem:[%s19653_s7 + $0xd18] sm:$0xff] }
 0x765   :  { %11578 = vmatprep.subr.bf16.mxu0 %v12711_v44  ;;  %v6301_v33 = vld [vmem:[%s19653_s7 + $0xd78] sm:$0xff]  ;;  %v12926_v44 = vcombine.low %v6313_v20, %v6325_v45 }
 0x766   :  { %v12903_v35 = vcombine.high %v6289_v29, %v6301_v33  ;;  %v12902_v63 = vcombine.low %v6289_v29, %v6301_v33 }
 0x767   :  { %11536 = vmatpush2.bf16.msra.mxu1 %v13092_v10  ;;  %v12879_v10 = vcombine.high %v6265_v58, %v6277_v61 }
 0x768   :  { %11579 = vmatpush2.bf16.msra.mxu0 %v12710_v32  ;;  %11537 = vmatprep.subr.bf16.mxu1 %v13069_v39  ;;  %v6637_v32 = vld [vmem:[%s19653_s7 + $0x17f8] sm:$0xff]  ;;  %v12878_v39 = vcombine.low %v6265_v58, %v6277_v61 }
 0x769   :  { %11580 = vmatprep.subr.bf16.mxu0 %v12687_v11  ;;  %v13239_v11 = vcombine.high %v6625_v27, %v6637_v32 }
 0x76b   :  { %11538 = vmatpush2.bf16.msra.mxu1 %v13068_v0  ;;  %v13238_v0 = vcombine.low %v6625_v27, %v6637_v32 }
 0x76c   :  { %11581 = vmatpush2.bf16.msra.mxu0 %v12686_v6  ;;  %11593 = vmatprep.subr.bf16.mxu1 %v13047_v41  ;;  %v6577_v6 = vld [vmem:[%s19653_s7 + $0x1618] sm:$0xff] }
 0x76d   :  { %v6589_v41 = vld [vmem:[%s19653_s7 + $0x1678] sm:$0xff] }
 0x76e   :  { %v11283_v2 = vpop.f32.mrf.mxu1  ;;  %11540 = vmatmul.mubr.bf16.vlgmr.msra.gmra.mxu1 %v17384_v4  ;;  %v13191_v43 = vcombine.high %v6577_v6, %v6589_v41  ;;  %v13190_v48 = vcombine.low %v6577_v6, %v6589_v41 }
 0x76f   :  { %v11284_v56 = vadd.f32 %v11283_v2, %v11241_v57  ;;  %11583 = vmatmul.mubr.bf16.vlgmr.msra.gmra.mxu0 %v17268_v12  ;;  %11594 = vmatpush1.bf16.msra.mxu1 %v13046_v49  ;;  %v6373_v12 = vld [vmem:[%s19653_s7 + $0xfb8] sm:$0xff]  ;;  %v13167_v49 = vcombine.high %v6553_v54, %v6565_v13  ;;  %v13166_v57 = vcombine.low %v6553_v54, %v6565_v13 }
 0x770   :  { %11625 = vmatprep.mubr.bf16.mxu1 %v17382_v21  ;;  %v11285_v53 = vpop.f32.mrf.mxu1  ;;  %11595 = vmatprep.subr.bf16.mxu1 %v13023_v46  ;;  %v12975_v22 = vcombine.high %v6361_v19, %v6373_v12  ;;  %v12974_v55 = vcombine.low %v6361_v19, %v6373_v12  ;;  %v6541_v46 = vld [vmem:[%s19653_s7 + $0x14f8] sm:$0xff]  ;;  %v11326_v12 = vpop.f32.mrf.mxu0 }
 0x771   :  { %11650 = vst [vmem:[%s19656_s9 + $0x70] sm:$0xff] %v11284_v56  ;;  %v11286_v16 = vadd.f32 %v11285_v53, %v11243_v18  ;;  %v13143_v17 = vcombine.high %v6529_v42, %v6541_v46  ;;  %v6517_v2 = vld [vmem:[%s19653_s7 + $0x1438] sm:$0xff]  ;;  %v13142_v18 = vcombine.low %v6529_v42, %v6541_v46 }
 0x772   :  { %v11287_v1 = vpop.f32.mrf.mxu1  ;;  %v13119_v56 = vcombine.high %v6505_v30, %v6517_v2  ;;  %v13118_v53 = vcombine.low %v6505_v30, %v6517_v2 }
 0x773   :  { %11651 = vst [vmem:[%s19656_s9 + $0x78] sm:$0xff] %v11286_v16  ;;  %v11288_v21 = vadd.f32 %v11287_v1, %v11245_v15  ;;  %11596 = vmatpush1.bf16.msra.mxu1 %v13022_v47  ;;  %v6481_v47 = vld [vmem:[%s19653_s7 + $0x1318] sm:$0xff] }
 0x774   :  { %v11289_v31 = vpop.f32.mrf.mxu1  ;;  %11597 = vmatprep.subr.bf16.mxu1 %v12999_v50  ;;  %v13095_v50 = vcombine.high %v6481_v47, %v6493_v37  ;;  %v6457_v15 = vld [vmem:[%s19653_s7 + $0x1258] sm:$0xff]  ;;  %v13094_v19 = vcombine.low %v6481_v47, %v6493_v37 }
 0x775   :  { %11674 = vst [vmem:[%s19656_s9 + $0x130] sm:$0xff] %v11288_v21  ;;  %v11290_v23 = vadd.f32 %v11289_v31, %v11247_v25  ;;  %v6469_v16 = vld [vmem:[%s19653_s7 + $0x12b8] sm:$0xff]  ;;  %v19580_v25 = vld [vmem:[%s19655_s8 + $0x10] sm:$0xff] }
 0x776   :  { %v13071_v1 = vcombine.high %v6457_v15, %v6469_v16  ;;  %v13070_v21 = vcombine.low %v6457_v15, %v6469_v16  ;;  %v6711_v31 = vrot.slane %v19580_v25, %v15353_v5  ;;  %v6719_v58 = vrot.slane %v19580_v25, %v16523_v14 }
 0x777   :  { %11675 = vst [vmem:[%s19656_s9 + $0x138] sm:$0xff] %v11290_v23  ;;  %11598 = vmatpush1.bf16.msra.mxu1 %v12998_v8  ;;  %v11328_v8 = vpop.f32.mrf.mxu0  ;;  %v6723_v61 = vrot.slane %v19580_v25, %v16520_v40  ;;  %v6727_v54 = vrot.slane %v19580_v25, %v18384_v59  ;;  %v6731_v13 = vrot.slane %v19580_v25, %v18399_v36 }
 0x778   :  { %11599 = vmatprep.subr.bf16.mxu1 %v12975_v22  ;;  %v6715_v22 = vrot.slane %v19580_v25, %v16107_v60  ;;  %v11327_v26 = vadd.f32 %v11326_v12, %v6711_v31  ;;  %v6735_v15 = vrot.slane %v19580_v25, %v18602_v9  ;;  %v6739_v16 = vrot.slane %v19580_v25, %v18617_v28 }
 0x779   :  { %v11330_v23 = vpop.f32.mrf.mxu0 }
 0x77b   :  { %11600 = vmatpush1.bf16.msra.mxu1 %v12974_v55  ;;  %v11329_v55 = vadd.f32 %v11328_v8, %v6715_v22  ;;  %v11332_v20 = vpop.f32.mrf.mxu0 }
 0x77c   :  { %11601 = vmatprep.subr.bf16.mxu1 %v12951_v38  ;;  %v11333_v29 = vadd.f32 %v11332_v20, %v6715_v22 }
 0x77f   :  { %11602 = vmatpush1.bf16.msra.mxu1 %v12950_v51  ;;  %v11331_v51 = vadd.f32 %v11330_v23, %v6711_v31 }
 0x780   :  { %11603 = vmatprep.subr.bf16.mxu1 %v12927_v52 }
 0x783   :  { %11604 = vmatpush1.bf16.msra.mxu1 %v12926_v44 }
 0x784   :  { %11605 = vmatprep.subr.bf16.mxu1 %v12903_v35 }
 0x787   :  { %11606 = vmatpush1.bf16.msra.mxu1 %v12902_v63 }
 0x788   :  { %11607 = vmatprep.subr.bf16.mxu1 %v12879_v10 }
 0x78b   :  { %11608 = vmatpush1.bf16.msra.mxu1 %v12878_v39 }
 0x78c   :  { %11609 = vmatprep.subr.bf16.mxu1 %v13239_v11 }
 0x78f   :  { %11610 = vmatpush2.bf16.msra.mxu1 %v13238_v0 }
 0x790   :  { %11611 = vmatprep.subr.bf16.mxu1 %v13215_v3 }
 0x793   :  { %11612 = vmatpush2.bf16.msra.mxu1 %v13214_v24 }
 0x794   :  { %11613 = vmatprep.subr.bf16.mxu1 %v13191_v43 }
 0x797   :  { %11614 = vmatpush2.bf16.msra.mxu1 %v13190_v48 }
 0x798   :  { %11615 = vmatprep.subr.bf16.mxu1 %v13167_v49 }
 0x79b   :  { %11616 = vmatpush2.bf16.msra.mxu1 %v13166_v57 }
 0x79c   :  { %11617 = vmatprep.subr.bf16.mxu1 %v13143_v17 }
 0x79f   :  { %11618 = vmatpush2.bf16.msra.mxu1 %v13142_v18 }
 0x7a0   :  { %11619 = vmatprep.subr.bf16.mxu1 %v13119_v56 }
 0x7a3   :  { %11620 = vmatpush2.bf16.msra.mxu1 %v13118_v53 }
 0x7a4   :  { %11621 = vmatprep.subr.bf16.mxu1 %v13095_v50 }
 0x7a7   :  { %11622 = vmatpush2.bf16.msra.mxu1 %v13094_v19 }
 0x7a8   :  { %11623 = vmatprep.subr.bf16.mxu1 %v13071_v1 }
 0x7ab   :  { %11624 = vmatpush2.bf16.msra.mxu1 %v13070_v21 }
 0x7ae   :  { %v11369_v34 = vpop.f32.mrf.mxu1  ;;  %11626 = vmatmul.mubr.bf16.vlgmr.msra.gmra.mxu1 %v17384_v4 }
 0x7af   :  { %v11370_v38 = vadd.f32 %v11369_v34, %v11327_v26  ;;  %v11412_v44 = vpop.f32.mrf.mxu0 }
 0x7b0   :  { %v11371_v45 = vpop.f32.mrf.mxu1  ;;  %v11413_v10 = vadd.f32 %v11412_v44, %v6719_v58 }
 0x7b1   :  { %11652 = vst [vmem:[%s19656_s9 + $0x80] sm:$0xff] %v11370_v38  ;;  %v11372_v52 = vadd.f32 %v11371_v45, %v11329_v55  ;;  %v11414_v35 = vpop.f32.mrf.mxu0 }
 0x7b2   :  { %v11373_v5 = vpop.f32.mrf.mxu1  ;;  %v11415_v32 = vadd.f32 %v11414_v35, %v6723_v61 }
 0x7b3   :  { %11653 = vst [vmem:[%s19656_s9 + $0x88] sm:$0xff] %v11372_v52  ;;  %v11374_v60 = vadd.f32 %v11373_v5, %v11331_v51  ;;  %v11416_v63 = vpop.f32.mrf.mxu0 }
 0x7b4   :  { %v11375_v33 = vpop.f32.mrf.mxu1  ;;  %v11417_v62 = vadd.f32 %v11416_v63, %v6719_v58 }
 0x7b5   :  { %11676 = vst [vmem:[%s19656_s9 + $0x140] sm:$0xff] %v11374_v60  ;;  %v11376_v4 = vadd.f32 %v11375_v33, %v11333_v29  ;;  %v11418_v11 = vpop.f32.mrf.mxu0 }
 0x7b6   :  { %v11419_v6 = vadd.f32 %v11418_v11, %v6723_v61 }
 0x7b7   :  { %11677 = vst [vmem:[%s19656_s9 + $0x148] sm:$0xff] %v11376_v4 }
 0x7ee   :  { %v11455_v27 = vpop.f32.mrf.mxu1 }
 0x7ef   :  { %v11456_v39 = vadd.f32 %v11455_v27, %v11413_v10  ;;  %v11498_v24 = vpop.f32.mrf.mxu0 }
 0x7f0   :  { %v11457_v7 = vpop.f32.mrf.mxu1  ;;  %v11499_v49 = vadd.f32 %v11498_v24, %v6727_v54 }
 0x7f1   :  { %11654 = vst [vmem:[%s19656_s9 + $0x90] sm:$0xff] %v11456_v39  ;;  %v11458_v0 = vadd.f32 %v11457_v7, %v11415_v32  ;;  %v11500_v43 = vpop.f32.mrf.mxu0 }
 0x7f2   :  { %v11459_v3 = vpop.f32.mrf.mxu1  ;;  %v11501_v46 = vadd.f32 %v11500_v43, %v6731_v13 }
 0x7f3   :  { %11655 = vst [vmem:[%s19656_s9 + $0x98] sm:$0xff] %v11458_v0  ;;  %v11460_v40 = vadd.f32 %v11459_v3, %v11417_v62  ;;  %v11502_v48 = vpop.f32.mrf.mxu0 }
 0x7f4   :  { %v11461_v14 = vpop.f32.mrf.mxu1  ;;  %v11503_v2 = vadd.f32 %v11502_v48, %v6727_v54 }
 0x7f5   :  { %11678 = vst [vmem:[%s19656_s9 + $0x150] sm:$0xff] %v11460_v40  ;;  %v11462_v41 = vadd.f32 %v11461_v14, %v11419_v6  ;;  %v11504_v17 = vpop.f32.mrf.mxu0 }
 0x7f6   :  { %v11505_v47 = vadd.f32 %v11504_v17, %v6731_v13 }
 0x7f7   :  { %11679 = vst [vmem:[%s19656_s9 + $0x158] sm:$0xff] %v11462_v41 }
 0x82e   :  { %v11541_v42 = vpop.f32.mrf.mxu1 }
 0x82f   :  { %v11542_v57 = vadd.f32 %v11541_v42, %v11499_v49  ;;  %v11584_v53 = vpop.f32.mrf.mxu0 }
 0x830   :  { %v11543_v30 = vpop.f32.mrf.mxu1  ;;  %v11585_v12 = vadd.f32 %v11584_v53, %v6735_v15 }
 0x831   :  { %11656 = vst [vmem:[%s19656_s9 + $0xa0] sm:$0xff] %v11542_v57  ;;  %v11544_v18 = vadd.f32 %v11543_v30, %v11501_v46  ;;  %v11586_v50 = vpop.f32.mrf.mxu0 }
 0x832   :  { %v11545_v56 = vpop.f32.mrf.mxu1  ;;  %v11587_v21 = vadd.f32 %v11586_v50, %v6739_v16 }
 0x833   :  { %11657 = vst [vmem:[%s19656_s9 + $0xa8] sm:$0xff] %v11544_v18  ;;  %v11546_v59 = vadd.f32 %v11545_v56, %v11503_v2  ;;  %v11588_v19 = vpop.f32.mrf.mxu0 }
 0x834   :  { %v11547_v36 = vpop.f32.mrf.mxu1  ;;  %v11589_v23 = vadd.f32 %v11588_v19, %v6735_v15 }
 0x835   :  { %11680 = vst [vmem:[%s19656_s9 + $0x160] sm:$0xff] %v11546_v59  ;;  %v11548_v37 = vadd.f32 %v11547_v36, %v11505_v47  ;;  %v11590_v31 = vpop.f32.mrf.mxu0 }
 0x836   :  { %v11591_v55 = vadd.f32 %v11590_v31, %v6739_v16 }
 0x837   :  { %11681 = vst [vmem:[%s19656_s9 + $0x168] sm:$0xff] %v11548_v37 }
 0x86e   :  { %v11627_v1 = vpop.f32.mrf.mxu1 }
 0x86f   :  { %v11628_v8 = vadd.f32 %v11627_v1, %v11585_v12 }
 0x870   :  { %v11629_v22 = vpop.f32.mrf.mxu1 }
 0x871   :  { %11658 = vst [vmem:[%s19656_s9 + $0xb0] sm:$0xff] %v11628_v8  ;;  %v11630_v26 = vadd.f32 %v11629_v22, %v11587_v21 }
 0x872   :  { %v11631_v34 = vpop.f32.mrf.mxu1 }
 0x873   :  { %11659 = vst [vmem:[%s19656_s9 + $0xb8] sm:$0xff] %v11630_v26  ;;  %v11632_v9 = vadd.f32 %v11631_v34, %v11589_v23 }
 0x874   :  { %v11633_v28 = vpop.f32.mrf.mxu1 }
 0x875   :  { %11682 = vst [vmem:[%s19656_s9 + $0x170] sm:$0xff] %v11632_v9  ;;  %v11634_v25 = vadd.f32 %v11633_v28, %v11591_v55 }
 0x877   :  { %11683 = vst [vmem:[%s19656_s9 + $0x178] sm:$0xff] %v11634_v25 }

</bundles_post_ra>
